<compile_context>
chip_gen: v6e
topology: v6e:2x2x1
jax: 0.10.0
libtpu: 0.0.40
codegen_flags: <defaults>
</compile_context>

<pallas_src>
import functools

import jax
import jax.numpy as jnp
from jax.experimental import pallas as pl
from jax.experimental.pallas import tpu as pltpu


_PARAM_NAMES = ("wemb", "wq", "wk", "wv", "bq", "bk", "bv", "wo", "bo",
                "g1", "be1", "w1", "b1", "w2", "b2", "g2", "be2")


def _layer_norm(y, gamma, beta, eps=1e-5):
    # One-pass LN: mean and mean-of-squares are independent reductions.
    mu = jnp.mean(y, axis=-1, keepdims=True)
    ms = jnp.mean(y * y, axis=-1, keepdims=True)
    var = ms - mu * mu
    return (y - mu) * jax.lax.rsqrt(var + eps) * gamma + beta


def _encoder_stack(act, e, num_layers, num_heads,
                   wq_ref, wk_ref, wv_ref, bq_ref, bk_ref, bv_ref,
                   wo_ref, bo_ref, g1_ref, be1_ref,
                   w1_ref, b1_ref, w2_ref, b2_ref, g2_ref, be2_ref):
    """Post-norm transformer encoder stack `e` (0 = ab_encoder, 1 = re_encoder)."""
    n = act.shape[0]
    d = wo_ref.shape[-1]
    bf16 = jnp.bfloat16

    for l in range(num_layers):           # static unroll; num_layers is tiny
        act_bf = act.astype(bf16)

        # --- multi-head self-attention ---------------------------------
        # Per-head weight slabs (d, dh) / (dh, d): q/k/v produced directly by
        # MXU dots (no lane sub-slicing); 1/sqrt(dh) already folded into wq/bq.
        attn = jnp.zeros((n, d), jnp.float32)
        for h in range(num_heads):
            q = jnp.dot(act_bf, wq_ref[e, l, h],
                        preferred_element_type=jnp.float32) + bq_ref[e, l, h]
            k = jnp.dot(act_bf, wk_ref[e, l, h],
                        preferred_element_type=jnp.float32) + bk_ref[e, l, h]
            v = jnp.dot(act_bf, wv_ref[e, l, h],
                        preferred_element_type=jnp.float32) + bv_ref[e, l, h]

            s = jax.lax.dot_general(q.astype(bf16), k.astype(bf16),
                                    (((1,), (1,)), ((), ())),
                                    preferred_element_type=jnp.float32)
            s = s - jnp.max(s, axis=-1, keepdims=True)
            p = jnp.exp(s)
            p = p * pl.reciprocal(jnp.sum(p, axis=-1, keepdims=True),
                                  approx=True)

            ctx = jnp.dot(p.astype(bf16), v.astype(bf16),
                          preferred_element_type=jnp.float32)
            # accumulate through this head's rows of the output projection
            attn = attn + jnp.dot(ctx.astype(bf16), wo_ref[e, l, h],
                                  preferred_element_type=jnp.float32)
        attn = attn + bo_ref[e, l]

        # --- add & norm 1 ----------------------------------------------
        y = _layer_norm(act + attn, g1_ref[e, l], be1_ref[e, l])

        # --- feed-forward: Linear -> ReLU -> Linear ---------------------
        h1 = jnp.maximum(
            jnp.dot(y.astype(bf16), w1_ref[e, l],
                    preferred_element_type=jnp.float32) + b1_ref[e, l], 0.0)
        f = jnp.dot(h1.astype(bf16), w2_ref[e, l],
                    preferred_element_type=jnp.float32) + b2_ref[e, l]

        # --- add & norm 2 ----------------------------------------------
        act = _layer_norm(y + f, g2_ref[e, l], be2_ref[e, l])
    return act


def _fused_graph_transformer_kernel(
        x_ref, wemb_ref,
        wq_ref, wk_ref, wv_ref, bq_ref, bk_ref, bv_ref,
        wo_ref, bo_ref, g1_ref, be1_ref,
        w1_ref, b1_ref, w2_ref, b2_ref, g2_ref, be2_ref,
        o_ref, *, num_heads):
    """One grid program = one full GraphTransformer forward for one graph."""
    d = wemb_ref.shape[1]
    num_layers = wq_ref.shape[1]

    # output = self.embedding(x)   (Linear(in_size -> d_model), bias=False).
    # Computed once; both encoder stacks consume the same embedded features.
    emb = jnp.dot(x_ref[0].astype(jnp.bfloat16), wemb_ref[...],
                  preferred_element_type=jnp.float32)

    stack_args = (wq_ref, wk_ref, wv_ref, bq_ref, bk_ref, bv_ref,
                  wo_ref, bo_ref, g1_ref, be1_ref,
                  w1_ref, b1_ref, w2_ref, b2_ref, g2_ref, be2_ref)

    ab_out = _encoder_stack(emb, 0, num_layers, num_heads, *stack_args)
    re_out = _encoder_stack(emb, 1, num_layers, num_heads, *stack_args)

    # combined_features = torch.cat((ab_output, re_output), dim=1) written
    # directly from the kernel (no separate XLA concatenate launch).
    o_ref[0, :, 0:d] = ab_out
    o_ref[0, :, d:2 * d] = re_out


# ------------------------------- wrapper -------------------------------------


def graph_transformer_forward(x, params, *, num_heads):
    """Fused forward over G independent graphs.

    x: (G, N, in_size).  G=1 reproduces exactly one module forward; G>1 simply
    batches independent graphs to amortize launch/DMA overhead (and feeds both
    TensorCores on v7x via the "parallel" grid axis).
    Returns (G, N, 2*d_model) combined features.
    """
    g_n, n, in_size = x.shape
    d_model = params["wemb"].shape[1]

    def full_spec(shape):
        nd = len(shape)
        return pl.BlockSpec(shape, lambda g, _nd=nd: (0,) * _nd)

    in_specs = [pl.BlockSpec((1, n, in_size), lambda g: (g, 0, 0))]
    args = [x]
    for name in _PARAM_NAMES:
        p = params[name]
        in_specs.append(full_spec(p.shape))
        args.append(p)

    return pl.pallas_call(
        functools.partial(_fused_graph_transformer_kernel,
                          num_heads=num_heads),
        grid=(g_n,),
        in_specs=in_specs,
        out_specs=pl.BlockSpec((1, n, 2 * d_model), lambda g: (g, 0, 0)),
        out_shape=jax.ShapeDtypeStruct((g_n, n, 2 * d_model), jnp.float32),
        compiler_params=pltpu.CompilerParams(
            dimension_semantics=("parallel",)),   # graphs split across TCs on v7x
    )(*args)


# ----------------------------- parameter prep --------------------------------


def init_layer_params(key, d_model, dim_ff, scale=0.1):
    """Raw (PyTorch-layout-like) per-layer parameters, all float32."""
    kqkv, ko, k1, k2 = jax.random.split(key, 4)
    f32 = jnp.float32
    return dict(
        wqkv=jax.random.normal(kqkv, (d_model, 3 * d_model), f32) * scale,
        bqkv=jnp.zeros((3 * d_model,), f32),
        wo=jax.random.normal(ko, (d_model, d_model), f32) * scale,
        bo=jnp.zeros((d_model,), f32),
        g1=jnp.ones((d_model,), f32),
        be1=jnp.zeros((d_model,), f32),
        w1=jax.random.normal(k1, (d_model, dim_ff), f32) * scale,
        b1=jnp.zeros((dim_ff,), f32),
        w2=jax.random.normal(k2, (dim_ff, d_model), f32) * scale,
        b2=jnp.zeros((d_model,), f32),
        g2=jnp.ones((d_model,), f32),
        be2=jnp.zeros((d_model,), f32),
    )


def prepare_params(w_emb, ab_layers, re_layers, num_heads):
    """Offline (one-time) parameter prep:
      * split wqkv into per-head wq/wk/wv slabs (H, d, dh), wo into (H, dh, d)
      * fold the 1/sqrt(dh) attention scale into wq / bq
      * cast all matmul weights to bfloat16 (biases / LN params stay f32)
      * stack over layers and over the two encoders -> leading (2, L) axes
    """
    d = w_emb.shape[1]
    dh = d // num_heads
    scale = 1.0 / (dh ** 0.5)

    def per_layer(p):
        wqkv, bqkv = p["wqkv"], p["bqkv"]
        wq, wk, wv = wqkv[:, :d] * scale, wqkv[:, d:2 * d], wqkv[:, 2 * d:]
        bq, bk, bv = bqkv[:d] * scale, bqkv[d:2 * d], bqkv[2 * d:]

        def heads_w(w):   # (d, d) -> (H, d, dh)
            return jnp.transpose(w.reshape(d, num_heads, dh), (1, 0, 2))

        def heads_b(b):   # (d,) -> (H, 1, dh)
            return b.reshape(num_heads, 1, dh)

        return dict(
            wq=heads_w(wq).astype(jnp.bfloat16),
            wk=heads_w(wk).astype(jnp.bfloat16),
            wv=heads_w(wv).astype(jnp.bfloat16),
            bq=heads_b(bq), bk=heads_b(bk), bv=heads_b(bv),
            wo=p["wo"].reshape(num_heads, dh, d).astype(jnp.bfloat16),
            bo=p["bo"].reshape(1, d),
            g1=p["g1"].reshape(1, d), be1=p["be1"].reshape(1, d),
            w1=p["w1"].astype(jnp.bfloat16), b1=p["b1"].reshape(1, -1),
            w2=p["w2"].astype(jnp.bfloat16), b2=p["b2"].reshape(1, d),
            g2=p["g2"].reshape(1, d), be2=p["be2"].reshape(1, d),
        )

    def stack_encoder(layers):
        prepped = [per_layer(p) for p in layers]
        return {k: jnp.stack([q[k] for q in prepped]) for k in prepped[0]}

    ab = stack_encoder(ab_layers)     # GraphTransformerEncoder layers
    re = stack_encoder(re_layers)     # DiffTransformerEncoder layers
    out = {k: jnp.stack([ab[k], re[k]]) for k in ab}   # (2, L, ...)
    out["wemb"] = w_emb.astype(jnp.bfloat16)
    return out


# --------------------------------- main ---------------------------------------


if __name__ == "__main__":
    # Small shapes consistent with the module: G independent graphs of N nodes,
    # in_size features projected to d_model; 2 encoder layers per encoder.
    G, N, in_size = 4, 16, 8
    d_model, num_heads, dim_ff, num_layers = 32, 4, 64, 2

    key = jax.random.PRNGKey(0)
    kx, ke, ka, kr = jax.random.split(key, 4)

    x = jax.random.normal(kx, (G, N, in_size), jnp.float32)          # data.x per graph
    w_emb = jax.random.normal(ke, (in_size, d_model), jnp.float32) * 0.1

    # nn.TransformerEncoder deep-copies its layer, so at init every layer of an
    # encoder shares identical weights; distinct trained per-layer weights are
    # supported by passing different dicts per layer.
    ab_layer = init_layer_params(ka, d_model, dim_ff)
    re_layer = init_layer_params(kr, d_model, dim_ff)
    params = prepare_params(w_emb,
                            [ab_layer] * num_layers,
                            [re_layer] * num_layers,
                            num_heads)

    fwd = jax.jit(functools.partial(graph_transformer_forward,
                                    num_heads=num_heads))
    out = jax.block_until_ready(fwd(x, params))

    assert out.shape == (G, N, 2 * d_model) and out.dtype == jnp.float32
    assert bool(jnp.all(jnp.isfinite(out)))
    print("KERNEL_OK")
</pallas_src>

<mosaic_0001>
module attributes {stable_mosaic.version = 11 : i64} {
  func.func @_fused_graph_transformer_kernel(%arg0: i32, %arg1: memref<1x16x8xf32, #tpu.memory_space<vmem>>, %arg2: memref<8x32xbf16, #tpu.memory_space<vmem>>, %arg3: memref<2x2x4x32x8xbf16, #tpu.memory_space<vmem>>, %arg4: memref<2x2x4x32x8xbf16, #tpu.memory_space<vmem>>, %arg5: memref<2x2x4x32x8xbf16, #tpu.memory_space<vmem>>, %arg6: memref<2x2x4x1x8xf32, #tpu.memory_space<vmem>>, %arg7: memref<2x2x4x1x8xf32, #tpu.memory_space<vmem>>, %arg8: memref<2x2x4x1x8xf32, #tpu.memory_space<vmem>>, %arg9: memref<2x2x4x8x32xbf16, #tpu.memory_space<vmem>>, %arg10: memref<2x2x1x32xf32, #tpu.memory_space<vmem>>, %arg11: memref<2x2x1x32xf32, #tpu.memory_space<vmem>>, %arg12: memref<2x2x1x32xf32, #tpu.memory_space<vmem>>, %arg13: memref<2x2x32x64xbf16, #tpu.memory_space<vmem>>, %arg14: memref<2x2x1x64xf32, #tpu.memory_space<vmem>>, %arg15: memref<2x2x64x32xbf16, #tpu.memory_space<vmem>>, %arg16: memref<2x2x1x32xf32, #tpu.memory_space<vmem>>, %arg17: memref<2x2x1x32xf32, #tpu.memory_space<vmem>>, %arg18: memref<2x2x1x32xf32, #tpu.memory_space<vmem>>, %arg19: memref<1x16x64xf32, #tpu.memory_space<vmem>>) attributes {dimension_semantics = [#tpu.dimension_semantics<parallel>], iteration_bounds = array<i64: 4>, scalar_prefetch = 0 : i64, scratch_operands = 0 : i64, tpu.core_type = #tpu.core_type<tc>, window_params = [{transform_indices = @transform_0, window_bounds = array<i64: 1, 16, 8>}, {pipeline_mode = #tpu.pipeline_mode<synchronous>, transform_indices = @transform_1, window_bounds = array<i64: 8, 32>}, {pipeline_mode = #tpu.pipeline_mode<synchronous>, transform_indices = @transform_2, window_bounds = array<i64: 2, 2, 4, 32, 8>}, {pipeline_mode = #tpu.pipeline_mode<synchronous>, transform_indices = @transform_3, window_bounds = array<i64: 2, 2, 4, 32, 8>}, {pipeline_mode = #tpu.pipeline_mode<synchronous>, transform_indices = @transform_4, window_bounds = array<i64: 2, 2, 4, 32, 8>}, {pipeline_mode = #tpu.pipeline_mode<synchronous>, transform_indices = @transform_5, window_bounds = array<i64: 2, 2, 4, 1, 8>}, {pipeline_mode = #tpu.pipeline_mode<synchronous>, transform_indices = @transform_6, window_bounds = array<i64: 2, 2, 4, 1, 8>}, {pipeline_mode = #tpu.pipeline_mode<synchronous>, transform_indices = @transform_7, window_bounds = array<i64: 2, 2, 4, 1, 8>}, {pipeline_mode = #tpu.pipeline_mode<synchronous>, transform_indices = @transform_8, window_bounds = array<i64: 2, 2, 4, 8, 32>}, {pipeline_mode = #tpu.pipeline_mode<synchronous>, transform_indices = @transform_9, window_bounds = array<i64: 2, 2, 1, 32>}, {pipeline_mode = #tpu.pipeline_mode<synchronous>, transform_indices = @transform_10, window_bounds = array<i64: 2, 2, 1, 32>}, {pipeline_mode = #tpu.pipeline_mode<synchronous>, transform_indices = @transform_11, window_bounds = array<i64: 2, 2, 1, 32>}, {pipeline_mode = #tpu.pipeline_mode<synchronous>, transform_indices = @transform_12, window_bounds = array<i64: 2, 2, 32, 64>}, {pipeline_mode = #tpu.pipeline_mode<synchronous>, transform_indices = @transform_13, window_bounds = array<i64: 2, 2, 1, 64>}, {pipeline_mode = #tpu.pipeline_mode<synchronous>, transform_indices = @transform_14, window_bounds = array<i64: 2, 2, 64, 32>}, {pipeline_mode = #tpu.pipeline_mode<synchronous>, transform_indices = @transform_15, window_bounds = array<i64: 2, 2, 1, 32>}, {pipeline_mode = #tpu.pipeline_mode<synchronous>, transform_indices = @transform_16, window_bounds = array<i64: 2, 2, 1, 32>}, {pipeline_mode = #tpu.pipeline_mode<synchronous>, transform_indices = @transform_17, window_bounds = array<i64: 2, 2, 1, 32>}, {transform_indices = @transform_18, window_bounds = array<i64: 1, 16, 64>}]} {
    %c0 = arith.constant 0 : index
    %c0_0 = arith.constant 0 : index
    %c0_1 = arith.constant 0 : index
    %0 = vector.load %arg1[%c0, %c0_0, %c0_1] : memref<1x16x8xf32, #tpu.memory_space<vmem>>, vector<1x16x8xf32>
    %1 = vector.shape_cast %0 : vector<1x16x8xf32> to vector<16x8xf32>
    %2 = arith.truncf %1 : vector<16x8xf32> to vector<16x8xbf16>
    %c0_2 = arith.constant 0 : index
    %c0_3 = arith.constant 0 : index
    %3 = vector.load %arg2[%c0_2, %c0_3] : memref<8x32xbf16, #tpu.memory_space<vmem>>, vector<8x32xbf16>
    %cst = arith.constant dense<0.000000e+00> : vector<16x32xf32>
    %4 = tpu.matmul %2, %3, %cst {dimension_numbers = #tpu.dot_dimension_numbers<[1], [0], [0], [1], [0, 0, 1, 1], [], []>} : vector<16x8xbf16>, vector<8x32xbf16>, vector<16x32xf32> -> vector<16x32xf32>
    %5 = arith.truncf %4 : vector<16x32xf32> to vector<16x32xbf16>
    %cst_4 = arith.constant 0.000000e+00 : f32
    %6 = vector.broadcast %cst_4 : f32 to vector<16x32xf32>
    %c0_5 = arith.constant 0 : index
    %c0_6 = arith.constant 0 : index
    %c0_7 = arith.constant 0 : index
    %c0_8 = arith.constant 0 : index
    %c0_9 = arith.constant 0 : index
    %7 = vector.load %arg3[%c0_5, %c0_6, %c0_7, %c0_8, %c0_9] : memref<2x2x4x32x8xbf16, #tpu.memory_space<vmem>>, vector<1x1x1x32x8xbf16>
    %8 = vector.shape_cast %7 : vector<1x1x1x32x8xbf16> to vector<32x8xbf16>
    %cst_10 = arith.constant dense<0.000000e+00> : vector<16x8xf32>
    %9 = tpu.matmul %5, %8, %cst_10 {dimension_numbers = #tpu.dot_dimension_numbers<[1], [0], [0], [1], [0, 0, 1, 1], [], []>} : vector<16x32xbf16>, vector<32x8xbf16>, vector<16x8xf32> -> vector<16x8xf32>
    %c0_11 = arith.constant 0 : index
    %c0_12 = arith.constant 0 : index
    %c0_13 = arith.constant 0 : index
    %c0_14 = arith.constant 0 : index
    %c0_15 = arith.constant 0 : index
    %10 = vector.load %arg6[%c0_11, %c0_12, %c0_13, %c0_14, %c0_15] : memref<2x2x4x1x8xf32, #tpu.memory_space<vmem>>, vector<1x1x1x1x8xf32>
    %11 = vector.shape_cast %10 : vector<1x1x1x1x8xf32> to vector<1x8xf32>
    %12 = vector.broadcast %11 : vector<1x8xf32> to vector<16x8xf32>
    %13 = arith.addf %9, %12 : vector<16x8xf32>
    %c0_16 = arith.constant 0 : index
    %c0_17 = arith.constant 0 : index
    %c0_18 = arith.constant 0 : index
    %c0_19 = arith.constant 0 : index
    %c0_20 = arith.constant 0 : index
    %14 = vector.load %arg4[%c0_16, %c0_17, %c0_18, %c0_19, %c0_20] : memref<2x2x4x32x8xbf16, #tpu.memory_space<vmem>>, vector<1x1x1x32x8xbf16>
    %15 = vector.shape_cast %14 : vector<1x1x1x32x8xbf16> to vector<32x8xbf16>
    %cst_21 = arith.constant dense<0.000000e+00> : vector<16x8xf32>
    %16 = tpu.matmul %5, %15, %cst_21 {dimension_numbers = #tpu.dot_dimension_numbers<[1], [0], [0], [1], [0, 0, 1, 1], [], []>} : vector<16x32xbf16>, vector<32x8xbf16>, vector<16x8xf32> -> vector<16x8xf32>
    %c0_22 = arith.constant 0 : index
    %c0_23 = arith.constant 0 : index
    %c0_24 = arith.constant 0 : index
    %c0_25 = arith.constant 0 : index
    %c0_26 = arith.constant 0 : index
    %17 = vector.load %arg7[%c0_22, %c0_23, %c0_24, %c0_25, %c0_26] : memref<2x2x4x1x8xf32, #tpu.memory_space<vmem>>, vector<1x1x1x1x8xf32>
    %18 = vector.shape_cast %17 : vector<1x1x1x1x8xf32> to vector<1x8xf32>
    %19 = vector.broadcast %18 : vector<1x8xf32> to vector<16x8xf32>
    %20 = arith.addf %16, %19 : vector<16x8xf32>
    %c0_27 = arith.constant 0 : index
    %c0_28 = arith.constant 0 : index
    %c0_29 = arith.constant 0 : index
    %c0_30 = arith.constant 0 : index
    %c0_31 = arith.constant 0 : index
    %21 = vector.load %arg5[%c0_27, %c0_28, %c0_29, %c0_30, %c0_31] : memref<2x2x4x32x8xbf16, #tpu.memory_space<vmem>>, vector<1x1x1x32x8xbf16>
    %22 = vector.shape_cast %21 : vector<1x1x1x32x8xbf16> to vector<32x8xbf16>
    %cst_32 = arith.constant dense<0.000000e+00> : vector<16x8xf32>
    %23 = tpu.matmul %5, %22, %cst_32 {dimension_numbers = #tpu.dot_dimension_numbers<[1], [0], [0], [1], [0, 0, 1, 1], [], []>} : vector<16x32xbf16>, vector<32x8xbf16>, vector<16x8xf32> -> vector<16x8xf32>
    %c0_33 = arith.constant 0 : index
    %c0_34 = arith.constant 0 : index
    %c0_35 = arith.constant 0 : index
    %c0_36 = arith.constant 0 : index
    %c0_37 = arith.constant 0 : index
    %24 = vector.load %arg8[%c0_33, %c0_34, %c0_35, %c0_36, %c0_37] : memref<2x2x4x1x8xf32, #tpu.memory_space<vmem>>, vector<1x1x1x1x8xf32>
    %25 = vector.shape_cast %24 : vector<1x1x1x1x8xf32> to vector<1x8xf32>
    %26 = vector.broadcast %25 : vector<1x8xf32> to vector<16x8xf32>
    %27 = arith.addf %23, %26 : vector<16x8xf32>
    %28 = arith.truncf %13 : vector<16x8xf32> to vector<16x8xbf16>
    %29 = arith.truncf %20 : vector<16x8xf32> to vector<16x8xbf16>
    %cst_38 = arith.constant dense<0.000000e+00> : vector<16x16xf32>
    %30 = tpu.matmul %28, %29, %cst_38 {dimension_numbers = #tpu.dot_dimension_numbers<[1], [1], [0], [0], [0, 0, 1, 0], [], []>} : vector<16x8xbf16>, vector<16x8xbf16>, vector<16x16xf32> -> vector<16x16xf32>
    %cst_39 = arith.constant dense<0xFF800000> : vector<16xf32>
    %31 = vector.multi_reduction <maximumf>, %30, %cst_39 [1] : vector<16x16xf32> to vector<16xf32>
    %32 = vector.shape_cast %31 : vector<16xf32> to vector<16x1xf32>
    %33 = vector.broadcast %32 : vector<16x1xf32> to vector<16x16xf32>
    %34 = arith.subf %30, %33 : vector<16x16xf32>
    %35 = math.exp %34 : vector<16x16xf32>
    %cst_40 = arith.constant dense<0.000000e+00> : vector<16xf32>
    %36 = vector.multi_reduction <add>, %35, %cst_40 [1] : vector<16x16xf32> to vector<16xf32>
    %37 = vector.shape_cast %36 : vector<16xf32> to vector<16x1xf32>
    %38 = tpu.reciprocal %37 {approx = true} : vector<16x1xf32> -> vector<16x1xf32>
    %39 = vector.broadcast %38 : vector<16x1xf32> to vector<16x16xf32>
    %40 = arith.mulf %35, %39 : vector<16x16xf32>
    %41 = arith.truncf %40 : vector<16x16xf32> to vector<16x16xbf16>
    %42 = arith.truncf %27 : vector<16x8xf32> to vector<16x8xbf16>
    %cst_41 = arith.constant dense<0.000000e+00> : vector<16x8xf32>
    %43 = tpu.matmul %41, %42, %cst_41 {dimension_numbers = #tpu.dot_dimension_numbers<[1], [0], [0], [1], [0, 0, 1, 1], [], []>} : vector<16x16xbf16>, vector<16x8xbf16>, vector<16x8xf32> -> vector<16x8xf32>
    %44 = arith.truncf %43 : vector<16x8xf32> to vector<16x8xbf16>
    %c0_42 = arith.constant 0 : index
    %c0_43 = arith.constant 0 : index
    %c0_44 = arith.constant 0 : index
    %c0_45 = arith.constant 0 : index
    %c0_46 = arith.constant 0 : index
    %45 = vector.load %arg9[%c0_42, %c0_43, %c0_44, %c0_45, %c0_46] : memref<2x2x4x8x32xbf16, #tpu.memory_space<vmem>>, vector<1x1x1x8x32xbf16>
    %46 = vector.shape_cast %45 : vector<1x1x1x8x32xbf16> to vector<8x32xbf16>
    %cst_47 = arith.constant dense<0.000000e+00> : vector<16x32xf32>
    %47 = tpu.matmul %44, %46, %cst_47 {dimension_numbers = #tpu.dot_dimension_numbers<[1], [0], [0], [1], [0, 0, 1, 1], [], []>} : vector<16x8xbf16>, vector<8x32xbf16>, vector<16x32xf32> -> vector<16x32xf32>
    %48 = arith.addf %6, %47 : vector<16x32xf32>
    %c0_48 = arith.constant 0 : index
    %c0_49 = arith.constant 0 : index
    %c1 = arith.constant 1 : index
    %c0_50 = arith.constant 0 : index
    %c0_51 = arith.constant 0 : index
    %49 = vector.load %arg3[%c0_48, %c0_49, %c1, %c0_50, %c0_51] : memref<2x2x4x32x8xbf16, #tpu.memory_space<vmem>>, vector<1x1x1x32x8xbf16>
    %50 = vector.shape_cast %49 : vector<1x1x1x32x8xbf16> to vector<32x8xbf16>
    %cst_52 = arith.constant dense<0.000000e+00> : vector<16x8xf32>
    %51 = tpu.matmul %5, %50, %cst_52 {dimension_numbers = #tpu.dot_dimension_numbers<[1], [0], [0], [1], [0, 0, 1, 1], [], []>} : vector<16x32xbf16>, vector<32x8xbf16>, vector<16x8xf32> -> vector<16x8xf32>
    %c0_53 = arith.constant 0 : index
    %c0_54 = arith.constant 0 : index
    %c1_55 = arith.constant 1 : index
    %c0_56 = arith.constant 0 : index
    %c0_57 = arith.constant 0 : index
    %52 = vector.load %arg6[%c0_53, %c0_54, %c1_55, %c0_56, %c0_57] : memref<2x2x4x1x8xf32, #tpu.memory_space<vmem>>, vector<1x1x1x1x8xf32>
    %53 = vector.shape_cast %52 : vector<1x1x1x1x8xf32> to vector<1x8xf32>
    %54 = vector.broadcast %53 : vector<1x8xf32> to vector<16x8xf32>
    %55 = arith.addf %51, %54 : vector<16x8xf32>
    %c0_58 = arith.constant 0 : index
    %c0_59 = arith.constant 0 : index
    %c1_60 = arith.constant 1 : index
    %c0_61 = arith.constant 0 : index
    %c0_62 = arith.constant 0 : index
    %56 = vector.load %arg4[%c0_58, %c0_59, %c1_60, %c0_61, %c0_62] : memref<2x2x4x32x8xbf16, #tpu.memory_space<vmem>>, vector<1x1x1x32x8xbf16>
    %57 = vector.shape_cast %56 : vector<1x1x1x32x8xbf16> to vector<32x8xbf16>
    %cst_63 = arith.constant dense<0.000000e+00> : vector<16x8xf32>
    %58 = tpu.matmul %5, %57, %cst_63 {dimension_numbers = #tpu.dot_dimension_numbers<[1], [0], [0], [1], [0, 0, 1, 1], [], []>} : vector<16x32xbf16>, vector<32x8xbf16>, vector<16x8xf32> -> vector<16x8xf32>
    %c0_64 = arith.constant 0 : index
    %c0_65 = arith.constant 0 : index
    %c1_66 = arith.constant 1 : index
    %c0_67 = arith.constant 0 : index
    %c0_68 = arith.constant 0 : index
    %59 = vector.load %arg7[%c0_64, %c0_65, %c1_66, %c0_67, %c0_68] : memref<2x2x4x1x8xf32, #tpu.memory_space<vmem>>, vector<1x1x1x1x8xf32>
    %60 = vector.shape_cast %59 : vector<1x1x1x1x8xf32> to vector<1x8xf32>
    %61 = vector.broadcast %60 : vector<1x8xf32> to vector<16x8xf32>
    %62 = arith.addf %58, %61 : vector<16x8xf32>
    %c0_69 = arith.constant 0 : index
    %c0_70 = arith.constant 0 : index
    %c1_71 = arith.constant 1 : index
    %c0_72 = arith.constant 0 : index
    %c0_73 = arith.constant 0 : index
    %63 = vector.load %arg5[%c0_69, %c0_70, %c1_71, %c0_72, %c0_73] : memref<2x2x4x32x8xbf16, #tpu.memory_space<vmem>>, vector<1x1x1x32x8xbf16>
    %64 = vector.shape_cast %63 : vector<1x1x1x32x8xbf16> to vector<32x8xbf16>
    %cst_74 = arith.constant dense<0.000000e+00> : vector<16x8xf32>
    %65 = tpu.matmul %5, %64, %cst_74 {dimension_numbers = #tpu.dot_dimension_numbers<[1], [0], [0], [1], [0, 0, 1, 1], [], []>} : vector<16x32xbf16>, vector<32x8xbf16>, vector<16x8xf32> -> vector<16x8xf32>
    %c0_75 = arith.constant 0 : index
    %c0_76 = arith.constant 0 : index
    %c1_77 = arith.constant 1 : index
    %c0_78 = arith.constant 0 : index
    %c0_79 = arith.constant 0 : index
    %66 = vector.load %arg8[%c0_75, %c0_76, %c1_77, %c0_78, %c0_79] : memref<2x2x4x1x8xf32, #tpu.memory_space<vmem>>, vector<1x1x1x1x8xf32>
    %67 = vector.shape_cast %66 : vector<1x1x1x1x8xf32> to vector<1x8xf32>
    %68 = vector.broadcast %67 : vector<1x8xf32> to vector<16x8xf32>
    %69 = arith.addf %65, %68 : vector<16x8xf32>
    %70 = arith.truncf %55 : vector<16x8xf32> to vector<16x8xbf16>
    %71 = arith.truncf %62 : vector<16x8xf32> to vector<16x8xbf16>
    %cst_80 = arith.constant dense<0.000000e+00> : vector<16x16xf32>
    %72 = tpu.matmul %70, %71, %cst_80 {dimension_numbers = #tpu.dot_dimension_numbers<[1], [1], [0], [0], [0, 0, 1, 0], [], []>} : vector<16x8xbf16>, vector<16x8xbf16>, vector<16x16xf32> -> vector<16x16xf32>
    %cst_81 = arith.constant dense<0xFF800000> : vector<16xf32>
    %73 = vector.multi_reduction <maximumf>, %72, %cst_81 [1] : vector<16x16xf32> to vector<16xf32>
    %74 = vector.shape_cast %73 : vector<16xf32> to vector<16x1xf32>
    %75 = vector.broadcast %74 : vector<16x1xf32> to vector<16x16xf32>
    %76 = arith.subf %72, %75 : vector<16x16xf32>
    %77 = math.exp %76 : vector<16x16xf32>
    %cst_82 = arith.constant dense<0.000000e+00> : vector<16xf32>
    %78 = vector.multi_reduction <add>, %77, %cst_82 [1] : vector<16x16xf32> to vector<16xf32>
    %79 = vector.shape_cast %78 : vector<16xf32> to vector<16x1xf32>
    %80 = tpu.reciprocal %79 {approx = true} : vector<16x1xf32> -> vector<16x1xf32>
    %81 = vector.broadcast %80 : vector<16x1xf32> to vector<16x16xf32>
    %82 = arith.mulf %77, %81 : vector<16x16xf32>
    %83 = arith.truncf %82 : vector<16x16xf32> to vector<16x16xbf16>
    %84 = arith.truncf %69 : vector<16x8xf32> to vector<16x8xbf16>
    %cst_83 = arith.constant dense<0.000000e+00> : vector<16x8xf32>
    %85 = tpu.matmul %83, %84, %cst_83 {dimension_numbers = #tpu.dot_dimension_numbers<[1], [0], [0], [1], [0, 0, 1, 1], [], []>} : vector<16x16xbf16>, vector<16x8xbf16>, vector<16x8xf32> -> vector<16x8xf32>
    %86 = arith.truncf %85 : vector<16x8xf32> to vector<16x8xbf16>
    %c0_84 = arith.constant 0 : index
    %c0_85 = arith.constant 0 : index
    %c1_86 = arith.constant 1 : index
    %c0_87 = arith.constant 0 : index
    %c0_88 = arith.constant 0 : index
    %87 = vector.load %arg9[%c0_84, %c0_85, %c1_86, %c0_87, %c0_88] : memref<2x2x4x8x32xbf16, #tpu.memory_space<vmem>>, vector<1x1x1x8x32xbf16>
    %88 = vector.shape_cast %87 : vector<1x1x1x8x32xbf16> to vector<8x32xbf16>
    %cst_89 = arith.constant dense<0.000000e+00> : vector<16x32xf32>
    %89 = tpu.matmul %86, %88, %cst_89 {dimension_numbers = #tpu.dot_dimension_numbers<[1], [0], [0], [1], [0, 0, 1, 1], [], []>} : vector<16x8xbf16>, vector<8x32xbf16>, vector<16x32xf32> -> vector<16x32xf32>
    %90 = arith.addf %48, %89 : vector<16x32xf32>
    %c0_90 = arith.constant 0 : index
    %c0_91 = arith.constant 0 : index
    %c2 = arith.constant 2 : index
    %c0_92 = arith.constant 0 : index
    %c0_93 = arith.constant 0 : index
    %91 = vector.load %arg3[%c0_90, %c0_91, %c2, %c0_92, %c0_93] : memref<2x2x4x32x8xbf16, #tpu.memory_space<vmem>>, vector<1x1x1x32x8xbf16>
    %92 = vector.shape_cast %91 : vector<1x1x1x32x8xbf16> to vector<32x8xbf16>
    %cst_94 = arith.constant dense<0.000000e+00> : vector<16x8xf32>
    %93 = tpu.matmul %5, %92, %cst_94 {dimension_numbers = #tpu.dot_dimension_numbers<[1], [0], [0], [1], [0, 0, 1, 1], [], []>} : vector<16x32xbf16>, vector<32x8xbf16>, vector<16x8xf32> -> vector<16x8xf32>
    %c0_95 = arith.constant 0 : index
    %c0_96 = arith.constant 0 : index
    %c2_97 = arith.constant 2 : index
    %c0_98 = arith.constant 0 : index
    %c0_99 = arith.constant 0 : index
    %94 = vector.load %arg6[%c0_95, %c0_96, %c2_97, %c0_98, %c0_99] : memref<2x2x4x1x8xf32, #tpu.memory_space<vmem>>, vector<1x1x1x1x8xf32>
    %95 = vector.shape_cast %94 : vector<1x1x1x1x8xf32> to vector<1x8xf32>
    %96 = vector.broadcast %95 : vector<1x8xf32> to vector<16x8xf32>
    %97 = arith.addf %93, %96 : vector<16x8xf32>
    %c0_100 = arith.constant 0 : index
    %c0_101 = arith.constant 0 : index
    %c2_102 = arith.constant 2 : index
    %c0_103 = arith.constant 0 : index
    %c0_104 = arith.constant 0 : index
    %98 = vector.load %arg4[%c0_100, %c0_101, %c2_102, %c0_103, %c0_104] : memref<2x2x4x32x8xbf16, #tpu.memory_space<vmem>>, vector<1x1x1x32x8xbf16>
    %99 = vector.shape_cast %98 : vector<1x1x1x32x8xbf16> to vector<32x8xbf16>
    %cst_105 = arith.constant dense<0.000000e+00> : vector<16x8xf32>
    %100 = tpu.matmul %5, %99, %cst_105 {dimension_numbers = #tpu.dot_dimension_numbers<[1], [0], [0], [1], [0, 0, 1, 1], [], []>} : vector<16x32xbf16>, vector<32x8xbf16>, vector<16x8xf32> -> vector<16x8xf32>
    %c0_106 = arith.constant 0 : index
    %c0_107 = arith.constant 0 : index
    %c2_108 = arith.constant 2 : index
    %c0_109 = arith.constant 0 : index
    %c0_110 = arith.constant 0 : index
    %101 = vector.load %arg7[%c0_106, %c0_107, %c2_108, %c0_109, %c0_110] : memref<2x2x4x1x8xf32, #tpu.memory_space<vmem>>, vector<1x1x1x1x8xf32>
    %102 = vector.shape_cast %101 : vector<1x1x1x1x8xf32> to vector<1x8xf32>
    %103 = vector.broadcast %102 : vector<1x8xf32> to vector<16x8xf32>
    %104 = arith.addf %100, %103 : vector<16x8xf32>
    %c0_111 = arith.constant 0 : index
    %c0_112 = arith.constant 0 : index
    %c2_113 = arith.constant 2 : index
    %c0_114 = arith.constant 0 : index
    %c0_115 = arith.constant 0 : index
    %105 = vector.load %arg5[%c0_111, %c0_112, %c2_113, %c0_114, %c0_115] : memref<2x2x4x32x8xbf16, #tpu.memory_space<vmem>>, vector<1x1x1x32x8xbf16>
    %106 = vector.shape_cast %105 : vector<1x1x1x32x8xbf16> to vector<32x8xbf16>
    %cst_116 = arith.constant dense<0.000000e+00> : vector<16x8xf32>
    %107 = tpu.matmul %5, %106, %cst_116 {dimension_numbers = #tpu.dot_dimension_numbers<[1], [0], [0], [1], [0, 0, 1, 1], [], []>} : vector<16x32xbf16>, vector<32x8xbf16>, vector<16x8xf32> -> vector<16x8xf32>
    %c0_117 = arith.constant 0 : index
    %c0_118 = arith.constant 0 : index
    %c2_119 = arith.constant 2 : index
    %c0_120 = arith.constant 0 : index
    %c0_121 = arith.constant 0 : index
    %108 = vector.load %arg8[%c0_117, %c0_118, %c2_119, %c0_120, %c0_121] : memref<2x2x4x1x8xf32, #tpu.memory_space<vmem>>, vector<1x1x1x1x8xf32>
    %109 = vector.shape_cast %108 : vector<1x1x1x1x8xf32> to vector<1x8xf32>
    %110 = vector.broadcast %109 : vector<1x8xf32> to vector<16x8xf32>
    %111 = arith.addf %107, %110 : vector<16x8xf32>
    %112 = arith.truncf %97 : vector<16x8xf32> to vector<16x8xbf16>
    %113 = arith.truncf %104 : vector<16x8xf32> to vector<16x8xbf16>
    %cst_122 = arith.constant dense<0.000000e+00> : vector<16x16xf32>
    %114 = tpu.matmul %112, %113, %cst_122 {dimension_numbers = #tpu.dot_dimension_numbers<[1], [1], [0], [0], [0, 0, 1, 0], [], []>} : vector<16x8xbf16>, vector<16x8xbf16>, vector<16x16xf32> -> vector<16x16xf32>
    %cst_123 = arith.constant dense<0xFF800000> : vector<16xf32>
    %115 = vector.multi_reduction <maximumf>, %114, %cst_123 [1] : vector<16x16xf32> to vector<16xf32>
    %116 = vector.shape_cast %115 : vector<16xf32> to vector<16x1xf32>
    %117 = vector.broadcast %116 : vector<16x1xf32> to vector<16x16xf32>
    %118 = arith.subf %114, %117 : vector<16x16xf32>
    %119 = math.exp %118 : vector<16x16xf32>
    %cst_124 = arith.constant dense<0.000000e+00> : vector<16xf32>
    %120 = vector.multi_reduction <add>, %119, %cst_124 [1] : vector<16x16xf32> to vector<16xf32>
    %121 = vector.shape_cast %120 : vector<16xf32> to vector<16x1xf32>
    %122 = tpu.reciprocal %121 {approx = true} : vector<16x1xf32> -> vector<16x1xf32>
    %123 = vector.broadcast %122 : vector<16x1xf32> to vector<16x16xf32>
    %124 = arith.mulf %119, %123 : vector<16x16xf32>
    %125 = arith.truncf %124 : vector<16x16xf32> to vector<16x16xbf16>
    %126 = arith.truncf %111 : vector<16x8xf32> to vector<16x8xbf16>
    %cst_125 = arith.constant dense<0.000000e+00> : vector<16x8xf32>
    %127 = tpu.matmul %125, %126, %cst_125 {dimension_numbers = #tpu.dot_dimension_numbers<[1], [0], [0], [1], [0, 0, 1, 1], [], []>} : vector<16x16xbf16>, vector<16x8xbf16>, vector<16x8xf32> -> vector<16x8xf32>
    %128 = arith.truncf %127 : vector<16x8xf32> to vector<16x8xbf16>
    %c0_126 = arith.constant 0 : index
    %c0_127 = arith.constant 0 : index
    %c2_128 = arith.constant 2 : index
    %c0_129 = arith.constant 0 : index
    %c0_130 = arith.constant 0 : index
    %129 = vector.load %arg9[%c0_126, %c0_127, %c2_128, %c0_129, %c0_130] : memref<2x2x4x8x32xbf16, #tpu.memory_space<vmem>>, vector<1x1x1x8x32xbf16>
    %130 = vector.shape_cast %129 : vector<1x1x1x8x32xbf16> to vector<8x32xbf16>
    %cst_131 = arith.constant dense<0.000000e+00> : vector<16x32xf32>
    %131 = tpu.matmul %128, %130, %cst_131 {dimension_numbers = #tpu.dot_dimension_numbers<[1], [0], [0], [1], [0, 0, 1, 1], [], []>} : vector<16x8xbf16>, vector<8x32xbf16>, vector<16x32xf32> -> vector<16x32xf32>
    %132 = arith.addf %90, %131 : vector<16x32xf32>
    %c0_132 = arith.constant 0 : index
    %c0_133 = arith.constant 0 : index
    %c3 = arith.constant 3 : index
    %c0_134 = arith.constant 0 : index
    %c0_135 = arith.constant 0 : index
    %133 = vector.load %arg3[%c0_132, %c0_133, %c3, %c0_134, %c0_135] : memref<2x2x4x32x8xbf16, #tpu.memory_space<vmem>>, vector<1x1x1x32x8xbf16>
    %134 = vector.shape_cast %133 : vector<1x1x1x32x8xbf16> to vector<32x8xbf16>
    %cst_136 = arith.constant dense<0.000000e+00> : vector<16x8xf32>
    %135 = tpu.matmul %5, %134, %cst_136 {dimension_numbers = #tpu.dot_dimension_numbers<[1], [0], [0], [1], [0, 0, 1, 1], [], []>} : vector<16x32xbf16>, vector<32x8xbf16>, vector<16x8xf32> -> vector<16x8xf32>
    %c0_137 = arith.constant 0 : index
    %c0_138 = arith.constant 0 : index
    %c3_139 = arith.constant 3 : index
    %c0_140 = arith.constant 0 : index
    %c0_141 = arith.constant 0 : index
    %136 = vector.load %arg6[%c0_137, %c0_138, %c3_139, %c0_140, %c0_141] : memref<2x2x4x1x8xf32, #tpu.memory_space<vmem>>, vector<1x1x1x1x8xf32>
    %137 = vector.shape_cast %136 : vector<1x1x1x1x8xf32> to vector<1x8xf32>
    %138 = vector.broadcast %137 : vector<1x8xf32> to vector<16x8xf32>
    %139 = arith.addf %135, %138 : vector<16x8xf32>
    %c0_142 = arith.constant 0 : index
    %c0_143 = arith.constant 0 : index
    %c3_144 = arith.constant 3 : index
    %c0_145 = arith.constant 0 : index
    %c0_146 = arith.constant 0 : index
    %140 = vector.load %arg4[%c0_142, %c0_143, %c3_144, %c0_145, %c0_146] : memref<2x2x4x32x8xbf16, #tpu.memory_space<vmem>>, vector<1x1x1x32x8xbf16>
    %141 = vector.shape_cast %140 : vector<1x1x1x32x8xbf16> to vector<32x8xbf16>
    %cst_147 = arith.constant dense<0.000000e+00> : vector<16x8xf32>
    %142 = tpu.matmul %5, %141, %cst_147 {dimension_numbers = #tpu.dot_dimension_numbers<[1], [0], [0], [1], [0, 0, 1, 1], [], []>} : vector<16x32xbf16>, vector<32x8xbf16>, vector<16x8xf32> -> vector<16x8xf32>
    %c0_148 = arith.constant 0 : index
    %c0_149 = arith.constant 0 : index
    %c3_150 = arith.constant 3 : index
    %c0_151 = arith.constant 0 : index
    %c0_152 = arith.constant 0 : index
    %143 = vector.load %arg7[%c0_148, %c0_149, %c3_150, %c0_151, %c0_152] : memref<2x2x4x1x8xf32, #tpu.memory_space<vmem>>, vector<1x1x1x1x8xf32>
    %144 = vector.shape_cast %143 : vector<1x1x1x1x8xf32> to vector<1x8xf32>
    %145 = vector.broadcast %144 : vector<1x8xf32> to vector<16x8xf32>
    %146 = arith.addf %142, %145 : vector<16x8xf32>
    %c0_153 = arith.constant 0 : index
    %c0_154 = arith.constant 0 : index
    %c3_155 = arith.constant 3 : index
    %c0_156 = arith.constant 0 : index
    %c0_157 = arith.constant 0 : index
    %147 = vector.load %arg5[%c0_153, %c0_154, %c3_155, %c0_156, %c0_157] : memref<2x2x4x32x8xbf16, #tpu.memory_space<vmem>>, vector<1x1x1x32x8xbf16>
    %148 = vector.shape_cast %147 : vector<1x1x1x32x8xbf16> to vector<32x8xbf16>
    %cst_158 = arith.constant dense<0.000000e+00> : vector<16x8xf32>
    %149 = tpu.matmul %5, %148, %cst_158 {dimension_numbers = #tpu.dot_dimension_numbers<[1], [0], [0], [1], [0, 0, 1, 1], [], []>} : vector<16x32xbf16>, vector<32x8xbf16>, vector<16x8xf32> -> vector<16x8xf32>
    %c0_159 = arith.constant 0 : index
    %c0_160 = arith.constant 0 : index
    %c3_161 = arith.constant 3 : index
    %c0_162 = arith.constant 0 : index
    %c0_163 = arith.constant 0 : index
    %150 = vector.load %arg8[%c0_159, %c0_160, %c3_161, %c0_162, %c0_163] : memref<2x2x4x1x8xf32, #tpu.memory_space<vmem>>, vector<1x1x1x1x8xf32>
    %151 = vector.shape_cast %150 : vector<1x1x1x1x8xf32> to vector<1x8xf32>
    %152 = vector.broadcast %151 : vector<1x8xf32> to vector<16x8xf32>
    %153 = arith.addf %149, %152 : vector<16x8xf32>
    %154 = arith.truncf %139 : vector<16x8xf32> to vector<16x8xbf16>
    %155 = arith.truncf %146 : vector<16x8xf32> to vector<16x8xbf16>
    %cst_164 = arith.constant dense<0.000000e+00> : vector<16x16xf32>
    %156 = tpu.matmul %154, %155, %cst_164 {dimension_numbers = #tpu.dot_dimension_numbers<[1], [1], [0], [0], [0, 0, 1, 0], [], []>} : vector<16x8xbf16>, vector<16x8xbf16>, vector<16x16xf32> -> vector<16x16xf32>
    %cst_165 = arith.constant dense<0xFF800000> : vector<16xf32>
    %157 = vector.multi_reduction <maximumf>, %156, %cst_165 [1] : vector<16x16xf32> to vector<16xf32>
    %158 = vector.shape_cast %157 : vector<16xf32> to vector<16x1xf32>
    %159 = vector.broadcast %158 : vector<16x1xf32> to vector<16x16xf32>
    %160 = arith.subf %156, %159 : vector<16x16xf32>
    %161 = math.exp %160 : vector<16x16xf32>
    %cst_166 = arith.constant dense<0.000000e+00> : vector<16xf32>
    %162 = vector.multi_reduction <add>, %161, %cst_166 [1] : vector<16x16xf32> to vector<16xf32>
    %163 = vector.shape_cast %162 : vector<16xf32> to vector<16x1xf32>
    %164 = tpu.reciprocal %163 {approx = true} : vector<16x1xf32> -> vector<16x1xf32>
    %165 = vector.broadcast %164 : vector<16x1xf32> to vector<16x16xf32>
    %166 = arith.mulf %161, %165 : vector<16x16xf32>
    %167 = arith.truncf %166 : vector<16x16xf32> to vector<16x16xbf16>
    %168 = arith.truncf %153 : vector<16x8xf32> to vector<16x8xbf16>
    %cst_167 = arith.constant dense<0.000000e+00> : vector<16x8xf32>
    %169 = tpu.matmul %167, %168, %cst_167 {dimension_numbers = #tpu.dot_dimension_numbers<[1], [0], [0], [1], [0, 0, 1, 1], [], []>} : vector<16x16xbf16>, vector<16x8xbf16>, vector<16x8xf32> -> vector<16x8xf32>
    %170 = arith.truncf %169 : vector<16x8xf32> to vector<16x8xbf16>
    %c0_168 = arith.constant 0 : index
    %c0_169 = arith.constant 0 : index
    %c3_170 = arith.constant 3 : index
    %c0_171 = arith.constant 0 : index
    %c0_172 = arith.constant 0 : index
    %171 = vector.load %arg9[%c0_168, %c0_169, %c3_170, %c0_171, %c0_172] : memref<2x2x4x8x32xbf16, #tpu.memory_space<vmem>>, vector<1x1x1x8x32xbf16>
    %172 = vector.shape_cast %171 : vector<1x1x1x8x32xbf16> to vector<8x32xbf16>
    %cst_173 = arith.constant dense<0.000000e+00> : vector<16x32xf32>
    %173 = tpu.matmul %170, %172, %cst_173 {dimension_numbers = #tpu.dot_dimension_numbers<[1], [0], [0], [1], [0, 0, 1, 1], [], []>} : vector<16x8xbf16>, vector<8x32xbf16>, vector<16x32xf32> -> vector<16x32xf32>
    %174 = arith.addf %132, %173 : vector<16x32xf32>
    %c0_174 = arith.constant 0 : index
    %c0_175 = arith.constant 0 : index
    %c0_176 = arith.constant 0 : index
    %c0_177 = arith.constant 0 : index
    %175 = vector.load %arg10[%c0_174, %c0_175, %c0_176, %c0_177] : memref<2x2x1x32xf32, #tpu.memory_space<vmem>>, vector<1x1x1x32xf32>
    %176 = vector.shape_cast %175 : vector<1x1x1x32xf32> to vector<1x32xf32>
    %177 = vector.broadcast %176 : vector<1x32xf32> to vector<16x32xf32>
    %178 = arith.addf %174, %177 : vector<16x32xf32>
    %179 = arith.addf %4, %178 : vector<16x32xf32>
    %c0_178 = arith.constant 0 : index
    %c0_179 = arith.constant 0 : index
    %c0_180 = arith.constant 0 : index
    %c0_181 = arith.constant 0 : index
    %180 = vector.load %arg11[%c0_178, %c0_179, %c0_180, %c0_181] : memref<2x2x1x32xf32, #tpu.memory_space<vmem>>, vector<1x1x1x32xf32>
    %181 = vector.shape_cast %180 : vector<1x1x1x32xf32> to vector<1x32xf32>
    %c0_182 = arith.constant 0 : index
    %c0_183 = arith.constant 0 : index
    %c0_184 = arith.constant 0 : index
    %c0_185 = arith.constant 0 : index
    %182 = vector.load %arg12[%c0_182, %c0_183, %c0_184, %c0_185] : memref<2x2x1x32xf32, #tpu.memory_space<vmem>>, vector<1x1x1x32xf32>
    %183 = vector.shape_cast %182 : vector<1x1x1x32xf32> to vector<1x32xf32>
    %cst_186 = arith.constant dense<0.000000e+00> : vector<16xf32>
    %184 = vector.multi_reduction <add>, %179, %cst_186 [1] : vector<16x32xf32> to vector<16xf32>
    %185 = vector.shape_cast %184 : vector<16xf32> to vector<16x1xf32>
    %cst_187 = arith.constant 3.200000e+01 : f32
    %186 = vector.broadcast %cst_187 : f32 to vector<16x1xf32>
    %187 = arith.divf %185, %186 : vector<16x1xf32>
    %188 = arith.mulf %179, %179 : vector<16x32xf32>
    %cst_188 = arith.constant dense<0.000000e+00> : vector<16xf32>
    %189 = vector.multi_reduction <add>, %188, %cst_188 [1] : vector<16x32xf32> to vector<16xf32>
    %190 = vector.shape_cast %189 : vector<16xf32> to vector<16x1xf32>
    %cst_189 = arith.constant 3.200000e+01 : f32
    %191 = vector.broadcast %cst_189 : f32 to vector<16x1xf32>
    %192 = arith.divf %190, %191 : vector<16x1xf32>
    %193 = arith.mulf %187, %187 : vector<16x1xf32>
    %194 = arith.subf %192, %193 : vector<16x1xf32>
    %195 = vector.broadcast %187 : vector<16x1xf32> to vector<16x32xf32>
    %196 = arith.subf %179, %195 : vector<16x32xf32>
    %cst_190 = arith.constant 9.99999974E-6 : f32
    %197 = vector.broadcast %cst_190 : f32 to vector<16x1xf32>
    %198 = arith.addf %194, %197 : vector<16x1xf32>
    %199 = math.rsqrt %198 : vector<16x1xf32>
    %200 = vector.broadcast %199 : vector<16x1xf32> to vector<16x32xf32>
    %201 = arith.mulf %196, %200 : vector<16x32xf32>
    %202 = vector.broadcast %181 : vector<1x32xf32> to vector<16x32xf32>
    %203 = arith.mulf %201, %202 : vector<16x32xf32>
    %204 = vector.broadcast %183 : vector<1x32xf32> to vector<16x32xf32>
    %205 = arith.addf %203, %204 : vector<16x32xf32>
    %206 = arith.truncf %205 : vector<16x32xf32> to vector<16x32xbf16>
    %c0_191 = arith.constant 0 : index
    %c0_192 = arith.constant 0 : index
    %c0_193 = arith.constant 0 : index
    %c0_194 = arith.constant 0 : index
    %207 = vector.load %arg13[%c0_191, %c0_192, %c0_193, %c0_194] : memref<2x2x32x64xbf16, #tpu.memory_space<vmem>>, vector<1x1x32x64xbf16>
    %208 = vector.shape_cast %207 : vector<1x1x32x64xbf16> to vector<32x64xbf16>
    %cst_195 = arith.constant dense<0.000000e+00> : vector<16x64xf32>
    %209 = tpu.matmul %206, %208, %cst_195 {dimension_numbers = #tpu.dot_dimension_numbers<[1], [0], [0], [1], [0, 0, 1, 1], [], []>} : vector<16x32xbf16>, vector<32x64xbf16>, vector<16x64xf32> -> vector<16x64xf32>
    %c0_196 = arith.constant 0 : index
    %c0_197 = arith.constant 0 : index
    %c0_198 = arith.constant 0 : index
    %c0_199 = arith.constant 0 : index
    %210 = vector.load %arg14[%c0_196, %c0_197, %c0_198, %c0_199] : memref<2x2x1x64xf32, #tpu.memory_space<vmem>>, vector<1x1x1x64xf32>
    %211 = vector.shape_cast %210 : vector<1x1x1x64xf32> to vector<1x64xf32>
    %212 = vector.broadcast %211 : vector<1x64xf32> to vector<16x64xf32>
    %213 = arith.addf %209, %212 : vector<16x64xf32>
    %cst_200 = arith.constant 0.000000e+00 : f32
    %214 = vector.broadcast %cst_200 : f32 to vector<16x64xf32>
    %215 = arith.maximumf %213, %214 : vector<16x64xf32>
    %216 = arith.truncf %215 : vector<16x64xf32> to vector<16x64xbf16>
    %c0_201 = arith.constant 0 : index
    %c0_202 = arith.constant 0 : index
    %c0_203 = arith.constant 0 : index
    %c0_204 = arith.constant 0 : index
    %217 = vector.load %arg15[%c0_201, %c0_202, %c0_203, %c0_204] : memref<2x2x64x32xbf16, #tpu.memory_space<vmem>>, vector<1x1x64x32xbf16>
    %218 = vector.shape_cast %217 : vector<1x1x64x32xbf16> to vector<64x32xbf16>
    %cst_205 = arith.constant dense<0.000000e+00> : vector<16x32xf32>
    %219 = tpu.matmul %216, %218, %cst_205 {dimension_numbers = #tpu.dot_dimension_numbers<[1], [0], [0], [1], [0, 0, 1, 1], [], []>} : vector<16x64xbf16>, vector<64x32xbf16>, vector<16x32xf32> -> vector<16x32xf32>
    %c0_206 = arith.constant 0 : index
    %c0_207 = arith.constant 0 : index
    %c0_208 = arith.constant 0 : index
    %c0_209 = arith.constant 0 : index
    %220 = vector.load %arg16[%c0_206, %c0_207, %c0_208, %c0_209] : memref<2x2x1x32xf32, #tpu.memory_space<vmem>>, vector<1x1x1x32xf32>
    %221 = vector.shape_cast %220 : vector<1x1x1x32xf32> to vector<1x32xf32>
    %222 = vector.broadcast %221 : vector<1x32xf32> to vector<16x32xf32>
    %223 = arith.addf %219, %222 : vector<16x32xf32>
    %224 = arith.addf %205, %223 : vector<16x32xf32>
    %c0_210 = arith.constant 0 : index
    %c0_211 = arith.constant 0 : index
    %c0_212 = arith.constant 0 : index
    %c0_213 = arith.constant 0 : index
    %225 = vector.load %arg17[%c0_210, %c0_211, %c0_212, %c0_213] : memref<2x2x1x32xf32, #tpu.memory_space<vmem>>, vector<1x1x1x32xf32>
    %226 = vector.shape_cast %225 : vector<1x1x1x32xf32> to vector<1x32xf32>
    %c0_214 = arith.constant 0 : index
    %c0_215 = arith.constant 0 : index
    %c0_216 = arith.constant 0 : index
    %c0_217 = arith.constant 0 : index
    %227 = vector.load %arg18[%c0_214, %c0_215, %c0_216, %c0_217] : memref<2x2x1x32xf32, #tpu.memory_space<vmem>>, vector<1x1x1x32xf32>
    %228 = vector.shape_cast %227 : vector<1x1x1x32xf32> to vector<1x32xf32>
    %cst_218 = arith.constant dense<0.000000e+00> : vector<16xf32>
    %229 = vector.multi_reduction <add>, %224, %cst_218 [1] : vector<16x32xf32> to vector<16xf32>
    %230 = vector.shape_cast %229 : vector<16xf32> to vector<16x1xf32>
    %cst_219 = arith.constant 3.200000e+01 : f32
    %231 = vector.broadcast %cst_219 : f32 to vector<16x1xf32>
    %232 = arith.divf %230, %231 : vector<16x1xf32>
    %233 = arith.mulf %224, %224 : vector<16x32xf32>
    %cst_220 = arith.constant dense<0.000000e+00> : vector<16xf32>
    %234 = vector.multi_reduction <add>, %233, %cst_220 [1] : vector<16x32xf32> to vector<16xf32>
    %235 = vector.shape_cast %234 : vector<16xf32> to vector<16x1xf32>
    %cst_221 = arith.constant 3.200000e+01 : f32
    %236 = vector.broadcast %cst_221 : f32 to vector<16x1xf32>
    %237 = arith.divf %235, %236 : vector<16x1xf32>
    %238 = arith.mulf %232, %232 : vector<16x1xf32>
    %239 = arith.subf %237, %238 : vector<16x1xf32>
    %240 = vector.broadcast %232 : vector<16x1xf32> to vector<16x32xf32>
    %241 = arith.subf %224, %240 : vector<16x32xf32>
    %cst_222 = arith.constant 9.99999974E-6 : f32
    %242 = vector.broadcast %cst_222 : f32 to vector<16x1xf32>
    %243 = arith.addf %239, %242 : vector<16x1xf32>
    %244 = math.rsqrt %243 : vector<16x1xf32>
    %245 = vector.broadcast %244 : vector<16x1xf32> to vector<16x32xf32>
    %246 = arith.mulf %241, %245 : vector<16x32xf32>
    %247 = vector.broadcast %226 : vector<1x32xf32> to vector<16x32xf32>
    %248 = arith.mulf %246, %247 : vector<16x32xf32>
    %249 = vector.broadcast %228 : vector<1x32xf32> to vector<16x32xf32>
    %250 = arith.addf %248, %249 : vector<16x32xf32>
    %251 = arith.truncf %250 : vector<16x32xf32> to vector<16x32xbf16>
    %cst_223 = arith.constant 0.000000e+00 : f32
    %252 = vector.broadcast %cst_223 : f32 to vector<16x32xf32>
    %c0_224 = arith.constant 0 : index
    %c1_225 = arith.constant 1 : index
    %c0_226 = arith.constant 0 : index
    %c0_227 = arith.constant 0 : index
    %c0_228 = arith.constant 0 : index
    %253 = vector.load %arg3[%c0_224, %c1_225, %c0_226, %c0_227, %c0_228] : memref<2x2x4x32x8xbf16, #tpu.memory_space<vmem>>, vector<1x1x1x32x8xbf16>
    %254 = vector.shape_cast %253 : vector<1x1x1x32x8xbf16> to vector<32x8xbf16>
    %cst_229 = arith.constant dense<0.000000e+00> : vector<16x8xf32>
    %255 = tpu.matmul %251, %254, %cst_229 {dimension_numbers = #tpu.dot_dimension_numbers<[1], [0], [0], [1], [0, 0, 1, 1], [], []>} : vector<16x32xbf16>, vector<32x8xbf16>, vector<16x8xf32> -> vector<16x8xf32>
    %c0_230 = arith.constant 0 : index
    %c1_231 = arith.constant 1 : index
    %c0_232 = arith.constant 0 : index
    %c0_233 = arith.constant 0 : index
    %c0_234 = arith.constant 0 : index
    %256 = vector.load %arg6[%c0_230, %c1_231, %c0_232, %c0_233, %c0_234] : memref<2x2x4x1x8xf32, #tpu.memory_space<vmem>>, vector<1x1x1x1x8xf32>
    %257 = vector.shape_cast %256 : vector<1x1x1x1x8xf32> to vector<1x8xf32>
    %258 = vector.broadcast %257 : vector<1x8xf32> to vector<16x8xf32>
    %259 = arith.addf %255, %258 : vector<16x8xf32>
    %c0_235 = arith.constant 0 : index
    %c1_236 = arith.constant 1 : index
    %c0_237 = arith.constant 0 : index
    %c0_238 = arith.constant 0 : index
    %c0_239 = arith.constant 0 : index
    %260 = vector.load %arg4[%c0_235, %c1_236, %c0_237, %c0_238, %c0_239] : memref<2x2x4x32x8xbf16, #tpu.memory_space<vmem>>, vector<1x1x1x32x8xbf16>
    %261 = vector.shape_cast %260 : vector<1x1x1x32x8xbf16> to vector<32x8xbf16>
    %cst_240 = arith.constant dense<0.000000e+00> : vector<16x8xf32>
    %262 = tpu.matmul %251, %261, %cst_240 {dimension_numbers = #tpu.dot_dimension_numbers<[1], [0], [0], [1], [0, 0, 1, 1], [], []>} : vector<16x32xbf16>, vector<32x8xbf16>, vector<16x8xf32> -> vector<16x8xf32>
    %c0_241 = arith.constant 0 : index
    %c1_242 = arith.constant 1 : index
    %c0_243 = arith.constant 0 : index
    %c0_244 = arith.constant 0 : index
    %c0_245 = arith.constant 0 : index
    %263 = vector.load %arg7[%c0_241, %c1_242, %c0_243, %c0_244, %c0_245] : memref<2x2x4x1x8xf32, #tpu.memory_space<vmem>>, vector<1x1x1x1x8xf32>
    %264 = vector.shape_cast %263 : vector<1x1x1x1x8xf32> to vector<1x8xf32>
    %265 = vector.broadcast %264 : vector<1x8xf32> to vector<16x8xf32>
    %266 = arith.addf %262, %265 : vector<16x8xf32>
    %c0_246 = arith.constant 0 : index
    %c1_247 = arith.constant 1 : index
    %c0_248 = arith.constant 0 : index
    %c0_249 = arith.constant 0 : index
    %c0_250 = arith.constant 0 : index
    %267 = vector.load %arg5[%c0_246, %c1_247, %c0_248, %c0_249, %c0_250] : memref<2x2x4x32x8xbf16, #tpu.memory_space<vmem>>, vector<1x1x1x32x8xbf16>
    %268 = vector.shape_cast %267 : vector<1x1x1x32x8xbf16> to vector<32x8xbf16>
    %cst_251 = arith.constant dense<0.000000e+00> : vector<16x8xf32>
    %269 = tpu.matmul %251, %268, %cst_251 {dimension_numbers = #tpu.dot_dimension_numbers<[1], [0], [0], [1], [0, 0, 1, 1], [], []>} : vector<16x32xbf16>, vector<32x8xbf16>, vector<16x8xf32> -> vector<16x8xf32>
    %c0_252 = arith.constant 0 : index
    %c1_253 = arith.constant 1 : index
    %c0_254 = arith.constant 0 : index
    %c0_255 = arith.constant 0 : index
    %c0_256 = arith.constant 0 : index
    %270 = vector.load %arg8[%c0_252, %c1_253, %c0_254, %c0_255, %c0_256] : memref<2x2x4x1x8xf32, #tpu.memory_space<vmem>>, vector<1x1x1x1x8xf32>
    %271 = vector.shape_cast %270 : vector<1x1x1x1x8xf32> to vector<1x8xf32>
    %272 = vector.broadcast %271 : vector<1x8xf32> to vector<16x8xf32>
    %273 = arith.addf %269, %272 : vector<16x8xf32>
    %274 = arith.truncf %259 : vector<16x8xf32> to vector<16x8xbf16>
    %275 = arith.truncf %266 : vector<16x8xf32> to vector<16x8xbf16>
    %cst_257 = arith.constant dense<0.000000e+00> : vector<16x16xf32>
    %276 = tpu.matmul %274, %275, %cst_257 {dimension_numbers = #tpu.dot_dimension_numbers<[1], [1], [0], [0], [0, 0, 1, 0], [], []>} : vector<16x8xbf16>, vector<16x8xbf16>, vector<16x16xf32> -> vector<16x16xf32>
    %cst_258 = arith.constant dense<0xFF800000> : vector<16xf32>
    %277 = vector.multi_reduction <maximumf>, %276, %cst_258 [1] : vector<16x16xf32> to vector<16xf32>
    %278 = vector.shape_cast %277 : vector<16xf32> to vector<16x1xf32>
    %279 = vector.broadcast %278 : vector<16x1xf32> to vector<16x16xf32>
    %280 = arith.subf %276, %279 : vector<16x16xf32>
    %281 = math.exp %280 : vector<16x16xf32>
    %cst_259 = arith.constant dense<0.000000e+00> : vector<16xf32>
    %282 = vector.multi_reduction <add>, %281, %cst_259 [1] : vector<16x16xf32> to vector<16xf32>
    %283 = vector.shape_cast %282 : vector<16xf32> to vector<16x1xf32>
    %284 = tpu.reciprocal %283 {approx = true} : vector<16x1xf32> -> vector<16x1xf32>
    %285 = vector.broadcast %284 : vector<16x1xf32> to vector<16x16xf32>
    %286 = arith.mulf %281, %285 : vector<16x16xf32>
    %287 = arith.truncf %286 : vector<16x16xf32> to vector<16x16xbf16>
    %288 = arith.truncf %273 : vector<16x8xf32> to vector<16x8xbf16>
    %cst_260 = arith.constant dense<0.000000e+00> : vector<16x8xf32>
    %289 = tpu.matmul %287, %288, %cst_260 {dimension_numbers = #tpu.dot_dimension_numbers<[1], [0], [0], [1], [0, 0, 1, 1], [], []>} : vector<16x16xbf16>, vector<16x8xbf16>, vector<16x8xf32> -> vector<16x8xf32>
    %290 = arith.truncf %289 : vector<16x8xf32> to vector<16x8xbf16>
    %c0_261 = arith.constant 0 : index
    %c1_262 = arith.constant 1 : index
    %c0_263 = arith.constant 0 : index
    %c0_264 = arith.constant 0 : index
    %c0_265 = arith.constant 0 : index
    %291 = vector.load %arg9[%c0_261, %c1_262, %c0_263, %c0_264, %c0_265] : memref<2x2x4x8x32xbf16, #tpu.memory_space<vmem>>, vector<1x1x1x8x32xbf16>
    %292 = vector.shape_cast %291 : vector<1x1x1x8x32xbf16> to vector<8x32xbf16>
    %cst_266 = arith.constant dense<0.000000e+00> : vector<16x32xf32>
    %293 = tpu.matmul %290, %292, %cst_266 {dimension_numbers = #tpu.dot_dimension_numbers<[1], [0], [0], [1], [0, 0, 1, 1], [], []>} : vector<16x8xbf16>, vector<8x32xbf16>, vector<16x32xf32> -> vector<16x32xf32>
    %294 = arith.addf %252, %293 : vector<16x32xf32>
    %c0_267 = arith.constant 0 : index
    %c1_268 = arith.constant 1 : index
    %c1_269 = arith.constant 1 : index
    %c0_270 = arith.constant 0 : index
    %c0_271 = arith.constant 0 : index
    %295 = vector.load %arg3[%c0_267, %c1_268, %c1_269, %c0_270, %c0_271] : memref<2x2x4x32x8xbf16, #tpu.memory_space<vmem>>, vector<1x1x1x32x8xbf16>
    %296 = vector.shape_cast %295 : vector<1x1x1x32x8xbf16> to vector<32x8xbf16>
    %cst_272 = arith.constant dense<0.000000e+00> : vector<16x8xf32>
    %297 = tpu.matmul %251, %296, %cst_272 {dimension_numbers = #tpu.dot_dimension_numbers<[1], [0], [0], [1], [0, 0, 1, 1], [], []>} : vector<16x32xbf16>, vector<32x8xbf16>, vector<16x8xf32> -> vector<16x8xf32>
    %c0_273 = arith.constant 0 : index
    %c1_274 = arith.constant 1 : index
    %c1_275 = arith.constant 1 : index
    %c0_276 = arith.constant 0 : index
    %c0_277 = arith.constant 0 : index
    %298 = vector.load %arg6[%c0_273, %c1_274, %c1_275, %c0_276, %c0_277] : memref<2x2x4x1x8xf32, #tpu.memory_space<vmem>>, vector<1x1x1x1x8xf32>
    %299 = vector.shape_cast %298 : vector<1x1x1x1x8xf32> to vector<1x8xf32>
    %300 = vector.broadcast %299 : vector<1x8xf32> to vector<16x8xf32>
    %301 = arith.addf %297, %300 : vector<16x8xf32>
    %c0_278 = arith.constant 0 : index
    %c1_279 = arith.constant 1 : index
    %c1_280 = arith.constant 1 : index
    %c0_281 = arith.constant 0 : index
    %c0_282 = arith.constant 0 : index
    %302 = vector.load %arg4[%c0_278, %c1_279, %c1_280, %c0_281, %c0_282] : memref<2x2x4x32x8xbf16, #tpu.memory_space<vmem>>, vector<1x1x1x32x8xbf16>
    %303 = vector.shape_cast %302 : vector<1x1x1x32x8xbf16> to vector<32x8xbf16>
    %cst_283 = arith.constant dense<0.000000e+00> : vector<16x8xf32>
    %304 = tpu.matmul %251, %303, %cst_283 {dimension_numbers = #tpu.dot_dimension_numbers<[1], [0], [0], [1], [0, 0, 1, 1], [], []>} : vector<16x32xbf16>, vector<32x8xbf16>, vector<16x8xf32> -> vector<16x8xf32>
    %c0_284 = arith.constant 0 : index
    %c1_285 = arith.constant 1 : index
    %c1_286 = arith.constant 1 : index
    %c0_287 = arith.constant 0 : index
    %c0_288 = arith.constant 0 : index
    %305 = vector.load %arg7[%c0_284, %c1_285, %c1_286, %c0_287, %c0_288] : memref<2x2x4x1x8xf32, #tpu.memory_space<vmem>>, vector<1x1x1x1x8xf32>
    %306 = vector.shape_cast %305 : vector<1x1x1x1x8xf32> to vector<1x8xf32>
    %307 = vector.broadcast %306 : vector<1x8xf32> to vector<16x8xf32>
    %308 = arith.addf %304, %307 : vector<16x8xf32>
    %c0_289 = arith.constant 0 : index
    %c1_290 = arith.constant 1 : index
    %c1_291 = arith.constant 1 : index
    %c0_292 = arith.constant 0 : index
    %c0_293 = arith.constant 0 : index
    %309 = vector.load %arg5[%c0_289, %c1_290, %c1_291, %c0_292, %c0_293] : memref<2x2x4x32x8xbf16, #tpu.memory_space<vmem>>, vector<1x1x1x32x8xbf16>
    %310 = vector.shape_cast %309 : vector<1x1x1x32x8xbf16> to vector<32x8xbf16>
    %cst_294 = arith.constant dense<0.000000e+00> : vector<16x8xf32>
    %311 = tpu.matmul %251, %310, %cst_294 {dimension_numbers = #tpu.dot_dimension_numbers<[1], [0], [0], [1], [0, 0, 1, 1], [], []>} : vector<16x32xbf16>, vector<32x8xbf16>, vector<16x8xf32> -> vector<16x8xf32>
    %c0_295 = arith.constant 0 : index
    %c1_296 = arith.constant 1 : index
    %c1_297 = arith.constant 1 : index
    %c0_298 = arith.constant 0 : index
    %c0_299 = arith.constant 0 : index
    %312 = vector.load %arg8[%c0_295, %c1_296, %c1_297, %c0_298, %c0_299] : memref<2x2x4x1x8xf32, #tpu.memory_space<vmem>>, vector<1x1x1x1x8xf32>
    %313 = vector.shape_cast %312 : vector<1x1x1x1x8xf32> to vector<1x8xf32>
    %314 = vector.broadcast %313 : vector<1x8xf32> to vector<16x8xf32>
    %315 = arith.addf %311, %314 : vector<16x8xf32>
    %316 = arith.truncf %301 : vector<16x8xf32> to vector<16x8xbf16>
    %317 = arith.truncf %308 : vector<16x8xf32> to vector<16x8xbf16>
    %cst_300 = arith.constant dense<0.000000e+00> : vector<16x16xf32>
    %318 = tpu.matmul %316, %317, %cst_300 {dimension_numbers = #tpu.dot_dimension_numbers<[1], [1], [0], [0], [0, 0, 1, 0], [], []>} : vector<16x8xbf16>, vector<16x8xbf16>, vector<16x16xf32> -> vector<16x16xf32>
    %cst_301 = arith.constant dense<0xFF800000> : vector<16xf32>
    %319 = vector.multi_reduction <maximumf>, %318, %cst_301 [1] : vector<16x16xf32> to vector<16xf32>
    %320 = vector.shape_cast %319 : vector<16xf32> to vector<16x1xf32>
    %321 = vector.broadcast %320 : vector<16x1xf32> to vector<16x16xf32>
    %322 = arith.subf %318, %321 : vector<16x16xf32>
    %323 = math.exp %322 : vector<16x16xf32>
    %cst_302 = arith.constant dense<0.000000e+00> : vector<16xf32>
    %324 = vector.multi_reduction <add>, %323, %cst_302 [1] : vector<16x16xf32> to vector<16xf32>
    %325 = vector.shape_cast %324 : vector<16xf32> to vector<16x1xf32>
    %326 = tpu.reciprocal %325 {approx = true} : vector<16x1xf32> -> vector<16x1xf32>
    %327 = vector.broadcast %326 : vector<16x1xf32> to vector<16x16xf32>
    %328 = arith.mulf %323, %327 : vector<16x16xf32>
    %329 = arith.truncf %328 : vector<16x16xf32> to vector<16x16xbf16>
    %330 = arith.truncf %315 : vector<16x8xf32> to vector<16x8xbf16>
    %cst_303 = arith.constant dense<0.000000e+00> : vector<16x8xf32>
    %331 = tpu.matmul %329, %330, %cst_303 {dimension_numbers = #tpu.dot_dimension_numbers<[1], [0], [0], [1], [0, 0, 1, 1], [], []>} : vector<16x16xbf16>, vector<16x8xbf16>, vector<16x8xf32> -> vector<16x8xf32>
    %332 = arith.truncf %331 : vector<16x8xf32> to vector<16x8xbf16>
    %c0_304 = arith.constant 0 : index
    %c1_305 = arith.constant 1 : index
    %c1_306 = arith.constant 1 : index
    %c0_307 = arith.constant 0 : index
    %c0_308 = arith.constant 0 : index
    %333 = vector.load %arg9[%c0_304, %c1_305, %c1_306, %c0_307, %c0_308] : memref<2x2x4x8x32xbf16, #tpu.memory_space<vmem>>, vector<1x1x1x8x32xbf16>
    %334 = vector.shape_cast %333 : vector<1x1x1x8x32xbf16> to vector<8x32xbf16>
    %cst_309 = arith.constant dense<0.000000e+00> : vector<16x32xf32>
    %335 = tpu.matmul %332, %334, %cst_309 {dimension_numbers = #tpu.dot_dimension_numbers<[1], [0], [0], [1], [0, 0, 1, 1], [], []>} : vector<16x8xbf16>, vector<8x32xbf16>, vector<16x32xf32> -> vector<16x32xf32>
    %336 = arith.addf %294, %335 : vector<16x32xf32>
    %c0_310 = arith.constant 0 : index
    %c1_311 = arith.constant 1 : index
    %c2_312 = arith.constant 2 : index
    %c0_313 = arith.constant 0 : index
    %c0_314 = arith.constant 0 : index
    %337 = vector.load %arg3[%c0_310, %c1_311, %c2_312, %c0_313, %c0_314] : memref<2x2x4x32x8xbf16, #tpu.memory_space<vmem>>, vector<1x1x1x32x8xbf16>
    %338 = vector.shape_cast %337 : vector<1x1x1x32x8xbf16> to vector<32x8xbf16>
    %cst_315 = arith.constant dense<0.000000e+00> : vector<16x8xf32>
    %339 = tpu.matmul %251, %338, %cst_315 {dimension_numbers = #tpu.dot_dimension_numbers<[1], [0], [0], [1], [0, 0, 1, 1], [], []>} : vector<16x32xbf16>, vector<32x8xbf16>, vector<16x8xf32> -> vector<16x8xf32>
    %c0_316 = arith.constant 0 : index
    %c1_317 = arith.constant 1 : index
    %c2_318 = arith.constant 2 : index
    %c0_319 = arith.constant 0 : index
    %c0_320 = arith.constant 0 : index
    %340 = vector.load %arg6[%c0_316, %c1_317, %c2_318, %c0_319, %c0_320] : memref<2x2x4x1x8xf32, #tpu.memory_space<vmem>>, vector<1x1x1x1x8xf32>
    %341 = vector.shape_cast %340 : vector<1x1x1x1x8xf32> to vector<1x8xf32>
    %342 = vector.broadcast %341 : vector<1x8xf32> to vector<16x8xf32>
    %343 = arith.addf %339, %342 : vector<16x8xf32>
    %c0_321 = arith.constant 0 : index
    %c1_322 = arith.constant 1 : index
    %c2_323 = arith.constant 2 : index
    %c0_324 = arith.constant 0 : index
    %c0_325 = arith.constant 0 : index
    %344 = vector.load %arg4[%c0_321, %c1_322, %c2_323, %c0_324, %c0_325] : memref<2x2x4x32x8xbf16, #tpu.memory_space<vmem>>, vector<1x1x1x32x8xbf16>
    %345 = vector.shape_cast %344 : vector<1x1x1x32x8xbf16> to vector<32x8xbf16>
    %cst_326 = arith.constant dense<0.000000e+00> : vector<16x8xf32>
    %346 = tpu.matmul %251, %345, %cst_326 {dimension_numbers = #tpu.dot_dimension_numbers<[1], [0], [0], [1], [0, 0, 1, 1], [], []>} : vector<16x32xbf16>, vector<32x8xbf16>, vector<16x8xf32> -> vector<16x8xf32>
    %c0_327 = arith.constant 0 : index
    %c1_328 = arith.constant 1 : index
    %c2_329 = arith.constant 2 : index
    %c0_330 = arith.constant 0 : index
    %c0_331 = arith.constant 0 : index
    %347 = vector.load %arg7[%c0_327, %c1_328, %c2_329, %c0_330, %c0_331] : memref<2x2x4x1x8xf32, #tpu.memory_space<vmem>>, vector<1x1x1x1x8xf32>
    %348 = vector.shape_cast %347 : vector<1x1x1x1x8xf32> to vector<1x8xf32>
    %349 = vector.broadcast %348 : vector<1x8xf32> to vector<16x8xf32>
    %350 = arith.addf %346, %349 : vector<16x8xf32>
    %c0_332 = arith.constant 0 : index
    %c1_333 = arith.constant 1 : index
    %c2_334 = arith.constant 2 : index
    %c0_335 = arith.constant 0 : index
    %c0_336 = arith.constant 0 : index
    %351 = vector.load %arg5[%c0_332, %c1_333, %c2_334, %c0_335, %c0_336] : memref<2x2x4x32x8xbf16, #tpu.memory_space<vmem>>, vector<1x1x1x32x8xbf16>
    %352 = vector.shape_cast %351 : vector<1x1x1x32x8xbf16> to vector<32x8xbf16>
    %cst_337 = arith.constant dense<0.000000e+00> : vector<16x8xf32>
    %353 = tpu.matmul %251, %352, %cst_337 {dimension_numbers = #tpu.dot_dimension_numbers<[1], [0], [0], [1], [0, 0, 1, 1], [], []>} : vector<16x32xbf16>, vector<32x8xbf16>, vector<16x8xf32> -> vector<16x8xf32>
    %c0_338 = arith.constant 0 : index
    %c1_339 = arith.constant 1 : index
    %c2_340 = arith.constant 2 : index
    %c0_341 = arith.constant 0 : index
    %c0_342 = arith.constant 0 : index
    %354 = vector.load %arg8[%c0_338, %c1_339, %c2_340, %c0_341, %c0_342] : memref<2x2x4x1x8xf32, #tpu.memory_space<vmem>>, vector<1x1x1x1x8xf32>
    %355 = vector.shape_cast %354 : vector<1x1x1x1x8xf32> to vector<1x8xf32>
    %356 = vector.broadcast %355 : vector<1x8xf32> to vector<16x8xf32>
    %357 = arith.addf %353, %356 : vector<16x8xf32>
    %358 = arith.truncf %343 : vector<16x8xf32> to vector<16x8xbf16>
    %359 = arith.truncf %350 : vector<16x8xf32> to vector<16x8xbf16>
    %cst_343 = arith.constant dense<0.000000e+00> : vector<16x16xf32>
    %360 = tpu.matmul %358, %359, %cst_343 {dimension_numbers = #tpu.dot_dimension_numbers<[1], [1], [0], [0], [0, 0, 1, 0], [], []>} : vector<16x8xbf16>, vector<16x8xbf16>, vector<16x16xf32> -> vector<16x16xf32>
    %cst_344 = arith.constant dense<0xFF800000> : vector<16xf32>
    %361 = vector.multi_reduction <maximumf>, %360, %cst_344 [1] : vector<16x16xf32> to vector<16xf32>
    %362 = vector.shape_cast %361 : vector<16xf32> to vector<16x1xf32>
    %363 = vector.broadcast %362 : vector<16x1xf32> to vector<16x16xf32>
    %364 = arith.subf %360, %363 : vector<16x16xf32>
    %365 = math.exp %364 : vector<16x16xf32>
    %cst_345 = arith.constant dense<0.000000e+00> : vector<16xf32>
    %366 = vector.multi_reduction <add>, %365, %cst_345 [1] : vector<16x16xf32> to vector<16xf32>
    %367 = vector.shape_cast %366 : vector<16xf32> to vector<16x1xf32>
    %368 = tpu.reciprocal %367 {approx = true} : vector<16x1xf32> -> vector<16x1xf32>
    %369 = vector.broadcast %368 : vector<16x1xf32> to vector<16x16xf32>
    %370 = arith.mulf %365, %369 : vector<16x16xf32>
    %371 = arith.truncf %370 : vector<16x16xf32> to vector<16x16xbf16>
    %372 = arith.truncf %357 : vector<16x8xf32> to vector<16x8xbf16>
    %cst_346 = arith.constant dense<0.000000e+00> : vector<16x8xf32>
    %373 = tpu.matmul %371, %372, %cst_346 {dimension_numbers = #tpu.dot_dimension_numbers<[1], [0], [0], [1], [0, 0, 1, 1], [], []>} : vector<16x16xbf16>, vector<16x8xbf16>, vector<16x8xf32> -> vector<16x8xf32>
    %374 = arith.truncf %373 : vector<16x8xf32> to vector<16x8xbf16>
    %c0_347 = arith.constant 0 : index
    %c1_348 = arith.constant 1 : index
    %c2_349 = arith.constant 2 : index
    %c0_350 = arith.constant 0 : index
    %c0_351 = arith.constant 0 : index
    %375 = vector.load %arg9[%c0_347, %c1_348, %c2_349, %c0_350, %c0_351] : memref<2x2x4x8x32xbf16, #tpu.memory_space<vmem>>, vector<1x1x1x8x32xbf16>
    %376 = vector.shape_cast %375 : vector<1x1x1x8x32xbf16> to vector<8x32xbf16>
    %cst_352 = arith.constant dense<0.000000e+00> : vector<16x32xf32>
    %377 = tpu.matmul %374, %376, %cst_352 {dimension_numbers = #tpu.dot_dimension_numbers<[1], [0], [0], [1], [0, 0, 1, 1], [], []>} : vector<16x8xbf16>, vector<8x32xbf16>, vector<16x32xf32> -> vector<16x32xf32>
    %378 = arith.addf %336, %377 : vector<16x32xf32>
    %c0_353 = arith.constant 0 : index
    %c1_354 = arith.constant 1 : index
    %c3_355 = arith.constant 3 : index
    %c0_356 = arith.constant 0 : index
    %c0_357 = arith.constant 0 : index
    %379 = vector.load %arg3[%c0_353, %c1_354, %c3_355, %c0_356, %c0_357] : memref<2x2x4x32x8xbf16, #tpu.memory_space<vmem>>, vector<1x1x1x32x8xbf16>
    %380 = vector.shape_cast %379 : vector<1x1x1x32x8xbf16> to vector<32x8xbf16>
    %cst_358 = arith.constant dense<0.000000e+00> : vector<16x8xf32>
    %381 = tpu.matmul %251, %380, %cst_358 {dimension_numbers = #tpu.dot_dimension_numbers<[1], [0], [0], [1], [0, 0, 1, 1], [], []>} : vector<16x32xbf16>, vector<32x8xbf16>, vector<16x8xf32> -> vector<16x8xf32>
    %c0_359 = arith.constant 0 : index
    %c1_360 = arith.constant 1 : index
    %c3_361 = arith.constant 3 : index
    %c0_362 = arith.constant 0 : index
    %c0_363 = arith.constant 0 : index
    %382 = vector.load %arg6[%c0_359, %c1_360, %c3_361, %c0_362, %c0_363] : memref<2x2x4x1x8xf32, #tpu.memory_space<vmem>>, vector<1x1x1x1x8xf32>
    %383 = vector.shape_cast %382 : vector<1x1x1x1x8xf32> to vector<1x8xf32>
    %384 = vector.broadcast %383 : vector<1x8xf32> to vector<16x8xf32>
    %385 = arith.addf %381, %384 : vector<16x8xf32>
    %c0_364 = arith.constant 0 : index
    %c1_365 = arith.constant 1 : index
    %c3_366 = arith.constant 3 : index
    %c0_367 = arith.constant 0 : index
    %c0_368 = arith.constant 0 : index
    %386 = vector.load %arg4[%c0_364, %c1_365, %c3_366, %c0_367, %c0_368] : memref<2x2x4x32x8xbf16, #tpu.memory_space<vmem>>, vector<1x1x1x32x8xbf16>
    %387 = vector.shape_cast %386 : vector<1x1x1x32x8xbf16> to vector<32x8xbf16>
    %cst_369 = arith.constant dense<0.000000e+00> : vector<16x8xf32>
    %388 = tpu.matmul %251, %387, %cst_369 {dimension_numbers = #tpu.dot_dimension_numbers<[1], [0], [0], [1], [0, 0, 1, 1], [], []>} : vector<16x32xbf16>, vector<32x8xbf16>, vector<16x8xf32> -> vector<16x8xf32>
    %c0_370 = arith.constant 0 : index
    %c1_371 = arith.constant 1 : index
    %c3_372 = arith.constant 3 : index
    %c0_373 = arith.constant 0 : index
    %c0_374 = arith.constant 0 : index
    %389 = vector.load %arg7[%c0_370, %c1_371, %c3_372, %c0_373, %c0_374] : memref<2x2x4x1x8xf32, #tpu.memory_space<vmem>>, vector<1x1x1x1x8xf32>
    %390 = vector.shape_cast %389 : vector<1x1x1x1x8xf32> to vector<1x8xf32>
    %391 = vector.broadcast %390 : vector<1x8xf32> to vector<16x8xf32>
    %392 = arith.addf %388, %391 : vector<16x8xf32>
    %c0_375 = arith.constant 0 : index
    %c1_376 = arith.constant 1 : index
    %c3_377 = arith.constant 3 : index
    %c0_378 = arith.constant 0 : index
    %c0_379 = arith.constant 0 : index
    %393 = vector.load %arg5[%c0_375, %c1_376, %c3_377, %c0_378, %c0_379] : memref<2x2x4x32x8xbf16, #tpu.memory_space<vmem>>, vector<1x1x1x32x8xbf16>
    %394 = vector.shape_cast %393 : vector<1x1x1x32x8xbf16> to vector<32x8xbf16>
    %cst_380 = arith.constant dense<0.000000e+00> : vector<16x8xf32>
    %395 = tpu.matmul %251, %394, %cst_380 {dimension_numbers = #tpu.dot_dimension_numbers<[1], [0], [0], [1], [0, 0, 1, 1], [], []>} : vector<16x32xbf16>, vector<32x8xbf16>, vector<16x8xf32> -> vector<16x8xf32>
    %c0_381 = arith.constant 0 : index
    %c1_382 = arith.constant 1 : index
    %c3_383 = arith.constant 3 : index
    %c0_384 = arith.constant 0 : index
    %c0_385 = arith.constant 0 : index
    %396 = vector.load %arg8[%c0_381, %c1_382, %c3_383, %c0_384, %c0_385] : memref<2x2x4x1x8xf32, #tpu.memory_space<vmem>>, vector<1x1x1x1x8xf32>
    %397 = vector.shape_cast %396 : vector<1x1x1x1x8xf32> to vector<1x8xf32>
    %398 = vector.broadcast %397 : vector<1x8xf32> to vector<16x8xf32>
    %399 = arith.addf %395, %398 : vector<16x8xf32>
    %400 = arith.truncf %385 : vector<16x8xf32> to vector<16x8xbf16>
    %401 = arith.truncf %392 : vector<16x8xf32> to vector<16x8xbf16>
    %cst_386 = arith.constant dense<0.000000e+00> : vector<16x16xf32>
    %402 = tpu.matmul %400, %401, %cst_386 {dimension_numbers = #tpu.dot_dimension_numbers<[1], [1], [0], [0], [0, 0, 1, 0], [], []>} : vector<16x8xbf16>, vector<16x8xbf16>, vector<16x16xf32> -> vector<16x16xf32>
    %cst_387 = arith.constant dense<0xFF800000> : vector<16xf32>
    %403 = vector.multi_reduction <maximumf>, %402, %cst_387 [1] : vector<16x16xf32> to vector<16xf32>
    %404 = vector.shape_cast %403 : vector<16xf32> to vector<16x1xf32>
    %405 = vector.broadcast %404 : vector<16x1xf32> to vector<16x16xf32>
    %406 = arith.subf %402, %405 : vector<16x16xf32>
    %407 = math.exp %406 : vector<16x16xf32>
    %cst_388 = arith.constant dense<0.000000e+00> : vector<16xf32>
    %408 = vector.multi_reduction <add>, %407, %cst_388 [1] : vector<16x16xf32> to vector<16xf32>
    %409 = vector.shape_cast %408 : vector<16xf32> to vector<16x1xf32>
    %410 = tpu.reciprocal %409 {approx = true} : vector<16x1xf32> -> vector<16x1xf32>
    %411 = vector.broadcast %410 : vector<16x1xf32> to vector<16x16xf32>
    %412 = arith.mulf %407, %411 : vector<16x16xf32>
    %413 = arith.truncf %412 : vector<16x16xf32> to vector<16x16xbf16>
    %414 = arith.truncf %399 : vector<16x8xf32> to vector<16x8xbf16>
    %cst_389 = arith.constant dense<0.000000e+00> : vector<16x8xf32>
    %415 = tpu.matmul %413, %414, %cst_389 {dimension_numbers = #tpu.dot_dimension_numbers<[1], [0], [0], [1], [0, 0, 1, 1], [], []>} : vector<16x16xbf16>, vector<16x8xbf16>, vector<16x8xf32> -> vector<16x8xf32>
    %416 = arith.truncf %415 : vector<16x8xf32> to vector<16x8xbf16>
    %c0_390 = arith.constant 0 : index
    %c1_391 = arith.constant 1 : index
    %c3_392 = arith.constant 3 : index
    %c0_393 = arith.constant 0 : index
    %c0_394 = arith.constant 0 : index
    %417 = vector.load %arg9[%c0_390, %c1_391, %c3_392, %c0_393, %c0_394] : memref<2x2x4x8x32xbf16, #tpu.memory_space<vmem>>, vector<1x1x1x8x32xbf16>
    %418 = vector.shape_cast %417 : vector<1x1x1x8x32xbf16> to vector<8x32xbf16>
    %cst_395 = arith.constant dense<0.000000e+00> : vector<16x32xf32>
    %419 = tpu.matmul %416, %418, %cst_395 {dimension_numbers = #tpu.dot_dimension_numbers<[1], [0], [0], [1], [0, 0, 1, 1], [], []>} : vector<16x8xbf16>, vector<8x32xbf16>, vector<16x32xf32> -> vector<16x32xf32>
    %420 = arith.addf %378, %419 : vector<16x32xf32>
    %c0_396 = arith.constant 0 : index
    %c1_397 = arith.constant 1 : index
    %c0_398 = arith.constant 0 : index
    %c0_399 = arith.constant 0 : index
    %421 = vector.load %arg10[%c0_396, %c1_397, %c0_398, %c0_399] : memref<2x2x1x32xf32, #tpu.memory_space<vmem>>, vector<1x1x1x32xf32>
    %422 = vector.shape_cast %421 : vector<1x1x1x32xf32> to vector<1x32xf32>
    %423 = vector.broadcast %422 : vector<1x32xf32> to vector<16x32xf32>
    %424 = arith.addf %420, %423 : vector<16x32xf32>
    %425 = arith.addf %250, %424 : vector<16x32xf32>
    %c0_400 = arith.constant 0 : index
    %c1_401 = arith.constant 1 : index
    %c0_402 = arith.constant 0 : index
    %c0_403 = arith.constant 0 : index
    %426 = vector.load %arg11[%c0_400, %c1_401, %c0_402, %c0_403] : memref<2x2x1x32xf32, #tpu.memory_space<vmem>>, vector<1x1x1x32xf32>
    %427 = vector.shape_cast %426 : vector<1x1x1x32xf32> to vector<1x32xf32>
    %c0_404 = arith.constant 0 : index
    %c1_405 = arith.constant 1 : index
    %c0_406 = arith.constant 0 : index
    %c0_407 = arith.constant 0 : index
    %428 = vector.load %arg12[%c0_404, %c1_405, %c0_406, %c0_407] : memref<2x2x1x32xf32, #tpu.memory_space<vmem>>, vector<1x1x1x32xf32>
    %429 = vector.shape_cast %428 : vector<1x1x1x32xf32> to vector<1x32xf32>
    %cst_408 = arith.constant dense<0.000000e+00> : vector<16xf32>
    %430 = vector.multi_reduction <add>, %425, %cst_408 [1] : vector<16x32xf32> to vector<16xf32>
    %431 = vector.shape_cast %430 : vector<16xf32> to vector<16x1xf32>
    %cst_409 = arith.constant 3.200000e+01 : f32
    %432 = vector.broadcast %cst_409 : f32 to vector<16x1xf32>
    %433 = arith.divf %431, %432 : vector<16x1xf32>
    %434 = arith.mulf %425, %425 : vector<16x32xf32>
    %cst_410 = arith.constant dense<0.000000e+00> : vector<16xf32>
    %435 = vector.multi_reduction <add>, %434, %cst_410 [1] : vector<16x32xf32> to vector<16xf32>
    %436 = vector.shape_cast %435 : vector<16xf32> to vector<16x1xf32>
    %cst_411 = arith.constant 3.200000e+01 : f32
    %437 = vector.broadcast %cst_411 : f32 to vector<16x1xf32>
    %438 = arith.divf %436, %437 : vector<16x1xf32>
    %439 = arith.mulf %433, %433 : vector<16x1xf32>
    %440 = arith.subf %438, %439 : vector<16x1xf32>
    %441 = vector.broadcast %433 : vector<16x1xf32> to vector<16x32xf32>
    %442 = arith.subf %425, %441 : vector<16x32xf32>
    %cst_412 = arith.constant 9.99999974E-6 : f32
    %443 = vector.broadcast %cst_412 : f32 to vector<16x1xf32>
    %444 = arith.addf %440, %443 : vector<16x1xf32>
    %445 = math.rsqrt %444 : vector<16x1xf32>
    %446 = vector.broadcast %445 : vector<16x1xf32> to vector<16x32xf32>
    %447 = arith.mulf %442, %446 : vector<16x32xf32>
    %448 = vector.broadcast %427 : vector<1x32xf32> to vector<16x32xf32>
    %449 = arith.mulf %447, %448 : vector<16x32xf32>
    %450 = vector.broadcast %429 : vector<1x32xf32> to vector<16x32xf32>
    %451 = arith.addf %449, %450 : vector<16x32xf32>
    %452 = arith.truncf %451 : vector<16x32xf32> to vector<16x32xbf16>
    %c0_413 = arith.constant 0 : index
    %c1_414 = arith.constant 1 : index
    %c0_415 = arith.constant 0 : index
    %c0_416 = arith.constant 0 : index
    %453 = vector.load %arg13[%c0_413, %c1_414, %c0_415, %c0_416] : memref<2x2x32x64xbf16, #tpu.memory_space<vmem>>, vector<1x1x32x64xbf16>
    %454 = vector.shape_cast %453 : vector<1x1x32x64xbf16> to vector<32x64xbf16>
    %cst_417 = arith.constant dense<0.000000e+00> : vector<16x64xf32>
    %455 = tpu.matmul %452, %454, %cst_417 {dimension_numbers = #tpu.dot_dimension_numbers<[1], [0], [0], [1], [0, 0, 1, 1], [], []>} : vector<16x32xbf16>, vector<32x64xbf16>, vector<16x64xf32> -> vector<16x64xf32>
    %c0_418 = arith.constant 0 : index
    %c1_419 = arith.constant 1 : index
    %c0_420 = arith.constant 0 : index
    %c0_421 = arith.constant 0 : index
    %456 = vector.load %arg14[%c0_418, %c1_419, %c0_420, %c0_421] : memref<2x2x1x64xf32, #tpu.memory_space<vmem>>, vector<1x1x1x64xf32>
    %457 = vector.shape_cast %456 : vector<1x1x1x64xf32> to vector<1x64xf32>
    %458 = vector.broadcast %457 : vector<1x64xf32> to vector<16x64xf32>
    %459 = arith.addf %455, %458 : vector<16x64xf32>
    %cst_422 = arith.constant 0.000000e+00 : f32
    %460 = vector.broadcast %cst_422 : f32 to vector<16x64xf32>
    %461 = arith.maximumf %459, %460 : vector<16x64xf32>
    %462 = arith.truncf %461 : vector<16x64xf32> to vector<16x64xbf16>
    %c0_423 = arith.constant 0 : index
    %c1_424 = arith.constant 1 : index
    %c0_425 = arith.constant 0 : index
    %c0_426 = arith.constant 0 : index
    %463 = vector.load %arg15[%c0_423, %c1_424, %c0_425, %c0_426] : memref<2x2x64x32xbf16, #tpu.memory_space<vmem>>, vector<1x1x64x32xbf16>
    %464 = vector.shape_cast %463 : vector<1x1x64x32xbf16> to vector<64x32xbf16>
    %cst_427 = arith.constant dense<0.000000e+00> : vector<16x32xf32>
    %465 = tpu.matmul %462, %464, %cst_427 {dimension_numbers = #tpu.dot_dimension_numbers<[1], [0], [0], [1], [0, 0, 1, 1], [], []>} : vector<16x64xbf16>, vector<64x32xbf16>, vector<16x32xf32> -> vector<16x32xf32>
    %c0_428 = arith.constant 0 : index
    %c1_429 = arith.constant 1 : index
    %c0_430 = arith.constant 0 : index
    %c0_431 = arith.constant 0 : index
    %466 = vector.load %arg16[%c0_428, %c1_429, %c0_430, %c0_431] : memref<2x2x1x32xf32, #tpu.memory_space<vmem>>, vector<1x1x1x32xf32>
    %467 = vector.shape_cast %466 : vector<1x1x1x32xf32> to vector<1x32xf32>
    %468 = vector.broadcast %467 : vector<1x32xf32> to vector<16x32xf32>
    %469 = arith.addf %465, %468 : vector<16x32xf32>
    %470 = arith.addf %451, %469 : vector<16x32xf32>
    %c0_432 = arith.constant 0 : index
    %c1_433 = arith.constant 1 : index
    %c0_434 = arith.constant 0 : index
    %c0_435 = arith.constant 0 : index
    %471 = vector.load %arg17[%c0_432, %c1_433, %c0_434, %c0_435] : memref<2x2x1x32xf32, #tpu.memory_space<vmem>>, vector<1x1x1x32xf32>
    %472 = vector.shape_cast %471 : vector<1x1x1x32xf32> to vector<1x32xf32>
    %c0_436 = arith.constant 0 : index
    %c1_437 = arith.constant 1 : index
    %c0_438 = arith.constant 0 : index
    %c0_439 = arith.constant 0 : index
    %473 = vector.load %arg18[%c0_436, %c1_437, %c0_438, %c0_439] : memref<2x2x1x32xf32, #tpu.memory_space<vmem>>, vector<1x1x1x32xf32>
    %474 = vector.shape_cast %473 : vector<1x1x1x32xf32> to vector<1x32xf32>
    %cst_440 = arith.constant dense<0.000000e+00> : vector<16xf32>
    %475 = vector.multi_reduction <add>, %470, %cst_440 [1] : vector<16x32xf32> to vector<16xf32>
    %476 = vector.shape_cast %475 : vector<16xf32> to vector<16x1xf32>
    %cst_441 = arith.constant 3.200000e+01 : f32
    %477 = vector.broadcast %cst_441 : f32 to vector<16x1xf32>
    %478 = arith.divf %476, %477 : vector<16x1xf32>
    %479 = arith.mulf %470, %470 : vector<16x32xf32>
    %cst_442 = arith.constant dense<0.000000e+00> : vector<16xf32>
    %480 = vector.multi_reduction <add>, %479, %cst_442 [1] : vector<16x32xf32> to vector<16xf32>
    %481 = vector.shape_cast %480 : vector<16xf32> to vector<16x1xf32>
    %cst_443 = arith.constant 3.200000e+01 : f32
    %482 = vector.broadcast %cst_443 : f32 to vector<16x1xf32>
    %483 = arith.divf %481, %482 : vector<16x1xf32>
    %484 = arith.mulf %478, %478 : vector<16x1xf32>
    %485 = arith.subf %483, %484 : vector<16x1xf32>
    %486 = vector.broadcast %478 : vector<16x1xf32> to vector<16x32xf32>
    %487 = arith.subf %470, %486 : vector<16x32xf32>
    %cst_444 = arith.constant 9.99999974E-6 : f32
    %488 = vector.broadcast %cst_444 : f32 to vector<16x1xf32>
    %489 = arith.addf %485, %488 : vector<16x1xf32>
    %490 = math.rsqrt %489 : vector<16x1xf32>
    %491 = vector.broadcast %490 : vector<16x1xf32> to vector<16x32xf32>
    %492 = arith.mulf %487, %491 : vector<16x32xf32>
    %493 = vector.broadcast %472 : vector<1x32xf32> to vector<16x32xf32>
    %494 = arith.mulf %492, %493 : vector<16x32xf32>
    %495 = vector.broadcast %474 : vector<1x32xf32> to vector<16x32xf32>
    %496 = arith.addf %494, %495 : vector<16x32xf32>
    %497 = arith.truncf %4 : vector<16x32xf32> to vector<16x32xbf16>
    %cst_445 = arith.constant 0.000000e+00 : f32
    %498 = vector.broadcast %cst_445 : f32 to vector<16x32xf32>
    %c1_446 = arith.constant 1 : index
    %c0_447 = arith.constant 0 : index
    %c0_448 = arith.constant 0 : index
    %c0_449 = arith.constant 0 : index
    %c0_450 = arith.constant 0 : index
    %499 = vector.load %arg3[%c1_446, %c0_447, %c0_448, %c0_449, %c0_450] : memref<2x2x4x32x8xbf16, #tpu.memory_space<vmem>>, vector<1x1x1x32x8xbf16>
    %500 = vector.shape_cast %499 : vector<1x1x1x32x8xbf16> to vector<32x8xbf16>
    %cst_451 = arith.constant dense<0.000000e+00> : vector<16x8xf32>
    %501 = tpu.matmul %497, %500, %cst_451 {dimension_numbers = #tpu.dot_dimension_numbers<[1], [0], [0], [1], [0, 0, 1, 1], [], []>} : vector<16x32xbf16>, vector<32x8xbf16>, vector<16x8xf32> -> vector<16x8xf32>
    %c1_452 = arith.constant 1 : index
    %c0_453 = arith.constant 0 : index
    %c0_454 = arith.constant 0 : index
    %c0_455 = arith.constant 0 : index
    %c0_456 = arith.constant 0 : index
    %502 = vector.load %arg6[%c1_452, %c0_453, %c0_454, %c0_455, %c0_456] : memref<2x2x4x1x8xf32, #tpu.memory_space<vmem>>, vector<1x1x1x1x8xf32>
    %503 = vector.shape_cast %502 : vector<1x1x1x1x8xf32> to vector<1x8xf32>
    %504 = vector.broadcast %503 : vector<1x8xf32> to vector<16x8xf32>
    %505 = arith.addf %501, %504 : vector<16x8xf32>
    %c1_457 = arith.constant 1 : index
    %c0_458 = arith.constant 0 : index
    %c0_459 = arith.constant 0 : index
    %c0_460 = arith.constant 0 : index
    %c0_461 = arith.constant 0 : index
    %506 = vector.load %arg4[%c1_457, %c0_458, %c0_459, %c0_460, %c0_461] : memref<2x2x4x32x8xbf16, #tpu.memory_space<vmem>>, vector<1x1x1x32x8xbf16>
    %507 = vector.shape_cast %506 : vector<1x1x1x32x8xbf16> to vector<32x8xbf16>
    %cst_462 = arith.constant dense<0.000000e+00> : vector<16x8xf32>
    %508 = tpu.matmul %497, %507, %cst_462 {dimension_numbers = #tpu.dot_dimension_numbers<[1], [0], [0], [1], [0, 0, 1, 1], [], []>} : vector<16x32xbf16>, vector<32x8xbf16>, vector<16x8xf32> -> vector<16x8xf32>
    %c1_463 = arith.constant 1 : index
    %c0_464 = arith.constant 0 : index
    %c0_465 = arith.constant 0 : index
    %c0_466 = arith.constant 0 : index
    %c0_467 = arith.constant 0 : index
    %509 = vector.load %arg7[%c1_463, %c0_464, %c0_465, %c0_466, %c0_467] : memref<2x2x4x1x8xf32, #tpu.memory_space<vmem>>, vector<1x1x1x1x8xf32>
    %510 = vector.shape_cast %509 : vector<1x1x1x1x8xf32> to vector<1x8xf32>
    %511 = vector.broadcast %510 : vector<1x8xf32> to vector<16x8xf32>
    %512 = arith.addf %508, %511 : vector<16x8xf32>
    %c1_468 = arith.constant 1 : index
    %c0_469 = arith.constant 0 : index
    %c0_470 = arith.constant 0 : index
    %c0_471 = arith.constant 0 : index
    %c0_472 = arith.constant 0 : index
    %513 = vector.load %arg5[%c1_468, %c0_469, %c0_470, %c0_471, %c0_472] : memref<2x2x4x32x8xbf16, #tpu.memory_space<vmem>>, vector<1x1x1x32x8xbf16>
    %514 = vector.shape_cast %513 : vector<1x1x1x32x8xbf16> to vector<32x8xbf16>
    %cst_473 = arith.constant dense<0.000000e+00> : vector<16x8xf32>
    %515 = tpu.matmul %497, %514, %cst_473 {dimension_numbers = #tpu.dot_dimension_numbers<[1], [0], [0], [1], [0, 0, 1, 1], [], []>} : vector<16x32xbf16>, vector<32x8xbf16>, vector<16x8xf32> -> vector<16x8xf32>
    %c1_474 = arith.constant 1 : index
    %c0_475 = arith.constant 0 : index
    %c0_476 = arith.constant 0 : index
    %c0_477 = arith.constant 0 : index
    %c0_478 = arith.constant 0 : index
    %516 = vector.load %arg8[%c1_474, %c0_475, %c0_476, %c0_477, %c0_478] : memref<2x2x4x1x8xf32, #tpu.memory_space<vmem>>, vector<1x1x1x1x8xf32>
    %517 = vector.shape_cast %516 : vector<1x1x1x1x8xf32> to vector<1x8xf32>
    %518 = vector.broadcast %517 : vector<1x8xf32> to vector<16x8xf32>
    %519 = arith.addf %515, %518 : vector<16x8xf32>
    %520 = arith.truncf %505 : vector<16x8xf32> to vector<16x8xbf16>
    %521 = arith.truncf %512 : vector<16x8xf32> to vector<16x8xbf16>
    %cst_479 = arith.constant dense<0.000000e+00> : vector<16x16xf32>
    %522 = tpu.matmul %520, %521, %cst_479 {dimension_numbers = #tpu.dot_dimension_numbers<[1], [1], [0], [0], [0, 0, 1, 0], [], []>} : vector<16x8xbf16>, vector<16x8xbf16>, vector<16x16xf32> -> vector<16x16xf32>
    %cst_480 = arith.constant dense<0xFF800000> : vector<16xf32>
    %523 = vector.multi_reduction <maximumf>, %522, %cst_480 [1] : vector<16x16xf32> to vector<16xf32>
    %524 = vector.shape_cast %523 : vector<16xf32> to vector<16x1xf32>
    %525 = vector.broadcast %524 : vector<16x1xf32> to vector<16x16xf32>
    %526 = arith.subf %522, %525 : vector<16x16xf32>
    %527 = math.exp %526 : vector<16x16xf32>
    %cst_481 = arith.constant dense<0.000000e+00> : vector<16xf32>
    %528 = vector.multi_reduction <add>, %527, %cst_481 [1] : vector<16x16xf32> to vector<16xf32>
    %529 = vector.shape_cast %528 : vector<16xf32> to vector<16x1xf32>
    %530 = tpu.reciprocal %529 {approx = true} : vector<16x1xf32> -> vector<16x1xf32>
    %531 = vector.broadcast %530 : vector<16x1xf32> to vector<16x16xf32>
    %532 = arith.mulf %527, %531 : vector<16x16xf32>
    %533 = arith.truncf %532 : vector<16x16xf32> to vector<16x16xbf16>
    %534 = arith.truncf %519 : vector<16x8xf32> to vector<16x8xbf16>
    %cst_482 = arith.constant dense<0.000000e+00> : vector<16x8xf32>
    %535 = tpu.matmul %533, %534, %cst_482 {dimension_numbers = #tpu.dot_dimension_numbers<[1], [0], [0], [1], [0, 0, 1, 1], [], []>} : vector<16x16xbf16>, vector<16x8xbf16>, vector<16x8xf32> -> vector<16x8xf32>
    %536 = arith.truncf %535 : vector<16x8xf32> to vector<16x8xbf16>
    %c1_483 = arith.constant 1 : index
    %c0_484 = arith.constant 0 : index
    %c0_485 = arith.constant 0 : index
    %c0_486 = arith.constant 0 : index
    %c0_487 = arith.constant 0 : index
    %537 = vector.load %arg9[%c1_483, %c0_484, %c0_485, %c0_486, %c0_487] : memref<2x2x4x8x32xbf16, #tpu.memory_space<vmem>>, vector<1x1x1x8x32xbf16>
    %538 = vector.shape_cast %537 : vector<1x1x1x8x32xbf16> to vector<8x32xbf16>
    %cst_488 = arith.constant dense<0.000000e+00> : vector<16x32xf32>
    %539 = tpu.matmul %536, %538, %cst_488 {dimension_numbers = #tpu.dot_dimension_numbers<[1], [0], [0], [1], [0, 0, 1, 1], [], []>} : vector<16x8xbf16>, vector<8x32xbf16>, vector<16x32xf32> -> vector<16x32xf32>
    %540 = arith.addf %498, %539 : vector<16x32xf32>
    %c1_489 = arith.constant 1 : index
    %c0_490 = arith.constant 0 : index
    %c1_491 = arith.constant 1 : index
    %c0_492 = arith.constant 0 : index
    %c0_493 = arith.constant 0 : index
    %541 = vector.load %arg3[%c1_489, %c0_490, %c1_491, %c0_492, %c0_493] : memref<2x2x4x32x8xbf16, #tpu.memory_space<vmem>>, vector<1x1x1x32x8xbf16>
    %542 = vector.shape_cast %541 : vector<1x1x1x32x8xbf16> to vector<32x8xbf16>
    %cst_494 = arith.constant dense<0.000000e+00> : vector<16x8xf32>
    %543 = tpu.matmul %497, %542, %cst_494 {dimension_numbers = #tpu.dot_dimension_numbers<[1], [0], [0], [1], [0, 0, 1, 1], [], []>} : vector<16x32xbf16>, vector<32x8xbf16>, vector<16x8xf32> -> vector<16x8xf32>
    %c1_495 = arith.constant 1 : index
    %c0_496 = arith.constant 0 : index
    %c1_497 = arith.constant 1 : index
    %c0_498 = arith.constant 0 : index
    %c0_499 = arith.constant 0 : index
    %544 = vector.load %arg6[%c1_495, %c0_496, %c1_497, %c0_498, %c0_499] : memref<2x2x4x1x8xf32, #tpu.memory_space<vmem>>, vector<1x1x1x1x8xf32>
    %545 = vector.shape_cast %544 : vector<1x1x1x1x8xf32> to vector<1x8xf32>
    %546 = vector.broadcast %545 : vector<1x8xf32> to vector<16x8xf32>
    %547 = arith.addf %543, %546 : vector<16x8xf32>
    %c1_500 = arith.constant 1 : index
    %c0_501 = arith.constant 0 : index
    %c1_502 = arith.constant 1 : index
    %c0_503 = arith.constant 0 : index
    %c0_504 = arith.constant 0 : index
    %548 = vector.load %arg4[%c1_500, %c0_501, %c1_502, %c0_503, %c0_504] : memref<2x2x4x32x8xbf16, #tpu.memory_space<vmem>>, vector<1x1x1x32x8xbf16>
    %549 = vector.shape_cast %548 : vector<1x1x1x32x8xbf16> to vector<32x8xbf16>
    %cst_505 = arith.constant dense<0.000000e+00> : vector<16x8xf32>
    %550 = tpu.matmul %497, %549, %cst_505 {dimension_numbers = #tpu.dot_dimension_numbers<[1], [0], [0], [1], [0, 0, 1, 1], [], []>} : vector<16x32xbf16>, vector<32x8xbf16>, vector<16x8xf32> -> vector<16x8xf32>
    %c1_506 = arith.constant 1 : index
    %c0_507 = arith.constant 0 : index
    %c1_508 = arith.constant 1 : index
    %c0_509 = arith.constant 0 : index
    %c0_510 = arith.constant 0 : index
    %551 = vector.load %arg7[%c1_506, %c0_507, %c1_508, %c0_509, %c0_510] : memref<2x2x4x1x8xf32, #tpu.memory_space<vmem>>, vector<1x1x1x1x8xf32>
    %552 = vector.shape_cast %551 : vector<1x1x1x1x8xf32> to vector<1x8xf32>
    %553 = vector.broadcast %552 : vector<1x8xf32> to vector<16x8xf32>
    %554 = arith.addf %550, %553 : vector<16x8xf32>
    %c1_511 = arith.constant 1 : index
    %c0_512 = arith.constant 0 : index
    %c1_513 = arith.constant 1 : index
    %c0_514 = arith.constant 0 : index
    %c0_515 = arith.constant 0 : index
    %555 = vector.load %arg5[%c1_511, %c0_512, %c1_513, %c0_514, %c0_515] : memref<2x2x4x32x8xbf16, #tpu.memory_space<vmem>>, vector<1x1x1x32x8xbf16>
    %556 = vector.shape_cast %555 : vector<1x1x1x32x8xbf16> to vector<32x8xbf16>
    %cst_516 = arith.constant dense<0.000000e+00> : vector<16x8xf32>
    %557 = tpu.matmul %497, %556, %cst_516 {dimension_numbers = #tpu.dot_dimension_numbers<[1], [0], [0], [1], [0, 0, 1, 1], [], []>} : vector<16x32xbf16>, vector<32x8xbf16>, vector<16x8xf32> -> vector<16x8xf32>
    %c1_517 = arith.constant 1 : index
    %c0_518 = arith.constant 0 : index
    %c1_519 = arith.constant 1 : index
    %c0_520 = arith.constant 0 : index
    %c0_521 = arith.constant 0 : index
    %558 = vector.load %arg8[%c1_517, %c0_518, %c1_519, %c0_520, %c0_521] : memref<2x2x4x1x8xf32, #tpu.memory_space<vmem>>, vector<1x1x1x1x8xf32>
    %559 = vector.shape_cast %558 : vector<1x1x1x1x8xf32> to vector<1x8xf32>
    %560 = vector.broadcast %559 : vector<1x8xf32> to vector<16x8xf32>
    %561 = arith.addf %557, %560 : vector<16x8xf32>
    %562 = arith.truncf %547 : vector<16x8xf32> to vector<16x8xbf16>
    %563 = arith.truncf %554 : vector<16x8xf32> to vector<16x8xbf16>
    %cst_522 = arith.constant dense<0.000000e+00> : vector<16x16xf32>
    %564 = tpu.matmul %562, %563, %cst_522 {dimension_numbers = #tpu.dot_dimension_numbers<[1], [1], [0], [0], [0, 0, 1, 0], [], []>} : vector<16x8xbf16>, vector<16x8xbf16>, vector<16x16xf32> -> vector<16x16xf32>
    %cst_523 = arith.constant dense<0xFF800000> : vector<16xf32>
    %565 = vector.multi_reduction <maximumf>, %564, %cst_523 [1] : vector<16x16xf32> to vector<16xf32>
    %566 = vector.shape_cast %565 : vector<16xf32> to vector<16x1xf32>
    %567 = vector.broadcast %566 : vector<16x1xf32> to vector<16x16xf32>
    %568 = arith.subf %564, %567 : vector<16x16xf32>
    %569 = math.exp %568 : vector<16x16xf32>
    %cst_524 = arith.constant dense<0.000000e+00> : vector<16xf32>
    %570 = vector.multi_reduction <add>, %569, %cst_524 [1] : vector<16x16xf32> to vector<16xf32>
    %571 = vector.shape_cast %570 : vector<16xf32> to vector<16x1xf32>
    %572 = tpu.reciprocal %571 {approx = true} : vector<16x1xf32> -> vector<16x1xf32>
    %573 = vector.broadcast %572 : vector<16x1xf32> to vector<16x16xf32>
    %574 = arith.mulf %569, %573 : vector<16x16xf32>
    %575 = arith.truncf %574 : vector<16x16xf32> to vector<16x16xbf16>
    %576 = arith.truncf %561 : vector<16x8xf32> to vector<16x8xbf16>
    %cst_525 = arith.constant dense<0.000000e+00> : vector<16x8xf32>
    %577 = tpu.matmul %575, %576, %cst_525 {dimension_numbers = #tpu.dot_dimension_numbers<[1], [0], [0], [1], [0, 0, 1, 1], [], []>} : vector<16x16xbf16>, vector<16x8xbf16>, vector<16x8xf32> -> vector<16x8xf32>
    %578 = arith.truncf %577 : vector<16x8xf32> to vector<16x8xbf16>
    %c1_526 = arith.constant 1 : index
    %c0_527 = arith.constant 0 : index
    %c1_528 = arith.constant 1 : index
    %c0_529 = arith.constant 0 : index
    %c0_530 = arith.constant 0 : index
    %579 = vector.load %arg9[%c1_526, %c0_527, %c1_528, %c0_529, %c0_530] : memref<2x2x4x8x32xbf16, #tpu.memory_space<vmem>>, vector<1x1x1x8x32xbf16>
    %580 = vector.shape_cast %579 : vector<1x1x1x8x32xbf16> to vector<8x32xbf16>
    %cst_531 = arith.constant dense<0.000000e+00> : vector<16x32xf32>
    %581 = tpu.matmul %578, %580, %cst_531 {dimension_numbers = #tpu.dot_dimension_numbers<[1], [0], [0], [1], [0, 0, 1, 1], [], []>} : vector<16x8xbf16>, vector<8x32xbf16>, vector<16x32xf32> -> vector<16x32xf32>
    %582 = arith.addf %540, %581 : vector<16x32xf32>
    %c1_532 = arith.constant 1 : index
    %c0_533 = arith.constant 0 : index
    %c2_534 = arith.constant 2 : index
    %c0_535 = arith.constant 0 : index
    %c0_536 = arith.constant 0 : index
    %583 = vector.load %arg3[%c1_532, %c0_533, %c2_534, %c0_535, %c0_536] : memref<2x2x4x32x8xbf16, #tpu.memory_space<vmem>>, vector<1x1x1x32x8xbf16>
    %584 = vector.shape_cast %583 : vector<1x1x1x32x8xbf16> to vector<32x8xbf16>
    %cst_537 = arith.constant dense<0.000000e+00> : vector<16x8xf32>
    %585 = tpu.matmul %497, %584, %cst_537 {dimension_numbers = #tpu.dot_dimension_numbers<[1], [0], [0], [1], [0, 0, 1, 1], [], []>} : vector<16x32xbf16>, vector<32x8xbf16>, vector<16x8xf32> -> vector<16x8xf32>
    %c1_538 = arith.constant 1 : index
    %c0_539 = arith.constant 0 : index
    %c2_540 = arith.constant 2 : index
    %c0_541 = arith.constant 0 : index
    %c0_542 = arith.constant 0 : index
    %586 = vector.load %arg6[%c1_538, %c0_539, %c2_540, %c0_541, %c0_542] : memref<2x2x4x1x8xf32, #tpu.memory_space<vmem>>, vector<1x1x1x1x8xf32>
    %587 = vector.shape_cast %586 : vector<1x1x1x1x8xf32> to vector<1x8xf32>
    %588 = vector.broadcast %587 : vector<1x8xf32> to vector<16x8xf32>
    %589 = arith.addf %585, %588 : vector<16x8xf32>
    %c1_543 = arith.constant 1 : index
    %c0_544 = arith.constant 0 : index
    %c2_545 = arith.constant 2 : index
    %c0_546 = arith.constant 0 : index
    %c0_547 = arith.constant 0 : index
    %590 = vector.load %arg4[%c1_543, %c0_544, %c2_545, %c0_546, %c0_547] : memref<2x2x4x32x8xbf16, #tpu.memory_space<vmem>>, vector<1x1x1x32x8xbf16>
    %591 = vector.shape_cast %590 : vector<1x1x1x32x8xbf16> to vector<32x8xbf16>
    %cst_548 = arith.constant dense<0.000000e+00> : vector<16x8xf32>
    %592 = tpu.matmul %497, %591, %cst_548 {dimension_numbers = #tpu.dot_dimension_numbers<[1], [0], [0], [1], [0, 0, 1, 1], [], []>} : vector<16x32xbf16>, vector<32x8xbf16>, vector<16x8xf32> -> vector<16x8xf32>
    %c1_549 = arith.constant 1 : index
    %c0_550 = arith.constant 0 : index
    %c2_551 = arith.constant 2 : index
    %c0_552 = arith.constant 0 : index
    %c0_553 = arith.constant 0 : index
    %593 = vector.load %arg7[%c1_549, %c0_550, %c2_551, %c0_552, %c0_553] : memref<2x2x4x1x8xf32, #tpu.memory_space<vmem>>, vector<1x1x1x1x8xf32>
    %594 = vector.shape_cast %593 : vector<1x1x1x1x8xf32> to vector<1x8xf32>
    %595 = vector.broadcast %594 : vector<1x8xf32> to vector<16x8xf32>
    %596 = arith.addf %592, %595 : vector<16x8xf32>
    %c1_554 = arith.constant 1 : index
    %c0_555 = arith.constant 0 : index
    %c2_556 = arith.constant 2 : index
    %c0_557 = arith.constant 0 : index
    %c0_558 = arith.constant 0 : index
    %597 = vector.load %arg5[%c1_554, %c0_555, %c2_556, %c0_557, %c0_558] : memref<2x2x4x32x8xbf16, #tpu.memory_space<vmem>>, vector<1x1x1x32x8xbf16>
    %598 = vector.shape_cast %597 : vector<1x1x1x32x8xbf16> to vector<32x8xbf16>
    %cst_559 = arith.constant dense<0.000000e+00> : vector<16x8xf32>
    %599 = tpu.matmul %497, %598, %cst_559 {dimension_numbers = #tpu.dot_dimension_numbers<[1], [0], [0], [1], [0, 0, 1, 1], [], []>} : vector<16x32xbf16>, vector<32x8xbf16>, vector<16x8xf32> -> vector<16x8xf32>
    %c1_560 = arith.constant 1 : index
    %c0_561 = arith.constant 0 : index
    %c2_562 = arith.constant 2 : index
    %c0_563 = arith.constant 0 : index
    %c0_564 = arith.constant 0 : index
    %600 = vector.load %arg8[%c1_560, %c0_561, %c2_562, %c0_563, %c0_564] : memref<2x2x4x1x8xf32, #tpu.memory_space<vmem>>, vector<1x1x1x1x8xf32>
    %601 = vector.shape_cast %600 : vector<1x1x1x1x8xf32> to vector<1x8xf32>
    %602 = vector.broadcast %601 : vector<1x8xf32> to vector<16x8xf32>
    %603 = arith.addf %599, %602 : vector<16x8xf32>
    %604 = arith.truncf %589 : vector<16x8xf32> to vector<16x8xbf16>
    %605 = arith.truncf %596 : vector<16x8xf32> to vector<16x8xbf16>
    %cst_565 = arith.constant dense<0.000000e+00> : vector<16x16xf32>
    %606 = tpu.matmul %604, %605, %cst_565 {dimension_numbers = #tpu.dot_dimension_numbers<[1], [1], [0], [0], [0, 0, 1, 0], [], []>} : vector<16x8xbf16>, vector<16x8xbf16>, vector<16x16xf32> -> vector<16x16xf32>
    %cst_566 = arith.constant dense<0xFF800000> : vector<16xf32>
    %607 = vector.multi_reduction <maximumf>, %606, %cst_566 [1] : vector<16x16xf32> to vector<16xf32>
    %608 = vector.shape_cast %607 : vector<16xf32> to vector<16x1xf32>
    %609 = vector.broadcast %608 : vector<16x1xf32> to vector<16x16xf32>
    %610 = arith.subf %606, %609 : vector<16x16xf32>
    %611 = math.exp %610 : vector<16x16xf32>
    %cst_567 = arith.constant dense<0.000000e+00> : vector<16xf32>
    %612 = vector.multi_reduction <add>, %611, %cst_567 [1] : vector<16x16xf32> to vector<16xf32>
    %613 = vector.shape_cast %612 : vector<16xf32> to vector<16x1xf32>
    %614 = tpu.reciprocal %613 {approx = true} : vector<16x1xf32> -> vector<16x1xf32>
    %615 = vector.broadcast %614 : vector<16x1xf32> to vector<16x16xf32>
    %616 = arith.mulf %611, %615 : vector<16x16xf32>
    %617 = arith.truncf %616 : vector<16x16xf32> to vector<16x16xbf16>
    %618 = arith.truncf %603 : vector<16x8xf32> to vector<16x8xbf16>
    %cst_568 = arith.constant dense<0.000000e+00> : vector<16x8xf32>
    %619 = tpu.matmul %617, %618, %cst_568 {dimension_numbers = #tpu.dot_dimension_numbers<[1], [0], [0], [1], [0, 0, 1, 1], [], []>} : vector<16x16xbf16>, vector<16x8xbf16>, vector<16x8xf32> -> vector<16x8xf32>
    %620 = arith.truncf %619 : vector<16x8xf32> to vector<16x8xbf16>
    %c1_569 = arith.constant 1 : index
    %c0_570 = arith.constant 0 : index
    %c2_571 = arith.constant 2 : index
    %c0_572 = arith.constant 0 : index
    %c0_573 = arith.constant 0 : index
    %621 = vector.load %arg9[%c1_569, %c0_570, %c2_571, %c0_572, %c0_573] : memref<2x2x4x8x32xbf16, #tpu.memory_space<vmem>>, vector<1x1x1x8x32xbf16>
    %622 = vector.shape_cast %621 : vector<1x1x1x8x32xbf16> to vector<8x32xbf16>
    %cst_574 = arith.constant dense<0.000000e+00> : vector<16x32xf32>
    %623 = tpu.matmul %620, %622, %cst_574 {dimension_numbers = #tpu.dot_dimension_numbers<[1], [0], [0], [1], [0, 0, 1, 1], [], []>} : vector<16x8xbf16>, vector<8x32xbf16>, vector<16x32xf32> -> vector<16x32xf32>
    %624 = arith.addf %582, %623 : vector<16x32xf32>
    %c1_575 = arith.constant 1 : index
    %c0_576 = arith.constant 0 : index
    %c3_577 = arith.constant 3 : index
    %c0_578 = arith.constant 0 : index
    %c0_579 = arith.constant 0 : index
    %625 = vector.load %arg3[%c1_575, %c0_576, %c3_577, %c0_578, %c0_579] : memref<2x2x4x32x8xbf16, #tpu.memory_space<vmem>>, vector<1x1x1x32x8xbf16>
    %626 = vector.shape_cast %625 : vector<1x1x1x32x8xbf16> to vector<32x8xbf16>
    %cst_580 = arith.constant dense<0.000000e+00> : vector<16x8xf32>
    %627 = tpu.matmul %497, %626, %cst_580 {dimension_numbers = #tpu.dot_dimension_numbers<[1], [0], [0], [1], [0, 0, 1, 1], [], []>} : vector<16x32xbf16>, vector<32x8xbf16>, vector<16x8xf32> -> vector<16x8xf32>
    %c1_581 = arith.constant 1 : index
    %c0_582 = arith.constant 0 : index
    %c3_583 = arith.constant 3 : index
    %c0_584 = arith.constant 0 : index
    %c0_585 = arith.constant 0 : index
    %628 = vector.load %arg6[%c1_581, %c0_582, %c3_583, %c0_584, %c0_585] : memref<2x2x4x1x8xf32, #tpu.memory_space<vmem>>, vector<1x1x1x1x8xf32>
    %629 = vector.shape_cast %628 : vector<1x1x1x1x8xf32> to vector<1x8xf32>
    %630 = vector.broadcast %629 : vector<1x8xf32> to vector<16x8xf32>
    %631 = arith.addf %627, %630 : vector<16x8xf32>
    %c1_586 = arith.constant 1 : index
    %c0_587 = arith.constant 0 : index
    %c3_588 = arith.constant 3 : index
    %c0_589 = arith.constant 0 : index
    %c0_590 = arith.constant 0 : index
    %632 = vector.load %arg4[%c1_586, %c0_587, %c3_588, %c0_589, %c0_590] : memref<2x2x4x32x8xbf16, #tpu.memory_space<vmem>>, vector<1x1x1x32x8xbf16>
    %633 = vector.shape_cast %632 : vector<1x1x1x32x8xbf16> to vector<32x8xbf16>
    %cst_591 = arith.constant dense<0.000000e+00> : vector<16x8xf32>
    %634 = tpu.matmul %497, %633, %cst_591 {dimension_numbers = #tpu.dot_dimension_numbers<[1], [0], [0], [1], [0, 0, 1, 1], [], []>} : vector<16x32xbf16>, vector<32x8xbf16>, vector<16x8xf32> -> vector<16x8xf32>
    %c1_592 = arith.constant 1 : index
    %c0_593 = arith.constant 0 : index
    %c3_594 = arith.constant 3 : index
    %c0_595 = arith.constant 0 : index
    %c0_596 = arith.constant 0 : index
    %635 = vector.load %arg7[%c1_592, %c0_593, %c3_594, %c0_595, %c0_596] : memref<2x2x4x1x8xf32, #tpu.memory_space<vmem>>, vector<1x1x1x1x8xf32>
    %636 = vector.shape_cast %635 : vector<1x1x1x1x8xf32> to vector<1x8xf32>
    %637 = vector.broadcast %636 : vector<1x8xf32> to vector<16x8xf32>
    %638 = arith.addf %634, %637 : vector<16x8xf32>
    %c1_597 = arith.constant 1 : index
    %c0_598 = arith.constant 0 : index
    %c3_599 = arith.constant 3 : index
    %c0_600 = arith.constant 0 : index
    %c0_601 = arith.constant 0 : index
    %639 = vector.load %arg5[%c1_597, %c0_598, %c3_599, %c0_600, %c0_601] : memref<2x2x4x32x8xbf16, #tpu.memory_space<vmem>>, vector<1x1x1x32x8xbf16>
    %640 = vector.shape_cast %639 : vector<1x1x1x32x8xbf16> to vector<32x8xbf16>
    %cst_602 = arith.constant dense<0.000000e+00> : vector<16x8xf32>
    %641 = tpu.matmul %497, %640, %cst_602 {dimension_numbers = #tpu.dot_dimension_numbers<[1], [0], [0], [1], [0, 0, 1, 1], [], []>} : vector<16x32xbf16>, vector<32x8xbf16>, vector<16x8xf32> -> vector<16x8xf32>
    %c1_603 = arith.constant 1 : index
    %c0_604 = arith.constant 0 : index
    %c3_605 = arith.constant 3 : index
    %c0_606 = arith.constant 0 : index
    %c0_607 = arith.constant 0 : index
    %642 = vector.load %arg8[%c1_603, %c0_604, %c3_605, %c0_606, %c0_607] : memref<2x2x4x1x8xf32, #tpu.memory_space<vmem>>, vector<1x1x1x1x8xf32>
    %643 = vector.shape_cast %642 : vector<1x1x1x1x8xf32> to vector<1x8xf32>
    %644 = vector.broadcast %643 : vector<1x8xf32> to vector<16x8xf32>
    %645 = arith.addf %641, %644 : vector<16x8xf32>
    %646 = arith.truncf %631 : vector<16x8xf32> to vector<16x8xbf16>
    %647 = arith.truncf %638 : vector<16x8xf32> to vector<16x8xbf16>
    %cst_608 = arith.constant dense<0.000000e+00> : vector<16x16xf32>
    %648 = tpu.matmul %646, %647, %cst_608 {dimension_numbers = #tpu.dot_dimension_numbers<[1], [1], [0], [0], [0, 0, 1, 0], [], []>} : vector<16x8xbf16>, vector<16x8xbf16>, vector<16x16xf32> -> vector<16x16xf32>
    %cst_609 = arith.constant dense<0xFF800000> : vector<16xf32>
    %649 = vector.multi_reduction <maximumf>, %648, %cst_609 [1] : vector<16x16xf32> to vector<16xf32>
    %650 = vector.shape_cast %649 : vector<16xf32> to vector<16x1xf32>
    %651 = vector.broadcast %650 : vector<16x1xf32> to vector<16x16xf32>
    %652 = arith.subf %648, %651 : vector<16x16xf32>
    %653 = math.exp %652 : vector<16x16xf32>
    %cst_610 = arith.constant dense<0.000000e+00> : vector<16xf32>
    %654 = vector.multi_reduction <add>, %653, %cst_610 [1] : vector<16x16xf32> to vector<16xf32>
    %655 = vector.shape_cast %654 : vector<16xf32> to vector<16x1xf32>
    %656 = tpu.reciprocal %655 {approx = true} : vector<16x1xf32> -> vector<16x1xf32>
    %657 = vector.broadcast %656 : vector<16x1xf32> to vector<16x16xf32>
    %658 = arith.mulf %653, %657 : vector<16x16xf32>
    %659 = arith.truncf %658 : vector<16x16xf32> to vector<16x16xbf16>
    %660 = arith.truncf %645 : vector<16x8xf32> to vector<16x8xbf16>
    %cst_611 = arith.constant dense<0.000000e+00> : vector<16x8xf32>
    %661 = tpu.matmul %659, %660, %cst_611 {dimension_numbers = #tpu.dot_dimension_numbers<[1], [0], [0], [1], [0, 0, 1, 1], [], []>} : vector<16x16xbf16>, vector<16x8xbf16>, vector<16x8xf32> -> vector<16x8xf32>
    %662 = arith.truncf %661 : vector<16x8xf32> to vector<16x8xbf16>
    %c1_612 = arith.constant 1 : index
    %c0_613 = arith.constant 0 : index
    %c3_614 = arith.constant 3 : index
    %c0_615 = arith.constant 0 : index
    %c0_616 = arith.constant 0 : index
    %663 = vector.load %arg9[%c1_612, %c0_613, %c3_614, %c0_615, %c0_616] : memref<2x2x4x8x32xbf16, #tpu.memory_space<vmem>>, vector<1x1x1x8x32xbf16>
    %664 = vector.shape_cast %663 : vector<1x1x1x8x32xbf16> to vector<8x32xbf16>
    %cst_617 = arith.constant dense<0.000000e+00> : vector<16x32xf32>
    %665 = tpu.matmul %662, %664, %cst_617 {dimension_numbers = #tpu.dot_dimension_numbers<[1], [0], [0], [1], [0, 0, 1, 1], [], []>} : vector<16x8xbf16>, vector<8x32xbf16>, vector<16x32xf32> -> vector<16x32xf32>
    %666 = arith.addf %624, %665 : vector<16x32xf32>
    %c1_618 = arith.constant 1 : index
    %c0_619 = arith.constant 0 : index
    %c0_620 = arith.constant 0 : index
    %c0_621 = arith.constant 0 : index
    %667 = vector.load %arg10[%c1_618, %c0_619, %c0_620, %c0_621] : memref<2x2x1x32xf32, #tpu.memory_space<vmem>>, vector<1x1x1x32xf32>
    %668 = vector.shape_cast %667 : vector<1x1x1x32xf32> to vector<1x32xf32>
    %669 = vector.broadcast %668 : vector<1x32xf32> to vector<16x32xf32>
    %670 = arith.addf %666, %669 : vector<16x32xf32>
    %671 = arith.addf %4, %670 : vector<16x32xf32>
    %c1_622 = arith.constant 1 : index
    %c0_623 = arith.constant 0 : index
    %c0_624 = arith.constant 0 : index
    %c0_625 = arith.constant 0 : index
    %672 = vector.load %arg11[%c1_622, %c0_623, %c0_624, %c0_625] : memref<2x2x1x32xf32, #tpu.memory_space<vmem>>, vector<1x1x1x32xf32>
    %673 = vector.shape_cast %672 : vector<1x1x1x32xf32> to vector<1x32xf32>
    %c1_626 = arith.constant 1 : index
    %c0_627 = arith.constant 0 : index
    %c0_628 = arith.constant 0 : index
    %c0_629 = arith.constant 0 : index
    %674 = vector.load %arg12[%c1_626, %c0_627, %c0_628, %c0_629] : memref<2x2x1x32xf32, #tpu.memory_space<vmem>>, vector<1x1x1x32xf32>
    %675 = vector.shape_cast %674 : vector<1x1x1x32xf32> to vector<1x32xf32>
    %cst_630 = arith.constant dense<0.000000e+00> : vector<16xf32>
    %676 = vector.multi_reduction <add>, %671, %cst_630 [1] : vector<16x32xf32> to vector<16xf32>
    %677 = vector.shape_cast %676 : vector<16xf32> to vector<16x1xf32>
    %cst_631 = arith.constant 3.200000e+01 : f32
    %678 = vector.broadcast %cst_631 : f32 to vector<16x1xf32>
    %679 = arith.divf %677, %678 : vector<16x1xf32>
    %680 = arith.mulf %671, %671 : vector<16x32xf32>
    %cst_632 = arith.constant dense<0.000000e+00> : vector<16xf32>
    %681 = vector.multi_reduction <add>, %680, %cst_632 [1] : vector<16x32xf32> to vector<16xf32>
    %682 = vector.shape_cast %681 : vector<16xf32> to vector<16x1xf32>
    %cst_633 = arith.constant 3.200000e+01 : f32
    %683 = vector.broadcast %cst_633 : f32 to vector<16x1xf32>
    %684 = arith.divf %682, %683 : vector<16x1xf32>
    %685 = arith.mulf %679, %679 : vector<16x1xf32>
    %686 = arith.subf %684, %685 : vector<16x1xf32>
    %687 = vector.broadcast %679 : vector<16x1xf32> to vector<16x32xf32>
    %688 = arith.subf %671, %687 : vector<16x32xf32>
    %cst_634 = arith.constant 9.99999974E-6 : f32
    %689 = vector.broadcast %cst_634 : f32 to vector<16x1xf32>
    %690 = arith.addf %686, %689 : vector<16x1xf32>
    %691 = math.rsqrt %690 : vector<16x1xf32>
    %692 = vector.broadcast %691 : vector<16x1xf32> to vector<16x32xf32>
    %693 = arith.mulf %688, %692 : vector<16x32xf32>
    %694 = vector.broadcast %673 : vector<1x32xf32> to vector<16x32xf32>
    %695 = arith.mulf %693, %694 : vector<16x32xf32>
    %696 = vector.broadcast %675 : vector<1x32xf32> to vector<16x32xf32>
    %697 = arith.addf %695, %696 : vector<16x32xf32>
    %698 = arith.truncf %697 : vector<16x32xf32> to vector<16x32xbf16>
    %c1_635 = arith.constant 1 : index
    %c0_636 = arith.constant 0 : index
    %c0_637 = arith.constant 0 : index
    %c0_638 = arith.constant 0 : index
    %699 = vector.load %arg13[%c1_635, %c0_636, %c0_637, %c0_638] : memref<2x2x32x64xbf16, #tpu.memory_space<vmem>>, vector<1x1x32x64xbf16>
    %700 = vector.shape_cast %699 : vector<1x1x32x64xbf16> to vector<32x64xbf16>
    %cst_639 = arith.constant dense<0.000000e+00> : vector<16x64xf32>
    %701 = tpu.matmul %698, %700, %cst_639 {dimension_numbers = #tpu.dot_dimension_numbers<[1], [0], [0], [1], [0, 0, 1, 1], [], []>} : vector<16x32xbf16>, vector<32x64xbf16>, vector<16x64xf32> -> vector<16x64xf32>
    %c1_640 = arith.constant 1 : index
    %c0_641 = arith.constant 0 : index
    %c0_642 = arith.constant 0 : index
    %c0_643 = arith.constant 0 : index
    %702 = vector.load %arg14[%c1_640, %c0_641, %c0_642, %c0_643] : memref<2x2x1x64xf32, #tpu.memory_space<vmem>>, vector<1x1x1x64xf32>
    %703 = vector.shape_cast %702 : vector<1x1x1x64xf32> to vector<1x64xf32>
    %704 = vector.broadcast %703 : vector<1x64xf32> to vector<16x64xf32>
    %705 = arith.addf %701, %704 : vector<16x64xf32>
    %cst_644 = arith.constant 0.000000e+00 : f32
    %706 = vector.broadcast %cst_644 : f32 to vector<16x64xf32>
    %707 = arith.maximumf %705, %706 : vector<16x64xf32>
    %708 = arith.truncf %707 : vector<16x64xf32> to vector<16x64xbf16>
    %c1_645 = arith.constant 1 : index
    %c0_646 = arith.constant 0 : index
    %c0_647 = arith.constant 0 : index
    %c0_648 = arith.constant 0 : index
    %709 = vector.load %arg15[%c1_645, %c0_646, %c0_647, %c0_648] : memref<2x2x64x32xbf16, #tpu.memory_space<vmem>>, vector<1x1x64x32xbf16>
    %710 = vector.shape_cast %709 : vector<1x1x64x32xbf16> to vector<64x32xbf16>
    %cst_649 = arith.constant dense<0.000000e+00> : vector<16x32xf32>
    %711 = tpu.matmul %708, %710, %cst_649 {dimension_numbers = #tpu.dot_dimension_numbers<[1], [0], [0], [1], [0, 0, 1, 1], [], []>} : vector<16x64xbf16>, vector<64x32xbf16>, vector<16x32xf32> -> vector<16x32xf32>
    %c1_650 = arith.constant 1 : index
    %c0_651 = arith.constant 0 : index
    %c0_652 = arith.constant 0 : index
    %c0_653 = arith.constant 0 : index
    %712 = vector.load %arg16[%c1_650, %c0_651, %c0_652, %c0_653] : memref<2x2x1x32xf32, #tpu.memory_space<vmem>>, vector<1x1x1x32xf32>
    %713 = vector.shape_cast %712 : vector<1x1x1x32xf32> to vector<1x32xf32>
    %714 = vector.broadcast %713 : vector<1x32xf32> to vector<16x32xf32>
    %715 = arith.addf %711, %714 : vector<16x32xf32>
    %716 = arith.addf %697, %715 : vector<16x32xf32>
    %c1_654 = arith.constant 1 : index
    %c0_655 = arith.constant 0 : index
    %c0_656 = arith.constant 0 : index
    %c0_657 = arith.constant 0 : index
    %717 = vector.load %arg17[%c1_654, %c0_655, %c0_656, %c0_657] : memref<2x2x1x32xf32, #tpu.memory_space<vmem>>, vector<1x1x1x32xf32>
    %718 = vector.shape_cast %717 : vector<1x1x1x32xf32> to vector<1x32xf32>
    %c1_658 = arith.constant 1 : index
    %c0_659 = arith.constant 0 : index
    %c0_660 = arith.constant 0 : index
    %c0_661 = arith.constant 0 : index
    %719 = vector.load %arg18[%c1_658, %c0_659, %c0_660, %c0_661] : memref<2x2x1x32xf32, #tpu.memory_space<vmem>>, vector<1x1x1x32xf32>
    %720 = vector.shape_cast %719 : vector<1x1x1x32xf32> to vector<1x32xf32>
    %cst_662 = arith.constant dense<0.000000e+00> : vector<16xf32>
    %721 = vector.multi_reduction <add>, %716, %cst_662 [1] : vector<16x32xf32> to vector<16xf32>
    %722 = vector.shape_cast %721 : vector<16xf32> to vector<16x1xf32>
    %cst_663 = arith.constant 3.200000e+01 : f32
    %723 = vector.broadcast %cst_663 : f32 to vector<16x1xf32>
    %724 = arith.divf %722, %723 : vector<16x1xf32>
    %725 = arith.mulf %716, %716 : vector<16x32xf32>
    %cst_664 = arith.constant dense<0.000000e+00> : vector<16xf32>
    %726 = vector.multi_reduction <add>, %725, %cst_664 [1] : vector<16x32xf32> to vector<16xf32>
    %727 = vector.shape_cast %726 : vector<16xf32> to vector<16x1xf32>
    %cst_665 = arith.constant 3.200000e+01 : f32
    %728 = vector.broadcast %cst_665 : f32 to vector<16x1xf32>
    %729 = arith.divf %727, %728 : vector<16x1xf32>
    %730 = arith.mulf %724, %724 : vector<16x1xf32>
    %731 = arith.subf %729, %730 : vector<16x1xf32>
    %732 = vector.broadcast %724 : vector<16x1xf32> to vector<16x32xf32>
    %733 = arith.subf %716, %732 : vector<16x32xf32>
    %cst_666 = arith.constant 9.99999974E-6 : f32
    %734 = vector.broadcast %cst_666 : f32 to vector<16x1xf32>
    %735 = arith.addf %731, %734 : vector<16x1xf32>
    %736 = math.rsqrt %735 : vector<16x1xf32>
    %737 = vector.broadcast %736 : vector<16x1xf32> to vector<16x32xf32>
    %738 = arith.mulf %733, %737 : vector<16x32xf32>
    %739 = vector.broadcast %718 : vector<1x32xf32> to vector<16x32xf32>
    %740 = arith.mulf %738, %739 : vector<16x32xf32>
    %741 = vector.broadcast %720 : vector<1x32xf32> to vector<16x32xf32>
    %742 = arith.addf %740, %741 : vector<16x32xf32>
    %743 = arith.truncf %742 : vector<16x32xf32> to vector<16x32xbf16>
    %cst_667 = arith.constant 0.000000e+00 : f32
    %744 = vector.broadcast %cst_667 : f32 to vector<16x32xf32>
    %c1_668 = arith.constant 1 : index
    %c1_669 = arith.constant 1 : index
    %c0_670 = arith.constant 0 : index
    %c0_671 = arith.constant 0 : index
    %c0_672 = arith.constant 0 : index
    %745 = vector.load %arg3[%c1_668, %c1_669, %c0_670, %c0_671, %c0_672] : memref<2x2x4x32x8xbf16, #tpu.memory_space<vmem>>, vector<1x1x1x32x8xbf16>
    %746 = vector.shape_cast %745 : vector<1x1x1x32x8xbf16> to vector<32x8xbf16>
    %cst_673 = arith.constant dense<0.000000e+00> : vector<16x8xf32>
    %747 = tpu.matmul %743, %746, %cst_673 {dimension_numbers = #tpu.dot_dimension_numbers<[1], [0], [0], [1], [0, 0, 1, 1], [], []>} : vector<16x32xbf16>, vector<32x8xbf16>, vector<16x8xf32> -> vector<16x8xf32>
    %c1_674 = arith.constant 1 : index
    %c1_675 = arith.constant 1 : index
    %c0_676 = arith.constant 0 : index
    %c0_677 = arith.constant 0 : index
    %c0_678 = arith.constant 0 : index
    %748 = vector.load %arg6[%c1_674, %c1_675, %c0_676, %c0_677, %c0_678] : memref<2x2x4x1x8xf32, #tpu.memory_space<vmem>>, vector<1x1x1x1x8xf32>
    %749 = vector.shape_cast %748 : vector<1x1x1x1x8xf32> to vector<1x8xf32>
    %750 = vector.broadcast %749 : vector<1x8xf32> to vector<16x8xf32>
    %751 = arith.addf %747, %750 : vector<16x8xf32>
    %c1_679 = arith.constant 1 : index
    %c1_680 = arith.constant 1 : index
    %c0_681 = arith.constant 0 : index
    %c0_682 = arith.constant 0 : index
    %c0_683 = arith.constant 0 : index
    %752 = vector.load %arg4[%c1_679, %c1_680, %c0_681, %c0_682, %c0_683] : memref<2x2x4x32x8xbf16, #tpu.memory_space<vmem>>, vector<1x1x1x32x8xbf16>
    %753 = vector.shape_cast %752 : vector<1x1x1x32x8xbf16> to vector<32x8xbf16>
    %cst_684 = arith.constant dense<0.000000e+00> : vector<16x8xf32>
    %754 = tpu.matmul %743, %753, %cst_684 {dimension_numbers = #tpu.dot_dimension_numbers<[1], [0], [0], [1], [0, 0, 1, 1], [], []>} : vector<16x32xbf16>, vector<32x8xbf16>, vector<16x8xf32> -> vector<16x8xf32>
    %c1_685 = arith.constant 1 : index
    %c1_686 = arith.constant 1 : index
    %c0_687 = arith.constant 0 : index
    %c0_688 = arith.constant 0 : index
    %c0_689 = arith.constant 0 : index
    %755 = vector.load %arg7[%c1_685, %c1_686, %c0_687, %c0_688, %c0_689] : memref<2x2x4x1x8xf32, #tpu.memory_space<vmem>>, vector<1x1x1x1x8xf32>
    %756 = vector.shape_cast %755 : vector<1x1x1x1x8xf32> to vector<1x8xf32>
    %757 = vector.broadcast %756 : vector<1x8xf32> to vector<16x8xf32>
    %758 = arith.addf %754, %757 : vector<16x8xf32>
    %c1_690 = arith.constant 1 : index
    %c1_691 = arith.constant 1 : index
    %c0_692 = arith.constant 0 : index
    %c0_693 = arith.constant 0 : index
    %c0_694 = arith.constant 0 : index
    %759 = vector.load %arg5[%c1_690, %c1_691, %c0_692, %c0_693, %c0_694] : memref<2x2x4x32x8xbf16, #tpu.memory_space<vmem>>, vector<1x1x1x32x8xbf16>
    %760 = vector.shape_cast %759 : vector<1x1x1x32x8xbf16> to vector<32x8xbf16>
    %cst_695 = arith.constant dense<0.000000e+00> : vector<16x8xf32>
    %761 = tpu.matmul %743, %760, %cst_695 {dimension_numbers = #tpu.dot_dimension_numbers<[1], [0], [0], [1], [0, 0, 1, 1], [], []>} : vector<16x32xbf16>, vector<32x8xbf16>, vector<16x8xf32> -> vector<16x8xf32>
    %c1_696 = arith.constant 1 : index
    %c1_697 = arith.constant 1 : index
    %c0_698 = arith.constant 0 : index
    %c0_699 = arith.constant 0 : index
    %c0_700 = arith.constant 0 : index
    %762 = vector.load %arg8[%c1_696, %c1_697, %c0_698, %c0_699, %c0_700] : memref<2x2x4x1x8xf32, #tpu.memory_space<vmem>>, vector<1x1x1x1x8xf32>
    %763 = vector.shape_cast %762 : vector<1x1x1x1x8xf32> to vector<1x8xf32>
    %764 = vector.broadcast %763 : vector<1x8xf32> to vector<16x8xf32>
    %765 = arith.addf %761, %764 : vector<16x8xf32>
    %766 = arith.truncf %751 : vector<16x8xf32> to vector<16x8xbf16>
    %767 = arith.truncf %758 : vector<16x8xf32> to vector<16x8xbf16>
    %cst_701 = arith.constant dense<0.000000e+00> : vector<16x16xf32>
    %768 = tpu.matmul %766, %767, %cst_701 {dimension_numbers = #tpu.dot_dimension_numbers<[1], [1], [0], [0], [0, 0, 1, 0], [], []>} : vector<16x8xbf16>, vector<16x8xbf16>, vector<16x16xf32> -> vector<16x16xf32>
    %cst_702 = arith.constant dense<0xFF800000> : vector<16xf32>
    %769 = vector.multi_reduction <maximumf>, %768, %cst_702 [1] : vector<16x16xf32> to vector<16xf32>
    %770 = vector.shape_cast %769 : vector<16xf32> to vector<16x1xf32>
    %771 = vector.broadcast %770 : vector<16x1xf32> to vector<16x16xf32>
    %772 = arith.subf %768, %771 : vector<16x16xf32>
    %773 = math.exp %772 : vector<16x16xf32>
    %cst_703 = arith.constant dense<0.000000e+00> : vector<16xf32>
    %774 = vector.multi_reduction <add>, %773, %cst_703 [1] : vector<16x16xf32> to vector<16xf32>
    %775 = vector.shape_cast %774 : vector<16xf32> to vector<16x1xf32>
    %776 = tpu.reciprocal %775 {approx = true} : vector<16x1xf32> -> vector<16x1xf32>
    %777 = vector.broadcast %776 : vector<16x1xf32> to vector<16x16xf32>
    %778 = arith.mulf %773, %777 : vector<16x16xf32>
    %779 = arith.truncf %778 : vector<16x16xf32> to vector<16x16xbf16>
    %780 = arith.truncf %765 : vector<16x8xf32> to vector<16x8xbf16>
    %cst_704 = arith.constant dense<0.000000e+00> : vector<16x8xf32>
    %781 = tpu.matmul %779, %780, %cst_704 {dimension_numbers = #tpu.dot_dimension_numbers<[1], [0], [0], [1], [0, 0, 1, 1], [], []>} : vector<16x16xbf16>, vector<16x8xbf16>, vector<16x8xf32> -> vector<16x8xf32>
    %782 = arith.truncf %781 : vector<16x8xf32> to vector<16x8xbf16>
    %c1_705 = arith.constant 1 : index
    %c1_706 = arith.constant 1 : index
    %c0_707 = arith.constant 0 : index
    %c0_708 = arith.constant 0 : index
    %c0_709 = arith.constant 0 : index
    %783 = vector.load %arg9[%c1_705, %c1_706, %c0_707, %c0_708, %c0_709] : memref<2x2x4x8x32xbf16, #tpu.memory_space<vmem>>, vector<1x1x1x8x32xbf16>
    %784 = vector.shape_cast %783 : vector<1x1x1x8x32xbf16> to vector<8x32xbf16>
    %cst_710 = arith.constant dense<0.000000e+00> : vector<16x32xf32>
    %785 = tpu.matmul %782, %784, %cst_710 {dimension_numbers = #tpu.dot_dimension_numbers<[1], [0], [0], [1], [0, 0, 1, 1], [], []>} : vector<16x8xbf16>, vector<8x32xbf16>, vector<16x32xf32> -> vector<16x32xf32>
    %786 = arith.addf %744, %785 : vector<16x32xf32>
    %c1_711 = arith.constant 1 : index
    %c1_712 = arith.constant 1 : index
    %c1_713 = arith.constant 1 : index
    %c0_714 = arith.constant 0 : index
    %c0_715 = arith.constant 0 : index
    %787 = vector.load %arg3[%c1_711, %c1_712, %c1_713, %c0_714, %c0_715] : memref<2x2x4x32x8xbf16, #tpu.memory_space<vmem>>, vector<1x1x1x32x8xbf16>
    %788 = vector.shape_cast %787 : vector<1x1x1x32x8xbf16> to vector<32x8xbf16>
    %cst_716 = arith.constant dense<0.000000e+00> : vector<16x8xf32>
    %789 = tpu.matmul %743, %788, %cst_716 {dimension_numbers = #tpu.dot_dimension_numbers<[1], [0], [0], [1], [0, 0, 1, 1], [], []>} : vector<16x32xbf16>, vector<32x8xbf16>, vector<16x8xf32> -> vector<16x8xf32>
    %c1_717 = arith.constant 1 : index
    %c1_718 = arith.constant 1 : index
    %c1_719 = arith.constant 1 : index
    %c0_720 = arith.constant 0 : index
    %c0_721 = arith.constant 0 : index
    %790 = vector.load %arg6[%c1_717, %c1_718, %c1_719, %c0_720, %c0_721] : memref<2x2x4x1x8xf32, #tpu.memory_space<vmem>>, vector<1x1x1x1x8xf32>
    %791 = vector.shape_cast %790 : vector<1x1x1x1x8xf32> to vector<1x8xf32>
    %792 = vector.broadcast %791 : vector<1x8xf32> to vector<16x8xf32>
    %793 = arith.addf %789, %792 : vector<16x8xf32>
    %c1_722 = arith.constant 1 : index
    %c1_723 = arith.constant 1 : index
    %c1_724 = arith.constant 1 : index
    %c0_725 = arith.constant 0 : index
    %c0_726 = arith.constant 0 : index
    %794 = vector.load %arg4[%c1_722, %c1_723, %c1_724, %c0_725, %c0_726] : memref<2x2x4x32x8xbf16, #tpu.memory_space<vmem>>, vector<1x1x1x32x8xbf16>
    %795 = vector.shape_cast %794 : vector<1x1x1x32x8xbf16> to vector<32x8xbf16>
    %cst_727 = arith.constant dense<0.000000e+00> : vector<16x8xf32>
    %796 = tpu.matmul %743, %795, %cst_727 {dimension_numbers = #tpu.dot_dimension_numbers<[1], [0], [0], [1], [0, 0, 1, 1], [], []>} : vector<16x32xbf16>, vector<32x8xbf16>, vector<16x8xf32> -> vector<16x8xf32>
    %c1_728 = arith.constant 1 : index
    %c1_729 = arith.constant 1 : index
    %c1_730 = arith.constant 1 : index
    %c0_731 = arith.constant 0 : index
    %c0_732 = arith.constant 0 : index
    %797 = vector.load %arg7[%c1_728, %c1_729, %c1_730, %c0_731, %c0_732] : memref<2x2x4x1x8xf32, #tpu.memory_space<vmem>>, vector<1x1x1x1x8xf32>
    %798 = vector.shape_cast %797 : vector<1x1x1x1x8xf32> to vector<1x8xf32>
    %799 = vector.broadcast %798 : vector<1x8xf32> to vector<16x8xf32>
    %800 = arith.addf %796, %799 : vector<16x8xf32>
    %c1_733 = arith.constant 1 : index
    %c1_734 = arith.constant 1 : index
    %c1_735 = arith.constant 1 : index
    %c0_736 = arith.constant 0 : index
    %c0_737 = arith.constant 0 : index
    %801 = vector.load %arg5[%c1_733, %c1_734, %c1_735, %c0_736, %c0_737] : memref<2x2x4x32x8xbf16, #tpu.memory_space<vmem>>, vector<1x1x1x32x8xbf16>
    %802 = vector.shape_cast %801 : vector<1x1x1x32x8xbf16> to vector<32x8xbf16>
    %cst_738 = arith.constant dense<0.000000e+00> : vector<16x8xf32>
    %803 = tpu.matmul %743, %802, %cst_738 {dimension_numbers = #tpu.dot_dimension_numbers<[1], [0], [0], [1], [0, 0, 1, 1], [], []>} : vector<16x32xbf16>, vector<32x8xbf16>, vector<16x8xf32> -> vector<16x8xf32>
    %c1_739 = arith.constant 1 : index
    %c1_740 = arith.constant 1 : index
    %c1_741 = arith.constant 1 : index
    %c0_742 = arith.constant 0 : index
    %c0_743 = arith.constant 0 : index
    %804 = vector.load %arg8[%c1_739, %c1_740, %c1_741, %c0_742, %c0_743] : memref<2x2x4x1x8xf32, #tpu.memory_space<vmem>>, vector<1x1x1x1x8xf32>
    %805 = vector.shape_cast %804 : vector<1x1x1x1x8xf32> to vector<1x8xf32>
    %806 = vector.broadcast %805 : vector<1x8xf32> to vector<16x8xf32>
    %807 = arith.addf %803, %806 : vector<16x8xf32>
    %808 = arith.truncf %793 : vector<16x8xf32> to vector<16x8xbf16>
    %809 = arith.truncf %800 : vector<16x8xf32> to vector<16x8xbf16>
    %cst_744 = arith.constant dense<0.000000e+00> : vector<16x16xf32>
    %810 = tpu.matmul %808, %809, %cst_744 {dimension_numbers = #tpu.dot_dimension_numbers<[1], [1], [0], [0], [0, 0, 1, 0], [], []>} : vector<16x8xbf16>, vector<16x8xbf16>, vector<16x16xf32> -> vector<16x16xf32>
    %cst_745 = arith.constant dense<0xFF800000> : vector<16xf32>
    %811 = vector.multi_reduction <maximumf>, %810, %cst_745 [1] : vector<16x16xf32> to vector<16xf32>
    %812 = vector.shape_cast %811 : vector<16xf32> to vector<16x1xf32>
    %813 = vector.broadcast %812 : vector<16x1xf32> to vector<16x16xf32>
    %814 = arith.subf %810, %813 : vector<16x16xf32>
    %815 = math.exp %814 : vector<16x16xf32>
    %cst_746 = arith.constant dense<0.000000e+00> : vector<16xf32>
    %816 = vector.multi_reduction <add>, %815, %cst_746 [1] : vector<16x16xf32> to vector<16xf32>
    %817 = vector.shape_cast %816 : vector<16xf32> to vector<16x1xf32>
    %818 = tpu.reciprocal %817 {approx = true} : vector<16x1xf32> -> vector<16x1xf32>
    %819 = vector.broadcast %818 : vector<16x1xf32> to vector<16x16xf32>
    %820 = arith.mulf %815, %819 : vector<16x16xf32>
    %821 = arith.truncf %820 : vector<16x16xf32> to vector<16x16xbf16>
    %822 = arith.truncf %807 : vector<16x8xf32> to vector<16x8xbf16>
    %cst_747 = arith.constant dense<0.000000e+00> : vector<16x8xf32>
    %823 = tpu.matmul %821, %822, %cst_747 {dimension_numbers = #tpu.dot_dimension_numbers<[1], [0], [0], [1], [0, 0, 1, 1], [], []>} : vector<16x16xbf16>, vector<16x8xbf16>, vector<16x8xf32> -> vector<16x8xf32>
    %824 = arith.truncf %823 : vector<16x8xf32> to vector<16x8xbf16>
    %c1_748 = arith.constant 1 : index
    %c1_749 = arith.constant 1 : index
    %c1_750 = arith.constant 1 : index
    %c0_751 = arith.constant 0 : index
    %c0_752 = arith.constant 0 : index
    %825 = vector.load %arg9[%c1_748, %c1_749, %c1_750, %c0_751, %c0_752] : memref<2x2x4x8x32xbf16, #tpu.memory_space<vmem>>, vector<1x1x1x8x32xbf16>
    %826 = vector.shape_cast %825 : vector<1x1x1x8x32xbf16> to vector<8x32xbf16>
    %cst_753 = arith.constant dense<0.000000e+00> : vector<16x32xf32>
    %827 = tpu.matmul %824, %826, %cst_753 {dimension_numbers = #tpu.dot_dimension_numbers<[1], [0], [0], [1], [0, 0, 1, 1], [], []>} : vector<16x8xbf16>, vector<8x32xbf16>, vector<16x32xf32> -> vector<16x32xf32>
    %828 = arith.addf %786, %827 : vector<16x32xf32>
    %c1_754 = arith.constant 1 : index
    %c1_755 = arith.constant 1 : index
    %c2_756 = arith.constant 2 : index
    %c0_757 = arith.constant 0 : index
    %c0_758 = arith.constant 0 : index
    %829 = vector.load %arg3[%c1_754, %c1_755, %c2_756, %c0_757, %c0_758] : memref<2x2x4x32x8xbf16, #tpu.memory_space<vmem>>, vector<1x1x1x32x8xbf16>
    %830 = vector.shape_cast %829 : vector<1x1x1x32x8xbf16> to vector<32x8xbf16>
    %cst_759 = arith.constant dense<0.000000e+00> : vector<16x8xf32>
    %831 = tpu.matmul %743, %830, %cst_759 {dimension_numbers = #tpu.dot_dimension_numbers<[1], [0], [0], [1], [0, 0, 1, 1], [], []>} : vector<16x32xbf16>, vector<32x8xbf16>, vector<16x8xf32> -> vector<16x8xf32>
    %c1_760 = arith.constant 1 : index
    %c1_761 = arith.constant 1 : index
    %c2_762 = arith.constant 2 : index
    %c0_763 = arith.constant 0 : index
    %c0_764 = arith.constant 0 : index
    %832 = vector.load %arg6[%c1_760, %c1_761, %c2_762, %c0_763, %c0_764] : memref<2x2x4x1x8xf32, #tpu.memory_space<vmem>>, vector<1x1x1x1x8xf32>
    %833 = vector.shape_cast %832 : vector<1x1x1x1x8xf32> to vector<1x8xf32>
    %834 = vector.broadcast %833 : vector<1x8xf32> to vector<16x8xf32>
    %835 = arith.addf %831, %834 : vector<16x8xf32>
    %c1_765 = arith.constant 1 : index
    %c1_766 = arith.constant 1 : index
    %c2_767 = arith.constant 2 : index
    %c0_768 = arith.constant 0 : index
    %c0_769 = arith.constant 0 : index
    %836 = vector.load %arg4[%c1_765, %c1_766, %c2_767, %c0_768, %c0_769] : memref<2x2x4x32x8xbf16, #tpu.memory_space<vmem>>, vector<1x1x1x32x8xbf16>
    %837 = vector.shape_cast %836 : vector<1x1x1x32x8xbf16> to vector<32x8xbf16>
    %cst_770 = arith.constant dense<0.000000e+00> : vector<16x8xf32>
    %838 = tpu.matmul %743, %837, %cst_770 {dimension_numbers = #tpu.dot_dimension_numbers<[1], [0], [0], [1], [0, 0, 1, 1], [], []>} : vector<16x32xbf16>, vector<32x8xbf16>, vector<16x8xf32> -> vector<16x8xf32>
    %c1_771 = arith.constant 1 : index
    %c1_772 = arith.constant 1 : index
    %c2_773 = arith.constant 2 : index
    %c0_774 = arith.constant 0 : index
    %c0_775 = arith.constant 0 : index
    %839 = vector.load %arg7[%c1_771, %c1_772, %c2_773, %c0_774, %c0_775] : memref<2x2x4x1x8xf32, #tpu.memory_space<vmem>>, vector<1x1x1x1x8xf32>
    %840 = vector.shape_cast %839 : vector<1x1x1x1x8xf32> to vector<1x8xf32>
    %841 = vector.broadcast %840 : vector<1x8xf32> to vector<16x8xf32>
    %842 = arith.addf %838, %841 : vector<16x8xf32>
    %c1_776 = arith.constant 1 : index
    %c1_777 = arith.constant 1 : index
    %c2_778 = arith.constant 2 : index
    %c0_779 = arith.constant 0 : index
    %c0_780 = arith.constant 0 : index
    %843 = vector.load %arg5[%c1_776, %c1_777, %c2_778, %c0_779, %c0_780] : memref<2x2x4x32x8xbf16, #tpu.memory_space<vmem>>, vector<1x1x1x32x8xbf16>
    %844 = vector.shape_cast %843 : vector<1x1x1x32x8xbf16> to vector<32x8xbf16>
    %cst_781 = arith.constant dense<0.000000e+00> : vector<16x8xf32>
    %845 = tpu.matmul %743, %844, %cst_781 {dimension_numbers = #tpu.dot_dimension_numbers<[1], [0], [0], [1], [0, 0, 1, 1], [], []>} : vector<16x32xbf16>, vector<32x8xbf16>, vector<16x8xf32> -> vector<16x8xf32>
    %c1_782 = arith.constant 1 : index
    %c1_783 = arith.constant 1 : index
    %c2_784 = arith.constant 2 : index
    %c0_785 = arith.constant 0 : index
    %c0_786 = arith.constant 0 : index
    %846 = vector.load %arg8[%c1_782, %c1_783, %c2_784, %c0_785, %c0_786] : memref<2x2x4x1x8xf32, #tpu.memory_space<vmem>>, vector<1x1x1x1x8xf32>
    %847 = vector.shape_cast %846 : vector<1x1x1x1x8xf32> to vector<1x8xf32>
    %848 = vector.broadcast %847 : vector<1x8xf32> to vector<16x8xf32>
    %849 = arith.addf %845, %848 : vector<16x8xf32>
    %850 = arith.truncf %835 : vector<16x8xf32> to vector<16x8xbf16>
    %851 = arith.truncf %842 : vector<16x8xf32> to vector<16x8xbf16>
    %cst_787 = arith.constant dense<0.000000e+00> : vector<16x16xf32>
    %852 = tpu.matmul %850, %851, %cst_787 {dimension_numbers = #tpu.dot_dimension_numbers<[1], [1], [0], [0], [0, 0, 1, 0], [], []>} : vector<16x8xbf16>, vector<16x8xbf16>, vector<16x16xf32> -> vector<16x16xf32>
    %cst_788 = arith.constant dense<0xFF800000> : vector<16xf32>
    %853 = vector.multi_reduction <maximumf>, %852, %cst_788 [1] : vector<16x16xf32> to vector<16xf32>
    %854 = vector.shape_cast %853 : vector<16xf32> to vector<16x1xf32>
    %855 = vector.broadcast %854 : vector<16x1xf32> to vector<16x16xf32>
    %856 = arith.subf %852, %855 : vector<16x16xf32>
    %857 = math.exp %856 : vector<16x16xf32>
    %cst_789 = arith.constant dense<0.000000e+00> : vector<16xf32>
    %858 = vector.multi_reduction <add>, %857, %cst_789 [1] : vector<16x16xf32> to vector<16xf32>
    %859 = vector.shape_cast %858 : vector<16xf32> to vector<16x1xf32>
    %860 = tpu.reciprocal %859 {approx = true} : vector<16x1xf32> -> vector<16x1xf32>
    %861 = vector.broadcast %860 : vector<16x1xf32> to vector<16x16xf32>
    %862 = arith.mulf %857, %861 : vector<16x16xf32>
    %863 = arith.truncf %862 : vector<16x16xf32> to vector<16x16xbf16>
    %864 = arith.truncf %849 : vector<16x8xf32> to vector<16x8xbf16>
    %cst_790 = arith.constant dense<0.000000e+00> : vector<16x8xf32>
    %865 = tpu.matmul %863, %864, %cst_790 {dimension_numbers = #tpu.dot_dimension_numbers<[1], [0], [0], [1], [0, 0, 1, 1], [], []>} : vector<16x16xbf16>, vector<16x8xbf16>, vector<16x8xf32> -> vector<16x8xf32>
    %866 = arith.truncf %865 : vector<16x8xf32> to vector<16x8xbf16>
    %c1_791 = arith.constant 1 : index
    %c1_792 = arith.constant 1 : index
    %c2_793 = arith.constant 2 : index
    %c0_794 = arith.constant 0 : index
    %c0_795 = arith.constant 0 : index
    %867 = vector.load %arg9[%c1_791, %c1_792, %c2_793, %c0_794, %c0_795] : memref<2x2x4x8x32xbf16, #tpu.memory_space<vmem>>, vector<1x1x1x8x32xbf16>
    %868 = vector.shape_cast %867 : vector<1x1x1x8x32xbf16> to vector<8x32xbf16>
    %cst_796 = arith.constant dense<0.000000e+00> : vector<16x32xf32>
    %869 = tpu.matmul %866, %868, %cst_796 {dimension_numbers = #tpu.dot_dimension_numbers<[1], [0], [0], [1], [0, 0, 1, 1], [], []>} : vector<16x8xbf16>, vector<8x32xbf16>, vector<16x32xf32> -> vector<16x32xf32>
    %870 = arith.addf %828, %869 : vector<16x32xf32>
    %c1_797 = arith.constant 1 : index
    %c1_798 = arith.constant 1 : index
    %c3_799 = arith.constant 3 : index
    %c0_800 = arith.constant 0 : index
    %c0_801 = arith.constant 0 : index
    %871 = vector.load %arg3[%c1_797, %c1_798, %c3_799, %c0_800, %c0_801] : memref<2x2x4x32x8xbf16, #tpu.memory_space<vmem>>, vector<1x1x1x32x8xbf16>
    %872 = vector.shape_cast %871 : vector<1x1x1x32x8xbf16> to vector<32x8xbf16>
    %cst_802 = arith.constant dense<0.000000e+00> : vector<16x8xf32>
    %873 = tpu.matmul %743, %872, %cst_802 {dimension_numbers = #tpu.dot_dimension_numbers<[1], [0], [0], [1], [0, 0, 1, 1], [], []>} : vector<16x32xbf16>, vector<32x8xbf16>, vector<16x8xf32> -> vector<16x8xf32>
    %c1_803 = arith.constant 1 : index
    %c1_804 = arith.constant 1 : index
    %c3_805 = arith.constant 3 : index
    %c0_806 = arith.constant 0 : index
    %c0_807 = arith.constant 0 : index
    %874 = vector.load %arg6[%c1_803, %c1_804, %c3_805, %c0_806, %c0_807] : memref<2x2x4x1x8xf32, #tpu.memory_space<vmem>>, vector<1x1x1x1x8xf32>
    %875 = vector.shape_cast %874 : vector<1x1x1x1x8xf32> to vector<1x8xf32>
    %876 = vector.broadcast %875 : vector<1x8xf32> to vector<16x8xf32>
    %877 = arith.addf %873, %876 : vector<16x8xf32>
    %c1_808 = arith.constant 1 : index
    %c1_809 = arith.constant 1 : index
    %c3_810 = arith.constant 3 : index
    %c0_811 = arith.constant 0 : index
    %c0_812 = arith.constant 0 : index
    %878 = vector.load %arg4[%c1_808, %c1_809, %c3_810, %c0_811, %c0_812] : memref<2x2x4x32x8xbf16, #tpu.memory_space<vmem>>, vector<1x1x1x32x8xbf16>
    %879 = vector.shape_cast %878 : vector<1x1x1x32x8xbf16> to vector<32x8xbf16>
    %cst_813 = arith.constant dense<0.000000e+00> : vector<16x8xf32>
    %880 = tpu.matmul %743, %879, %cst_813 {dimension_numbers = #tpu.dot_dimension_numbers<[1], [0], [0], [1], [0, 0, 1, 1], [], []>} : vector<16x32xbf16>, vector<32x8xbf16>, vector<16x8xf32> -> vector<16x8xf32>
    %c1_814 = arith.constant 1 : index
    %c1_815 = arith.constant 1 : index
    %c3_816 = arith.constant 3 : index
    %c0_817 = arith.constant 0 : index
    %c0_818 = arith.constant 0 : index
    %881 = vector.load %arg7[%c1_814, %c1_815, %c3_816, %c0_817, %c0_818] : memref<2x2x4x1x8xf32, #tpu.memory_space<vmem>>, vector<1x1x1x1x8xf32>
    %882 = vector.shape_cast %881 : vector<1x1x1x1x8xf32> to vector<1x8xf32>
    %883 = vector.broadcast %882 : vector<1x8xf32> to vector<16x8xf32>
    %884 = arith.addf %880, %883 : vector<16x8xf32>
    %c1_819 = arith.constant 1 : index
    %c1_820 = arith.constant 1 : index
    %c3_821 = arith.constant 3 : index
    %c0_822 = arith.constant 0 : index
    %c0_823 = arith.constant 0 : index
    %885 = vector.load %arg5[%c1_819, %c1_820, %c3_821, %c0_822, %c0_823] : memref<2x2x4x32x8xbf16, #tpu.memory_space<vmem>>, vector<1x1x1x32x8xbf16>
    %886 = vector.shape_cast %885 : vector<1x1x1x32x8xbf16> to vector<32x8xbf16>
    %cst_824 = arith.constant dense<0.000000e+00> : vector<16x8xf32>
    %887 = tpu.matmul %743, %886, %cst_824 {dimension_numbers = #tpu.dot_dimension_numbers<[1], [0], [0], [1], [0, 0, 1, 1], [], []>} : vector<16x32xbf16>, vector<32x8xbf16>, vector<16x8xf32> -> vector<16x8xf32>
    %c1_825 = arith.constant 1 : index
    %c1_826 = arith.constant 1 : index
    %c3_827 = arith.constant 3 : index
    %c0_828 = arith.constant 0 : index
    %c0_829 = arith.constant 0 : index
    %888 = vector.load %arg8[%c1_825, %c1_826, %c3_827, %c0_828, %c0_829] : memref<2x2x4x1x8xf32, #tpu.memory_space<vmem>>, vector<1x1x1x1x8xf32>
    %889 = vector.shape_cast %888 : vector<1x1x1x1x8xf32> to vector<1x8xf32>
    %890 = vector.broadcast %889 : vector<1x8xf32> to vector<16x8xf32>
    %891 = arith.addf %887, %890 : vector<16x8xf32>
    %892 = arith.truncf %877 : vector<16x8xf32> to vector<16x8xbf16>
    %893 = arith.truncf %884 : vector<16x8xf32> to vector<16x8xbf16>
    %cst_830 = arith.constant dense<0.000000e+00> : vector<16x16xf32>
    %894 = tpu.matmul %892, %893, %cst_830 {dimension_numbers = #tpu.dot_dimension_numbers<[1], [1], [0], [0], [0, 0, 1, 0], [], []>} : vector<16x8xbf16>, vector<16x8xbf16>, vector<16x16xf32> -> vector<16x16xf32>
    %cst_831 = arith.constant dense<0xFF800000> : vector<16xf32>
    %895 = vector.multi_reduction <maximumf>, %894, %cst_831 [1] : vector<16x16xf32> to vector<16xf32>
    %896 = vector.shape_cast %895 : vector<16xf32> to vector<16x1xf32>
    %897 = vector.broadcast %896 : vector<16x1xf32> to vector<16x16xf32>
    %898 = arith.subf %894, %897 : vector<16x16xf32>
    %899 = math.exp %898 : vector<16x16xf32>
    %cst_832 = arith.constant dense<0.000000e+00> : vector<16xf32>
    %900 = vector.multi_reduction <add>, %899, %cst_832 [1] : vector<16x16xf32> to vector<16xf32>
    %901 = vector.shape_cast %900 : vector<16xf32> to vector<16x1xf32>
    %902 = tpu.reciprocal %901 {approx = true} : vector<16x1xf32> -> vector<16x1xf32>
    %903 = vector.broadcast %902 : vector<16x1xf32> to vector<16x16xf32>
    %904 = arith.mulf %899, %903 : vector<16x16xf32>
    %905 = arith.truncf %904 : vector<16x16xf32> to vector<16x16xbf16>
    %906 = arith.truncf %891 : vector<16x8xf32> to vector<16x8xbf16>
    %cst_833 = arith.constant dense<0.000000e+00> : vector<16x8xf32>
    %907 = tpu.matmul %905, %906, %cst_833 {dimension_numbers = #tpu.dot_dimension_numbers<[1], [0], [0], [1], [0, 0, 1, 1], [], []>} : vector<16x16xbf16>, vector<16x8xbf16>, vector<16x8xf32> -> vector<16x8xf32>
    %908 = arith.truncf %907 : vector<16x8xf32> to vector<16x8xbf16>
    %c1_834 = arith.constant 1 : index
    %c1_835 = arith.constant 1 : index
    %c3_836 = arith.constant 3 : index
    %c0_837 = arith.constant 0 : index
    %c0_838 = arith.constant 0 : index
    %909 = vector.load %arg9[%c1_834, %c1_835, %c3_836, %c0_837, %c0_838] : memref<2x2x4x8x32xbf16, #tpu.memory_space<vmem>>, vector<1x1x1x8x32xbf16>
    %910 = vector.shape_cast %909 : vector<1x1x1x8x32xbf16> to vector<8x32xbf16>
    %cst_839 = arith.constant dense<0.000000e+00> : vector<16x32xf32>
    %911 = tpu.matmul %908, %910, %cst_839 {dimension_numbers = #tpu.dot_dimension_numbers<[1], [0], [0], [1], [0, 0, 1, 1], [], []>} : vector<16x8xbf16>, vector<8x32xbf16>, vector<16x32xf32> -> vector<16x32xf32>
    %912 = arith.addf %870, %911 : vector<16x32xf32>
    %c1_840 = arith.constant 1 : index
    %c1_841 = arith.constant 1 : index
    %c0_842 = arith.constant 0 : index
    %c0_843 = arith.constant 0 : index
    %913 = vector.load %arg10[%c1_840, %c1_841, %c0_842, %c0_843] : memref<2x2x1x32xf32, #tpu.memory_space<vmem>>, vector<1x1x1x32xf32>
    %914 = vector.shape_cast %913 : vector<1x1x1x32xf32> to vector<1x32xf32>
    %915 = vector.broadcast %914 : vector<1x32xf32> to vector<16x32xf32>
    %916 = arith.addf %912, %915 : vector<16x32xf32>
    %917 = arith.addf %742, %916 : vector<16x32xf32>
    %c1_844 = arith.constant 1 : index
    %c1_845 = arith.constant 1 : index
    %c0_846 = arith.constant 0 : index
    %c0_847 = arith.constant 0 : index
    %918 = vector.load %arg11[%c1_844, %c1_845, %c0_846, %c0_847] : memref<2x2x1x32xf32, #tpu.memory_space<vmem>>, vector<1x1x1x32xf32>
    %919 = vector.shape_cast %918 : vector<1x1x1x32xf32> to vector<1x32xf32>
    %c1_848 = arith.constant 1 : index
    %c1_849 = arith.constant 1 : index
    %c0_850 = arith.constant 0 : index
    %c0_851 = arith.constant 0 : index
    %920 = vector.load %arg12[%c1_848, %c1_849, %c0_850, %c0_851] : memref<2x2x1x32xf32, #tpu.memory_space<vmem>>, vector<1x1x1x32xf32>
    %921 = vector.shape_cast %920 : vector<1x1x1x32xf32> to vector<1x32xf32>
    %cst_852 = arith.constant dense<0.000000e+00> : vector<16xf32>
    %922 = vector.multi_reduction <add>, %917, %cst_852 [1] : vector<16x32xf32> to vector<16xf32>
    %923 = vector.shape_cast %922 : vector<16xf32> to vector<16x1xf32>
    %cst_853 = arith.constant 3.200000e+01 : f32
    %924 = vector.broadcast %cst_853 : f32 to vector<16x1xf32>
    %925 = arith.divf %923, %924 : vector<16x1xf32>
    %926 = arith.mulf %917, %917 : vector<16x32xf32>
    %cst_854 = arith.constant dense<0.000000e+00> : vector<16xf32>
    %927 = vector.multi_reduction <add>, %926, %cst_854 [1] : vector<16x32xf32> to vector<16xf32>
    %928 = vector.shape_cast %927 : vector<16xf32> to vector<16x1xf32>
    %cst_855 = arith.constant 3.200000e+01 : f32
    %929 = vector.broadcast %cst_855 : f32 to vector<16x1xf32>
    %930 = arith.divf %928, %929 : vector<16x1xf32>
    %931 = arith.mulf %925, %925 : vector<16x1xf32>
    %932 = arith.subf %930, %931 : vector<16x1xf32>
    %933 = vector.broadcast %925 : vector<16x1xf32> to vector<16x32xf32>
    %934 = arith.subf %917, %933 : vector<16x32xf32>
    %cst_856 = arith.constant 9.99999974E-6 : f32
    %935 = vector.broadcast %cst_856 : f32 to vector<16x1xf32>
    %936 = arith.addf %932, %935 : vector<16x1xf32>
    %937 = math.rsqrt %936 : vector<16x1xf32>
    %938 = vector.broadcast %937 : vector<16x1xf32> to vector<16x32xf32>
    %939 = arith.mulf %934, %938 : vector<16x32xf32>
    %940 = vector.broadcast %919 : vector<1x32xf32> to vector<16x32xf32>
    %941 = arith.mulf %939, %940 : vector<16x32xf32>
    %942 = vector.broadcast %921 : vector<1x32xf32> to vector<16x32xf32>
    %943 = arith.addf %941, %942 : vector<16x32xf32>
    %944 = arith.truncf %943 : vector<16x32xf32> to vector<16x32xbf16>
    %c1_857 = arith.constant 1 : index
    %c1_858 = arith.constant 1 : index
    %c0_859 = arith.constant 0 : index
    %c0_860 = arith.constant 0 : index
    %945 = vector.load %arg13[%c1_857, %c1_858, %c0_859, %c0_860] : memref<2x2x32x64xbf16, #tpu.memory_space<vmem>>, vector<1x1x32x64xbf16>
    %946 = vector.shape_cast %945 : vector<1x1x32x64xbf16> to vector<32x64xbf16>
    %cst_861 = arith.constant dense<0.000000e+00> : vector<16x64xf32>
    %947 = tpu.matmul %944, %946, %cst_861 {dimension_numbers = #tpu.dot_dimension_numbers<[1], [0], [0], [1], [0, 0, 1, 1], [], []>} : vector<16x32xbf16>, vector<32x64xbf16>, vector<16x64xf32> -> vector<16x64xf32>
    %c1_862 = arith.constant 1 : index
    %c1_863 = arith.constant 1 : index
    %c0_864 = arith.constant 0 : index
    %c0_865 = arith.constant 0 : index
    %948 = vector.load %arg14[%c1_862, %c1_863, %c0_864, %c0_865] : memref<2x2x1x64xf32, #tpu.memory_space<vmem>>, vector<1x1x1x64xf32>
    %949 = vector.shape_cast %948 : vector<1x1x1x64xf32> to vector<1x64xf32>
    %950 = vector.broadcast %949 : vector<1x64xf32> to vector<16x64xf32>
    %951 = arith.addf %947, %950 : vector<16x64xf32>
    %cst_866 = arith.constant 0.000000e+00 : f32
    %952 = vector.broadcast %cst_866 : f32 to vector<16x64xf32>
    %953 = arith.maximumf %951, %952 : vector<16x64xf32>
    %954 = arith.truncf %953 : vector<16x64xf32> to vector<16x64xbf16>
    %c1_867 = arith.constant 1 : index
    %c1_868 = arith.constant 1 : index
    %c0_869 = arith.constant 0 : index
    %c0_870 = arith.constant 0 : index
    %955 = vector.load %arg15[%c1_867, %c1_868, %c0_869, %c0_870] : memref<2x2x64x32xbf16, #tpu.memory_space<vmem>>, vector<1x1x64x32xbf16>
    %956 = vector.shape_cast %955 : vector<1x1x64x32xbf16> to vector<64x32xbf16>
    %cst_871 = arith.constant dense<0.000000e+00> : vector<16x32xf32>
    %957 = tpu.matmul %954, %956, %cst_871 {dimension_numbers = #tpu.dot_dimension_numbers<[1], [0], [0], [1], [0, 0, 1, 1], [], []>} : vector<16x64xbf16>, vector<64x32xbf16>, vector<16x32xf32> -> vector<16x32xf32>
    %c1_872 = arith.constant 1 : index
    %c1_873 = arith.constant 1 : index
    %c0_874 = arith.constant 0 : index
    %c0_875 = arith.constant 0 : index
    %958 = vector.load %arg16[%c1_872, %c1_873, %c0_874, %c0_875] : memref<2x2x1x32xf32, #tpu.memory_space<vmem>>, vector<1x1x1x32xf32>
    %959 = vector.shape_cast %958 : vector<1x1x1x32xf32> to vector<1x32xf32>
    %960 = vector.broadcast %959 : vector<1x32xf32> to vector<16x32xf32>
    %961 = arith.addf %957, %960 : vector<16x32xf32>
    %962 = arith.addf %943, %961 : vector<16x32xf32>
    %c1_876 = arith.constant 1 : index
    %c1_877 = arith.constant 1 : index
    %c0_878 = arith.constant 0 : index
    %c0_879 = arith.constant 0 : index
    %963 = vector.load %arg17[%c1_876, %c1_877, %c0_878, %c0_879] : memref<2x2x1x32xf32, #tpu.memory_space<vmem>>, vector<1x1x1x32xf32>
    %964 = vector.shape_cast %963 : vector<1x1x1x32xf32> to vector<1x32xf32>
    %c1_880 = arith.constant 1 : index
    %c1_881 = arith.constant 1 : index
    %c0_882 = arith.constant 0 : index
    %c0_883 = arith.constant 0 : index
    %965 = vector.load %arg18[%c1_880, %c1_881, %c0_882, %c0_883] : memref<2x2x1x32xf32, #tpu.memory_space<vmem>>, vector<1x1x1x32xf32>
    %966 = vector.shape_cast %965 : vector<1x1x1x32xf32> to vector<1x32xf32>
    %cst_884 = arith.constant dense<0.000000e+00> : vector<16xf32>
    %967 = vector.multi_reduction <add>, %962, %cst_884 [1] : vector<16x32xf32> to vector<16xf32>
    %968 = vector.shape_cast %967 : vector<16xf32> to vector<16x1xf32>
    %cst_885 = arith.constant 3.200000e+01 : f32
    %969 = vector.broadcast %cst_885 : f32 to vector<16x1xf32>
    %970 = arith.divf %968, %969 : vector<16x1xf32>
    %971 = arith.mulf %962, %962 : vector<16x32xf32>
    %cst_886 = arith.constant dense<0.000000e+00> : vector<16xf32>
    %972 = vector.multi_reduction <add>, %971, %cst_886 [1] : vector<16x32xf32> to vector<16xf32>
    %973 = vector.shape_cast %972 : vector<16xf32> to vector<16x1xf32>
    %cst_887 = arith.constant 3.200000e+01 : f32
    %974 = vector.broadcast %cst_887 : f32 to vector<16x1xf32>
    %975 = arith.divf %973, %974 : vector<16x1xf32>
    %976 = arith.mulf %970, %970 : vector<16x1xf32>
    %977 = arith.subf %975, %976 : vector<16x1xf32>
    %978 = vector.broadcast %970 : vector<16x1xf32> to vector<16x32xf32>
    %979 = arith.subf %962, %978 : vector<16x32xf32>
    %cst_888 = arith.constant 9.99999974E-6 : f32
    %980 = vector.broadcast %cst_888 : f32 to vector<16x1xf32>
    %981 = arith.addf %977, %980 : vector<16x1xf32>
    %982 = math.rsqrt %981 : vector<16x1xf32>
    %983 = vector.broadcast %982 : vector<16x1xf32> to vector<16x32xf32>
    %984 = arith.mulf %979, %983 : vector<16x32xf32>
    %985 = vector.broadcast %964 : vector<1x32xf32> to vector<16x32xf32>
    %986 = arith.mulf %984, %985 : vector<16x32xf32>
    %987 = vector.broadcast %966 : vector<1x32xf32> to vector<16x32xf32>
    %988 = arith.addf %986, %987 : vector<16x32xf32>
    %c0_889 = arith.constant 0 : index
    %c0_890 = arith.constant 0 : index
    %c0_891 = arith.constant 0 : index
    %989 = vector.load %arg19[%c0_889, %c0_890, %c0_891] : memref<1x16x64xf32, #tpu.memory_space<vmem>>, vector<1x16x32xf32>
    %990 = vector.shape_cast %989 : vector<1x16x32xf32> to vector<16x32xf32>
    %991 = vector.shape_cast %496 : vector<16x32xf32> to vector<1x16x32xf32>
    tpu.vector_store %arg19[%c0_889, %c0_890, %c0_891], %991 {strides = array<i32>} : memref<1x16x64xf32, #tpu.memory_space<vmem>>, vector<1x16x32xf32>,
    %c0_892 = arith.constant 0 : index
    %c0_893 = arith.constant 0 : index
    %c32 = arith.constant 32 : index
    %992 = vector.load %arg19[%c0_892, %c0_893, %c32] : memref<1x16x64xf32, #tpu.memory_space<vmem>>, vector<1x16x32xf32>
    %993 = vector.shape_cast %992 : vector<1x16x32xf32> to vector<16x32xf32>
    %994 = vector.shape_cast %988 : vector<16x32xf32> to vector<1x16x32xf32>
    tpu.vector_store %arg19[%c0_892, %c0_893, %c32], %994 {strides = array<i32>} : memref<1x16x64xf32, #tpu.memory_space<vmem>>, vector<1x16x32xf32>,
    return
  }
  func.func @transform_0(%arg0: i32) -> (i32, i32, i32) {
    %c0_i32 = arith.constant 0 : i32
    %c0_i32_0 = arith.constant 0 : i32
    %c0_i32_1 = arith.constant 0 : i32
    return %arg0, %c0_i32, %c0_i32_0 : i32, i32, i32
  }
  func.func @transform_1(%arg0: i32) -> (i32, i32) {
    %c0_i32 = arith.constant 0 : i32
    %c0_i32_0 = arith.constant 0 : i32
    %c0_i32_1 = arith.constant 0 : i32
    return %c0_i32, %c0_i32_0 : i32, i32
  }
  func.func @transform_2(%arg0: i32) -> (i32, i32, i32, i32, i32) {
    %c0_i32 = arith.constant 0 : i32
    %c0_i32_0 = arith.constant 0 : i32
    %c0_i32_1 = arith.constant 0 : i32
    %c0_i32_2 = arith.constant 0 : i32
    %c0_i32_3 = arith.constant 0 : i32
    %c0_i32_4 = arith.constant 0 : i32
    return %c0_i32, %c0_i32_0, %c0_i32_1, %c0_i32_2, %c0_i32_3 : i32, i32, i32, i32, i32
  }
  func.func @transform_3(%arg0: i32) -> (i32, i32, i32, i32, i32) {
    %c0_i32 = arith.constant 0 : i32
    %c0_i32_0 = arith.constant 0 : i32
    %c0_i32_1 = arith.constant 0 : i32
    %c0_i32_2 = arith.constant 0 : i32
    %c0_i32_3 = arith.constant 0 : i32
    %c0_i32_4 = arith.constant 0 : i32
    return %c0_i32, %c0_i32_0, %c0_i32_1, %c0_i32_2, %c0_i32_3 : i32, i32, i32, i32, i32
  }
  func.func @transform_4(%arg0: i32) -> (i32, i32, i32, i32, i32) {
    %c0_i32 = arith.constant 0 : i32
    %c0_i32_0 = arith.constant 0 : i32
    %c0_i32_1 = arith.constant 0 : i32
    %c0_i32_2 = arith.constant 0 : i32
    %c0_i32_3 = arith.constant 0 : i32
    %c0_i32_4 = arith.constant 0 : i32
    return %c0_i32, %c0_i32_0, %c0_i32_1, %c0_i32_2, %c0_i32_3 : i32, i32, i32, i32, i32
  }
  func.func @transform_5(%arg0: i32) -> (i32, i32, i32, i32, i32) {
    %c0_i32 = arith.constant 0 : i32
    %c0_i32_0 = arith.constant 0 : i32
    %c0_i32_1 = arith.constant 0 : i32
    %c0_i32_2 = arith.constant 0 : i32
    %c0_i32_3 = arith.constant 0 : i32
    %c0_i32_4 = arith.constant 0 : i32
    return %c0_i32, %c0_i32_0, %c0_i32_1, %c0_i32_2, %c0_i32_3 : i32, i32, i32, i32, i32
  }
  func.func @transform_6(%arg0: i32) -> (i32, i32, i32, i32, i32) {
    %c0_i32 = arith.constant 0 : i32
    %c0_i32_0 = arith.constant 0 : i32
    %c0_i32_1 = arith.constant 0 : i32
    %c0_i32_2 = arith.constant 0 : i32
    %c0_i32_3 = arith.constant 0 : i32
    %c0_i32_4 = arith.constant 0 : i32
    return %c0_i32, %c0_i32_0, %c0_i32_1, %c0_i32_2, %c0_i32_3 : i32, i32, i32, i32, i32
  }
  func.func @transform_7(%arg0: i32) -> (i32, i32, i32, i32, i32) {
    %c0_i32 = arith.constant 0 : i32
    %c0_i32_0 = arith.constant 0 : i32
    %c0_i32_1 = arith.constant 0 : i32
    %c0_i32_2 = arith.constant 0 : i32
    %c0_i32_3 = arith.constant 0 : i32
    %c0_i32_4 = arith.constant 0 : i32
    return %c0_i32, %c0_i32_0, %c0_i32_1, %c0_i32_2, %c0_i32_3 : i32, i32, i32, i32, i32
  }
  func.func @transform_8(%arg0: i32) -> (i32, i32, i32, i32, i32) {
    %c0_i32 = arith.constant 0 : i32
    %c0_i32_0 = arith.constant 0 : i32
    %c0_i32_1 = arith.constant 0 : i32
    %c0_i32_2 = arith.constant 0 : i32
    %c0_i32_3 = arith.constant 0 : i32
    %c0_i32_4 = arith.constant 0 : i32
    return %c0_i32, %c0_i32_0, %c0_i32_1, %c0_i32_2, %c0_i32_3 : i32, i32, i32, i32, i32
  }
  func.func @transform_9(%arg0: i32) -> (i32, i32, i32, i32) {
    %c0_i32 = arith.constant 0 : i32
    %c0_i32_0 = arith.constant 0 : i32
    %c0_i32_1 = arith.constant 0 : i32
    %c0_i32_2 = arith.constant 0 : i32
    %c0_i32_3 = arith.constant 0 : i32
    return %c0_i32, %c0_i32_0, %c0_i32_1, %c0_i32_2 : i32, i32, i32, i32
  }
  func.func @transform_10(%arg0: i32) -> (i32, i32, i32, i32) {
    %c0_i32 = arith.constant 0 : i32
    %c0_i32_0 = arith.constant 0 : i32
    %c0_i32_1 = arith.constant 0 : i32
    %c0_i32_2 = arith.constant 0 : i32
    %c0_i32_3 = arith.constant 0 : i32
    return %c0_i32, %c0_i32_0, %c0_i32_1, %c0_i32_2 : i32, i32, i32, i32
  }
  func.func @transform_11(%arg0: i32) -> (i32, i32, i32, i32) {
    %c0_i32 = arith.constant 0 : i32
    %c0_i32_0 = arith.constant 0 : i32
    %c0_i32_1 = arith.constant 0 : i32
    %c0_i32_2 = arith.constant 0 : i32
    %c0_i32_3 = arith.constant 0 : i32
    return %c0_i32, %c0_i32_0, %c0_i32_1, %c0_i32_2 : i32, i32, i32, i32
  }
  func.func @transform_12(%arg0: i32) -> (i32, i32, i32, i32) {
    %c0_i32 = arith.constant 0 : i32
    %c0_i32_0 = arith.constant 0 : i32
    %c0_i32_1 = arith.constant 0 : i32
    %c0_i32_2 = arith.constant 0 : i32
    %c0_i32_3 = arith.constant 0 : i32
    return %c0_i32, %c0_i32_0, %c0_i32_1, %c0_i32_2 : i32, i32, i32, i32
  }
  func.func @transform_13(%arg0: i32) -> (i32, i32, i32, i32) {
    %c0_i32 = arith.constant 0 : i32
    %c0_i32_0 = arith.constant 0 : i32
    %c0_i32_1 = arith.constant 0 : i32
    %c0_i32_2 = arith.constant 0 : i32
    %c0_i32_3 = arith.constant 0 : i32
    return %c0_i32, %c0_i32_0, %c0_i32_1, %c0_i32_2 : i32, i32, i32, i32
  }
  func.func @transform_14(%arg0: i32) -> (i32, i32, i32, i32) {
    %c0_i32 = arith.constant 0 : i32
    %c0_i32_0 = arith.constant 0 : i32
    %c0_i32_1 = arith.constant 0 : i32
    %c0_i32_2 = arith.constant 0 : i32
    %c0_i32_3 = arith.constant 0 : i32
    return %c0_i32, %c0_i32_0, %c0_i32_1, %c0_i32_2 : i32, i32, i32, i32
  }
  func.func @transform_15(%arg0: i32) -> (i32, i32, i32, i32) {
    %c0_i32 = arith.constant 0 : i32
    %c0_i32_0 = arith.constant 0 : i32
    %c0_i32_1 = arith.constant 0 : i32
    %c0_i32_2 = arith.constant 0 : i32
    %c0_i32_3 = arith.constant 0 : i32
    return %c0_i32, %c0_i32_0, %c0_i32_1, %c0_i32_2 : i32, i32, i32, i32
  }
  func.func @transform_16(%arg0: i32) -> (i32, i32, i32, i32) {
    %c0_i32 = arith.constant 0 : i32
    %c0_i32_0 = arith.constant 0 : i32
    %c0_i32_1 = arith.constant 0 : i32
    %c0_i32_2 = arith.constant 0 : i32
    %c0_i32_3 = arith.constant 0 : i32
    return %c0_i32, %c0_i32_0, %c0_i32_1, %c0_i32_2 : i32, i32, i32, i32
  }
  func.func @transform_17(%arg0: i32) -> (i32, i32, i32, i32) {
    %c0_i32 = arith.constant 0 : i32
    %c0_i32_0 = arith.constant 0 : i32
    %c0_i32_1 = arith.constant 0 : i32
    %c0_i32_2 = arith.constant 0 : i32
    %c0_i32_3 = arith.constant 0 : i32
    return %c0_i32, %c0_i32_0, %c0_i32_1, %c0_i32_2 : i32, i32, i32, i32
  }
  func.func @transform_18(%arg0: i32) -> (i32, i32, i32) {
    %c0_i32 = arith.constant 0 : i32
    %c0_i32_0 = arith.constant 0 : i32
    %c0_i32_1 = arith.constant 0 : i32
    return %arg0, %c0_i32, %c0_i32_0 : i32, i32, i32
  }
}

</mosaic_0001>

<bundles_post_ra>
// kernel: graph_transformer_forward.1
= control target key start
LH: loop header
LB: loop body
LE: loop exit
PB: predicated region body
PF: predicated region fallthrough
CT: control target
= control target key end

     0   :  { %s11366_s0 = inlined_call_operand.vmem [shape: f32[4,16,8], index: 0, kind: input, shape index: {}]   ;;  %s11367_s1 = inlined_call_operand.vmem [shape: bf16[8,32], index: 1, kind: input, shape index: {}]   ;;  %s11368_s2 = inlined_call_operand.vmem [shape: bf16[2,2,4,32,8], index: 2, kind: input, shape index: {}]   ;;  %s11369_s3 = inlined_call_operand.vmem [shape: bf16[2,2,4,32,8], index: 3, kind: input, shape index: {}]   ;;  %s11370_s4 = inlined_call_operand.vmem [shape: bf16[2,2,4,32,8], index: 4, kind: input, shape index: {}]   ;;  %s11371_s5 = inlined_call_operand.vmem [shape: f32[2,2,4,1,8], index: 5, kind: input, shape index: {}]   ;;  %s11372_s6 = inlined_call_operand.vmem [shape: f32[2,2,4,1,8], index: 6, kind: input, shape index: {}]   ;;  %s11373_s7 = inlined_call_operand.vmem [shape: f32[2,2,4,1,8], index: 7, kind: input, shape index: {}]   ;;  %s11374_s8 = inlined_call_operand.vmem [shape: bf16[2,2,4,8,32], index: 8, kind: input, shape index: {}]   ;;  %s11375_s9 = inlined_call_operand.vmem [shape: f32[2,2,1,32], index: 9, kind: input, shape index: {}]   ;;  %s11376_s10 = inlined_call_operand.vmem [shape: f32[2,2,1,32], index: 10, kind: input, shape index: {}]   ;;  %s11377_s11 = inlined_call_operand.vmem [shape: f32[2,2,1,32], index: 11, kind: input, shape index: {}]   ;;  %s11378_s12 = inlined_call_operand.vmem [shape: bf16[2,2,32,64], index: 12, kind: input, shape index: {}]   ;;  %s11379_s13 = inlined_call_operand.vmem [shape: f32[2,2,1,64], index: 13, kind: input, shape index: {}]   ;;  %s11380_s14 = inlined_call_operand.vmem [shape: bf16[2,2,64,32], index: 14, kind: input, shape index: {}]   ;;  %s11381_s15 = inlined_call_operand.vmem [shape: f32[2,2,1,32], index: 15, kind: input, shape index: {}]   ;;  %s11382_s16 = inlined_call_operand.vmem [shape: f32[2,2,1,32], index: 16, kind: input, shape index: {}]   ;;  %s11383_s17 = inlined_call_operand.vmem [shape: f32[2,2,1,32], index: 17, kind: input, shape index: {}]   ;;  %s11384_s18 = inlined_call_operand.hbm [shape: f32[4,16,64], index: 18, kind: output, shape index: {}]  }
   0x1   :  { %11392 = sst [smem:[#allocation10_spill]] %s11366_s0 }
   0x2   :  { %11393 = sst [smem:[#allocation11_spill]] %s11367_s1 }
   0x3   :  { %11394 = sst [smem:[#allocation12_spill]] %s11368_s2 }
   0x4   :  { %23 = vsyncpa [#allocation3], 0 }
   0x5   :  { %25 = vsyncpa [#allocation3 + $0x1], 0  ;;  %s9792_s27 = smov 0   ;;  %s9794_s28 = smov 0  }
   0x6   :  { %s9796_s29 = smov 0   ;;  %s9798_s30 = smov 0  }
   0x7 LB: > { %11395 = sst [smem:[#allocation5_spill]] %s9677_s27  ;;  %s9813_s0 = sadd.s32 4294967295, %s9689_s30   ;;  %s9689_s30 = sphi %s9798_s30, %s11407_s30   ;;  %s9685_s29 = sphi %s9796_s29, %s11409_s29   ;;  %s9681_s28 = sphi %s9794_s28, %s11411_s28   ;;  %s9677_s27 = sphi %s9792_s27, %s11410_s27  }
   0x8   : > { %11396 = sst [smem:[#allocation6_spill]] %s9685_s29  ;;  %s7661_s19 = sadd.s32 4294967294, %s9689_s30  }
   0x9   : > { %s9817_s1 = sadd.s32 1, %s9689_s30   ;;  %s421_s20 = sadd.s32 1, %s9685_s29 }
   0xa   : > { %11397 = sst [smem:[#allocation7_spill]] %s9817_s1  ;;  %s418_s21 = ssub.s32 %s9689_s30, %s9817_s1 }
   0xb   : > { %p431_p0 = scmp.ne.s32.totalorder %s9685_s29, %s9681_s28  ;;  %p419_p1 = scmp.eq.s32.totalorder %s418_s21, 0 }
   0xc   : > { %p432_p2 = scmp.eq.s32.totalorder %s9813_s0, 3  ;;  %p437_p3 = scmp.ne.s32.totalorder %s9681_s28, %s9677_s27 }
   0xd   : > { %p438_p4 = scmp.eq.s32.totalorder %s7661_s19, 3  ;;  %p7664_p7 = scmp.ge.s32.totalorder %s9689_s30, 1 }
   0xe   : > { %s9828_s22 = scalar_select %p419_p1, %s9685_s29, %s421_s20  }
   0xf   : > { %p9830_p5 = por %p432_p2, %p431_p0  ;;  %p9834_p6 = por %p438_p4, %p437_p3 }
  0x10   : > { %11398 = sst [smem:[#allocation8_spill]] %s9828_s22  ;;  %p515_p8 = scmp.lt.s32.totalorder %s9689_s30, 5 }
  0x11   : > { %s11400_s23 = scalar_select %p9834_p6, 1, 0 }
  0x12   : > { %p516_p9 = pnand %p7664_p7, %p515_p8 }
  0x13   : > { %11401 = sst [smem:[#allocation9_spill]] %s11400_s23  ;;  %p569_p10 = scmp.lt.s32.totalorder (!%p516_p9), %s9813_s0, 3 }
  0x14   : > { %519 = sbr.rel (%p516_p9) target bundleno = 17591 (0x44b7), region = 92  ;;  %s11402_s26 = sld [smem:[#allocation11_spill]] (!%p516_p9) }
  0x15   : > { %s11403_s25 = sld [smem:[#allocation10_spill]] (!%p516_p9)  ;;  %s566_s22 = sand.u32 (!%p516_p9), 1, %s9681_s28  }
  0x16   : > { %s11404_s1 = sld [smem:[#allocation12_spill]] (!%p516_p9)  ;;  %s9693_s23 = smov (!%p516_p9), 32  }
  0x17   : > { %s8272_s27 = sshll.u32 (!%p516_p9), %s9813_s0, 8 }
  0x19   : > { %vm583_vm0 = vcmask 1043456   ;;  %v9691_v1 = vmov 0.0   ;;  %vm9692_vm1 = vmmov 0   ;;  %s570_s19 = scalar_select %p569_p10, %s9813_s0, 3  ;;  %vm579_vm2 = vcmask 64512   ;;  %v9350_v7 = vld [vmem:[%s11370_s4 + $0x8] sm:$0xff]  }
  0x1a   : > { %v578_v0 = vld [vmem:[%s11402_s26] sm:$0xf]  ;;  %8547 = vmatprep.subr.bf16.mxu0 %v9691_v1  ;;  %8549 = vmatprep.mubr.msk.bf16.mxu0 %vm9692_vm1, %v9691_v1  ;;  %vm652_vm3 = vcmask 261120   ;;  %v9353_v13 = vld [vmem:[%s11369_s3 + $0x8] sm:$0xff]   ;;  %v9357_v44 = vld [vmem:[%s11370_s4 + $0x18] sm:$0xff]   ;;  %vm874_vm4 = vcmask 130048  }
  0x1b   : > { %v585_v2 = vsel %vm583_vm0, %v578_v0, 0  ;;  %8569 = vmatprep.subr.bf16.mxu1 %v9691_v1  ;;  %8573 = vmatprep.mubr.msk.bf16.mxu1 %vm9692_vm1, %v9691_v1  ;;  %s8271_s20 = sshll.u32 %s570_s19, 4  ;;  %v9352_v9 = vld [vmem:[%s11370_s4] sm:$0xff]   ;;  %v9358_v45 = vld [vmem:[%s11370_s4 + $0x10] sm:$0xff]   ;;  %vm2261_vm5 = vcmask 523264   ;;  %s7665_s19 = sshll.u32 %s566_s22, 4 }
  0x1c   : > { %8548 = vmatpush3.bf16.msra.mxu0 %v585_v2  ;;  %s573_s26 = scalar_lea.vmem %s11403_s25, %s8271_s20  ;;  %v9349_v6 = vld [vmem:[%s11404_s1 + $0x8] sm:$0xff]   ;;  %8570 = vmatpush3.bf16.msra.mxu1 %v9350_v7  ;;  %v9351_v8 = vld [vmem:[%s11404_s1] sm:$0xff]   ;;  %v9355_v41 = vld [vmem:[%s11404_s1 + $0x18] sm:$0xff]   ;;  %s568_s24 = scalar_lea.vmem [#allocation2], %s7665_s19  ;;  %vm7582_vm6 = vcmask 523520  }
  0x1d   : > { %8553 = vmatprep.subr.bf16.mxu0 %v9691_v1  ;;  %v575_v3 = vld [vmem:[%s573_s26] sm:$0xff]  ;;  %v576_v4 = vld [vmem:[%s573_s26 + $0x8] sm:$0xff]  ;;  %8571 = vmatprep.subr.bf16.mxu1 %v9691_v1  ;;  %v9356_v43 = vld [vmem:[%s11404_s1 + $0x10] sm:$0xff]   ;;  %s7599_s29 = sshll.u32 %s568_s24, 4  ;;  %s11320_s26 = scalar_lea.hbm %s11384_s18, %s8272_s27  ;;  %s11322_s29 = int_to_ptr.vmem [resolvable:$true] %s7599_s29 }
  0x1e   : > { %v577_v5 = vpack.c.bf16 %v576_v4, %v575_v3  ;;  %v9354_v16 = vld [vmem:[%s11369_s3] sm:$0xff]   ;;  %s11326_s19 = scalar_lea.sflag [#allocation3], %s566_s22  ;;  %s9629_s20 = scalar_lea.vmem %s11322_s29, 256 }
  0x1f   : > { %v7677_v19 = vld [vmem:[%s11373_s7] ss:$0 sm:$0xff]  ;;  %v7688_v53 = vld [vmem:[%s11371_s5 + $0x1] ss:$0 sm:$0xff]  ;;  %p9630_p11 = scmp.ne.s32.totalorder %s11322_s29, %s9629_s20  ;;  %s9694_s0 = smov [#allocation2]  }
  0x20   : > { %8550 = vmatmul.mubr.msk.bf16.vlgmr.msra.gmra.mxu0 %vm579_vm2, %v577_v5  ;;  %8572 = vmatpush3.bf16.msra.mxu1 %v9352_v9  ;;  %v7673_v30 = vld [vmem:[%s11372_s6] ss:$0 sm:$0xff]  ;;  %v7706_v61 = vld [vmem:[%s11373_s7 + $0x1] ss:$0 sm:$0xff]  ;;  %s9633_s21 = sshll.u32 %s9694_s0, 4  ;;  %s9634_s21 = int_to_ptr.vmem [resolvable:$false] %s9633_s21 }
  0x21   : > { %8557 = vmatprep.mubr.msk.bf16.mxu0 %vm9692_vm1, %v9691_v1  ;;  %8554 = vmatpush3.bf16.msra.mxu0 %v9349_v6  ;;  %v7669_v38 = vld [vmem:[%s11371_s5] ss:$0 sm:$0xff]  ;;  %p9631_p12 = pnand %p9630_p11, %p9830_p5  ;;  %s9635_s27 = scalar_lea.vmem %s9634_s21, 512 }
  0x22   : > { %8555 = vmatprep.subr.bf16.mxu0 %v9691_v1  ;;  %8583 = vmatprep.subr.bf16.mxu1 %v9691_v1  ;;  %p9636_p0 = scmp.lt.s32.totalorder %s11322_s29, %s9634_s21  ;;  %p9637_p1 = scmp.lt.s32.totalorder %s9635_s27, %s9629_s20 }
  0x23   : > { %p9632_p13 = pneg %p9631_p12 }
  0x24   : > { %p9638_p2 = por %p9637_p1, %p9636_p0 }
  0x25   : > { %8556 = vmatpush3.bf16.msra.mxu0 %v9351_v8 }
  0x26   : > { %8561 = vmatprep.subr.bf16.mxu0 %v9691_v1  ;;  %p9639_p3 = pnand %p9638_p2, %p9632_p13 }
  0xe0   : > { %v9875_v10 = vpop.f32.mrf.mxu0 }
  0xe2   : > { %v8551_v11 = vpop.f32.mrf.mxu0 }
  0xe4   : > { %v9877_v12 = vpop.f32.mrf.mxu0 }
  0xe5   : > { %v9884_v14 = vpack.c.bf16 %v9877_v12, %v9875_v10 }
  0xe6   : > { %v8552_v15 = vpop.f32.mrf.mxu0 }
  0xe7   : > { %8558 = vmatmul.mubr.msk.bf16.vlgmr.msra.gmra.mxu0 %vm652_vm3, %v9884_v14  ;;  %8574 = vmatmul.mubr.msk.bf16.vlgmr.msra.gmra.mxu1 %vm652_vm3, %v9884_v14 }
  0xe8   : > { %8562 = vmatpush3.bf16.msra.mxu0 %v9353_v13  ;;  %8565 = vmatprep.mubr.msk.bf16.mxu0 %vm9692_vm1, %v9691_v1 }
  0xe9   : > { %8563 = vmatprep.subr.bf16.mxu0 %v9691_v1  ;;  %8585 = vmatprep.mubr.msk.bf16.mxu1 %vm9692_vm1, %v9691_v1 }
  0xec   : > { %8564 = vmatpush3.bf16.msra.mxu0 %v9354_v16 }
  0xed   : > { %8577 = vmatprep.subr.bf16.mxu0 %v9691_v1 }
  0xef   : > { %8566 = vmatmul.mubr.msk.bf16.vlgmr.msra.gmra.mxu0 %vm652_vm3, %v9884_v14 }
  0xf0   : > { %8579 = vmatprep.mubr.msk.bf16.mxu0 %vm9692_vm1, %v9691_v1 }
 0x1a7   : > { %v690_v17 = vpop.f32.mrf.mxu0  ;;  %v818_v18 = vpop.f32.mrf.mxu1 }
 0x1a8   : > { %v819_v24 = vadd.f32 %v7677_v19, %v818_v18  ;;  %v691_v40 = vadd.f32 %v7669_v38, %v690_v17 }
 0x1a9   : > { %v8559_v20 = vpop.f32.mrf.mxu0  ;;  %v8575_v21 = vpop.f32.mrf.mxu1 }
 0x1ab   : > { %v693_v22 = vpop.f32.mrf.mxu0  ;;  %v821_v23 = vpop.f32.mrf.mxu1 }
 0x1ac   : > { %v822_v25 = vadd.f32 %v7677_v19, %v821_v23  ;;  %v694_v39 = vadd.f32 %v7669_v38, %v693_v22 }
 0x1ad   : > { %v8560_v26 = vpop.f32.mrf.mxu0  ;;  %v8576_v27 = vpop.f32.mrf.mxu1 }
 0x1ae   : > { %v898_v28 = vpack.c.bf16 %v822_v25, %v819_v24  ;;  %v825_v42 = vpack.c.bf16 %v694_v39, %v691_v40  ;;  %v9359_v24 = vld [vmem:[%s11369_s3 + $0x18] sm:$0xff]   ;;  %v9360_v26 = vld [vmem:[%s11369_s3 + $0x10] sm:$0xff]  }
 0x1af   : > { %v754_v29 = vpop.f32.mrf.mxu0 }
 0x1b0   : > { %8584 = vmatpush3.bf16.msra.mxu1 %v898_v28  ;;  %v755_v33 = vadd.f32 %v7673_v30, %v754_v29 }
 0x1b1   : > { %v8567_v31 = vpop.f32.mrf.mxu0  ;;  %8597 = vmatprep.subr.bf16.mxu1 %v9691_v1 }
 0x1b3   : > { %v757_v32 = vpop.f32.mrf.mxu0 }
 0x1b4   : > { %v758_v34 = vadd.f32 %v7673_v30, %v757_v32 }
 0x1b5   : > { %v8568_v35 = vpop.f32.mrf.mxu0 }
 0x1b6   : > { %v826_v36 = vpack.c.bf16 %v758_v34, %v755_v33  ;;  %v7697_v33 = vld [vmem:[%s11372_s6 + $0x1] ss:$0 sm:$0xff] }
 0x1b8   : > { %v831_v37 = vsel %vm579_vm2, %v826_v36, 0 }
 0x1b9   : > { %8578 = vmatpush3.bf16.xpose.msra.mxu0 %v831_v37 }
 0x1ba   : > { %8589 = vmatprep.subr.bf16.mxu0 %v9691_v1 }
 0x1c0   : > { %8580 = vmatmul.mubr.msk.bf16.vlgmr.msra.gmra.mxu0 %vm579_vm2, %v825_v42 }
 0x1c1   : > { %8590 = vmatpush3.bf16.msra.mxu0 %v9355_v41  ;;  %8593 = vmatprep.mubr.msk.bf16.mxu0 %vm9692_vm1, %v9691_v1 }
 0x1c2   : > { %8591 = vmatprep.subr.bf16.mxu0 %v9691_v1 }
 0x1c5   : > { %8592 = vmatpush3.bf16.msra.mxu0 %v9356_v43 }
 0x1c6   : > { %8605 = vmatprep.subr.bf16.mxu0 %v9691_v1 }
 0x1c8   : > { %8594 = vmatmul.mubr.msk.bf16.vlgmr.msra.gmra.mxu0 %vm652_vm3, %v9884_v14 }
 0x1c9   : > { %8606 = vmatpush3.bf16.msra.mxu0 %v9357_v44  ;;  %8609 = vmatprep.mubr.msk.bf16.mxu0 %vm9692_vm1, %v9691_v1 }
 0x1ca   : > { %8607 = vmatprep.subr.bf16.mxu0 %v9691_v1 }
 0x1cd   : > { %8608 = vmatpush3.bf16.msra.mxu0 %v9358_v45 }
 0x1ce   : > { %8619 = vmatprep.subr.bf16.mxu0 %v9691_v1 }
 0x1d0   : > { %8610 = vmatmul.mubr.msk.bf16.vlgmr.msra.gmra.mxu0 %vm652_vm3, %v9884_v14 }
 0x1d1   : > { %8621 = vmatprep.mubr.msk.bf16.mxu0 %vm9692_vm1, %v9691_v1 }
 0x280   : > { %v867_v46 = vpop.f32.mrf.mxu0 }
 0x281   : > { %v875_v47 = vsel %vm874_vm4, %v867_v46, -inf }
 0x282   : > { %876 = vmax.xlane.f32.xlu0 %v875_v47  ;;  %v8581_v48 = vpop.f32.mrf.mxu0 }
 0x284   : > { %v870_v49 = vpop.f32.mrf.mxu0 }
 0x285   : > { %v878_v50 = vsel %vm874_vm4, %v870_v49, -inf }
 0x286   : > { %879 = vmax.xlane.f32.xlu0 %v878_v50  ;;  %v8582_v51 = vpop.f32.mrf.mxu0 }
 0x288   : > { %v1004_v52 = vpop.f32.mrf.mxu0 }
 0x289   : > { %v9947_v56 = vadd.f32 %v7688_v53, %v1004_v52 }
 0x28a   : > { %v8595_v54 = vpop.f32.mrf.mxu0 }
 0x28c   : > { %v1007_v55 = vpop.f32.mrf.mxu0 }
 0x28d   : > { %v9949_v57 = vadd.f32 %v7688_v53, %v1007_v55 }
 0x28e   : > { %v8596_v58 = vpop.f32.mrf.mxu0 }
 0x28f   : > { %v1143_v59 = vpack.c.bf16 %v9949_v57, %v9947_v56 }
 0x290   : > { %v1136_v60 = vpop.f32.mrf.mxu0 }
 0x291   : > { %v1137_v0 = vadd.f32 %v7706_v61, %v1136_v60 }
 0x292   : > { %v8611_v62 = vpop.f32.mrf.mxu0 }
 0x294   : > { %v1139_v63 = vpop.f32.mrf.mxu0 }
 0x295   : > { %v1140_v2 = vadd.f32 %v7706_v61, %v1139_v63  ;;  %v944_v61 = vld [vmem:[%s11374_s8] sm:$0xf] }
 0x296   : > { %v8612_v3 = vpop.f32.mrf.mxu0 }
 0x297   : > { %v1215_v4 = vpack.c.bf16 %v1140_v2, %v1137_v0  ;;  %v1314_v2 = vsel %vm583_vm0, %v944_v61, 0  ;;  %v9361_v3 = vld [vmem:[%s11369_s3 + $0x28] sm:$0xff]  }
 0x299   : > { %8620 = vmatpush3.bf16.msra.mxu0 %v1215_v4  ;;  %v9362_v4 = vld [vmem:[%s11369_s3 + $0x20] sm:$0xff]  }
 0x29a   : > { %8631 = vmatprep.subr.bf16.mxu0 %v9691_v1 }
 0x30b   : > { %v877_v5 = vpop.xlane.xlu0 %876 }
 0x30c   : > { %v881_v6 = vsub.f32 %v867_v46, %v877_v5  ;;  %v7712_v5 = vld [vmem:[%s11374_s8 + $0x4] sm:$0xf] }
 0x30e   : > { %v883_v7 = vmul.f32 1.442695, %v881_v6  ;;  %v1267_v6 = vsel %vm583_vm0, %v7712_v5, 0 }
 0x30f   : > { %v880_v8 = vpop.xlane.xlu0 %879 }
 0x310   : > { %9469 = vpow2.f32 %v883_v7  ;;  %v882_v9 = vsub.f32 %v870_v49, %v880_v8 }
 0x312   : > { %v885_v11 = vmul.f32 1.442695, %v882_v9 }
 0x314   : > { %9471 = vpow2.f32 %v885_v11  ;;  %v9363_v11 = vld [vmem:[%s11404_s1 + $0x28] sm:$0xff]  }
 0x31d   : > { %v9470_v13 = vpop.eup %9469 }
 0x31e   : > { %v887_v15 = vsel %vm874_vm4, %v9470_v13, 0.0 }
 0x31f   : > { %888 = vadd.xlane.f32.xlu1 %v887_v15 }
 0x321   : > { %v9472_v16 = vpop.eup %9471 }
 0x322   : > { %v890_v17 = vsel %vm874_vm4, %v9472_v16, 0.0 }
 0x323   : > { %891 = vadd.xlane.f32.xlu1 %v890_v17  ;;  %v9364_v17 = vld [vmem:[%s11404_s1 + $0x20] sm:$0xff]  }
 0x3a8   : > { %v889_v18 = vpop.xlane.xlu1 %888 }
 0x3a9   : > { %9473 = vrcp.f32 %v889_v18 }
 0x3ac   : > { %v892_v19 = vpop.xlane.xlu1 %891 }
 0x3ad   : > { %9475 = vrcp.f32 %v892_v19 }
 0x3b6   : > { %v9474_v20 = vpop.eup %9473 }
 0x3b7   : > { %v895_v22 = vmul.f32 %v9474_v20, %v9470_v13  ;;  %v9365_v20 = vld [vmem:[%s11370_s4 + $0x28] sm:$0xff]  }
 0x3ba   : > { %v9476_v21 = vpop.eup %9475 }
 0x3bb   : > { %v896_v23 = vmul.f32 %v9476_v21, %v9472_v16 }
 0x3bd   : > { %v897_v25 = vpack.c.bf16 %v896_v23, %v895_v22  ;;  %v9366_v23 = vld [vmem:[%s11370_s4 + $0x20] sm:$0xff]  }
 0x3bf   : > { %8586 = vmatmul.mubr.msk.bf16.vlgmr.msra.gmra.mxu1 %vm874_vm4, %v897_v25 }
 0x3c0   : > { %8598 = vmatpush3.bf16.msra.mxu1 %v9359_v24  ;;  %8601 = vmatprep.mubr.msk.bf16.mxu1 %vm9692_vm1, %v9691_v1  ;;  %v7729_v24 = vld [vmem:[%s11372_s6 + $0x2] ss:$0 sm:$0xff] }
 0x3c1   : > { %8599 = vmatprep.subr.bf16.mxu1 %v9691_v1 }
 0x3c4   : > { %8600 = vmatpush3.bf16.msra.mxu1 %v9360_v26 }
 0x3c5   : > { %8613 = vmatprep.subr.bf16.mxu1 %v9691_v1 }
 0x3c7   : > { %8602 = vmatmul.mubr.msk.bf16.vlgmr.msra.gmra.mxu1 %vm652_vm3, %v9884_v14 }
 0x3c8   : > { %8615 = vmatprep.mubr.msk.bf16.mxu1 %vm9692_vm1, %v9691_v1 }
 0x47f   : > { %v936_v27 = vpop.f32.mrf.mxu1 }
 0x481   : > { %v8587_v28 = vpop.f32.mrf.mxu1 }
 0x483   : > { %v939_v29 = vpop.f32.mrf.mxu1 }
 0x484   : > { %v943_v30 = vpack.c.bf16 %v939_v29, %v936_v27 }
 0x485   : > { %v8588_v31 = vpop.f32.mrf.mxu1 }
 0x487   : > { %v1070_v32 = vpop.f32.mrf.mxu1 }
 0x488   : > { %v1071_v36 = vadd.f32 %v7697_v33, %v1070_v32 }
 0x489   : > { %v8603_v34 = vpop.f32.mrf.mxu1 }
 0x48b   : > { %v1073_v35 = vpop.f32.mrf.mxu1 }
 0x48c   : > { %v1074_v37 = vadd.f32 %v7697_v33, %v1073_v35 }
 0x48d   : > { %v8604_v38 = vpop.f32.mrf.mxu1 }
 0x48e   : > { %v1144_v39 = vpack.c.bf16 %v1074_v37, %v1071_v36  ;;  %v7720_v37 = vld [vmem:[%s11371_s5 + $0x2] ss:$0 sm:$0xff] }
 0x490   : > { %v1149_v40 = vsel %vm579_vm2, %v1144_v39, 0 }
 0x491   : > { %8614 = vmatpush3.bf16.xpose.msra.mxu1 %v1149_v40 }
 0x492   : > { %8625 = vmatprep.subr.bf16.mxu1 %v9691_v1 }
 0x498   : > { %8616 = vmatmul.mubr.msk.bf16.vlgmr.msra.gmra.mxu1 %vm579_vm2, %v1143_v59 }
 0x499   : > { %8627 = vmatprep.mubr.msk.bf16.mxu1 %vm9692_vm1, %v9691_v1  ;;  %8626 = vmatpush3.bf16.msra.mxu1 %v1267_v6 }
 0x49a   : > { %8637 = vmatprep.subr.bf16.mxu1 %v9691_v1 }
 0x558   : > { %v1185_v41 = vpop.f32.mrf.mxu1 }
 0x559   : > { %v1192_v42 = vsel %vm874_vm4, %v1185_v41, -inf }
 0x55a   : > { %1193 = vmax.xlane.f32.xlu0 %v1192_v42  ;;  %v8617_v43 = vpop.f32.mrf.mxu1 }
 0x55c   : > { %v1188_v44 = vpop.f32.mrf.mxu1 }
 0x55d   : > { %v1195_v45 = vsel %vm874_vm4, %v1188_v44, -inf }
 0x55e   : > { %1196 = vmax.xlane.f32.xlu1 %v1195_v45  ;;  %v8618_v46 = vpop.f32.mrf.mxu1  ;;  %v7738_v45 = vld [vmem:[%s11373_s7 + $0x2] ss:$0 sm:$0xff] }
 0x5e3   : > { %v1194_v47 = vpop.xlane.xlu0 %1193 }
 0x5e4   : > { %v1198_v48 = vsub.f32 %v1185_v41, %v1194_v47 }
 0x5e6   : > { %v1200_v49 = vmul.f32 1.442695, %v1198_v48 }
 0x5e7   : > { %v1197_v50 = vpop.xlane.xlu1 %1196 }
 0x5e8   : > { %9477 = vpow2.f32 %v1200_v49  ;;  %v1199_v51 = vsub.f32 %v1188_v44, %v1197_v50 }
 0x5ea   : > { %v1202_v52 = vmul.f32 1.442695, %v1199_v51 }
 0x5ec   : > { %9479 = vpow2.f32 %v1202_v52 }
 0x5f5   : > { %v9478_v53 = vpop.eup %9477 }
 0x5f6   : > { %v1204_v54 = vsel %vm874_vm4, %v9478_v53, 0.0 }
 0x5f7   : > { %1205 = vadd.xlane.f32.xlu0 %v1204_v54 }
 0x5f9   : > { %v9480_v55 = vpop.eup %9479 }
 0x5fa   : > { %v1207_v56 = vsel %vm874_vm4, %v9480_v55, 0.0 }
 0x5fb   : > { %1208 = vadd.xlane.f32.xlu1 %v1207_v56 }
 0x680   : > { %v1206_v57 = vpop.xlane.xlu0 %1205 }
 0x681   : > { %9481 = vrcp.f32 %v1206_v57 }
 0x684   : > { %v1209_v58 = vpop.xlane.xlu1 %1208 }
 0x685   : > { %9483 = vrcp.f32 %v1209_v58 }
 0x68e   : > { %v9482_v59 = vpop.eup %9481 }
 0x68f   : > { %v1212_v62 = vmul.f32 %v9482_v59, %v9478_v53 }
 0x692   : > { %v9484_v60 = vpop.eup %9483 }
 0x693   : > { %v1213_v63 = vmul.f32 %v9484_v60, %v9480_v55 }
 0x695   : > { %v1214_v0 = vpack.c.bf16 %v1213_v63, %v1212_v62 }
 0x697   : > { %8622 = vmatmul.mubr.msk.bf16.vlgmr.msra.gmra.mxu0 %vm874_vm4, %v1214_v0 }
 0x698   : > { %8632 = vmatpush3.bf16.msra.mxu0 %v1314_v2  ;;  %8633 = vmatprep.mubr.msk.bf16.mxu0 %vm9692_vm1, %v9691_v1 }
 0x699   : > { %8645 = vmatprep.subr.bf16.mxu0 %v9691_v1 }
 0x69f   : > { %8634 = vmatmul.mubr.msk.bf16.vlgmr.msra.gmra.mxu0 %vm579_vm2, %v943_v30 }
 0x6a0   : > { %8646 = vmatpush3.bf16.msra.mxu0 %v9361_v3  ;;  %8649 = vmatprep.mubr.msk.bf16.mxu0 %vm9692_vm1, %v9691_v1 }
 0x6a1   : > { %8647 = vmatprep.subr.bf16.mxu0 %v9691_v1 }
 0x6a4   : > { %8648 = vmatpush3.bf16.msra.mxu0 %v9362_v4 }
 0x6a5   : > { %8661 = vmatprep.subr.bf16.mxu0 %v9691_v1 }
 0x6a7   : > { %8650 = vmatmul.mubr.msk.bf16.vlgmr.msra.gmra.mxu0 %vm652_vm3, %v9884_v14 }
 0x6a8   : > { %8663 = vmatprep.mubr.msk.bf16.mxu0 %vm9692_vm1, %v9691_v1 }
 0x757   : > { %v1253_v7 = vpop.f32.mrf.mxu0 }
 0x759   : > { %v8623_v8 = vpop.f32.mrf.mxu0 }
 0x75b   : > { %v1256_v9 = vpop.f32.mrf.mxu0 }
 0x75c   : > { %v1260_v13 = vpack.c.bf16 %v1256_v9, %v1253_v7 }
 0x75d   : > { %v8624_v15 = vpop.f32.mrf.mxu0 }
 0x75e   : > { %8628 = vmatmul.mubr.msk.bf16.vlgmr.msra.gmra.mxu1 %vm579_vm2, %v1260_v13  ;;  %v9367_v13 = vld [vmem:[%s11404_s1 + $0x38] sm:$0xff]  }
 0x75f   : > { %v10018_v16 = vpop.f32.mrf.mxu0  ;;  %8638 = vmatpush3.bf16.msra.mxu1 %v9363_v11  ;;  %8641 = vmatprep.mubr.msk.bf16.mxu1 %vm9692_vm1, %v9691_v1 }
 0x760   : > { %8639 = vmatprep.subr.bf16.mxu1 %v9691_v1 }
 0x761   : > { %v8635_v18 = vpop.f32.mrf.mxu0 }
 0x762   : > { %v9369_v18 = vld [vmem:[%s11370_s4 + $0x38] sm:$0xff]  }
 0x763   : > { %v10026_v19 = vpop.f32.mrf.mxu0  ;;  %8640 = vmatpush3.bf16.msra.mxu1 %v9364_v17  ;;  %v9368_v17 = vld [vmem:[%s11404_s1 + $0x30] sm:$0xff]  }
 0x764   : > { %8653 = vmatprep.subr.bf16.mxu1 %v9691_v1 }
 0x765   : > { %v8636_v21 = vpop.f32.mrf.mxu0 }
 0x766   : > { %8642 = vmatmul.mubr.msk.bf16.vlgmr.msra.gmra.mxu1 %vm652_vm3, %v9884_v14  ;;  %v7744_v21 = vld [vmem:[%s11374_s8 + $0x8] sm:$0xf] }
 0x767   : > { %v1482_v22 = vpop.f32.mrf.mxu0  ;;  %8654 = vmatpush3.bf16.msra.mxu1 %v9365_v20  ;;  %8657 = vmatprep.mubr.msk.bf16.mxu1 %vm9692_vm1, %v9691_v1  ;;  %v9370_v20 = vld [vmem:[%s11370_s4 + $0x30] sm:$0xff]  }
 0x768   : > { %8655 = vmatprep.subr.bf16.mxu1 %v9691_v1  ;;  %v1483_v27 = vadd.f32 %v7729_v24, %v1482_v22  ;;  %v1679_v22 = vsel %vm583_vm0, %v7744_v21, 0 }
 0x769   : > { %v8651_v25 = vpop.f32.mrf.mxu0 }
 0x76b   : > { %v1485_v26 = vpop.f32.mrf.mxu0  ;;  %8656 = vmatpush3.bf16.msra.mxu1 %v9366_v23 }
 0x76c   : > { %v1486_v28 = vadd.f32 %v7729_v24, %v1485_v26  ;;  %8667 = vmatprep.subr.bf16.mxu1 %v9691_v1  ;;  %v9371_v26 = vld [vmem:[%s11369_s3 + $0x38] sm:$0xff]  }
 0x76d   : > { %v8652_v29 = vpop.f32.mrf.mxu0 }
 0x76e   : > { %v1556_v30 = vpack.c.bf16 %v1486_v28, %v1483_v27  ;;  %8658 = vmatmul.mubr.msk.bf16.vlgmr.msra.gmra.mxu1 %vm652_vm3, %v9884_v14 }
 0x76f   : > { %8669 = vmatprep.mubr.msk.bf16.mxu1 %vm9692_vm1, %v9691_v1 }
 0x770   : > { %v1561_v31 = vsel %vm579_vm2, %v1556_v30, 0  ;;  %v9372_v30 = vld [vmem:[%s11369_s3 + $0x30] sm:$0xff]  }
 0x771   : > { %8662 = vmatpush3.bf16.xpose.msra.mxu0 %v1561_v31  ;;  %v7751_v31 = vld [vmem:[%s11371_s5 + $0x3] ss:$0 sm:$0xff] }
 0x772   : > { %8673 = vmatprep.subr.bf16.mxu0 %v9691_v1 }
 0x81e   : > { %v10050_v32 = vpop.f32.mrf.mxu1 }
 0x820   : > { %v8629_v33 = vpop.f32.mrf.mxu1 }
 0x822   : > { %v10052_v34 = vpop.f32.mrf.mxu1 }
 0x824   : > { %v8630_v35 = vpop.f32.mrf.mxu1 }
 0x826   : > { %v1416_v36 = vpop.f32.mrf.mxu1 }
 0x827   : > { %v1417_v40 = vadd.f32 %v7720_v37, %v1416_v36 }
 0x828   : > { %v8643_v38 = vpop.f32.mrf.mxu1 }
 0x82a   : > { %v1419_v39 = vpop.f32.mrf.mxu1 }
 0x82b   : > { %v1420_v41 = vadd.f32 %v7720_v37, %v1419_v39 }
 0x82c   : > { %v8644_v42 = vpop.f32.mrf.mxu1 }
 0x82d   : > { %v1555_v43 = vpack.c.bf16 %v1420_v41, %v1417_v40  ;;  %v7769_v41 = vld [vmem:[%s11373_s7 + $0x3] ss:$0 sm:$0xff] }
 0x82e   : > { %v1548_v44 = vpop.f32.mrf.mxu1 }
 0x82f   : > { %8664 = vmatmul.mubr.msk.bf16.vlgmr.msra.gmra.mxu0 %vm579_vm2, %v1555_v43  ;;  %v1549_v48 = vadd.f32 %v7738_v45, %v1548_v44 }
 0x830   : > { %v8659_v46 = vpop.f32.mrf.mxu1  ;;  %8675 = vmatprep.mubr.msk.bf16.mxu0 %vm9692_vm1, %v9691_v1  ;;  %8674 = vmatpush3.bf16.msra.mxu0 %v1679_v22 }
 0x831   : > { %8687 = vmatprep.subr.bf16.mxu0 %v9691_v1 }
 0x832   : > { %v1551_v47 = vpop.f32.mrf.mxu1 }
 0x833   : > { %v1552_v49 = vadd.f32 %v7738_v45, %v1551_v47 }
 0x834   : > { %v8660_v50 = vpop.f32.mrf.mxu1 }
 0x835   : > { %v1627_v51 = vpack.c.bf16 %v1552_v49, %v1549_v48  ;;  %v1351_v48 = vadd.f32 %v10018_v16, %v10050_v32 }
 0x837   : > { %8668 = vmatpush3.bf16.msra.mxu1 %v1627_v51 }
 0x838   : > { %8679 = vmatprep.subr.bf16.mxu1 %v9691_v1 }
 0x8ef   : > { %v1597_v52 = vpop.f32.mrf.mxu0 }
 0x8f0   : > { %v1604_v53 = vsel %vm874_vm4, %v1597_v52, -inf }
 0x8f1   : > { %1605 = vmax.xlane.f32.xlu0 %v1604_v53  ;;  %v8665_v54 = vpop.f32.mrf.mxu0 }
 0x8f3   : > { %v1600_v55 = vpop.f32.mrf.mxu0 }
 0x8f4   : > { %v1607_v56 = vsel %vm874_vm4, %v1600_v55, -inf }
 0x8f5   : > { %1608 = vmax.xlane.f32.xlu1 %v1607_v56  ;;  %v8666_v57 = vpop.f32.mrf.mxu0 }
 0x8f6   : > { %v7760_v57 = vld [vmem:[%s11372_s6 + $0x3] ss:$0 sm:$0xff] }
 0x97a   : > { %v1606_v58 = vpop.xlane.xlu0 %1605 }
 0x97b   : > { %v1610_v59 = vsub.f32 %v1597_v52, %v1606_v58  ;;  %v1354_v52 = vadd.f32 %v10026_v19, %v10052_v34 }
 0x97d   : > { %v1612_v60 = vmul.f32 1.442695, %v1610_v59 }
 0x97e   : > { %v1609_v61 = vpop.xlane.xlu1 %1608 }
 0x97f   : > { %9485 = vpow2.f32 %v1612_v60  ;;  %v1611_v62 = vsub.f32 %v1600_v55, %v1609_v61 }
 0x981   : > { %v1614_v63 = vmul.f32 1.442695, %v1611_v62 }
 0x983   : > { %9487 = vpow2.f32 %v1614_v63 }
 0x98c   : > { %v9486_v0 = vpop.eup %9485 }
 0x98d   : > { %v1616_v2 = vsel %vm874_vm4, %v9486_v0, 0.0 }
 0x98e   : > { %1617 = vadd.xlane.f32.xlu0 %v1616_v2 }
 0x990   : > { %v9488_v3 = vpop.eup %9487 }
 0x991   : > { %v1619_v4 = vsel %vm874_vm4, %v9488_v3, 0.0 }
 0x992   : > { %1620 = vadd.xlane.f32.xlu1 %v1619_v4 }
 0xa17   : > { %v1618_v5 = vpop.xlane.xlu0 %1617 }
 0xa18   : > { %9489 = vrcp.f32 %v1618_v5 }
 0xa1b   : > { %v1621_v6 = vpop.xlane.xlu1 %1620 }
 0xa1c   : > { %9491 = vrcp.f32 %v1621_v6 }
 0xa25   : > { %v9490_v7 = vpop.eup %9489 }
 0xa26   : > { %v1624_v9 = vmul.f32 %v9490_v7, %v9486_v0 }
 0xa29   : > { %v9492_v8 = vpop.eup %9491 }
 0xa2a   : > { %v1625_v11 = vmul.f32 %v9492_v8, %v9488_v3 }
 0xa2c   : > { %v1626_v15 = vpack.c.bf16 %v1625_v11, %v1624_v9 }
 0xa2e   : > { %8670 = vmatmul.mubr.msk.bf16.vlgmr.msra.gmra.mxu1 %vm874_vm4, %v1626_v15 }
 0xa2f   : > { %8680 = vmatpush3.bf16.msra.mxu1 %v9367_v13  ;;  %8683 = vmatprep.mubr.msk.bf16.mxu1 %vm9692_vm1, %v9691_v1 }
 0xa30   : > { %8681 = vmatprep.subr.bf16.mxu1 %v9691_v1 }
 0xa33   : > { %8682 = vmatpush3.bf16.msra.mxu1 %v9368_v17 }
 0xa34   : > { %8695 = vmatprep.subr.bf16.mxu1 %v9691_v1 }
 0xa36   : > { %8684 = vmatmul.mubr.msk.bf16.vlgmr.msra.gmra.mxu1 %vm652_vm3, %v9884_v14 }
 0xa37   : > { %8696 = vmatpush3.bf16.msra.mxu1 %v9369_v18  ;;  %8699 = vmatprep.mubr.msk.bf16.mxu1 %vm9692_vm1, %v9691_v1 }
 0xa38   : > { %8697 = vmatprep.subr.bf16.mxu1 %v9691_v1 }
 0xa3b   : > { %8698 = vmatpush3.bf16.msra.mxu1 %v9370_v20 }
 0xa3c   : > { %8709 = vmatprep.subr.bf16.mxu1 %v9691_v1 }
 0xa3e   : > { %8700 = vmatmul.mubr.msk.bf16.vlgmr.msra.gmra.mxu1 %vm652_vm3, %v9884_v14 }
 0xa3f   : > { %8711 = vmatprep.mubr.msk.bf16.mxu1 %vm9692_vm1, %v9691_v1 }
 0xaee   : > { %v1665_v23 = vpop.f32.mrf.mxu1 }
 0xaf0   : > { %v8671_v24 = vpop.f32.mrf.mxu1 }
 0xaf2   : > { %v1668_v25 = vpop.f32.mrf.mxu1 }
 0xaf3   : > { %v1672_v27 = vpack.c.bf16 %v1668_v25, %v1665_v23 }
 0xaf4   : > { %v8672_v28 = vpop.f32.mrf.mxu1 }
 0xaf5   : > { %8676 = vmatmul.mubr.msk.bf16.vlgmr.msra.gmra.mxu0 %vm579_vm2, %v1672_v27 }
 0xaf6   : > { %v1783_v29 = vpop.f32.mrf.mxu1  ;;  %8688 = vmatpush3.bf16.msra.mxu0 %v9371_v26  ;;  %8691 = vmatprep.mubr.msk.bf16.mxu0 %vm9692_vm1, %v9691_v1  ;;  %v7775_v26 = vld [vmem:[%s11374_s8 + $0xc] sm:$0xf] }
 0xaf7   : > { %8689 = vmatprep.subr.bf16.mxu0 %v9691_v1  ;;  %v1784_v36 = vadd.f32 %v7751_v31, %v1783_v29  ;;  %v2046_v27 = vsel %vm583_vm0, %v7775_v26, 0 }
 0xaf8   : > { %v8685_v33 = vpop.f32.mrf.mxu1 }
 0xafa   : > { %v1786_v35 = vpop.f32.mrf.mxu1  ;;  %8690 = vmatpush3.bf16.msra.mxu0 %v9372_v30 }
 0xafb   : > { %v1787_v37 = vadd.f32 %v7751_v31, %v1786_v35  ;;  %8703 = vmatprep.subr.bf16.mxu0 %v9691_v1 }
 0xafc   : > { %v8686_v38 = vpop.f32.mrf.mxu1 }
 0xafd   : > { %v1922_v39 = vpack.c.bf16 %v1787_v37, %v1784_v36  ;;  %8692 = vmatmul.mubr.msk.bf16.vlgmr.msra.gmra.mxu0 %vm652_vm3, %v9884_v14  ;;  %v7777_v36 = vld [vmem:[%s11375_s9] ss:$0 sm:$0xff] }
 0xafe   : > { %v1915_v40 = vpop.f32.mrf.mxu1  ;;  %8705 = vmatprep.mubr.msk.bf16.mxu0 %vm9692_vm1, %v9691_v1 }
 0xaff   : > { %v1916_v44 = vadd.f32 %v7769_v41, %v1915_v40 }
 0xb00   : > { %v8701_v42 = vpop.f32.mrf.mxu1 }
 0xb02   : > { %v1918_v43 = vpop.f32.mrf.mxu1 }
 0xb03   : > { %v1919_v45 = vadd.f32 %v7769_v41, %v1918_v43 }
 0xb04   : > { %v8702_v46 = vpop.f32.mrf.mxu1 }
 0xb05   : > { %v1994_v47 = vpack.c.bf16 %v1919_v45, %v1916_v44 }
 0xb07   : > { %8710 = vmatpush3.bf16.msra.mxu1 %v1994_v47 }
 0xb08   : > { %8721 = vmatprep.subr.bf16.mxu1 %v9691_v1 }
 0xbb5   : > { %v1715_v49 = vpop.f32.mrf.mxu0 }
 0xbb6   : > { %v10124_v50 = vadd.f32 %v1715_v49, %v1351_v48 }
 0xbb7   : > { %v8677_v51 = vpop.f32.mrf.mxu0 }
 0xbb9   : > { %v1718_v53 = vpop.f32.mrf.mxu0 }
 0xbba   : > { %v10128_v54 = vadd.f32 %v1718_v53, %v1354_v52  ;;  %v9373_v52 = vld [vmem:[%s11378_s12 + $0x8] sm:$0xff]   ;;  %v9374_v53 = vld [vmem:[%s11378_s12] sm:$0xff]  }
 0xbbb   : > { %v8678_v55 = vpop.f32.mrf.mxu0 }
 0xbbd   : > { %v1849_v56 = vpop.f32.mrf.mxu0 }
 0xbbe   : > { %v1850_v60 = vadd.f32 %v7760_v57, %v1849_v56 }
 0xbbf   : > { %v8693_v58 = vpop.f32.mrf.mxu0 }
 0xbc1   : > { %v1852_v59 = vpop.f32.mrf.mxu0 }
 0xbc2   : > { %v1853_v16 = vadd.f32 %v7760_v57, %v1852_v59 }
 0xbc3   : > { %v8694_v32 = vpop.f32.mrf.mxu0 }
 0xbc4   : > { %v1923_v61 = vpack.c.bf16 %v1853_v16, %v1850_v60 }
 0xbc6   : > { %v1928_v62 = vsel %vm579_vm2, %v1923_v61, 0 }
 0xbc7   : > { %8704 = vmatpush3.bf16.xpose.msra.mxu0 %v1928_v62 }
 0xbc8   : > { %8715 = vmatprep.subr.bf16.mxu0 %v9691_v1 }
 0xbce   : > { %8706 = vmatmul.mubr.msk.bf16.vlgmr.msra.gmra.mxu0 %vm579_vm2, %v1922_v39 }
 0xbcf   : > { %8717 = vmatprep.mubr.msk.bf16.mxu0 %vm9692_vm1, %v9691_v1  ;;  %8716 = vmatpush3.bf16.msra.mxu0 %v2046_v27 }
 0xbd0   : > { %8729 = vmatprep.subr.bf16.mxu0 %v9691_v1 }
 0xc8e   : > { %v1964_v19 = vpop.f32.mrf.mxu0 }
 0xc8f   : > { %v1971_v34 = vsel %vm874_vm4, %v1964_v19, -inf }
 0xc90   : > { %1972 = vmax.xlane.f32.xlu0 %v1971_v34  ;;  %v8707_v63 = vpop.f32.mrf.mxu0 }
 0xc92   : > { %v1967_v0 = vpop.f32.mrf.mxu0 }
 0xc93   : > { %v1974_v2 = vsel %vm874_vm4, %v1967_v0, -inf }
 0xc94   : > { %1975 = vmax.xlane.f32.xlu1 %v1974_v2  ;;  %v8708_v3 = vpop.f32.mrf.mxu0 }
 0xd19   : > { %v1973_v4 = vpop.xlane.xlu0 %1972 }
 0xd1a   : > { %v1977_v5 = vsub.f32 %v1964_v19, %v1973_v4 }
 0xd1c   : > { %v1979_v6 = vmul.f32 1.442695, %v1977_v5  ;;  %v7778_v5 = vld [vmem:[%s11376_s10] ss:$0 sm:$0xff] }
 0xd1d   : > { %v1976_v7 = vpop.xlane.xlu1 %1975 }
 0xd1e   : > { %9493 = vpow2.f32 %v1979_v6  ;;  %v1978_v8 = vsub.f32 %v1967_v0, %v1976_v7 }
 0xd20   : > { %v1981_v9 = vmul.f32 1.442695, %v1978_v8 }
 0xd22   : > { %9495 = vpow2.f32 %v1981_v9 }
 0xd2b   : > { %v9494_v11 = vpop.eup %9493 }
 0xd2c   : > { %v1983_v13 = vsel %vm874_vm4, %v9494_v11, 0.0 }
 0xd2d   : > { %1984 = vadd.xlane.f32.xlu0 %v1983_v13 }
 0xd2f   : > { %v9496_v15 = vpop.eup %9495 }
 0xd30   : > { %v1986_v17 = vsel %vm874_vm4, %v9496_v15, 0.0 }
 0xd31   : > { %1987 = vadd.xlane.f32.xlu1 %v1986_v17 }
 0xdb6   : > { %v1985_v18 = vpop.xlane.xlu0 %1984 }
 0xdb7   : > { %9497 = vrcp.f32 %v1985_v18 }
 0xdba   : > { %v1988_v20 = vpop.xlane.xlu1 %1987 }
 0xdbb   : > { %9499 = vrcp.f32 %v1988_v20  ;;  %v9376_v20 = vld [vmem:[%s11380_s14 + $0x10] sm:$0xff]  }
 0xdc4   : > { %v9498_v21 = vpop.eup %9497 }
 0xdc5   : > { %v1991_v23 = vmul.f32 %v9498_v21, %v9494_v11  ;;  %v7779_v11 = vld [vmem:[%s11377_s11] ss:$0 sm:$0xff]  ;;  %v9377_v21 = vld [vmem:[%s11380_s14 + $0x8] sm:$0xff]  }
 0xdc8   : > { %v9500_v22 = vpop.eup %9499 }
 0xdc9   : > { %v1992_v24 = vmul.f32 %v9500_v22, %v9496_v15  ;;  %v9378_v22 = vld [vmem:[%s11380_s14] sm:$0xff]  }
 0xdcb   : > { %v1993_v25 = vpack.c.bf16 %v1992_v24, %v1991_v23  ;;  %v7780_v23 = vld [vmem:[%s11379_s13] ss:$0 sm:$0xff] }
 0xdcd   : > { %8712 = vmatmul.mubr.msk.bf16.vlgmr.msra.gmra.mxu1 %vm874_vm4, %v1993_v25 }
 0xdce   : > { %8725 = vmatprep.mubr.msk.bf16.mxu1 %vm9692_vm1, %v9691_v1  ;;  %8722 = vmatpush3.bf16.msra.mxu1 %v9373_v52  ;;  %v9381_v52 = vld [vmem:[%s11404_s1 + $0x40] sm:$0xff]  }
 0xdcf   : > { %8723 = vmatprep.subr.bf16.mxu1 %v9691_v1 }
 0xdd2   : > { %8724 = vmatpush3.bf16.msra.mxu1 %v9374_v53  ;;  %v9382_v53 = vld [vmem:[%s11370_s4 + $0x40] sm:$0xff]  }
 0xdd3   : > { %8741 = vmatprep.subr.bf16.mxu1 %v9691_v1 }
 0xe8d   : > { %v2032_v28 = vpop.f32.mrf.mxu1 }
 0xe8f   : > { %v8713_v29 = vpop.f32.mrf.mxu1 }
 0xe91   : > { %v2035_v30 = vpop.f32.mrf.mxu1 }
 0xe92   : > { %v2039_v31 = vpack.c.bf16 %v2035_v30, %v2032_v28 }
 0xe93   : > { %v8714_v33 = vpop.f32.mrf.mxu1 }
 0xe94   : > { %8718 = vmatmul.mubr.msk.bf16.vlgmr.msra.gmra.mxu0 %vm579_vm2, %v2039_v31 }
 0xe95   : > { %8737 = vmatprep.mubr.msk.bf16.mxu0 %vm9692_vm1, %v9691_v1 }
 0xf54   : > { %v2082_v35 = vpop.f32.mrf.mxu0 }
 0xf55   : > { %v2089_v37 = vadd.f32 %v2082_v35, %v10124_v50  ;;  %v7784_v35 = vld [vmem:[%s11381_s15] ss:$0 sm:$0xff] }
 0xf56   : > { %v8719_v38 = vpop.f32.mrf.mxu0 }
 0xf57   : > { %v2098_v39 = vadd.f32 %v7777_v36, %v2089_v37 }
 0xf58   : > { %v2085_v40 = vpop.f32.mrf.mxu0 }
 0xf59   : > { %v2100_v41 = vadd.f32 %v2098_v39, %v9875_v10  ;;  %v2090_v42 = vadd.f32 %v2085_v40, %v10128_v54  ;;  %v9375_v54 = vld [vmem:[%s11380_s14 + $0x18] sm:$0xff]  }
 0xf5a   : > { %v8720_v43 = vpop.f32.mrf.mxu0  ;;  %8730 = vmatpush3.bf16.msra.mxu0 %v9375_v54 }
 0xf5b   : > { %v2099_v44 = vadd.f32 %v7777_v36, %v2090_v42  ;;  %v2104_v45 = vsel %vm652_vm3, %v2100_v41, 0.0  ;;  %v2113_v46 = vmul.f32 %v2100_v41, %v2100_v41  ;;  %8731 = vmatprep.subr.bf16.mxu0 %v9691_v1 }
 0xf5c   : > { %2105 = vadd.xlane.f32.xlu0 %v2104_v45 }
 0xf5d   : > { %v2101_v47 = vadd.f32 %v2099_v44, %v9877_v12  ;;  %v2115_v48 = vsel %vm652_vm3, %v2113_v46, 0.0 }
 0xf5e   : > { %8732 = vmatpush3.bf16.msra.mxu0 %v9376_v20  ;;  %v9384_v20 = vld [vmem:[%s11369_s3 + $0x40] sm:$0xff]  }
 0xf5f   : > { %v2107_v49 = vsel %vm652_vm3, %v2101_v47, 0.0  ;;  %v2114_v50 = vmul.f32 %v2101_v47, %v2101_v47  ;;  %8733 = vmatprep.subr.bf16.mxu0 %v9691_v1 }
 0xf60   : > { %2116 = vadd.xlane.f32.xlu0 %v2115_v48  ;;  %2108 = vadd.xlane.f32.xlu1 %v2107_v49 }
 0xf61   : > { %v2118_v51 = vsel %vm652_vm3, %v2114_v50, 0.0  ;;  %v9379_v50 = vld [vmem:[%s11404_s1 + $0x48] sm:$0xff]  }
 0xf62   : > { %8734 = vmatpush3.bf16.msra.mxu0 %v9377_v21 }
 0xf63   : > { %8735 = vmatprep.subr.bf16.mxu0 %v9691_v1 }
 0xf64   : > { %2119 = vadd.xlane.f32.xlu1 %v2118_v51  ;;  %v9380_v51 = vld [vmem:[%s11370_s4 + $0x48] sm:$0xff]  }
 0xf66   : > { %8736 = vmatpush3.bf16.msra.mxu0 %v9378_v22 }
 0xf67   : > { %8757 = vmatprep.subr.bf16.mxu0 %v9691_v1 }
 0xfe5   : > { %v2106_v55 = vpop.xlane.xlu0 %2105 }
 0xfe6   : > { %v2111_v56 = vmul.f32 0.03125, %v2106_v55 }
 0xfe8   : > { %v2123_v59 = vmul.f32 %v2111_v56, %v2111_v56  ;;  %v2127_v2 = vsub.f32 %v2100_v41, %v2111_v56 }
 0xfe9   : > { %v2117_v57 = vpop.xlane.xlu0 %2116  ;;  %v2109_v58 = vpop.xlane.xlu1 %2108 }
 0xfea   : > { %v2121_v60 = vmul.f32 0.03125, %v2117_v57  ;;  %v2112_v16 = vmul.f32 0.03125, %v2109_v58 }
 0xfec   : > { %v2125_v32 = vsub.f32 %v2121_v60, %v2123_v59  ;;  %v2124_v19 = vmul.f32 %v2112_v16, %v2112_v16  ;;  %v2128_v6 = vsub.f32 %v2101_v47, %v2112_v16 }
 0xfed   : > { %v2120_v61 = vpop.xlane.xlu1 %2119 }
 0xfee   : > { %v2129_v62 = vadd.f32 1e-05, %v2125_v32  ;;  %v2122_v34 = vmul.f32 0.03125, %v2120_v61 }
 0xff0   : > { %9501 = vrsqrt.f32 %v2129_v62  ;;  %v2126_v63 = vsub.f32 %v2122_v34, %v2124_v19 }
 0xff2   : > { %v2130_v0 = vadd.f32 1e-05, %v2126_v63 }
 0xff4   : > { %9503 = vrsqrt.f32 %v2130_v0 }
 0xffd   : > { %v9502_v3 = vpop.eup %9501 }
 0xffe   : > { %v2133_v4 = vmul.f32 %v9502_v3, %v2127_v2 }
0x1000   : > { %v2141_v9 = vmul.f32 %v7778_v5, %v2133_v4  ;;  %v7790_v4 = vld [vmem:[%s11382_s16] ss:$0 sm:$0xff] }
0x1001   : > { %v9504_v7 = vpop.eup %9503 }
0x1002   : > { %v2134_v8 = vmul.f32 %v9504_v7, %v2128_v6  ;;  %v2149_v15 = vadd.f32 %v7779_v11, %v2141_v9  ;;  %v7791_v9 = vld [vmem:[%s11383_s17] ss:$0 sm:$0xff] }
0x1004   : > { %v2142_v13 = vmul.f32 %v7778_v5, %v2134_v8 }
0x1006   : > { %v2150_v17 = vadd.f32 %v7779_v11, %v2142_v13 }
0x1008   : > { %v2151_v18 = vpack.c.bf16 %v2150_v17, %v2149_v15 }
0x100a   : > { %8726 = vmatmul.mubr.msk.bf16.vlgmr.msra.gmra.mxu1 %vm652_vm3, %v2151_v18 }
0x100b   : > { %8745 = vmatprep.mubr.msk.bf16.mxu1 %vm9692_vm1, %v9691_v1  ;;  %8742 = vmatpush3.bf16.msra.mxu1 %v9379_v50  ;;  %v9387_v50 = vld [vmem:[%s11370_s4 + $0x58] sm:$0xff]  }
0x100c   : > { %8743 = vmatprep.subr.bf16.mxu1 %v9691_v1 }
0x100f   : > { %8744 = vmatpush3.bf16.msra.mxu1 %v9381_v52 }
0x1010   : > { %8749 = vmatprep.subr.bf16.mxu1 %v9691_v1 }
0x10ca   : > { %v2212_v24 = vpop.f32.mrf.mxu1 }
0x10cb   : > { %v2213_v26 = vadd.f32 %v7780_v23, %v2212_v24 }
0x10cc   : > { %v8727_v25 = vpop.f32.mrf.mxu1 }
0x10cd   : > { %v2219_v30 = vmax.f32 %v2213_v26, 0.0 }
0x10ce   : > { %v2215_v27 = vpop.f32.mrf.mxu1 }
0x10cf   : > { %v2216_v28 = vadd.f32 %v7780_v23, %v2215_v27  ;;  %v7815_v23 = vld [vmem:[%s11373_s7 + $0x4] ss:$0 sm:$0xff] }
0x10d0   : > { %v8728_v29 = vpop.f32.mrf.mxu1 }
0x10d1   : > { %v2220_v31 = vmax.f32 %v2216_v28, 0.0 }
0x10d3   : > { %v2221_v33 = vpack.c.bf16 %v2220_v31, %v2219_v30 }
0x10d5   : > { %8738 = vmatmul.mubr.msk.bf16.vlgmr.msra.gmra.mxu0 %vm2261_vm5, %v2221_v33 }
0x10d6   : > { %8761 = vmatprep.mubr.msk.bf16.mxu0 %vm9692_vm1, %v9691_v1  ;;  %8758 = vmatpush3.bf16.msra.mxu0 %v9380_v51  ;;  %v9388_v51 = vld [vmem:[%s11370_s4 + $0x50] sm:$0xff]  }
0x10d7   : > { %8759 = vmatprep.subr.bf16.mxu0 %v9691_v1 }
0x10da   : > { %8760 = vmatpush3.bf16.msra.mxu0 %v9382_v53 }
0x10db   : > { %8771 = vmatprep.subr.bf16.mxu0 %v9691_v1 }
0x1195   : > { %v2299_v36 = vpop.f32.mrf.mxu0 }
0x1196   : > { %v2300_v37 = vadd.f32 %v7784_v35, %v2299_v36  ;;  %v7806_v36 = vld [vmem:[%s11372_s6 + $0x4] ss:$0 sm:$0xff] }
0x1197   : > { %v8739_v38 = vpop.f32.mrf.mxu0 }
0x1198   : > { %v2306_v39 = vadd.f32 %v2300_v37, %v2149_v15 }
0x1199   : > { %v2302_v40 = vpop.f32.mrf.mxu0 }
0x119a   : > { %v2303_v41 = vadd.f32 %v7784_v35, %v2302_v40  ;;  %v2310_v42 = vsel %vm652_vm3, %v2306_v39, 0.0  ;;  %v2318_v43 = vmul.f32 %v2306_v39, %v2306_v39 }
0x119b   : > { %2311 = vadd.xlane.f32.xlu0 %v2310_v42  ;;  %v8740_v44 = vpop.f32.mrf.mxu0 }
0x119c   : > { %v2307_v45 = vadd.f32 %v2303_v41, %v2150_v17  ;;  %v2320_v46 = vsel %vm652_vm3, %v2318_v43, 0.0  ;;  %v9383_v17 = vld [vmem:[%s11369_s3 + $0x48] sm:$0xff]   ;;  %v7797_v44 = vld [vmem:[%s11371_s5 + $0x4] ss:$0 sm:$0xff] }
0x119e   : > { %v2313_v47 = vsel %vm652_vm3, %v2307_v45, 0.0  ;;  %v2319_v48 = vmul.f32 %v2307_v45, %v2307_v45 }
0x119f   : > { %2321 = vadd.xlane.f32.xlu0 %v2320_v46  ;;  %2314 = vadd.xlane.f32.xlu1 %v2313_v47  ;;  %v9385_v47 = vld [vmem:[%s11404_s1 + $0x58] sm:$0xff]  }
0x11a0   : > { %v2323_v49 = vsel %vm652_vm3, %v2319_v48, 0.0 }
0x11a3   : > { %2324 = vadd.xlane.f32.xlu1 %v2323_v49  ;;  %v9386_v49 = vld [vmem:[%s11404_s1 + $0x50] sm:$0xff]  }
0x1224   : > { %v2312_v54 = vpop.xlane.xlu0 %2311 }
0x1225   : > { %v2316_v55 = vmul.f32 0.03125, %v2312_v54 }
0x1227   : > { %v2328_v58 = vmul.f32 %v2316_v55, %v2316_v55  ;;  %v2332_v0 = vsub.f32 %v2306_v39, %v2316_v55 }
0x1228   : > { %v2322_v56 = vpop.xlane.xlu0 %2321  ;;  %v2315_v57 = vpop.xlane.xlu1 %2314 }
0x1229   : > { %v2326_v59 = vmul.f32 0.03125, %v2322_v56  ;;  %v2317_v60 = vmul.f32 0.03125, %v2315_v57 }
0x122b   : > { %v2330_v16 = vsub.f32 %v2326_v59, %v2328_v58  ;;  %v2329_v62 = vmul.f32 %v2317_v60, %v2317_v60  ;;  %v2333_v5 = vsub.f32 %v2307_v45, %v2317_v60  ;;  %v7827_v59 = vld [vmem:[%s11371_s5 + $0x5] ss:$0 sm:$0xff] }
0x122c   : > { %v2325_v32 = vpop.xlane.xlu1 %2324 }
0x122d   : > { %v2334_v61 = vadd.f32 1e-05, %v2330_v16  ;;  %v2327_v19 = vmul.f32 0.03125, %v2325_v32 }
0x122f   : > { %9505 = vrsqrt.f32 %v2334_v61  ;;  %v2331_v34 = vsub.f32 %v2327_v19, %v2329_v62 }
0x1231   : > { %v2335_v63 = vadd.f32 1e-05, %v2331_v34 }
0x1233   : > { %9507 = vrsqrt.f32 %v2335_v63  ;;  %v7845_v63 = vld [vmem:[%s11373_s7 + $0x5] ss:$0 sm:$0xff] }
0x123c   : > { %v9506_v2 = vpop.eup %9505 }
0x123d   : > { %v2338_v3 = vmul.f32 %v9506_v2, %v2332_v0 }
0x123f   : > { %v2346_v7 = vmul.f32 %v7790_v4, %v2338_v3 }
0x1240   : > { %v9508_v6 = vpop.eup %9507 }
0x1241   : > { %v2339_v8 = vmul.f32 %v9508_v6, %v2333_v5  ;;  %v10232_v13 = vadd.f32 %v7791_v9, %v2346_v7 }
0x1243   : > { %v2347_v11 = vmul.f32 %v7790_v4, %v2339_v8 }
0x1245   : > { %v10234_v15 = vadd.f32 %v7791_v9, %v2347_v11 }
0x1247   : > { %v10241_v18 = vpack.c.bf16 %v10234_v15, %v10232_v13 }
0x1249   : > { %8746 = vmatmul.mubr.msk.bf16.vlgmr.msra.gmra.mxu1 %vm652_vm3, %v10241_v18  ;;  %8762 = vmatmul.mubr.msk.bf16.vlgmr.msra.gmra.mxu0 %vm652_vm3, %v10241_v18 }
0x124a   : > { %8750 = vmatpush3.bf16.msra.mxu1 %v9383_v17  ;;  %8753 = vmatprep.mubr.msk.bf16.mxu1 %vm9692_vm1, %v9691_v1 }
0x124b   : > { %8751 = vmatprep.subr.bf16.mxu1 %v9691_v1  ;;  %8773 = vmatprep.mubr.msk.bf16.mxu0 %vm9692_vm1, %v9691_v1 }
0x124e   : > { %8752 = vmatpush3.bf16.msra.mxu1 %v9384_v20 }
0x124f   : > { %8765 = vmatprep.subr.bf16.mxu1 %v9691_v1 }
0x1251   : > { %8754 = vmatmul.mubr.msk.bf16.vlgmr.msra.gmra.mxu1 %vm652_vm3, %v10241_v18 }
0x1252   : > { %8767 = vmatprep.mubr.msk.bf16.mxu1 %vm9692_vm1, %v9691_v1 }
0x1309   : > { %v2419_v21 = vpop.f32.mrf.mxu1  ;;  %v2551_v22 = vpop.f32.mrf.mxu0 }
0x130a   : > { %v2552_v28 = vadd.f32 %v7815_v23, %v2551_v22  ;;  %v2420_v46 = vadd.f32 %v7797_v44, %v2419_v21 }
0x130b   : > { %v8747_v24 = vpop.f32.mrf.mxu1  ;;  %v8763_v25 = vpop.f32.mrf.mxu0 }
0x130d   : > { %v2422_v26 = vpop.f32.mrf.mxu1  ;;  %v2554_v27 = vpop.f32.mrf.mxu0 }
0x130e   : > { %v2555_v29 = vadd.f32 %v7815_v23, %v2554_v27  ;;  %v2423_v45 = vadd.f32 %v7797_v44, %v2422_v26 }
0x130f   : > { %v8748_v30 = vpop.f32.mrf.mxu1  ;;  %v8764_v31 = vpop.f32.mrf.mxu0 }
0x1310   : > { %v2630_v33 = vpack.c.bf16 %v2555_v29, %v2552_v28  ;;  %v2558_v48 = vpack.c.bf16 %v2423_v45, %v2420_v46  ;;  %v9389_v31 = vld [vmem:[%s11369_s3 + $0x58] sm:$0xff]  }
0x1311   : > { %v2485_v35 = vpop.f32.mrf.mxu1 }
0x1312   : > { %8772 = vmatpush3.bf16.msra.mxu0 %v2630_v33  ;;  %v2486_v39 = vadd.f32 %v7806_v36, %v2485_v35  ;;  %v9390_v35 = vld [vmem:[%s11369_s3 + $0x50] sm:$0xff]  }
0x1313   : > { %v8755_v37 = vpop.f32.mrf.mxu1  ;;  %8785 = vmatprep.subr.bf16.mxu0 %v9691_v1 }
0x1315   : > { %v2488_v38 = vpop.f32.mrf.mxu1 }
0x1316   : > { %v2489_v40 = vadd.f32 %v7806_v36, %v2488_v38 }
0x1317   : > { %v8756_v41 = vpop.f32.mrf.mxu1 }
0x1318   : > { %v2559_v42 = vpack.c.bf16 %v2489_v40, %v2486_v39 }
0x131a   : > { %v2564_v43 = vsel %vm579_vm2, %v2559_v42, 0  ;;  %v7836_v42 = vld [vmem:[%s11372_s6 + $0x5] ss:$0 sm:$0xff] }
0x131b   : > { %8766 = vmatpush3.bf16.xpose.msra.mxu1 %v2564_v43 }
0x131c   : > { %8777 = vmatprep.subr.bf16.mxu1 %v9691_v1 }
0x1322   : > { %8768 = vmatmul.mubr.msk.bf16.vlgmr.msra.gmra.mxu1 %vm579_vm2, %v2558_v48 }
0x1323   : > { %8778 = vmatpush3.bf16.msra.mxu1 %v9385_v47  ;;  %8781 = vmatprep.mubr.msk.bf16.mxu1 %vm9692_vm1, %v9691_v1 }
0x1324   : > { %8779 = vmatprep.subr.bf16.mxu1 %v9691_v1 }
0x1327   : > { %8780 = vmatpush3.bf16.msra.mxu1 %v9386_v49 }
0x1328   : > { %8793 = vmatprep.subr.bf16.mxu1 %v9691_v1 }
0x132a   : > { %8782 = vmatmul.mubr.msk.bf16.vlgmr.msra.gmra.mxu1 %vm652_vm3, %v10241_v18 }
0x132b   : > { %8794 = vmatpush3.bf16.msra.mxu1 %v9387_v50  ;;  %8797 = vmatprep.mubr.msk.bf16.mxu1 %vm9692_vm1, %v9691_v1 }
0x132c   : > { %8795 = vmatprep.subr.bf16.mxu1 %v9691_v1 }
0x132f   : > { %8796 = vmatpush3.bf16.msra.mxu1 %v9388_v51 }
0x1330   : > { %8807 = vmatprep.subr.bf16.mxu1 %v9691_v1 }
0x1332   : > { %8798 = vmatmul.mubr.msk.bf16.vlgmr.msra.gmra.mxu1 %vm652_vm3, %v10241_v18 }
0x1333   : > { %8809 = vmatprep.mubr.msk.bf16.mxu1 %vm9692_vm1, %v9691_v1 }
0x13e2   : > { %v2600_v52 = vpop.f32.mrf.mxu1 }
0x13e3   : > { %v2607_v53 = vsel %vm874_vm4, %v2600_v52, -inf }
0x13e4   : > { %2608 = vmax.xlane.f32.xlu0 %v2607_v53  ;;  %v8769_v54 = vpop.f32.mrf.mxu1 }
0x13e6   : > { %v2603_v55 = vpop.f32.mrf.mxu1 }
0x13e7   : > { %v2610_v56 = vsel %vm874_vm4, %v2603_v55, -inf }
0x13e8   : > { %2611 = vmax.xlane.f32.xlu1 %v2610_v56  ;;  %v8770_v57 = vpop.f32.mrf.mxu1 }
0x13ea   : > { %v2737_v58 = vpop.f32.mrf.mxu1 }
0x13eb   : > { %v10304_v32 = vadd.f32 %v7827_v59, %v2737_v58 }
0x13ec   : > { %v8783_v60 = vpop.f32.mrf.mxu1 }
0x13ee   : > { %v2740_v16 = vpop.f32.mrf.mxu1 }
0x13ef   : > { %v10306_v61 = vadd.f32 %v7827_v59, %v2740_v16 }
0x13f0   : > { %v8784_v62 = vpop.f32.mrf.mxu1 }
0x13f1   : > { %v2876_v19 = vpack.c.bf16 %v10306_v61, %v10304_v32 }
0x13f2   : > { %v2869_v34 = vpop.f32.mrf.mxu1 }
0x13f3   : > { %v2870_v3 = vadd.f32 %v7845_v63, %v2869_v34 }
0x13f4   : > { %v8799_v0 = vpop.f32.mrf.mxu1 }
0x13f6   : > { %v2872_v2 = vpop.f32.mrf.mxu1 }
0x13f7   : > { %v2873_v4 = vadd.f32 %v7845_v63, %v2872_v2 }
0x13f8   : > { %v8800_v5 = vpop.f32.mrf.mxu1 }
0x13f9   : > { %v2948_v6 = vpack.c.bf16 %v2873_v4, %v2870_v3  ;;  %v7821_v3 = vld [vmem:[%s11374_s8 + $0x10] sm:$0xf] }
0x13fb   : > { %8808 = vmatpush3.bf16.msra.mxu1 %v2948_v6 }
0x13fc   : > { %8819 = vmatprep.subr.bf16.mxu1 %v9691_v1 }
0x146d   : > { %v2609_v7 = vpop.xlane.xlu0 %2608 }
0x146e   : > { %v2613_v8 = vsub.f32 %v2600_v52, %v2609_v7  ;;  %v3047_v7 = vsel %vm583_vm0, %v7821_v3, 0 }
0x1470   : > { %v2615_v9 = vmul.f32 1.442695, %v2613_v8  ;;  %v9391_v8 = vld [vmem:[%s11369_s3 + $0x68] sm:$0xff]  }
0x1471   : > { %v2612_v11 = vpop.xlane.xlu1 %2611 }
0x1472   : > { %9509 = vpow2.f32 %v2615_v9  ;;  %v2614_v17 = vsub.f32 %v2603_v55, %v2612_v11  ;;  %v9392_v9 = vld [vmem:[%s11369_s3 + $0x60] sm:$0xff]   ;;  %v7851_v11 = vld [vmem:[%s11374_s8 + $0x14] sm:$0xf] }
0x1474   : > { %v2617_v20 = vmul.f32 1.442695, %v2614_v17  ;;  %v3000_v17 = vsel %vm583_vm0, %v7851_v11, 0 }
0x1476   : > { %9511 = vpow2.f32 %v2617_v20 }
0x147f   : > { %v9510_v21 = vpop.eup %9509 }
0x1480   : > { %v2619_v22 = vsel %vm874_vm4, %v9510_v21, 0.0 }
0x1481   : > { %2620 = vadd.xlane.f32.xlu0 %v2619_v22 }
0x1483   : > { %v9512_v23 = vpop.eup %9511 }
0x1484   : > { %v2622_v24 = vsel %vm874_vm4, %v9512_v23, 0.0 }
0x1485   : > { %2623 = vadd.xlane.f32.xlu1 %v2622_v24 }
0x150a   : > { %v2621_v25 = vpop.xlane.xlu0 %2620 }
0x150b   : > { %9513 = vrcp.f32 %v2621_v25 }
0x150e   : > { %v2624_v26 = vpop.xlane.xlu1 %2623 }
0x150f   : > { %9515 = vrcp.f32 %v2624_v26 }
0x1518   : > { %v9514_v27 = vpop.eup %9513 }
0x1519   : > { %v2627_v29 = vmul.f32 %v9514_v27, %v9510_v21  ;;  %v9394_v27 = vld [vmem:[%s11404_s1 + $0x60] sm:$0xff]  }
0x151c   : > { %v9516_v28 = vpop.eup %9515 }
0x151d   : > { %v2628_v30 = vmul.f32 %v9516_v28, %v9512_v23  ;;  %v9393_v23 = vld [vmem:[%s11404_s1 + $0x68] sm:$0xff]  }
0x151f   : > { %v2629_v33 = vpack.c.bf16 %v2628_v30, %v2627_v29  ;;  %v9395_v30 = vld [vmem:[%s11370_s4 + $0x68] sm:$0xff]  }
0x1521   : > { %8774 = vmatmul.mubr.msk.bf16.vlgmr.msra.gmra.mxu0 %vm874_vm4, %v2629_v33 }
0x1522   : > { %8786 = vmatpush3.bf16.msra.mxu0 %v9389_v31  ;;  %8789 = vmatprep.mubr.msk.bf16.mxu0 %vm9692_vm1, %v9691_v1 }
0x1523   : > { %8787 = vmatprep.subr.bf16.mxu0 %v9691_v1 }
0x1526   : > { %8788 = vmatpush3.bf16.msra.mxu0 %v9390_v35  ;;  %v9396_v35 = vld [vmem:[%s11370_s4 + $0x60] sm:$0xff]  }
0x1527   : > { %8801 = vmatprep.subr.bf16.mxu0 %v9691_v1 }
0x1529   : > { %8790 = vmatmul.mubr.msk.bf16.vlgmr.msra.gmra.mxu0 %vm652_vm3, %v10241_v18 }
0x152a   : > { %8803 = vmatprep.mubr.msk.bf16.mxu0 %vm9692_vm1, %v9691_v1 }
0x15e1   : > { %v2668_v36 = vpop.f32.mrf.mxu0 }
0x15e3   : > { %v8775_v37 = vpop.f32.mrf.mxu0 }
0x15e5   : > { %v2671_v38 = vpop.f32.mrf.mxu0 }
0x15e6   : > { %v2675_v39 = vpack.c.bf16 %v2671_v38, %v2668_v36  ;;  %v7868_v36 = vld [vmem:[%s11372_s6 + $0x6] ss:$0 sm:$0xff] }
0x15e7   : > { %v8776_v40 = vpop.f32.mrf.mxu0 }
0x15e9   : > { %v2803_v41 = vpop.f32.mrf.mxu0 }
0x15ea   : > { %v2804_v45 = vadd.f32 %v7836_v42, %v2803_v41 }
0x15eb   : > { %v8791_v43 = vpop.f32.mrf.mxu0 }
0x15ed   : > { %v2806_v44 = vpop.f32.mrf.mxu0 }
0x15ee   : > { %v2807_v46 = vadd.f32 %v7836_v42, %v2806_v44 }
0x15ef   : > { %v8792_v47 = vpop.f32.mrf.mxu0 }
0x15f0   : > { %v2877_v48 = vpack.c.bf16 %v2807_v46, %v2804_v45 }
0x15f2   : > { %v2882_v49 = vsel %vm579_vm2, %v2877_v48, 0 }
0x15f3   : > { %8802 = vmatpush3.bf16.xpose.msra.mxu0 %v2882_v49  ;;  %v7859_v49 = vld [vmem:[%s11371_s5 + $0x6] ss:$0 sm:$0xff] }
0x15f4   : > { %8813 = vmatprep.subr.bf16.mxu0 %v9691_v1 }
0x15fa   : > { %8804 = vmatmul.mubr.msk.bf16.vlgmr.msra.gmra.mxu0 %vm579_vm2, %v2876_v19 }
0x15fb   : > { %8815 = vmatprep.mubr.msk.bf16.mxu0 %vm9692_vm1, %v9691_v1  ;;  %8814 = vmatpush3.bf16.msra.mxu0 %v3000_v17 }
0x15fc   : > { %8825 = vmatprep.subr.bf16.mxu0 %v9691_v1 }
0x16ba   : > { %v2918_v50 = vpop.f32.mrf.mxu0 }
0x16bb   : > { %v2925_v51 = vsel %vm874_vm4, %v2918_v50, -inf }
0x16bc   : > { %2926 = vmax.xlane.f32.xlu0 %v2925_v51  ;;  %v8805_v52 = vpop.f32.mrf.mxu0 }
0x16be   : > { %v2921_v53 = vpop.f32.mrf.mxu0 }
0x16bf   : > { %v2928_v54 = vsel %vm874_vm4, %v2921_v53, -inf }
0x16c0   : > { %2929 = vmax.xlane.f32.xlu1 %v2928_v54  ;;  %v8806_v55 = vpop.f32.mrf.mxu0 }
0x1745   : > { %v2927_v56 = vpop.xlane.xlu0 %2926 }
0x1746   : > { %v2931_v57 = vsub.f32 %v2918_v50, %v2927_v56 }
0x1748   : > { %v2933_v58 = vmul.f32 1.442695, %v2931_v57  ;;  %v7877_v57 = vld [vmem:[%s11373_s7 + $0x6] ss:$0 sm:$0xff] }
0x1749   : > { %v2930_v59 = vpop.xlane.xlu1 %2929 }
0x174a   : > { %9517 = vpow2.f32 %v2933_v58  ;;  %v2932_v60 = vsub.f32 %v2921_v53, %v2930_v59 }
0x174c   : > { %v2935_v16 = vmul.f32 1.442695, %v2932_v60 }
0x174e   : > { %9519 = vpow2.f32 %v2935_v16 }
0x1757   : > { %v9518_v32 = vpop.eup %9517 }
0x1758   : > { %v2937_v61 = vsel %vm874_vm4, %v9518_v32, 0.0 }
0x1759   : > { %2938 = vadd.xlane.f32.xlu0 %v2937_v61 }
0x175b   : > { %v9520_v62 = vpop.eup %9519 }
0x175c   : > { %v2940_v19 = vsel %vm874_vm4, %v9520_v62, 0.0 }
0x175d   : > { %2941 = vadd.xlane.f32.xlu1 %v2940_v19 }
0x17e2   : > { %v2939_v34 = vpop.xlane.xlu0 %2938 }
0x17e3   : > { %9521 = vrcp.f32 %v2939_v34 }
0x17e6   : > { %v2942_v63 = vpop.xlane.xlu1 %2941 }
0x17e7   : > { %9523 = vrcp.f32 %v2942_v63 }
0x17f0   : > { %v9522_v0 = vpop.eup %9521 }
0x17f1   : > { %v2945_v4 = vmul.f32 %v9522_v0, %v9518_v32 }
0x17f4   : > { %v9524_v2 = vpop.eup %9523 }
0x17f5   : > { %v2946_v5 = vmul.f32 %v9524_v2, %v9520_v62 }
0x17f7   : > { %v2947_v6 = vpack.c.bf16 %v2946_v5, %v2945_v4 }
0x17f9   : > { %8810 = vmatmul.mubr.msk.bf16.vlgmr.msra.gmra.mxu1 %vm874_vm4, %v2947_v6 }
0x17fa   : > { %8820 = vmatpush3.bf16.msra.mxu1 %v3047_v7  ;;  %8821 = vmatprep.mubr.msk.bf16.mxu1 %vm9692_vm1, %v9691_v1 }
0x17fb   : > { %8833 = vmatprep.subr.bf16.mxu1 %v9691_v1 }
0x1801   : > { %8822 = vmatmul.mubr.msk.bf16.vlgmr.msra.gmra.mxu1 %vm579_vm2, %v2675_v39 }
0x1802   : > { %8834 = vmatpush3.bf16.msra.mxu1 %v9391_v8  ;;  %8837 = vmatprep.mubr.msk.bf16.mxu1 %vm9692_vm1, %v9691_v1 }
0x1803   : > { %8835 = vmatprep.subr.bf16.mxu1 %v9691_v1 }
0x1806   : > { %8836 = vmatpush3.bf16.msra.mxu1 %v9392_v9 }
0x1807   : > { %8849 = vmatprep.subr.bf16.mxu1 %v9691_v1 }
0x1809   : > { %8838 = vmatmul.mubr.msk.bf16.vlgmr.msra.gmra.mxu1 %vm652_vm3, %v10241_v18 }
0x180a   : > { %8851 = vmatprep.mubr.msk.bf16.mxu1 %vm9692_vm1, %v9691_v1 }
0x18b9   : > { %v2986_v20 = vpop.f32.mrf.mxu1 }
0x18bb   : > { %v8811_v21 = vpop.f32.mrf.mxu1 }
0x18bd   : > { %v2989_v22 = vpop.f32.mrf.mxu1 }
0x18be   : > { %v2993_v24 = vpack.c.bf16 %v2989_v22, %v2986_v20 }
0x18bf   : > { %v8812_v25 = vpop.f32.mrf.mxu1 }
0x18c0   : > { %8816 = vmatmul.mubr.msk.bf16.vlgmr.msra.gmra.mxu0 %vm579_vm2, %v2993_v24 }
0x18c1   : > { %v10375_v26 = vpop.f32.mrf.mxu1  ;;  %8826 = vmatpush3.bf16.msra.mxu0 %v9393_v23  ;;  %8829 = vmatprep.mubr.msk.bf16.mxu0 %vm9692_vm1, %v9691_v1 }
0x18c2   : > { %8827 = vmatprep.subr.bf16.mxu0 %v9691_v1 }
0x18c3   : > { %v8823_v28 = vpop.f32.mrf.mxu1 }
0x18c4   : > { %v9397_v28 = vld [vmem:[%s11404_s1 + $0x78] sm:$0xff]  }
0x18c5   : > { %v10383_v29 = vpop.f32.mrf.mxu1  ;;  %8828 = vmatpush3.bf16.msra.mxu0 %v9394_v27 }
0x18c6   : > { %8841 = vmatprep.subr.bf16.mxu0 %v9691_v1 }
0x18c7   : > { %v8824_v31 = vpop.f32.mrf.mxu1 }
0x18c8   : > { %8830 = vmatmul.mubr.msk.bf16.vlgmr.msra.gmra.mxu0 %vm652_vm3, %v10241_v18  ;;  %v9398_v31 = vld [vmem:[%s11404_s1 + $0x70] sm:$0xff]  }
0x18c9   : > { %v3215_v33 = vpop.f32.mrf.mxu1  ;;  %8842 = vmatpush3.bf16.msra.mxu0 %v9395_v30  ;;  %8845 = vmatprep.mubr.msk.bf16.mxu0 %vm9692_vm1, %v9691_v1 }
0x18ca   : > { %8843 = vmatprep.subr.bf16.mxu0 %v9691_v1  ;;  %v3216_v39 = vadd.f32 %v7868_v36, %v3215_v33  ;;  %v9399_v33 = vld [vmem:[%s11370_s4 + $0x78] sm:$0xff]  }
0x18cb   : > { %v8839_v37 = vpop.f32.mrf.mxu1 }
0x18cd   : > { %v3218_v38 = vpop.f32.mrf.mxu1  ;;  %8844 = vmatpush3.bf16.msra.mxu0 %v9396_v35  ;;  %v9400_v35 = vld [vmem:[%s11370_s4 + $0x70] sm:$0xff]  }
0x18ce   : > { %v3219_v40 = vadd.f32 %v7868_v36, %v3218_v38  ;;  %8855 = vmatprep.subr.bf16.mxu0 %v9691_v1  ;;  %v7883_v36 = vld [vmem:[%s11374_s8 + $0x18] sm:$0xf] }
0x18cf   : > { %v8840_v41 = vpop.f32.mrf.mxu1  ;;  %v3412_v37 = vsel %vm583_vm0, %v7883_v36, 0 }
0x18d0   : > { %v3289_v42 = vpack.c.bf16 %v3219_v40, %v3216_v39  ;;  %8846 = vmatmul.mubr.msk.bf16.vlgmr.msra.gmra.mxu0 %vm652_vm3, %v10241_v18  ;;  %v9401_v41 = vld [vmem:[%s11369_s3 + $0x78] sm:$0xff]  }
0x18d1   : > { %8857 = vmatprep.mubr.msk.bf16.mxu0 %vm9692_vm1, %v9691_v1 }
0x18d2   : > { %v3294_v43 = vsel %vm579_vm2, %v3289_v42, 0 }
0x18d3   : > { %8850 = vmatpush3.bf16.xpose.msra.mxu1 %v3294_v43 }
0x18d4   : > { %8861 = vmatprep.subr.bf16.mxu1 %v9691_v1 }
0x1980   : > { %v10407_v44 = vpop.f32.mrf.mxu0 }
0x1982   : > { %v8817_v45 = vpop.f32.mrf.mxu0 }
0x1984   : > { %v10409_v46 = vpop.f32.mrf.mxu0 }
0x1986   : > { %v8818_v47 = vpop.f32.mrf.mxu0 }
0x1987   : > { %v9402_v47 = vld [vmem:[%s11369_s3 + $0x70] sm:$0xff]  }
0x1988   : > { %v3149_v48 = vpop.f32.mrf.mxu0 }
0x1989   : > { %v3150_v52 = vadd.f32 %v7859_v49, %v3149_v48  ;;  %v7890_v48 = vld [vmem:[%s11371_s5 + $0x7] ss:$0 sm:$0xff] }
0x198a   : > { %v8831_v50 = vpop.f32.mrf.mxu0 }
0x198c   : > { %v3152_v51 = vpop.f32.mrf.mxu0 }
0x198d   : > { %v3153_v53 = vadd.f32 %v7859_v49, %v3152_v51 }
0x198e   : > { %v8832_v54 = vpop.f32.mrf.mxu0 }
0x198f   : > { %v3288_v55 = vpack.c.bf16 %v3153_v53, %v3150_v52 }
0x1990   : > { %v3281_v56 = vpop.f32.mrf.mxu0 }
0x1991   : > { %8852 = vmatmul.mubr.msk.bf16.vlgmr.msra.gmra.mxu1 %vm579_vm2, %v3288_v55  ;;  %v3282_v60 = vadd.f32 %v7877_v57, %v3281_v56  ;;  %v7908_v56 = vld [vmem:[%s11373_s7 + $0x7] ss:$0 sm:$0xff] }
0x1992   : > { %v8847_v58 = vpop.f32.mrf.mxu0  ;;  %8863 = vmatprep.mubr.msk.bf16.mxu1 %vm9692_vm1, %v9691_v1  ;;  %8862 = vmatpush3.bf16.msra.mxu1 %v3412_v37 }
0x1993   : > { %8875 = vmatprep.subr.bf16.mxu1 %v9691_v1 }
0x1994   : > { %v3284_v59 = vpop.f32.mrf.mxu0 }
0x1995   : > { %v3285_v16 = vadd.f32 %v7877_v57, %v3284_v59 }
0x1996   : > { %v8848_v32 = vpop.f32.mrf.mxu0 }
0x1997   : > { %v3360_v61 = vpack.c.bf16 %v3285_v16, %v3282_v60 }
0x1999   : > { %8856 = vmatpush3.bf16.msra.mxu0 %v3360_v61 }
0x199a   : > { %8867 = vmatprep.subr.bf16.mxu0 %v9691_v1 }
0x1a51   : > { %v3330_v62 = vpop.f32.mrf.mxu1 }
0x1a52   : > { %v3337_v19 = vsel %vm874_vm4, %v3330_v62, -inf }
0x1a53   : > { %3338 = vmax.xlane.f32.xlu0 %v3337_v19  ;;  %v8853_v34 = vpop.f32.mrf.mxu1 }
0x1a54   : > { %v3087_v34 = vadd.f32 %v10383_v29, %v10409_v46 }
0x1a55   : > { %v3333_v63 = vpop.f32.mrf.mxu1 }
0x1a56   : > { %v3340_v0 = vsel %vm874_vm4, %v3333_v63, -inf }
0x1a57   : > { %3341 = vmax.xlane.f32.xlu1 %v3340_v0  ;;  %v8854_v2 = vpop.f32.mrf.mxu1 }
0x1adc   : > { %v3339_v3 = vpop.xlane.xlu0 %3338 }
0x1add   : > { %v3343_v4 = vsub.f32 %v3330_v62, %v3339_v3 }
0x1adf   : > { %v3345_v5 = vmul.f32 1.442695, %v3343_v4  ;;  %v7899_v4 = vld [vmem:[%s11372_s6 + $0x7] ss:$0 sm:$0xff] }
0x1ae0   : > { %v3342_v6 = vpop.xlane.xlu1 %3341 }
0x1ae1   : > { %9525 = vpow2.f32 %v3345_v5  ;;  %v3344_v7 = vsub.f32 %v3333_v63, %v3342_v6 }
0x1ae3   : > { %v3347_v8 = vmul.f32 1.442695, %v3344_v7 }
0x1ae5   : > { %9527 = vpow2.f32 %v3347_v8 }
0x1aee   : > { %v9526_v9 = vpop.eup %9525 }
0x1aef   : > { %v3349_v11 = vsel %vm874_vm4, %v9526_v9, 0.0 }
0x1af0   : > { %3350 = vadd.xlane.f32.xlu0 %v3349_v11 }
0x1af2   : > { %v9528_v17 = vpop.eup %9527 }
0x1af3   : > { %v3352_v20 = vsel %vm874_vm4, %v9528_v17, 0.0 }
0x1af4   : > { %3353 = vadd.xlane.f32.xlu1 %v3352_v20 }
0x1b79   : > { %v3351_v21 = vpop.xlane.xlu0 %3350 }
0x1b7a   : > { %9529 = vrcp.f32 %v3351_v21 }
0x1b7d   : > { %v3354_v22 = vpop.xlane.xlu1 %3353 }
0x1b7e   : > { %9531 = vrcp.f32 %v3354_v22 }
0x1b87   : > { %v9530_v23 = vpop.eup %9529 }
0x1b88   : > { %v3357_v25 = vmul.f32 %v9530_v23, %v9526_v9 }
0x1b8b   : > { %v9532_v24 = vpop.eup %9531 }
0x1b8c   : > { %v3358_v27 = vmul.f32 %v9532_v24, %v9528_v17 }
0x1b8e   : > { %v3359_v30 = vpack.c.bf16 %v3358_v27, %v3357_v25 }
0x1b90   : > { %8858 = vmatmul.mubr.msk.bf16.vlgmr.msra.gmra.mxu0 %vm874_vm4, %v3359_v30 }
0x1b91   : > { %8868 = vmatpush3.bf16.msra.mxu0 %v9397_v28  ;;  %8871 = vmatprep.mubr.msk.bf16.mxu0 %vm9692_vm1, %v9691_v1 }
0x1b92   : > { %8869 = vmatprep.subr.bf16.mxu0 %v9691_v1 }
0x1b95   : > { %8870 = vmatpush3.bf16.msra.mxu0 %v9398_v31 }
0x1b96   : > { %8883 = vmatprep.subr.bf16.mxu0 %v9691_v1 }
0x1b98   : > { %8872 = vmatmul.mubr.msk.bf16.vlgmr.msra.gmra.mxu0 %vm652_vm3, %v10241_v18 }
0x1b99   : > { %8884 = vmatpush3.bf16.msra.mxu0 %v9399_v33  ;;  %8887 = vmatprep.mubr.msk.bf16.mxu0 %vm9692_vm1, %v9691_v1 }
0x1b9a   : > { %8885 = vmatprep.subr.bf16.mxu0 %v9691_v1 }
0x1b9d   : > { %8886 = vmatpush3.bf16.msra.mxu0 %v9400_v35 }
0x1b9e   : > { %8897 = vmatprep.subr.bf16.mxu0 %v9691_v1 }
0x1ba0   : > { %8888 = vmatmul.mubr.msk.bf16.vlgmr.msra.gmra.mxu0 %vm652_vm3, %v10241_v18 }
0x1ba1   : > { %8899 = vmatprep.mubr.msk.bf16.mxu0 %vm9692_vm1, %v9691_v1 }
0x1c50   : > { %v3398_v38 = vpop.f32.mrf.mxu0 }
0x1c52   : > { %v8859_v39 = vpop.f32.mrf.mxu0 }
0x1c54   : > { %v3401_v40 = vpop.f32.mrf.mxu0 }
0x1c55   : > { %v3405_v42 = vpack.c.bf16 %v3401_v40, %v3398_v38 }
0x1c56   : > { %v8860_v43 = vpop.f32.mrf.mxu0 }
0x1c57   : > { %8864 = vmatmul.mubr.msk.bf16.vlgmr.msra.gmra.mxu1 %vm579_vm2, %v3405_v42  ;;  %v7914_v43 = vld [vmem:[%s11374_s8 + $0x1c] sm:$0xf] }
0x1c58   : > { %v3516_v45 = vpop.f32.mrf.mxu0  ;;  %8876 = vmatpush3.bf16.msra.mxu1 %v9401_v41  ;;  %8879 = vmatprep.mubr.msk.bf16.mxu1 %vm9692_vm1, %v9691_v1 }
0x1c59   : > { %8877 = vmatprep.subr.bf16.mxu1 %v9691_v1  ;;  %v3517_v51 = vadd.f32 %v7890_v48, %v3516_v45  ;;  %v3779_v45 = vsel %vm583_vm0, %v7914_v43, 0  ;;  %v9412_v43 = vld [vmem:[%s11380_s14 + $0x20] sm:$0xff]  }
0x1c5a   : > { %v8873_v49 = vpop.f32.mrf.mxu0 }
0x1c5c   : > { %v3519_v50 = vpop.f32.mrf.mxu0  ;;  %8878 = vmatpush3.bf16.msra.mxu1 %v9402_v47 }
0x1c5d   : > { %v3520_v52 = vadd.f32 %v7890_v48, %v3519_v50  ;;  %8891 = vmatprep.subr.bf16.mxu1 %v9691_v1 }
0x1c5e   : > { %v8874_v53 = vpop.f32.mrf.mxu0 }
0x1c5f   : > { %v3655_v54 = vpack.c.bf16 %v3520_v52, %v3517_v51  ;;  %8880 = vmatmul.mubr.msk.bf16.vlgmr.msra.gmra.mxu1 %vm652_vm3, %v10241_v18  ;;  %v3084_v18 = vadd.f32 %v10375_v26, %v10407_v44  ;;  %v7917_v53 = vld [vmem:[%s11375_s9 + $0x1] ss:$0 sm:$0xff] }
0x1c60   : > { %v3648_v55 = vpop.f32.mrf.mxu0  ;;  %8893 = vmatprep.mubr.msk.bf16.mxu1 %vm9692_vm1, %v9691_v1 }
0x1c61   : > { %v3649_v59 = vadd.f32 %v7908_v56, %v3648_v55 }
0x1c62   : > { %v8889_v57 = vpop.f32.mrf.mxu0 }
0x1c64   : > { %v3651_v58 = vpop.f32.mrf.mxu0 }
0x1c65   : > { %v3652_v60 = vadd.f32 %v7908_v56, %v3651_v58 }
0x1c66   : > { %v8890_v16 = vpop.f32.mrf.mxu0 }
0x1c67   : > { %v3727_v32 = vpack.c.bf16 %v3652_v60, %v3649_v59 }
0x1c69   : > { %8898 = vmatpush3.bf16.msra.mxu0 %v3727_v32 }
0x1c6a   : > { %8909 = vmatprep.subr.bf16.mxu0 %v9691_v1 }
0x1d17   : > { %v3448_v61 = vpop.f32.mrf.mxu1 }
0x1d18   : > { %v10481_v62 = vadd.f32 %v3448_v61, %v3084_v18 }
0x1d19   : > { %v8865_v19 = vpop.f32.mrf.mxu1 }
0x1d1b   : > { %v3451_v63 = vpop.f32.mrf.mxu1 }
0x1d1c   : > { %v10485_v0 = vadd.f32 %v3451_v63, %v3087_v34 }
0x1d1d   : > { %v8866_v2 = vpop.f32.mrf.mxu1 }
0x1d1f   : > { %v3582_v3 = vpop.f32.mrf.mxu1 }
0x1d20   : > { %v3583_v7 = vadd.f32 %v7899_v4, %v3582_v3 }
0x1d21   : > { %v8881_v5 = vpop.f32.mrf.mxu1 }
0x1d23   : > { %v3585_v6 = vpop.f32.mrf.mxu1 }
0x1d24   : > { %v3586_v26 = vadd.f32 %v7899_v4, %v3585_v6 }
0x1d25   : > { %v8882_v44 = vpop.f32.mrf.mxu1 }
0x1d26   : > { %v3656_v8 = vpack.c.bf16 %v3586_v26, %v3583_v7 }
0x1d28   : > { %v3661_v9 = vsel %vm579_vm2, %v3656_v8, 0 }
0x1d29   : > { %8892 = vmatpush3.bf16.xpose.msra.mxu1 %v3661_v9 }
0x1d2a   : > { %8903 = vmatprep.subr.bf16.mxu1 %v9691_v1 }
0x1d30   : > { %8894 = vmatmul.mubr.msk.bf16.vlgmr.msra.gmra.mxu1 %vm579_vm2, %v3655_v54 }
0x1d31   : > { %8905 = vmatprep.mubr.msk.bf16.mxu1 %vm9692_vm1, %v9691_v1  ;;  %8904 = vmatpush3.bf16.msra.mxu1 %v3779_v45  ;;  %v7927_v45 = vld [vmem:[%s11379_s13 + $0x1] ss:$0 sm:$0xff] }
0x1d32   : > { %8917 = vmatprep.subr.bf16.mxu1 %v9691_v1 }
0x1df0   : > { %v3697_v29 = vpop.f32.mrf.mxu1 }
0x1df1   : > { %v3704_v46 = vsel %vm874_vm4, %v3697_v29, -inf }
0x1df2   : > { %3705 = vmax.xlane.f32.xlu0 %v3704_v46  ;;  %v8895_v11 = vpop.f32.mrf.mxu1 }
0x1df4   : > { %v3700_v17 = vpop.f32.mrf.mxu1 }
0x1df5   : > { %v3707_v20 = vsel %vm874_vm4, %v3700_v17, -inf }
0x1df6   : > { %3708 = vmax.xlane.f32.xlu1 %v3707_v20  ;;  %v8896_v21 = vpop.f32.mrf.mxu1 }
0x1e7b   : > { %v3706_v22 = vpop.xlane.xlu0 %3705 }
0x1e7c   : > { %v3710_v23 = vsub.f32 %v3697_v29, %v3706_v22 }
0x1e7e   : > { %v3712_v24 = vmul.f32 1.442695, %v3710_v23  ;;  %v7920_v23 = vld [vmem:[%s11376_s10 + $0x1] ss:$0 sm:$0xff] }
0x1e7f   : > { %v3709_v25 = vpop.xlane.xlu1 %3708 }
0x1e80   : > { %9533 = vpow2.f32 %v3712_v24  ;;  %v3711_v27 = vsub.f32 %v3700_v17, %v3709_v25 }
0x1e82   : > { %v3714_v28 = vmul.f32 1.442695, %v3711_v27 }
0x1e84   : > { %9535 = vpow2.f32 %v3714_v28 }
0x1e8d   : > { %v9534_v30 = vpop.eup %9533 }
0x1e8e   : > { %v3716_v31 = vsel %vm874_vm4, %v9534_v30, 0.0 }
0x1e8f   : > { %3717 = vadd.xlane.f32.xlu0 %v3716_v31 }
0x1e91   : > { %v9536_v33 = vpop.eup %9535 }
0x1e92   : > { %v3719_v35 = vsel %vm874_vm4, %v9536_v33, 0.0 }
0x1e93   : > { %3720 = vadd.xlane.f32.xlu1 %v3719_v35 }
0x1f18   : > { %v3718_v36 = vpop.xlane.xlu0 %3717 }
0x1f19   : > { %9537 = vrcp.f32 %v3718_v36  ;;  %v9405_v36 = vld [vmem:[%s11404_s1 + $0x88] sm:$0xff]  }
0x1f1c   : > { %v3721_v37 = vpop.xlane.xlu1 %3720 }
0x1f1d   : > { %9539 = vrcp.f32 %v3721_v37 }
0x1f26   : > { %v9538_v38 = vpop.eup %9537 }
0x1f27   : > { %v3724_v40 = vmul.f32 %v9538_v38, %v9534_v30  ;;  %v7921_v30 = vld [vmem:[%s11377_s11 + $0x1] ss:$0 sm:$0xff] }
0x1f28   : > { %v9406_v38 = vld [vmem:[%s11404_s1 + $0x80] sm:$0xff]  }
0x1f2a   : > { %v9540_v39 = vpop.eup %9539 }
0x1f2b   : > { %v3725_v41 = vmul.f32 %v9540_v39, %v9536_v33  ;;  %v9407_v39 = vld [vmem:[%s11369_s3 + $0x88] sm:$0xff]  }
0x1f2d   : > { %v3726_v42 = vpack.c.bf16 %v3725_v41, %v3724_v40  ;;  %v9408_v40 = vld [vmem:[%s11369_s3 + $0x80] sm:$0xff]   ;;  %v9410_v41 = vld [vmem:[%s11380_s14 + $0x30] sm:$0xff]  }
0x1f2f   : > { %8900 = vmatmul.mubr.msk.bf16.vlgmr.msra.gmra.mxu0 %vm874_vm4, %v3726_v42  ;;  %v9411_v42 = vld [vmem:[%s11380_s14 + $0x28] sm:$0xff]  }
0x1f30   : > { %8913 = vmatprep.mubr.msk.bf16.mxu0 %vm9692_vm1, %v9691_v1 }
0x1fef   : > { %v3765_v47 = vpop.f32.mrf.mxu0 }
0x1ff1   : > { %v8901_v48 = vpop.f32.mrf.mxu0 }
0x1ff3   : > { %v3768_v49 = vpop.f32.mrf.mxu0 }
0x1ff4   : > { %v3772_v50 = vpack.c.bf16 %v3768_v49, %v3765_v47 }
0x1ff5   : > { %v8902_v51 = vpop.f32.mrf.mxu0 }
0x1ff6   : > { %8906 = vmatmul.mubr.msk.bf16.vlgmr.msra.gmra.mxu1 %vm579_vm2, %v3772_v50 }
0x1ff7   : > { %8925 = vmatprep.mubr.msk.bf16.mxu1 %vm9692_vm1, %v9691_v1 }
0x20b6   : > { %v3815_v52 = vpop.f32.mrf.mxu1 }
0x20b7   : > { %v3822_v54 = vadd.f32 %v3815_v52, %v10481_v62 }
0x20b8   : > { %v8907_v55 = vpop.f32.mrf.mxu1 }
0x20b9   : > { %v3832_v56 = vadd.f32 %v7917_v53, %v3822_v54 }
0x20ba   : > { %v3818_v57 = vpop.f32.mrf.mxu1 }
0x20bb   : > { %v3834_v58 = vadd.f32 %v3832_v56, %v10232_v13  ;;  %v3823_v59 = vadd.f32 %v3818_v57, %v10485_v0  ;;  %v9403_v13 = vld [vmem:[%s11378_s12 + $0x18] sm:$0xff]   ;;  %v9404_v0 = vld [vmem:[%s11378_s12 + $0x10] sm:$0xff]   ;;  %v9413_v56 = vld [vmem:[%s11370_s4 + $0x88] sm:$0xff]  }
0x20bc   : > { %v8908_v60 = vpop.f32.mrf.mxu1  ;;  %8910 = vmatpush3.bf16.msra.mxu0 %v9403_v13 }
0x20bd   : > { %v3833_v16 = vadd.f32 %v7917_v53, %v3823_v59  ;;  %v3840_v32 = vsel %vm652_vm3, %v3834_v58, 0.0  ;;  %v3848_v18 = vmul.f32 %v3834_v58, %v3834_v58  ;;  %8911 = vmatprep.subr.bf16.mxu0 %v9691_v1  ;;  %v9414_v60 = vld [vmem:[%s11370_s4 + $0x80] sm:$0xff]  }
0x20be   : > { %3841 = vadd.xlane.f32.xlu0 %v3840_v32 }
0x20bf   : > { %v3835_v61 = vadd.f32 %v3833_v16, %v10234_v15  ;;  %v3850_v19 = vsel %vm652_vm3, %v3848_v18, 0.0  ;;  %v9409_v15 = vld [vmem:[%s11380_s14 + $0x38] sm:$0xff]   ;;  %v7964_v18 = vld [vmem:[%s11372_s6 + $0x8] ss:$0 sm:$0xff] }
0x20c0   : > { %8912 = vmatpush3.bf16.msra.mxu0 %v9404_v0  ;;  %8918 = vmatpush3.bf16.msra.mxu1 %v9409_v15  ;;  %v7955_v15 = vld [vmem:[%s11371_s5 + $0x8] ss:$0 sm:$0xff] }
0x20c1   : > { %v3843_v34 = vsel %vm652_vm3, %v3835_v61, 0.0  ;;  %v3849_v62 = vmul.f32 %v3835_v61, %v3835_v61  ;;  %8929 = vmatprep.subr.bf16.mxu0 %v9691_v1  ;;  %8919 = vmatprep.subr.bf16.mxu1 %v9691_v1 }
0x20c2   : > { %3851 = vadd.xlane.f32.xlu0 %v3850_v19  ;;  %3844 = vadd.xlane.f32.xlu1 %v3843_v34 }
0x20c3   : > { %v3853_v63 = vsel %vm652_vm3, %v3849_v62, 0.0 }
0x20c4   : > { %8920 = vmatpush3.bf16.msra.mxu1 %v9410_v41 }
0x20c5   : > { %8921 = vmatprep.subr.bf16.mxu1 %v9691_v1 }
0x20c6   : > { %3854 = vadd.xlane.f32.xlu1 %v3853_v63 }
0x20c8   : > { %8922 = vmatpush3.bf16.msra.mxu1 %v9411_v42 }
0x20c9   : > { %8923 = vmatprep.subr.bf16.mxu1 %v9691_v1 }
0x20cc   : > { %8924 = vmatpush3.bf16.msra.mxu1 %v9412_v43 }
0x20cd   : > { %8945 = vmatprep.subr.bf16.mxu1 %v9691_v1 }
0x2147   : > { %v3842_v2 = vpop.xlane.xlu0 %3841 }
0x2148   : > { %v3846_v3 = vmul.f32 0.03125, %v3842_v2 }
0x214a   : > { %v3858_v6 = vmul.f32 %v3846_v3, %v3846_v3  ;;  %v3862_v20 = vsub.f32 %v3834_v58, %v3846_v3 }
0x214b   : > { %v3852_v4 = vpop.xlane.xlu0 %3851  ;;  %v3845_v5 = vpop.xlane.xlu1 %3844 }
0x214c   : > { %v3856_v7 = vmul.f32 0.03125, %v3852_v4  ;;  %v3847_v26 = vmul.f32 0.03125, %v3845_v5  ;;  %v9415_v4 = vld [vmem:[%s11404_s1 + $0x98] sm:$0xff]  }
0x214e   : > { %v3860_v44 = vsub.f32 %v3856_v7, %v3858_v6  ;;  %v3859_v29 = vmul.f32 %v3847_v26, %v3847_v26  ;;  %v3863_v24 = vsub.f32 %v3835_v61, %v3847_v26  ;;  %v9416_v6 = vld [vmem:[%s11404_s1 + $0x90] sm:$0xff]   ;;  %v9417_v7 = vld [vmem:[%s11370_s4 + $0x98] sm:$0xff]  }
0x214f   : > { %v3855_v8 = vpop.xlane.xlu1 %3854  ;;  %v9418_v26 = vld [vmem:[%s11370_s4 + $0x90] sm:$0xff]  }
0x2150   : > { %v3864_v9 = vadd.f32 1e-05, %v3860_v44  ;;  %v3857_v46 = vmul.f32 0.03125, %v3855_v8 }
0x2152   : > { %9541 = vrsqrt.f32 %v3864_v9  ;;  %v3861_v11 = vsub.f32 %v3857_v46, %v3859_v29 }
0x2154   : > { %v3865_v17 = vadd.f32 1e-05, %v3861_v11  ;;  %v7973_v11 = vld [vmem:[%s11373_s7 + $0x8] ss:$0 sm:$0xff] }
0x2156   : > { %9543 = vrsqrt.f32 %v3865_v17 }
0x215f   : > { %v9542_v21 = vpop.eup %9541 }
0x2160   : > { %v3868_v22 = vmul.f32 %v9542_v21, %v3862_v20 }
0x2162   : > { %v3876_v28 = vmul.f32 %v7920_v23, %v3868_v22 }
0x2163   : > { %v9544_v25 = vpop.eup %9543 }
0x2164   : > { %v3869_v27 = vmul.f32 %v9544_v25, %v3863_v24  ;;  %v10539_v33 = vadd.f32 %v7921_v30, %v3876_v28 }
0x2166   : > { %v3877_v31 = vmul.f32 %v7920_v23, %v3869_v27 }
0x2168   : > { %v10541_v35 = vadd.f32 %v7921_v30, %v3877_v31 }
0x216a   : > { %v3886_v37 = vpack.c.bf16 %v10541_v35, %v10539_v33 }
0x216c   : > { %8914 = vmatmul.mubr.msk.bf16.vlgmr.msra.gmra.mxu0 %vm652_vm3, %v3886_v37 }
0x216d   : > { %8930 = vmatpush3.bf16.msra.mxu0 %v9405_v36  ;;  %8933 = vmatprep.mubr.msk.bf16.mxu0 %vm9692_vm1, %v9691_v1 }
0x216e   : > { %8931 = vmatprep.subr.bf16.mxu0 %v9691_v1 }
0x2171   : > { %8932 = vmatpush3.bf16.msra.mxu0 %v9406_v38  ;;  %v7985_v38 = vld [vmem:[%s11371_s5 + $0x9] ss:$0 sm:$0xff] }
0x2172   : > { %8937 = vmatprep.subr.bf16.mxu0 %v9691_v1 }
0x2174   : > { %8934 = vmatmul.mubr.msk.bf16.vlgmr.msra.gmra.mxu0 %vm652_vm3, %v9884_v14 }
0x2175   : > { %8938 = vmatpush3.bf16.msra.mxu0 %v9407_v39  ;;  %8941 = vmatprep.mubr.msk.bf16.mxu0 %vm9692_vm1, %v9691_v1 }
0x2176   : > { %8939 = vmatprep.subr.bf16.mxu0 %v9691_v1 }
0x2179   : > { %8940 = vmatpush3.bf16.msra.mxu0 %v9408_v40 }
0x217a   : > { %8953 = vmatprep.subr.bf16.mxu0 %v9691_v1 }
0x217c   : > { %8942 = vmatmul.mubr.msk.bf16.vlgmr.msra.gmra.mxu0 %vm652_vm3, %v9884_v14 }
0x217d   : > { %8955 = vmatprep.mubr.msk.bf16.mxu0 %vm9692_vm1, %v9691_v1 }
0x222c   : > { %v3949_v47 = vpop.f32.mrf.mxu0 }
0x222d   : > { %v3950_v49 = vadd.f32 %v7927_v45, %v3949_v47 }
0x222e   : > { %v8915_v48 = vpop.f32.mrf.mxu0 }
0x222f   : > { %v3956_v53 = vmax.f32 %v3950_v49, 0.0  ;;  %v8003_v48 = vld [vmem:[%s11373_s7 + $0x9] ss:$0 sm:$0xff] }
0x2230   : > { %v3952_v50 = vpop.f32.mrf.mxu0 }
0x2231   : > { %v3953_v51 = vadd.f32 %v7927_v45, %v3952_v50 }
0x2232   : > { %v8916_v52 = vpop.f32.mrf.mxu0 }
0x2233   : > { %v3957_v54 = vmax.f32 %v3953_v51, 0.0 }
0x2234   : > { %v4155_v55 = vpop.f32.mrf.mxu0 }
0x2235   : > { %v3958_v57 = vpack.c.bf16 %v3957_v54, %v3956_v53  ;;  %v4156_v3 = vadd.f32 %v7955_v15, %v4155_v55 }
0x2236   : > { %v8935_v58 = vpop.f32.mrf.mxu0 }
0x2237   : > { %8926 = vmatmul.mubr.msk.bf16.vlgmr.msra.gmra.mxu1 %vm2261_vm5, %v3958_v57 }
0x2238   : > { %v4158_v59 = vpop.f32.mrf.mxu0  ;;  %8946 = vmatpush3.bf16.msra.mxu1 %v9413_v56  ;;  %8949 = vmatprep.mubr.msk.bf16.mxu1 %vm9692_vm1, %v9691_v1 }
0x2239   : > { %8947 = vmatprep.subr.bf16.mxu1 %v9691_v1  ;;  %v4159_v2 = vadd.f32 %v7955_v15, %v4158_v59  ;;  %v9419_v15 = vld [vmem:[%s11369_s3 + $0x98] sm:$0xff]  }
0x223a   : > { %v8936_v16 = vpop.f32.mrf.mxu0 }
0x223b   : > { %v4294_v5 = vpack.c.bf16 %v4159_v2, %v4156_v3  ;;  %v9420_v3 = vld [vmem:[%s11369_s3 + $0x90] sm:$0xff]  }
0x223c   : > { %v4221_v32 = vpop.f32.mrf.mxu0  ;;  %8948 = vmatpush3.bf16.msra.mxu1 %v9414_v60 }
0x223d   : > { %8959 = vmatprep.subr.bf16.mxu1 %v9691_v1  ;;  %v4222_v34 = vadd.f32 %v7964_v18, %v4221_v32 }
0x223e   : > { %v8943_v61 = vpop.f32.mrf.mxu0 }
0x223f   : > { %8950 = vmatmul.mubr.msk.bf16.vlgmr.msra.gmra.mxu1 %vm652_vm3, %v9884_v14 }
0x2240   : > { %v4224_v19 = vpop.f32.mrf.mxu0  ;;  %8961 = vmatprep.mubr.msk.bf16.mxu1 %vm9692_vm1, %v9691_v1 }
0x2241   : > { %v4225_v62 = vadd.f32 %v7964_v18, %v4224_v19 }
0x2242   : > { %v8944_v63 = vpop.f32.mrf.mxu0 }
0x2243   : > { %v4295_v13 = vpack.c.bf16 %v4225_v62, %v4222_v34 }
0x2245   : > { %v4300_v0 = vsel %vm579_vm2, %v4295_v13, 0 }
0x2246   : > { %8954 = vmatpush3.bf16.xpose.msra.mxu0 %v4300_v0 }
0x2247   : > { %8965 = vmatprep.subr.bf16.mxu0 %v9691_v1 }
0x224d   : > { %8956 = vmatmul.mubr.msk.bf16.vlgmr.msra.gmra.mxu0 %vm579_vm2, %v4294_v5 }
0x224e   : > { %8966 = vmatpush3.bf16.msra.mxu0 %v9415_v4  ;;  %8969 = vmatprep.mubr.msk.bf16.mxu0 %vm9692_vm1, %v9691_v1 }
0x224f   : > { %8967 = vmatprep.subr.bf16.mxu0 %v9691_v1 }
0x2252   : > { %8968 = vmatpush3.bf16.msra.mxu0 %v9416_v6 }
0x2253   : > { %8981 = vmatprep.subr.bf16.mxu0 %v9691_v1 }
0x2255   : > { %8970 = vmatmul.mubr.msk.bf16.vlgmr.msra.gmra.mxu0 %vm652_vm3, %v9884_v14 }
0x2256   : > { %8982 = vmatpush3.bf16.msra.mxu0 %v9417_v7  ;;  %8985 = vmatprep.mubr.msk.bf16.mxu0 %vm9692_vm1, %v9691_v1 }
0x2257   : > { %8983 = vmatprep.subr.bf16.mxu0 %v9691_v1 }
0x225a   : > { %8984 = vmatpush3.bf16.msra.mxu0 %v9418_v26 }
0x225b   : > { %8995 = vmatprep.subr.bf16.mxu0 %v9691_v1 }
0x225d   : > { %8986 = vmatmul.mubr.msk.bf16.vlgmr.msra.gmra.mxu0 %vm652_vm3, %v9884_v14 }
0x225e   : > { %8997 = vmatprep.mubr.msk.bf16.mxu0 %vm9692_vm1, %v9691_v1 }
0x22f7   : > { %v10637_v44 = vpop.f32.mrf.mxu1 }
0x22f9   : > { %v8927_v8 = vpop.f32.mrf.mxu1 }
0x22fb   : > { %v10639_v9 = vpop.f32.mrf.mxu1 }
0x22fd   : > { %v8928_v29 = vpop.f32.mrf.mxu1 }
0x22fe   : > { %v7994_v29 = vld [vmem:[%s11372_s6 + $0x9] ss:$0 sm:$0xff] }
0x22ff   : > { %v4287_v46 = vpop.f32.mrf.mxu1 }
0x2300   : > { %v4288_v21 = vadd.f32 %v7973_v11, %v4287_v46 }
0x2301   : > { %v8951_v17 = vpop.f32.mrf.mxu1 }
0x2303   : > { %v4290_v20 = vpop.f32.mrf.mxu1 }
0x2304   : > { %v4291_v22 = vadd.f32 %v7973_v11, %v4290_v20 }
0x2305   : > { %v8952_v23 = vpop.f32.mrf.mxu1 }
0x2306   : > { %v4366_v24 = vpack.c.bf16 %v4291_v22, %v4288_v21 }
0x2308   : > { %8960 = vmatpush3.bf16.msra.mxu1 %v4366_v24 }
0x2309   : > { %8973 = vmatprep.subr.bf16.mxu1 %v9691_v1 }
0x230d   : > { %v4336_v25 = vpop.f32.mrf.mxu0 }
0x230e   : > { %v4343_v27 = vsel %vm874_vm4, %v4336_v25, -inf }
0x230f   : > { %4344 = vmax.xlane.f32.xlu0 %v4343_v27  ;;  %v8957_v28 = vpop.f32.mrf.mxu0 }
0x2311   : > { %v4339_v30 = vpop.f32.mrf.mxu0 }
0x2312   : > { %v4346_v31 = vsel %vm874_vm4, %v4339_v30, -inf }
0x2313   : > { %4347 = vmax.xlane.f32.xlu1 %v4346_v31  ;;  %v8958_v36 = vpop.f32.mrf.mxu0 }
0x2315   : > { %v4473_v37 = vpop.f32.mrf.mxu0 }
0x2316   : > { %v10650_v41 = vadd.f32 %v7985_v38, %v4473_v37 }
0x2317   : > { %v8971_v39 = vpop.f32.mrf.mxu0 }
0x2319   : > { %v4476_v40 = vpop.f32.mrf.mxu0 }
0x231a   : > { %v10652_v42 = vadd.f32 %v7985_v38, %v4476_v40 }
0x231b   : > { %v8972_v43 = vpop.f32.mrf.mxu0 }
0x231c   : > { %v4612_v45 = vpack.c.bf16 %v10652_v42, %v10650_v41 }
0x231d   : > { %v4605_v47 = vpop.f32.mrf.mxu0 }
0x231e   : > { %v4606_v51 = vadd.f32 %v8003_v48, %v4605_v47 }
0x231f   : > { %v8987_v49 = vpop.f32.mrf.mxu0 }
0x2321   : > { %v4608_v50 = vpop.f32.mrf.mxu0 }
0x2322   : > { %v4609_v52 = vadd.f32 %v8003_v48, %v4608_v50 }
0x2323   : > { %v8988_v53 = vpop.f32.mrf.mxu0 }
0x2324   : > { %v4684_v54 = vpack.c.bf16 %v4609_v52, %v4606_v51  ;;  %v7979_v52 = vld [vmem:[%s11374_s8 + $0x20] sm:$0xf] }
0x2326   : > { %8996 = vmatpush3.bf16.msra.mxu0 %v4684_v54 }
0x2327   : > { %9007 = vmatprep.subr.bf16.mxu0 %v9691_v1 }
0x2398   : > { %v4345_v55 = vpop.xlane.xlu0 %4344 }
0x2399   : > { %v4349_v56 = vsub.f32 %v4336_v25, %v4345_v55 }
0x239b   : > { %v4351_v57 = vmul.f32 1.442695, %v4349_v56  ;;  %v4783_v56 = vsel %vm583_vm0, %v7979_v52, 0 }
0x239c   : > { %v4348_v58 = vpop.xlane.xlu1 %4347 }
0x239d   : > { %9545 = vpow2.f32 %v4351_v57  ;;  %v4350_v59 = vsub.f32 %v4339_v30, %v4348_v58  ;;  %v9421_v57 = vld [vmem:[%s11369_s3 + $0xa8] sm:$0xff]   ;;  %v9422_v58 = vld [vmem:[%s11369_s3 + $0xa0] sm:$0xff]  }
0x239f   : > { %v4353_v60 = vmul.f32 1.442695, %v4350_v59  ;;  %v8009_v59 = vld [vmem:[%s11374_s8 + $0x24] sm:$0xf] }
0x23a1   : > { %9547 = vpow2.f32 %v4353_v60  ;;  %v4736_v60 = vsel %vm583_vm0, %v8009_v59, 0 }
0x23aa   : > { %v9546_v16 = vpop.eup %9545 }
0x23ab   : > { %v4355_v32 = vsel %vm874_vm4, %v9546_v16, 0.0 }
0x23ac   : > { %4356 = vadd.xlane.f32.xlu0 %v4355_v32 }
0x23ae   : > { %v9548_v18 = vpop.eup %9547 }
0x23af   : > { %v4358_v61 = vsel %vm874_vm4, %v9548_v18, 0.0 }
0x23b0   : > { %4359 = vadd.xlane.f32.xlu1 %v4358_v61  ;;  %v9423_v61 = vld [vmem:[%s11404_s1 + $0xa8] sm:$0xff]  }
0x2435   : > { %v4357_v19 = vpop.xlane.xlu0 %4356 }
0x2436   : > { %9549 = vrcp.f32 %v4357_v19 }
0x2439   : > { %v4360_v34 = vpop.xlane.xlu1 %4359 }
0x243a   : > { %9551 = vrcp.f32 %v4360_v34 }
0x2443   : > { %v9550_v62 = vpop.eup %9549 }
0x2444   : > { %v4363_v13 = vmul.f32 %v9550_v62, %v9546_v16 }
0x2447   : > { %v9552_v63 = vpop.eup %9551 }
0x2448   : > { %v4364_v0 = vmul.f32 %v9552_v63, %v9548_v18  ;;  %v9424_v63 = vld [vmem:[%s11404_s1 + $0xa0] sm:$0xff]  }
0x244a   : > { %v4365_v2 = vpack.c.bf16 %v4364_v0, %v4363_v13 }
0x244c   : > { %8962 = vmatmul.mubr.msk.bf16.vlgmr.msra.gmra.mxu1 %vm874_vm4, %v4365_v2 }
0x244d   : > { %8974 = vmatpush3.bf16.msra.mxu1 %v9419_v15  ;;  %8977 = vmatprep.mubr.msk.bf16.mxu1 %vm9692_vm1, %v9691_v1  ;;  %v9425_v15 = vld [vmem:[%s11370_s4 + $0xa8] sm:$0xff]  }
0x244e   : > { %8975 = vmatprep.subr.bf16.mxu1 %v9691_v1 }
0x2451   : > { %8976 = vmatpush3.bf16.msra.mxu1 %v9420_v3 }
0x2452   : > { %8989 = vmatprep.subr.bf16.mxu1 %v9691_v1 }
0x2454   : > { %8978 = vmatmul.mubr.msk.bf16.vlgmr.msra.gmra.mxu1 %vm652_vm3, %v9884_v14 }
0x2455   : > { %8991 = vmatprep.mubr.msk.bf16.mxu1 %vm9692_vm1, %v9691_v1 }
0x250c   : > { %v4404_v4 = vpop.f32.mrf.mxu1 }
0x250e   : > { %v8963_v5 = vpop.f32.mrf.mxu1 }
0x250f   : > { %v8026_v5 = vld [vmem:[%s11372_s6 + $0xa] ss:$0 sm:$0xff] }
0x2510   : > { %v4407_v6 = vpop.f32.mrf.mxu1 }
0x2511   : > { %v4411_v7 = vpack.c.bf16 %v4407_v6, %v4404_v4  ;;  %v9426_v4 = vld [vmem:[%s11370_s4 + $0xa0] sm:$0xff]  }
0x2512   : > { %v8964_v26 = vpop.f32.mrf.mxu1 }
0x2514   : > { %v4539_v8 = vpop.f32.mrf.mxu1 }
0x2515   : > { %v4540_v17 = vadd.f32 %v7994_v29, %v4539_v8 }
0x2516   : > { %v8979_v46 = vpop.f32.mrf.mxu1 }
0x2518   : > { %v4542_v11 = vpop.f32.mrf.mxu1 }
0x2519   : > { %v4543_v20 = vadd.f32 %v7994_v29, %v4542_v11 }
0x251a   : > { %v8980_v21 = vpop.f32.mrf.mxu1 }
0x251b   : > { %v4613_v22 = vpack.c.bf16 %v4543_v20, %v4540_v17 }
0x251d   : > { %v4618_v23 = vsel %vm579_vm2, %v4613_v22, 0 }
0x251e   : > { %8990 = vmatpush3.bf16.xpose.msra.mxu1 %v4618_v23 }
0x251f   : > { %9001 = vmatprep.subr.bf16.mxu1 %v9691_v1 }
0x2525   : > { %8992 = vmatmul.mubr.msk.bf16.vlgmr.msra.gmra.mxu1 %vm579_vm2, %v4612_v45 }
0x2526   : > { %9003 = vmatprep.mubr.msk.bf16.mxu1 %vm9692_vm1, %v9691_v1  ;;  %9002 = vmatpush3.bf16.msra.mxu1 %v4736_v60 }
0x2527   : > { %9013 = vmatprep.subr.bf16.mxu1 %v9691_v1 }
0x25e5   : > { %v4654_v24 = vpop.f32.mrf.mxu1 }
0x25e6   : > { %v4661_v25 = vsel %vm874_vm4, %v4654_v24, -inf }
0x25e7   : > { %4662 = vmax.xlane.f32.xlu0 %v4661_v25  ;;  %v8993_v27 = vpop.f32.mrf.mxu1 }
0x25e9   : > { %v4657_v28 = vpop.f32.mrf.mxu1 }
0x25ea   : > { %v4664_v30 = vsel %vm874_vm4, %v4657_v28, -inf }
0x25eb   : > { %4665 = vmax.xlane.f32.xlu1 %v4664_v30  ;;  %v8994_v31 = vpop.f32.mrf.mxu1 }
0x2670   : > { %v4663_v36 = vpop.xlane.xlu0 %4662 }
0x2671   : > { %v4667_v37 = vsub.f32 %v4654_v24, %v4663_v36  ;;  %v8017_v24 = vld [vmem:[%s11371_s5 + $0xa] ss:$0 sm:$0xff] }
0x2673   : > { %v4669_v38 = vmul.f32 1.442695, %v4667_v37 }
0x2674   : > { %v4666_v39 = vpop.xlane.xlu1 %4665 }
0x2675   : > { %9553 = vpow2.f32 %v4669_v38  ;;  %v4668_v40 = vsub.f32 %v4657_v28, %v4666_v39  ;;  %v8035_v38 = vld [vmem:[%s11373_s7 + $0xa] ss:$0 sm:$0xff] }
0x2677   : > { %v4671_v41 = vmul.f32 1.442695, %v4668_v40 }
0x2679   : > { %9555 = vpow2.f32 %v4671_v41 }
0x2682   : > { %v9554_v42 = vpop.eup %9553 }
0x2683   : > { %v4673_v43 = vsel %vm874_vm4, %v9554_v42, 0.0 }
0x2684   : > { %4674 = vadd.xlane.f32.xlu0 %v4673_v43 }
0x2686   : > { %v9556_v45 = vpop.eup %9555 }
0x2687   : > { %v4676_v47 = vsel %vm874_vm4, %v9556_v45, 0.0 }
0x2688   : > { %4677 = vadd.xlane.f32.xlu1 %v4676_v47 }
0x270d   : > { %v4675_v48 = vpop.xlane.xlu0 %4674 }
0x270e   : > { %9557 = vrcp.f32 %v4675_v48 }
0x2711   : > { %v4678_v49 = vpop.xlane.xlu1 %4677 }
0x2712   : > { %9559 = vrcp.f32 %v4678_v49 }
0x271b   : > { %v9558_v50 = vpop.eup %9557 }
0x271c   : > { %v4681_v53 = vmul.f32 %v9558_v50, %v9554_v42 }
0x271f   : > { %v9560_v51 = vpop.eup %9559 }
0x2720   : > { %v4682_v54 = vmul.f32 %v9560_v51, %v9556_v45 }
0x2722   : > { %v4683_v55 = vpack.c.bf16 %v4682_v54, %v4681_v53 }
0x2724   : > { %8998 = vmatmul.mubr.msk.bf16.vlgmr.msra.gmra.mxu0 %vm874_vm4, %v4683_v55 }
0x2725   : > { %9008 = vmatpush3.bf16.msra.mxu0 %v4783_v56  ;;  %9009 = vmatprep.mubr.msk.bf16.mxu0 %vm9692_vm1, %v9691_v1 }
0x2726   : > { %9021 = vmatprep.subr.bf16.mxu0 %v9691_v1 }
0x272c   : > { %9010 = vmatmul.mubr.msk.bf16.vlgmr.msra.gmra.mxu0 %vm579_vm2, %v4411_v7 }
0x272d   : > { %9022 = vmatpush3.bf16.msra.mxu0 %v9421_v57  ;;  %9025 = vmatprep.mubr.msk.bf16.mxu0 %vm9692_vm1, %v9691_v1 }
0x272e   : > { %9023 = vmatprep.subr.bf16.mxu0 %v9691_v1 }
0x2731   : > { %9024 = vmatpush3.bf16.msra.mxu0 %v9422_v58 }
0x2732   : > { %9037 = vmatprep.subr.bf16.mxu0 %v9691_v1 }
0x2734   : > { %9026 = vmatmul.mubr.msk.bf16.vlgmr.msra.gmra.mxu0 %vm652_vm3, %v9884_v14 }
0x2735   : > { %9039 = vmatprep.mubr.msk.bf16.mxu0 %vm9692_vm1, %v9691_v1 }
0x27e4   : > { %v4722_v16 = vpop.f32.mrf.mxu0 }
0x27e6   : > { %v8999_v32 = vpop.f32.mrf.mxu0 }
0x27e8   : > { %v4725_v18 = vpop.f32.mrf.mxu0 }
0x27e9   : > { %v4729_v19 = vpack.c.bf16 %v4725_v18, %v4722_v16 }
0x27ea   : > { %v9000_v34 = vpop.f32.mrf.mxu0 }
0x27eb   : > { %9004 = vmatmul.mubr.msk.bf16.vlgmr.msra.gmra.mxu1 %vm579_vm2, %v4729_v19 }
0x27ec   : > { %v10721_v62 = vpop.f32.mrf.mxu0  ;;  %9014 = vmatpush3.bf16.msra.mxu1 %v9423_v61  ;;  %9017 = vmatprep.mubr.msk.bf16.mxu1 %vm9692_vm1, %v9691_v1 }
0x27ed   : > { %9015 = vmatprep.subr.bf16.mxu1 %v9691_v1 }
0x27ee   : > { %v9011_v13 = vpop.f32.mrf.mxu0 }
0x27f0   : > { %v10729_v0 = vpop.f32.mrf.mxu0  ;;  %9016 = vmatpush3.bf16.msra.mxu1 %v9424_v63 }
0x27f1   : > { %9029 = vmatprep.subr.bf16.mxu1 %v9691_v1 }
0x27f2   : > { %v9012_v2 = vpop.f32.mrf.mxu0 }
0x27f3   : > { %9018 = vmatmul.mubr.msk.bf16.vlgmr.msra.gmra.mxu1 %vm652_vm3, %v9884_v14 }
0x27f4   : > { %v4951_v3 = vpop.f32.mrf.mxu0  ;;  %9030 = vmatpush3.bf16.msra.mxu1 %v9425_v15  ;;  %9033 = vmatprep.mubr.msk.bf16.mxu1 %vm9692_vm1, %v9691_v1  ;;  %v9427_v15 = vld [vmem:[%s11404_s1 + $0xb8] sm:$0xff]  }
0x27f5   : > { %9031 = vmatprep.subr.bf16.mxu1 %v9691_v1  ;;  %v4952_v26 = vadd.f32 %v8026_v5, %v4951_v3  ;;  %v9428_v3 = vld [vmem:[%s11404_s1 + $0xb0] sm:$0xff]  }
0x27f6   : > { %v9027_v6 = vpop.f32.mrf.mxu0 }
0x27f7   : > { %v8041_v6 = vld [vmem:[%s11374_s8 + $0x28] sm:$0xf] }
0x27f8   : > { %v4954_v7 = vpop.f32.mrf.mxu0  ;;  %9032 = vmatpush3.bf16.msra.mxu1 %v9426_v4  ;;  %v9429_v4 = vld [vmem:[%s11370_s4 + $0xb8] sm:$0xff]  }
0x27f9   : > { %v4955_v8 = vadd.f32 %v8026_v5, %v4954_v7  ;;  %9043 = vmatprep.subr.bf16.mxu1 %v9691_v1  ;;  %v9430_v5 = vld [vmem:[%s11370_s4 + $0xb0] sm:$0xff]   ;;  %v5148_v7 = vsel %vm583_vm0, %v8041_v6, 0 }
0x27fa   : > { %v9028_v29 = vpop.f32.mrf.mxu0 }
0x27fb   : > { %v5025_v46 = vpack.c.bf16 %v4955_v8, %v4952_v26  ;;  %9034 = vmatmul.mubr.msk.bf16.vlgmr.msra.gmra.mxu1 %vm652_vm3, %v9884_v14 }
0x27fc   : > { %9045 = vmatprep.mubr.msk.bf16.mxu1 %vm9692_vm1, %v9691_v1 }
0x27fd   : > { %v5030_v11 = vsel %vm579_vm2, %v5025_v46, 0  ;;  %v9431_v46 = vld [vmem:[%s11369_s3 + $0xb8] sm:$0xff]  }
0x27fe   : > { %9038 = vmatpush3.bf16.xpose.msra.mxu0 %v5030_v11 }
0x27ff   : > { %9049 = vmatprep.subr.bf16.mxu0 %v9691_v1 }
0x28ab   : > { %v10753_v17 = vpop.f32.mrf.mxu1 }
0x28ad   : > { %v9005_v20 = vpop.f32.mrf.mxu1 }
0x28af   : > { %v10755_v21 = vpop.f32.mrf.mxu1 }
0x28b1   : > { %v9006_v22 = vpop.f32.mrf.mxu1 }
0x28b3   : > { %v4885_v23 = vpop.f32.mrf.mxu1 }
0x28b4   : > { %v4886_v28 = vadd.f32 %v8017_v24, %v4885_v23  ;;  %v9432_v23 = vld [vmem:[%s11369_s3 + $0xb0] sm:$0xff]  }
0x28b5   : > { %v9019_v25 = vpop.f32.mrf.mxu1 }
0x28b7   : > { %v4888_v27 = vpop.f32.mrf.mxu1 }
0x28b8   : > { %v4889_v30 = vadd.f32 %v8017_v24, %v4888_v27  ;;  %v8048_v24 = vld [vmem:[%s11371_s5 + $0xb] ss:$0 sm:$0xff] }
0x28b9   : > { %v9020_v31 = vpop.f32.mrf.mxu1 }
0x28ba   : > { %v5024_v36 = vpack.c.bf16 %v4889_v30, %v4886_v28 }
0x28bb   : > { %v5017_v37 = vpop.f32.mrf.mxu1 }
0x28bc   : > { %9040 = vmatmul.mubr.msk.bf16.vlgmr.msra.gmra.mxu0 %vm579_vm2, %v5024_v36  ;;  %v5018_v41 = vadd.f32 %v8035_v38, %v5017_v37 }
0x28bd   : > { %v9035_v39 = vpop.f32.mrf.mxu1  ;;  %9051 = vmatprep.mubr.msk.bf16.mxu0 %vm9692_vm1, %v9691_v1  ;;  %9050 = vmatpush3.bf16.msra.mxu0 %v5148_v7 }
0x28be   : > { %9063 = vmatprep.subr.bf16.mxu0 %v9691_v1 }
0x28bf   : > { %v5020_v40 = vpop.f32.mrf.mxu1 }
0x28c0   : > { %v5021_v42 = vadd.f32 %v8035_v38, %v5020_v40  ;;  %v8066_v38 = vld [vmem:[%s11373_s7 + $0xb] ss:$0 sm:$0xff] }
0x28c1   : > { %v9036_v43 = vpop.f32.mrf.mxu1 }
0x28c2   : > { %v5096_v45 = vpack.c.bf16 %v5021_v42, %v5018_v41 }
0x28c4   : > { %9044 = vmatpush3.bf16.msra.mxu1 %v5096_v45 }
0x28c5   : > { %9055 = vmatprep.subr.bf16.mxu1 %v9691_v1 }
0x297c   : > { %v5066_v47 = vpop.f32.mrf.mxu0 }
0x297d   : > { %v5073_v48 = vsel %vm874_vm4, %v5066_v47, -inf }
0x297e   : > { %5074 = vmax.xlane.f32.xlu0 %v5073_v48  ;;  %v9041_v49 = vpop.f32.mrf.mxu0 }
0x2980   : > { %v5069_v50 = vpop.f32.mrf.mxu0 }
0x2981   : > { %v5076_v51 = vsel %vm874_vm4, %v5069_v50, -inf }
0x2982   : > { %5077 = vmax.xlane.f32.xlu1 %v5076_v51  ;;  %v9042_v52 = vpop.f32.mrf.mxu0 }
0x2a07   : > { %v5075_v53 = vpop.xlane.xlu0 %5074 }
0x2a08   : > { %v5079_v54 = vsub.f32 %v5066_v47, %v5075_v53 }
0x2a0a   : > { %v5081_v55 = vmul.f32 1.442695, %v5079_v54 }
0x2a0b   : > { %v5078_v56 = vpop.xlane.xlu1 %5077 }
0x2a0c   : > { %9561 = vpow2.f32 %v5081_v55  ;;  %v5080_v57 = vsub.f32 %v5069_v50, %v5078_v56  ;;  %v4823_v50 = vadd.f32 %v10729_v0, %v10755_v21  ;;  %v8057_v55 = vld [vmem:[%s11372_s6 + $0xb] ss:$0 sm:$0xff] }
0x2a0e   : > { %v5083_v58 = vmul.f32 1.442695, %v5080_v57 }
0x2a10   : > { %9563 = vpow2.f32 %v5083_v58 }
0x2a19   : > { %v9562_v59 = vpop.eup %9561 }
0x2a1a   : > { %v5085_v60 = vsel %vm874_vm4, %v9562_v59, 0.0 }
0x2a1b   : > { %5086 = vadd.xlane.f32.xlu0 %v5085_v60 }
0x2a1d   : > { %v9564_v16 = vpop.eup %9563 }
0x2a1e   : > { %v5088_v32 = vsel %vm874_vm4, %v9564_v16, 0.0 }
0x2a1f   : > { %5089 = vadd.xlane.f32.xlu1 %v5088_v32 }
0x2aa4   : > { %v5087_v18 = vpop.xlane.xlu0 %5086 }
0x2aa5   : > { %9565 = vrcp.f32 %v5087_v18 }
0x2aa8   : > { %v5090_v61 = vpop.xlane.xlu1 %5089 }
0x2aa9   : > { %9567 = vrcp.f32 %v5090_v61 }
0x2ab2   : > { %v9566_v19 = vpop.eup %9565 }
0x2ab3   : > { %v5093_v63 = vmul.f32 %v9566_v19, %v9562_v59 }
0x2ab6   : > { %v9568_v34 = vpop.eup %9567 }
0x2ab7   : > { %v5094_v13 = vmul.f32 %v9568_v34, %v9564_v16 }
0x2ab9   : > { %v5095_v2 = vpack.c.bf16 %v5094_v13, %v5093_v63 }
0x2abb   : > { %9046 = vmatmul.mubr.msk.bf16.vlgmr.msra.gmra.mxu1 %vm874_vm4, %v5095_v2 }
0x2abc   : > { %9056 = vmatpush3.bf16.msra.mxu1 %v9427_v15  ;;  %9059 = vmatprep.mubr.msk.bf16.mxu1 %vm9692_vm1, %v9691_v1 }
0x2abd   : > { %9057 = vmatprep.subr.bf16.mxu1 %v9691_v1 }
0x2ac0   : > { %9058 = vmatpush3.bf16.msra.mxu1 %v9428_v3 }
0x2ac1   : > { %9071 = vmatprep.subr.bf16.mxu1 %v9691_v1 }
0x2ac3   : > { %9060 = vmatmul.mubr.msk.bf16.vlgmr.msra.gmra.mxu1 %vm652_vm3, %v9884_v14 }
0x2ac4   : > { %9072 = vmatpush3.bf16.msra.mxu1 %v9429_v4  ;;  %9075 = vmatprep.mubr.msk.bf16.mxu1 %vm9692_vm1, %v9691_v1 }
0x2ac5   : > { %9073 = vmatprep.subr.bf16.mxu1 %v9691_v1 }
0x2ac8   : > { %9074 = vmatpush3.bf16.msra.mxu1 %v9430_v5 }
0x2ac9   : > { %9085 = vmatprep.subr.bf16.mxu1 %v9691_v1 }
0x2acb   : > { %9076 = vmatmul.mubr.msk.bf16.vlgmr.msra.gmra.mxu1 %vm652_vm3, %v9884_v14 }
0x2acc   : > { %9087 = vmatprep.mubr.msk.bf16.mxu1 %vm9692_vm1, %v9691_v1 }
0x2b7b   : > { %v5134_v26 = vpop.f32.mrf.mxu1 }
0x2b7d   : > { %v9047_v8 = vpop.f32.mrf.mxu1 }
0x2b7f   : > { %v5137_v29 = vpop.f32.mrf.mxu1 }
0x2b80   : > { %v5141_v11 = vpack.c.bf16 %v5137_v29, %v5134_v26 }
0x2b81   : > { %v9048_v20 = vpop.f32.mrf.mxu1 }
0x2b82   : > { %9052 = vmatmul.mubr.msk.bf16.vlgmr.msra.gmra.mxu0 %vm579_vm2, %v5141_v11 }
0x2b83   : > { %v5252_v22 = vpop.f32.mrf.mxu1  ;;  %9064 = vmatpush3.bf16.msra.mxu0 %v9431_v46  ;;  %9067 = vmatprep.mubr.msk.bf16.mxu0 %vm9692_vm1, %v9691_v1 }
0x2b84   : > { %9065 = vmatprep.subr.bf16.mxu0 %v9691_v1  ;;  %v5253_v28 = vadd.f32 %v8048_v24, %v5252_v22  ;;  %v8072_v22 = vld [vmem:[%s11374_s8 + $0x2c] sm:$0xf] }
0x2b85   : > { %v9061_v25 = vpop.f32.mrf.mxu1 }
0x2b87   : > { %v5255_v27 = vpop.f32.mrf.mxu1  ;;  %9066 = vmatpush3.bf16.msra.mxu0 %v9432_v23  ;;  %v5515_v23 = vsel %vm583_vm0, %v8072_v22, 0 }
0x2b88   : > { %v5256_v30 = vadd.f32 %v8048_v24, %v5255_v27  ;;  %9079 = vmatprep.subr.bf16.mxu0 %v9691_v1 }
0x2b89   : > { %v9062_v31 = vpop.f32.mrf.mxu1 }
0x2b8a   : > { %v5391_v36 = vpack.c.bf16 %v5256_v30, %v5253_v28  ;;  %9068 = vmatmul.mubr.msk.bf16.vlgmr.msra.gmra.mxu0 %vm652_vm3, %v9884_v14  ;;  %v4820_v14 = vadd.f32 %v10721_v62, %v10753_v17 }
0x2b8b   : > { %v5384_v37 = vpop.f32.mrf.mxu1  ;;  %9081 = vmatprep.mubr.msk.bf16.mxu0 %vm9692_vm1, %v9691_v1 }
0x2b8c   : > { %v5385_v41 = vadd.f32 %v8066_v38, %v5384_v37 }
0x2b8d   : > { %v9077_v39 = vpop.f32.mrf.mxu1 }
0x2b8f   : > { %v5387_v40 = vpop.f32.mrf.mxu1 }
0x2b90   : > { %v5388_v42 = vadd.f32 %v8066_v38, %v5387_v40 }
0x2b91   : > { %v9078_v43 = vpop.f32.mrf.mxu1 }
0x2b92   : > { %v5463_v45 = vpack.c.bf16 %v5388_v42, %v5385_v41 }
0x2b94   : > { %9086 = vmatpush3.bf16.msra.mxu1 %v5463_v45 }
0x2b95   : > { %9097 = vmatprep.subr.bf16.mxu1 %v9691_v1 }
0x2c42   : > { %v5184_v47 = vpop.f32.mrf.mxu0 }
0x2c43   : > { %v10827_v48 = vadd.f32 %v5184_v47, %v4820_v14 }
0x2c44   : > { %v9053_v49 = vpop.f32.mrf.mxu0 }
0x2c46   : > { %v5187_v51 = vpop.f32.mrf.mxu0 }
0x2c47   : > { %v10831_v52 = vadd.f32 %v5187_v51, %v4823_v50 }
0x2c48   : > { %v9054_v53 = vpop.f32.mrf.mxu0 }
0x2c4a   : > { %v5318_v54 = vpop.f32.mrf.mxu0 }
0x2c4b   : > { %v5319_v58 = vadd.f32 %v8057_v55, %v5318_v54 }
0x2c4c   : > { %v9069_v56 = vpop.f32.mrf.mxu0 }
0x2c4e   : > { %v5321_v57 = vpop.f32.mrf.mxu0 }
0x2c4f   : > { %v5322_v62 = vadd.f32 %v8057_v55, %v5321_v57 }
0x2c50   : > { %v9070_v17 = vpop.f32.mrf.mxu0 }
0x2c51   : > { %v5392_v59 = vpack.c.bf16 %v5322_v62, %v5319_v58 }
0x2c53   : > { %v5397_v60 = vsel %vm579_vm2, %v5392_v59, 0 }
0x2c54   : > { %9080 = vmatpush3.bf16.xpose.msra.mxu0 %v5397_v60 }
0x2c55   : > { %9091 = vmatprep.subr.bf16.mxu0 %v9691_v1 }
0x2c5b   : > { %9082 = vmatmul.mubr.msk.bf16.vlgmr.msra.gmra.mxu0 %vm579_vm2, %v5391_v36  ;;  %v8075_v36 = vld [vmem:[%s11375_s9 + $0x2] ss:$0 sm:$0xff] }
0x2c5c   : > { %9093 = vmatprep.mubr.msk.bf16.mxu0 %vm9692_vm1, %v9691_v1  ;;  %9092 = vmatpush3.bf16.msra.mxu0 %v5515_v23 }
0x2c5d   : > { %9105 = vmatprep.subr.bf16.mxu0 %v9691_v1 }
0x2d1b   : > { %v5433_v0 = vpop.f32.mrf.mxu0 }
0x2d1c   : > { %v5440_v21 = vsel %vm874_vm4, %v5433_v0, -inf }
0x2d1d   : > { %5441 = vmax.xlane.f32.xlu0 %v5440_v21  ;;  %v9083_v16 = vpop.f32.mrf.mxu0 }
0x2d1f   : > { %v5436_v32 = vpop.f32.mrf.mxu0 }
0x2d20   : > { %v5443_v18 = vsel %vm874_vm4, %v5436_v32, -inf }
0x2d21   : > { %5444 = vmax.xlane.f32.xlu1 %v5443_v18  ;;  %v9084_v61 = vpop.f32.mrf.mxu0 }
0x2da6   : > { %v5442_v19 = vpop.xlane.xlu0 %5441 }
0x2da7   : > { %v5446_v34 = vsub.f32 %v5433_v0, %v5442_v19 }
0x2da9   : > { %v5448_v63 = vmul.f32 1.442695, %v5446_v34 }
0x2daa   : > { %v5445_v13 = vpop.xlane.xlu1 %5444 }
0x2dab   : > { %9569 = vpow2.f32 %v5448_v63  ;;  %v5447_v15 = vsub.f32 %v5436_v32, %v5445_v13  ;;  %v8078_v63 = vld [vmem:[%s11376_s10 + $0x2] ss:$0 sm:$0xff] }
0x2dad   : > { %v5450_v2 = vmul.f32 1.442695, %v5447_v15 }
0x2daf   : > { %9571 = vpow2.f32 %v5450_v2 }
0x2db8   : > { %v9570_v3 = vpop.eup %9569 }
0x2db9   : > { %v5452_v4 = vsel %vm874_vm4, %v9570_v3, 0.0 }
0x2dba   : > { %5453 = vadd.xlane.f32.xlu0 %v5452_v4  ;;  %v8079_v4 = vld [vmem:[%s11377_s11 + $0x2] ss:$0 sm:$0xff] }
0x2dbc   : > { %v9572_v5 = vpop.eup %9571 }
0x2dbd   : > { %v5455_v6 = vsel %vm874_vm4, %v9572_v5, 0.0 }
0x2dbe   : > { %5456 = vadd.xlane.f32.xlu1 %v5455_v6 }
0x2e43   : > { %v5454_v7 = vpop.xlane.xlu0 %5453 }
0x2e44   : > { %9573 = vrcp.f32 %v5454_v7 }
0x2e47   : > { %v5457_v26 = vpop.xlane.xlu1 %5456 }
0x2e48   : > { %9575 = vrcp.f32 %v5457_v26 }
0x2e51   : > { %v9574_v8 = vpop.eup %9573 }
0x2e52   : > { %v5460_v46 = vmul.f32 %v9574_v8, %v9570_v3  ;;  %v9436_v8 = vld [vmem:[%s11380_s14 + $0x50] sm:$0xff]  }
0x2e55   : > { %v9576_v29 = vpop.eup %9575 }
0x2e56   : > { %v5461_v11 = vmul.f32 %v9576_v29, %v9572_v5  ;;  %v9437_v29 = vld [vmem:[%s11380_s14 + $0x48] sm:$0xff]  }
0x2e58   : > { %v5462_v20 = vpack.c.bf16 %v5461_v11, %v5460_v46  ;;  %v9438_v46 = vld [vmem:[%s11380_s14 + $0x40] sm:$0xff]  }
0x2e59   : > { %v8085_v11 = vld [vmem:[%s11379_s13 + $0x2] ss:$0 sm:$0xff] }
0x2e5a   : > { %9088 = vmatmul.mubr.msk.bf16.vlgmr.msra.gmra.mxu1 %vm874_vm4, %v5462_v20 }
0x2e5b   : > { %9101 = vmatprep.mubr.msk.bf16.mxu1 %vm9692_vm1, %v9691_v1 }
0x2f1a   : > { %v5501_v24 = vpop.f32.mrf.mxu1 }
0x2f1c   : > { %v9089_v25 = vpop.f32.mrf.mxu1 }
0x2f1e   : > { %v5504_v27 = vpop.f32.mrf.mxu1 }
0x2f1f   : > { %v5508_v28 = vpack.c.bf16 %v5504_v27, %v5501_v24 }
0x2f20   : > { %v9090_v30 = vpop.f32.mrf.mxu1 }
0x2f21   : > { %9094 = vmatmul.mubr.msk.bf16.vlgmr.msra.gmra.mxu0 %vm579_vm2, %v5508_v28 }
0x2f22   : > { %9113 = vmatprep.mubr.msk.bf16.mxu0 %vm9692_vm1, %v9691_v1 }
0x2fe1   : > { %v5551_v31 = vpop.f32.mrf.mxu0 }
0x2fe2   : > { %v5558_v37 = vadd.f32 %v5551_v31, %v10827_v48 }
0x2fe3   : > { %v9095_v38 = vpop.f32.mrf.mxu0 }
0x2fe4   : > { %v5568_v39 = vadd.f32 %v8075_v36, %v5558_v37 }
0x2fe5   : > { %v5554_v40 = vpop.f32.mrf.mxu0 }
0x2fe6   : > { %v5570_v41 = vadd.f32 %v5568_v39, %v9875_v10  ;;  %v5559_v42 = vadd.f32 %v5554_v40, %v10831_v52  ;;  %v9433_v10 = vld [vmem:[%s11378_s12 + $0x28] sm:$0xff]   ;;  %v9435_v52 = vld [vmem:[%s11380_s14 + $0x58] sm:$0xff]  }
0x2fe7   : > { %v9096_v43 = vpop.f32.mrf.mxu0  ;;  %9098 = vmatpush3.bf16.msra.mxu1 %v9433_v10  ;;  %9106 = vmatpush3.bf16.msra.mxu0 %v9435_v52  ;;  %v9440_v10 = vld [vmem:[%s11370_s4 + $0xc8] sm:$0xff]   ;;  %v9442_v52 = vld [vmem:[%s11370_s4 + $0xc0] sm:$0xff]  }
0x2fe8   : > { %v5569_v45 = vadd.f32 %v8075_v36, %v5559_v42  ;;  %v5576_v14 = vsel %vm652_vm3, %v5570_v41, 0.0  ;;  %v5584_v47 = vmul.f32 %v5570_v41, %v5570_v41  ;;  %9099 = vmatprep.subr.bf16.mxu1 %v9691_v1  ;;  %9107 = vmatprep.subr.bf16.mxu0 %v9691_v1  ;;  %v8098_v36 = vld [vmem:[%s11381_s15 + $0x2] ss:$0 sm:$0xff] }
0x2fe9   : > { %5577 = vadd.xlane.f32.xlu0 %v5576_v14 }
0x2fea   : > { %v5571_v49 = vadd.f32 %v5569_v45, %v9877_v12  ;;  %v5586_v50 = vsel %vm652_vm3, %v5584_v47, 0.0  ;;  %v9434_v12 = vld [vmem:[%s11378_s12 + $0x20] sm:$0xff]  }
0x2feb   : > { %9100 = vmatpush3.bf16.msra.mxu1 %v9434_v12  ;;  %9108 = vmatpush3.bf16.msra.mxu0 %v9436_v8  ;;  %v9441_v12 = vld [vmem:[%s11404_s1 + $0xc0] sm:$0xff]  }
0x2fec   : > { %v5579_v51 = vsel %vm652_vm3, %v5571_v49, 0.0  ;;  %v5585_v48 = vmul.f32 %v5571_v49, %v5571_v49  ;;  %9117 = vmatprep.subr.bf16.mxu1 %v9691_v1  ;;  %9109 = vmatprep.subr.bf16.mxu0 %v9691_v1 }
0x2fed   : > { %5587 = vadd.xlane.f32.xlu0 %v5586_v50  ;;  %5580 = vadd.xlane.f32.xlu1 %v5579_v51 }
0x2fee   : > { %v5589_v53 = vsel %vm652_vm3, %v5585_v48, 0.0 }
0x2fef   : > { %9110 = vmatpush3.bf16.msra.mxu0 %v9437_v29  ;;  %v9444_v29 = vld [vmem:[%s11369_s3 + $0xc0] sm:$0xff]  }
0x2ff0   : > { %9111 = vmatprep.subr.bf16.mxu0 %v9691_v1 }
0x2ff1   : > { %5590 = vadd.xlane.f32.xlu1 %v5589_v53  ;;  %v9439_v53 = vld [vmem:[%s11404_s1 + $0xc8] sm:$0xff]  }
0x2ff3   : > { %9112 = vmatpush3.bf16.msra.mxu0 %v9438_v46 }
0x2ff4   : > { %9133 = vmatprep.subr.bf16.mxu0 %v9691_v1 }
0x3072   : > { %v5578_v54 = vpop.xlane.xlu0 %5577 }
0x3073   : > { %v5582_v55 = vmul.f32 0.03125, %v5578_v54 }
0x3075   : > { %v5594_v58 = vmul.f32 %v5582_v55, %v5582_v55  ;;  %v5598_v61 = vsub.f32 %v5570_v41, %v5582_v55 }
0x3076   : > { %v5588_v56 = vpop.xlane.xlu0 %5587  ;;  %v5581_v57 = vpop.xlane.xlu1 %5580 }
0x3077   : > { %v5592_v62 = vmul.f32 0.03125, %v5588_v56  ;;  %v5583_v17 = vmul.f32 0.03125, %v5581_v57 }
0x3079   : > { %v5596_v59 = vsub.f32 %v5592_v62, %v5594_v58  ;;  %v5595_v21 = vmul.f32 %v5583_v17, %v5583_v17  ;;  %v5599_v13 = vsub.f32 %v5571_v49, %v5583_v17 }
0x307a   : > { %v5591_v60 = vpop.xlane.xlu1 %5590 }
0x307b   : > { %v5600_v0 = vadd.f32 1e-05, %v5596_v59  ;;  %v5593_v16 = vmul.f32 0.03125, %v5591_v60 }
0x307d   : > { %9577 = vrsqrt.f32 %v5600_v0  ;;  %v5597_v32 = vsub.f32 %v5593_v16, %v5595_v21 }
0x307f   : > { %v5601_v18 = vadd.f32 1e-05, %v5597_v32 }
0x3081   : > { %9579 = vrsqrt.f32 %v5601_v18 }
0x308a   : > { %v9578_v19 = vpop.eup %9577 }
0x308b   : > { %v5604_v34 = vmul.f32 %v9578_v19, %v5598_v61 }
0x308d   : > { %v5612_v2 = vmul.f32 %v8078_v63, %v5604_v34 }
0x308e   : > { %v9580_v15 = vpop.eup %9579 }
0x308f   : > { %v5605_v3 = vmul.f32 %v9580_v15, %v5599_v13  ;;  %v5620_v6 = vadd.f32 %v8079_v4, %v5612_v2 }
0x3091   : > { %v5613_v5 = vmul.f32 %v8078_v63, %v5605_v3  ;;  %v8106_v63 = vld [vmem:[%s11382_s16 + $0x2] ss:$0 sm:$0xff] }
0x3093   : > { %v5621_v7 = vadd.f32 %v8079_v4, %v5613_v5  ;;  %v8107_v4 = vld [vmem:[%s11383_s17 + $0x2] ss:$0 sm:$0xff] }
0x3095   : > { %v5622_v26 = vpack.c.bf16 %v5621_v7, %v5620_v6 }
0x3097   : > { %9102 = vmatmul.mubr.msk.bf16.vlgmr.msra.gmra.mxu1 %vm652_vm3, %v5622_v26  ;;  %v9443_v26 = vld [vmem:[%s11369_s3 + $0xc8] sm:$0xff]  }
0x3098   : > { %9121 = vmatprep.mubr.msk.bf16.mxu1 %vm9692_vm1, %v9691_v1  ;;  %9118 = vmatpush3.bf16.msra.mxu1 %v9439_v53  ;;  %v9446_v53 = vld [vmem:[%s11404_s1 + $0xd0] sm:$0xff]  }
0x3099   : > { %9119 = vmatprep.subr.bf16.mxu1 %v9691_v1 }
0x309c   : > { %9120 = vmatpush3.bf16.msra.mxu1 %v9441_v12  ;;  %v9448_v12 = vld [vmem:[%s11370_s4 + $0xd0] sm:$0xff]  }
0x309d   : > { %9125 = vmatprep.subr.bf16.mxu1 %v9691_v1 }
0x3157   : > { %v5685_v20 = vpop.f32.mrf.mxu1 }
0x3158   : > { %v5686_v23 = vadd.f32 %v8085_v11, %v5685_v20  ;;  %v8131_v20 = vld [vmem:[%s11373_s7 + $0xc] ss:$0 sm:$0xff] }
0x3159   : > { %v9103_v22 = vpop.f32.mrf.mxu1 }
0x315a   : > { %v5692_v28 = vmax.f32 %v5686_v23, 0.0 }
0x315b   : > { %v5688_v24 = vpop.f32.mrf.mxu1 }
0x315c   : > { %v5689_v25 = vadd.f32 %v8085_v11, %v5688_v24 }
0x315d   : > { %v9104_v27 = vpop.f32.mrf.mxu1 }
0x315e   : > { %v5693_v30 = vmax.f32 %v5689_v25, 0.0 }
0x3160   : > { %v5694_v31 = vpack.c.bf16 %v5693_v30, %v5692_v28 }
0x3162   : > { %9114 = vmatmul.mubr.msk.bf16.vlgmr.msra.gmra.mxu0 %vm2261_vm5, %v5694_v31 }
0x3163   : > { %9137 = vmatprep.mubr.msk.bf16.mxu0 %vm9692_vm1, %v9691_v1  ;;  %9134 = vmatpush3.bf16.msra.mxu0 %v9440_v10  ;;  %v9447_v10 = vld [vmem:[%s11370_s4 + $0xd8] sm:$0xff]  }
0x3164   : > { %9135 = vmatprep.subr.bf16.mxu0 %v9691_v1 }
0x3167   : > { %9136 = vmatpush3.bf16.msra.mxu0 %v9442_v52 }
0x3168   : > { %9147 = vmatprep.subr.bf16.mxu0 %v9691_v1 }
0x3222   : > { %v5773_v37 = vpop.f32.mrf.mxu0 }
0x3223   : > { %v5774_v38 = vadd.f32 %v8098_v36, %v5773_v37 }
0x3224   : > { %v9115_v39 = vpop.f32.mrf.mxu0 }
0x3225   : > { %v5780_v40 = vadd.f32 %v5774_v38, %v5620_v6  ;;  %v8122_v38 = vld [vmem:[%s11372_s6 + $0xc] ss:$0 sm:$0xff] }
0x3226   : > { %v5776_v41 = vpop.f32.mrf.mxu0 }
0x3227   : > { %v5777_v42 = vadd.f32 %v8098_v36, %v5776_v41  ;;  %v5786_v43 = vsel %vm652_vm3, %v5780_v40, 0.0  ;;  %v5794_v45 = vmul.f32 %v5780_v40, %v5780_v40 }
0x3228   : > { %5787 = vadd.xlane.f32.xlu0 %v5786_v43  ;;  %v9116_v14 = vpop.f32.mrf.mxu0 }
0x3229   : > { %v5781_v47 = vadd.f32 %v5777_v42, %v5621_v7  ;;  %v5796_v49 = vsel %vm652_vm3, %v5794_v45, 0.0 }
0x322b   : > { %v5789_v50 = vsel %vm652_vm3, %v5781_v47, 0.0  ;;  %v5795_v51 = vmul.f32 %v5781_v47, %v5781_v47 }
0x322c   : > { %5797 = vadd.xlane.f32.xlu0 %v5796_v49  ;;  %5790 = vadd.xlane.f32.xlu1 %v5789_v50 }
0x322d   : > { %v5799_v48 = vsel %vm652_vm3, %v5795_v51, 0.0  ;;  %v9445_v51 = vld [vmem:[%s11404_s1 + $0xd8] sm:$0xff]  }
0x3230   : > { %5800 = vadd.xlane.f32.xlu1 %v5799_v48 }
0x32b1   : > { %v5788_v54 = vpop.xlane.xlu0 %5787 }
0x32b2   : > { %v5792_v55 = vmul.f32 0.03125, %v5788_v54 }
0x32b4   : > { %v5804_v58 = vmul.f32 %v5792_v55, %v5792_v55  ;;  %v5808_v61 = vsub.f32 %v5780_v40, %v5792_v55 }
0x32b5   : > { %v5798_v56 = vpop.xlane.xlu0 %5797  ;;  %v5791_v57 = vpop.xlane.xlu1 %5790 }
0x32b6   : > { %v5802_v62 = vmul.f32 0.03125, %v5798_v56  ;;  %v5793_v17 = vmul.f32 0.03125, %v5791_v57 }
0x32b8   : > { %v5806_v59 = vsub.f32 %v5802_v62, %v5804_v58  ;;  %v5805_v21 = vmul.f32 %v5793_v17, %v5793_v17  ;;  %v5809_v13 = vsub.f32 %v5781_v47, %v5793_v17  ;;  %v8113_v47 = vld [vmem:[%s11371_s5 + $0xc] ss:$0 sm:$0xff]  ;;  %v8143_v17 = vld [vmem:[%s11371_s5 + $0xd] ss:$0 sm:$0xff] }
0x32b9   : > { %v5801_v60 = vpop.xlane.xlu1 %5800 }
0x32ba   : > { %v5810_v0 = vadd.f32 1e-05, %v5806_v59  ;;  %v5803_v16 = vmul.f32 0.03125, %v5801_v60 }
0x32bc   : > { %9581 = vrsqrt.f32 %v5810_v0  ;;  %v5807_v32 = vsub.f32 %v5803_v16, %v5805_v21 }
0x32be   : > { %v5811_v18 = vadd.f32 1e-05, %v5807_v32 }
0x32c0   : > { %9583 = vrsqrt.f32 %v5811_v18 }
0x32c9   : > { %v9582_v19 = vpop.eup %9581 }
0x32ca   : > { %v5814_v34 = vmul.f32 %v9582_v19, %v5808_v61  ;;  %v8161_v61 = vld [vmem:[%s11373_s7 + $0xd] ss:$0 sm:$0xff] }
0x32cc   : > { %v5822_v2 = vmul.f32 %v8106_v63, %v5814_v34 }
0x32cd   : > { %v9584_v15 = vpop.eup %9583 }
0x32ce   : > { %v5815_v3 = vmul.f32 %v9584_v15, %v5809_v13  ;;  %v10935_v6 = vadd.f32 %v8107_v4, %v5822_v2 }
0x32d0   : > { %v5823_v5 = vmul.f32 %v8106_v63, %v5815_v3 }
0x32d2   : > { %v10937_v7 = vadd.f32 %v8107_v4, %v5823_v5 }
0x32d4   : > { %v10944_v8 = vpack.c.bf16 %v10937_v7, %v10935_v6 }
0x32d6   : > { %9122 = vmatmul.mubr.msk.bf16.vlgmr.msra.gmra.mxu1 %vm652_vm3, %v10944_v8  ;;  %9138 = vmatmul.mubr.msk.bf16.vlgmr.msra.gmra.mxu0 %vm652_vm3, %v10944_v8 }
0x32d7   : > { %9126 = vmatpush3.bf16.msra.mxu1 %v9443_v26  ;;  %9129 = vmatprep.mubr.msk.bf16.mxu1 %vm9692_vm1, %v9691_v1 }
0x32d8   : > { %9127 = vmatprep.subr.bf16.mxu1 %v9691_v1  ;;  %9149 = vmatprep.mubr.msk.bf16.mxu0 %vm9692_vm1, %v9691_v1 }
0x32db   : > { %9128 = vmatpush3.bf16.msra.mxu1 %v9444_v29 }
0x32dc   : > { %9141 = vmatprep.subr.bf16.mxu1 %v9691_v1 }
0x32de   : > { %9130 = vmatmul.mubr.msk.bf16.vlgmr.msra.gmra.mxu1 %vm652_vm3, %v10944_v8 }
0x32df   : > { %9143 = vmatprep.mubr.msk.bf16.mxu1 %vm9692_vm1, %v9691_v1 }
0x3396   : > { %v5895_v46 = vpop.f32.mrf.mxu1  ;;  %v6027_v11 = vpop.f32.mrf.mxu0 }
0x3397   : > { %v6028_v27 = vadd.f32 %v8131_v20, %v6027_v11  ;;  %v5896_v50 = vadd.f32 %v8113_v47, %v5895_v46 }
0x3398   : > { %v9123_v22 = vpop.f32.mrf.mxu1  ;;  %v9139_v23 = vpop.f32.mrf.mxu0 }
0x339a   : > { %v5898_v24 = vpop.f32.mrf.mxu1  ;;  %v6030_v25 = vpop.f32.mrf.mxu0 }
0x339b   : > { %v6031_v28 = vadd.f32 %v8131_v20, %v6030_v25  ;;  %v5899_v49 = vadd.f32 %v8113_v47, %v5898_v24 }
0x339c   : > { %v9124_v30 = vpop.f32.mrf.mxu1  ;;  %v9140_v31 = vpop.f32.mrf.mxu0 }
0x339d   : > { %v6106_v36 = vpack.c.bf16 %v6031_v28, %v6028_v27  ;;  %v6034_v48 = vpack.c.bf16 %v5899_v49, %v5896_v50 }
0x339e   : > { %v5961_v37 = vpop.f32.mrf.mxu1 }
0x339f   : > { %9148 = vmatpush3.bf16.msra.mxu0 %v6106_v36  ;;  %v5962_v41 = vadd.f32 %v8122_v38, %v5961_v37  ;;  %v9449_v36 = vld [vmem:[%s11369_s3 + $0xd8] sm:$0xff]  }
0x33a0   : > { %v9131_v39 = vpop.f32.mrf.mxu1  ;;  %9161 = vmatprep.subr.bf16.mxu0 %v9691_v1 }
0x33a2   : > { %v5964_v40 = vpop.f32.mrf.mxu1 }
0x33a3   : > { %v5965_v42 = vadd.f32 %v8122_v38, %v5964_v40  ;;  %v9450_v38 = vld [vmem:[%s11369_s3 + $0xd0] sm:$0xff]  }
0x33a4   : > { %v9132_v43 = vpop.f32.mrf.mxu1 }
0x33a5   : > { %v6035_v45 = vpack.c.bf16 %v5965_v42, %v5962_v41 }
0x33a7   : > { %v6040_v14 = vsel %vm579_vm2, %v6035_v45, 0 }
0x33a8   : > { %9142 = vmatpush3.bf16.xpose.msra.mxu1 %v6040_v14  ;;  %v8152_v14 = vld [vmem:[%s11372_s6 + $0xd] ss:$0 sm:$0xff] }
0x33a9   : > { %9153 = vmatprep.subr.bf16.mxu1 %v9691_v1 }
0x33af   : > { %9144 = vmatmul.mubr.msk.bf16.vlgmr.msra.gmra.mxu1 %vm579_vm2, %v6034_v48 }
0x33b0   : > { %9154 = vmatpush3.bf16.msra.mxu1 %v9445_v51  ;;  %9157 = vmatprep.mubr.msk.bf16.mxu1 %vm9692_vm1, %v9691_v1 }
0x33b1   : > { %9155 = vmatprep.subr.bf16.mxu1 %v9691_v1 }
0x33b4   : > { %9156 = vmatpush3.bf16.msra.mxu1 %v9446_v53 }
0x33b5   : > { %9169 = vmatprep.subr.bf16.mxu1 %v9691_v1 }
0x33b7   : > { %9158 = vmatmul.mubr.msk.bf16.vlgmr.msra.gmra.mxu1 %vm652_vm3, %v10944_v8 }
0x33b8   : > { %9170 = vmatpush3.bf16.msra.mxu1 %v9447_v10  ;;  %9173 = vmatprep.mubr.msk.bf16.mxu1 %vm9692_vm1, %v9691_v1 }
0x33b9   : > { %9171 = vmatprep.subr.bf16.mxu1 %v9691_v1 }
0x33bc   : > { %9172 = vmatpush3.bf16.msra.mxu1 %v9448_v12 }
0x33bd   : > { %9183 = vmatprep.subr.bf16.mxu1 %v9691_v1 }
0x33bf   : > { %9174 = vmatmul.mubr.msk.bf16.vlgmr.msra.gmra.mxu1 %vm652_vm3, %v10944_v8 }
0x33c0   : > { %9185 = vmatprep.mubr.msk.bf16.mxu1 %vm9692_vm1, %v9691_v1 }
0x346f   : > { %v6076_v52 = vpop.f32.mrf.mxu1 }
0x3470   : > { %v6083_v54 = vsel %vm874_vm4, %v6076_v52, -inf }
0x3471   : > { %6084 = vmax.xlane.f32.xlu0 %v6083_v54  ;;  %v9145_v55 = vpop.f32.mrf.mxu1 }
0x3473   : > { %v6079_v56 = vpop.f32.mrf.mxu1 }
0x3474   : > { %v6086_v57 = vsel %vm874_vm4, %v6079_v56, -inf }
0x3475   : > { %6087 = vmax.xlane.f32.xlu1 %v6086_v57  ;;  %v9146_v58 = vpop.f32.mrf.mxu1 }
0x3477   : > { %v6213_v62 = vpop.f32.mrf.mxu1 }
0x3478   : > { %v11007_v0 = vadd.f32 %v8143_v17, %v6213_v62 }
0x3479   : > { %v9159_v59 = vpop.f32.mrf.mxu1 }
0x347b   : > { %v6216_v60 = vpop.f32.mrf.mxu1 }
0x347c   : > { %v11009_v21 = vadd.f32 %v8143_v17, %v6216_v60 }
0x347d   : > { %v9160_v16 = vpop.f32.mrf.mxu1 }
0x347e   : > { %v6352_v32 = vpack.c.bf16 %v11009_v21, %v11007_v0 }
0x347f   : > { %v6345_v18 = vpop.f32.mrf.mxu1 }
0x3480   : > { %v6346_v63 = vadd.f32 %v8161_v61, %v6345_v18 }
0x3481   : > { %v9175_v19 = vpop.f32.mrf.mxu1 }
0x3483   : > { %v6348_v34 = vpop.f32.mrf.mxu1 }
0x3484   : > { %v6349_v13 = vadd.f32 %v8161_v61, %v6348_v34 }
0x3485   : > { %v9176_v15 = vpop.f32.mrf.mxu1 }
0x3486   : > { %v6424_v2 = vpack.c.bf16 %v6349_v13, %v6346_v63  ;;  %v8137_v13 = vld [vmem:[%s11374_s8 + $0x30] sm:$0xf] }
0x3488   : > { %9184 = vmatpush3.bf16.msra.mxu1 %v6424_v2 }
0x3489   : > { %9195 = vmatprep.subr.bf16.mxu1 %v9691_v1 }
0x34fa   : > { %v6085_v3 = vpop.xlane.xlu0 %6084 }
0x34fb   : > { %v6089_v4 = vsub.f32 %v6076_v52, %v6085_v3 }
0x34fd   : > { %v6091_v5 = vmul.f32 1.442695, %v6089_v4  ;;  %v6523_v4 = vsel %vm583_vm0, %v8137_v13, 0 }
0x34fe   : > { %v6088_v26 = vpop.xlane.xlu1 %6087 }
0x34ff   : > { %9585 = vpow2.f32 %v6091_v5  ;;  %v6090_v29 = vsub.f32 %v6079_v56, %v6088_v26  ;;  %v9451_v5 = vld [vmem:[%s11369_s3 + $0xe8] sm:$0xff]   ;;  %v9452_v26 = vld [vmem:[%s11369_s3 + $0xe0] sm:$0xff]  }
0x3501   : > { %v6093_v46 = vmul.f32 1.442695, %v6090_v29  ;;  %v8167_v29 = vld [vmem:[%s11374_s8 + $0x34] sm:$0xf] }
0x3503   : > { %9587 = vpow2.f32 %v6093_v46  ;;  %v6476_v46 = vsel %vm583_vm0, %v8167_v29, 0 }
0x350c   : > { %v9586_v11 = vpop.eup %9585 }
0x350d   : > { %v6095_v20 = vsel %vm874_vm4, %v9586_v11, 0.0 }
0x350e   : > { %6096 = vadd.xlane.f32.xlu0 %v6095_v20 }
0x3510   : > { %v9588_v22 = vpop.eup %9587 }
0x3511   : > { %v6098_v23 = vsel %vm874_vm4, %v9588_v22, 0.0 }
0x3512   : > { %6099 = vadd.xlane.f32.xlu1 %v6098_v23  ;;  %v9453_v23 = vld [vmem:[%s11404_s1 + $0xe8] sm:$0xff]  }
0x3597   : > { %v6097_v24 = vpop.xlane.xlu0 %6096 }
0x3598   : > { %9589 = vrcp.f32 %v6097_v24 }
0x359b   : > { %v6100_v25 = vpop.xlane.xlu1 %6099 }
0x359c   : > { %9591 = vrcp.f32 %v6100_v25 }
0x35a5   : > { %v9590_v27 = vpop.eup %9589 }
0x35a6   : > { %v6103_v30 = vmul.f32 %v9590_v27, %v9586_v11 }
0x35a9   : > { %v9592_v28 = vpop.eup %9591 }
0x35aa   : > { %v6104_v31 = vmul.f32 %v9592_v28, %v9588_v22  ;;  %v9454_v28 = vld [vmem:[%s11404_s1 + $0xe0] sm:$0xff]  }
0x35ac   : > { %v6105_v37 = vpack.c.bf16 %v6104_v31, %v6103_v30 }
0x35ae   : > { %9150 = vmatmul.mubr.msk.bf16.vlgmr.msra.gmra.mxu0 %vm874_vm4, %v6105_v37 }
0x35af   : > { %9162 = vmatpush3.bf16.msra.mxu0 %v9449_v36  ;;  %9165 = vmatprep.mubr.msk.bf16.mxu0 %vm9692_vm1, %v9691_v1  ;;  %v9455_v36 = vld [vmem:[%s11370_s4 + $0xe8] sm:$0xff]  }
0x35b0   : > { %9163 = vmatprep.subr.bf16.mxu0 %v9691_v1 }
0x35b3   : > { %9164 = vmatpush3.bf16.msra.mxu0 %v9450_v38 }
0x35b4   : > { %9177 = vmatprep.subr.bf16.mxu0 %v9691_v1 }
0x35b6   : > { %9166 = vmatmul.mubr.msk.bf16.vlgmr.msra.gmra.mxu0 %vm652_vm3, %v10944_v8 }
0x35b7   : > { %9179 = vmatprep.mubr.msk.bf16.mxu0 %vm9692_vm1, %v9691_v1 }
0x366e   : > { %v6144_v39 = vpop.f32.mrf.mxu0 }
0x3670   : > { %v9151_v40 = vpop.f32.mrf.mxu0 }
0x3671   : > { %v8184_v40 = vld [vmem:[%s11372_s6 + $0xe] ss:$0 sm:$0xff] }
0x3672   : > { %v6147_v41 = vpop.f32.mrf.mxu0 }
0x3673   : > { %v6151_v42 = vpack.c.bf16 %v6147_v41, %v6144_v39  ;;  %v9456_v39 = vld [vmem:[%s11370_s4 + $0xe0] sm:$0xff]  }
0x3674   : > { %v9152_v43 = vpop.f32.mrf.mxu0 }
0x3676   : > { %v6279_v45 = vpop.f32.mrf.mxu0 }
0x3677   : > { %v6280_v50 = vadd.f32 %v8152_v14, %v6279_v45 }
0x3678   : > { %v9167_v47 = vpop.f32.mrf.mxu0 }
0x367a   : > { %v6282_v49 = vpop.f32.mrf.mxu0 }
0x367b   : > { %v6283_v51 = vadd.f32 %v8152_v14, %v6282_v49 }
0x367c   : > { %v9168_v48 = vpop.f32.mrf.mxu0 }
0x367d   : > { %v6353_v53 = vpack.c.bf16 %v6283_v51, %v6280_v50 }
0x367f   : > { %v6358_v10 = vsel %vm579_vm2, %v6353_v53, 0 }
0x3680   : > { %9178 = vmatpush3.bf16.xpose.msra.mxu0 %v6358_v10 }
0x3681   : > { %9189 = vmatprep.subr.bf16.mxu0 %v9691_v1 }
0x3687   : > { %9180 = vmatmul.mubr.msk.bf16.vlgmr.msra.gmra.mxu0 %vm579_vm2, %v6352_v32 }
0x3688   : > { %9191 = vmatprep.mubr.msk.bf16.mxu0 %vm9692_vm1, %v9691_v1  ;;  %9190 = vmatpush3.bf16.msra.mxu0 %v6476_v46 }
0x3689   : > { %9201 = vmatprep.subr.bf16.mxu0 %v9691_v1 }
0x3747   : > { %v6394_v12 = vpop.f32.mrf.mxu0 }
0x3748   : > { %v6401_v52 = vsel %vm874_vm4, %v6394_v12, -inf }
0x3749   : > { %6402 = vmax.xlane.f32.xlu0 %v6401_v52  ;;  %v9181_v54 = vpop.f32.mrf.mxu0 }
0x374b   : > { %v6397_v55 = vpop.f32.mrf.mxu0 }
0x374c   : > { %v6404_v56 = vsel %vm874_vm4, %v6397_v55, -inf }
0x374d   : > { %6405 = vmax.xlane.f32.xlu1 %v6404_v56  ;;  %v9182_v57 = vpop.f32.mrf.mxu0 }
0x37d2   : > { %v6403_v58 = vpop.xlane.xlu0 %6402 }
0x37d3   : > { %v6407_v62 = vsub.f32 %v6394_v12, %v6403_v58  ;;  %v8175_v12 = vld [vmem:[%s11371_s5 + $0xe] ss:$0 sm:$0xff] }
0x37d5   : > { %v6409_v17 = vmul.f32 1.442695, %v6407_v62 }
0x37d6   : > { %v6406_v59 = vpop.xlane.xlu1 %6405 }
0x37d7   : > { %9593 = vpow2.f32 %v6409_v17  ;;  %v6408_v60 = vsub.f32 %v6397_v55, %v6406_v59  ;;  %v8193_v17 = vld [vmem:[%s11373_s7 + $0xe] ss:$0 sm:$0xff] }
0x37d9   : > { %v6411_v0 = vmul.f32 1.442695, %v6408_v60 }
0x37db   : > { %9595 = vpow2.f32 %v6411_v0 }
0x37e4   : > { %v9594_v21 = vpop.eup %9593 }
0x37e5   : > { %v6413_v16 = vsel %vm874_vm4, %v9594_v21, 0.0 }
0x37e6   : > { %6414 = vadd.xlane.f32.xlu0 %v6413_v16 }
0x37e8   : > { %v9596_v32 = vpop.eup %9595 }
0x37e9   : > { %v6416_v18 = vsel %vm874_vm4, %v9596_v32, 0.0 }
0x37ea   : > { %6417 = vadd.xlane.f32.xlu1 %v6416_v18 }
0x386f   : > { %v6415_v61 = vpop.xlane.xlu0 %6414 }
0x3870   : > { %9597 = vrcp.f32 %v6415_v61 }
0x3873   : > { %v6418_v19 = vpop.xlane.xlu1 %6417 }
0x3874   : > { %9599 = vrcp.f32 %v6418_v19 }
0x387d   : > { %v9598_v34 = vpop.eup %9597 }
0x387e   : > { %v6421_v15 = vmul.f32 %v9598_v34, %v9594_v21 }
0x3881   : > { %v9600_v63 = vpop.eup %9599 }
0x3882   : > { %v6422_v2 = vmul.f32 %v9600_v63, %v9596_v32 }
0x3884   : > { %v6423_v3 = vpack.c.bf16 %v6422_v2, %v6421_v15 }
0x3886   : > { %9186 = vmatmul.mubr.msk.bf16.vlgmr.msra.gmra.mxu1 %vm874_vm4, %v6423_v3 }
0x3887   : > { %9196 = vmatpush3.bf16.msra.mxu1 %v6523_v4  ;;  %9197 = vmatprep.mubr.msk.bf16.mxu1 %vm9692_vm1, %v9691_v1 }
0x3888   : > { %9209 = vmatprep.subr.bf16.mxu1 %v9691_v1 }
0x388e   : > { %9198 = vmatmul.mubr.msk.bf16.vlgmr.msra.gmra.mxu1 %vm579_vm2, %v6151_v42 }
0x388f   : > { %9210 = vmatpush3.bf16.msra.mxu1 %v9451_v5  ;;  %9213 = vmatprep.mubr.msk.bf16.mxu1 %vm9692_vm1, %v9691_v1 }
0x3890   : > { %9211 = vmatprep.subr.bf16.mxu1 %v9691_v1 }
0x3893   : > { %9212 = vmatpush3.bf16.msra.mxu1 %v9452_v26 }
0x3894   : > { %9225 = vmatprep.subr.bf16.mxu1 %v9691_v1 }
0x3896   : > { %9214 = vmatmul.mubr.msk.bf16.vlgmr.msra.gmra.mxu1 %vm652_vm3, %v10944_v8 }
0x3897   : > { %9227 = vmatprep.mubr.msk.bf16.mxu1 %vm9692_vm1, %v9691_v1 }
0x3946   : > { %v6462_v11 = vpop.f32.mrf.mxu1 }
0x3948   : > { %v9187_v20 = vpop.f32.mrf.mxu1 }
0x394a   : > { %v6465_v22 = vpop.f32.mrf.mxu1 }
0x394b   : > { %v6469_v24 = vpack.c.bf16 %v6465_v22, %v6462_v11 }
0x394c   : > { %v9188_v25 = vpop.f32.mrf.mxu1 }
0x394d   : > { %9192 = vmatmul.mubr.msk.bf16.vlgmr.msra.gmra.mxu0 %vm579_vm2, %v6469_v24 }
0x394e   : > { %v11078_v27 = vpop.f32.mrf.mxu1  ;;  %9202 = vmatpush3.bf16.msra.mxu0 %v9453_v23  ;;  %9205 = vmatprep.mubr.msk.bf16.mxu0 %vm9692_vm1, %v9691_v1 }
0x394f   : > { %9203 = vmatprep.subr.bf16.mxu0 %v9691_v1 }
0x3950   : > { %v9199_v30 = vpop.f32.mrf.mxu1 }
0x3952   : > { %v11086_v31 = vpop.f32.mrf.mxu1  ;;  %9204 = vmatpush3.bf16.msra.mxu0 %v9454_v28 }
0x3953   : > { %9217 = vmatprep.subr.bf16.mxu0 %v9691_v1 }
0x3954   : > { %v9200_v37 = vpop.f32.mrf.mxu1 }
0x3955   : > { %9206 = vmatmul.mubr.msk.bf16.vlgmr.msra.gmra.mxu0 %vm652_vm3, %v10944_v8 }
0x3956   : > { %v6691_v38 = vpop.f32.mrf.mxu1  ;;  %9218 = vmatpush3.bf16.msra.mxu0 %v9455_v36  ;;  %9221 = vmatprep.mubr.msk.bf16.mxu0 %vm9692_vm1, %v9691_v1  ;;  %v9457_v36 = vld [vmem:[%s11404_s1 + $0xf8] sm:$0xff]  }
0x3957   : > { %9219 = vmatprep.subr.bf16.mxu0 %v9691_v1  ;;  %v6692_v43 = vadd.f32 %v8184_v40, %v6691_v38  ;;  %v9458_v38 = vld [vmem:[%s11404_s1 + $0xf0] sm:$0xff]  }
0x3958   : > { %v9215_v41 = vpop.f32.mrf.mxu1 }
0x3959   : > { %v8199_v41 = vld [vmem:[%s11374_s8 + $0x38] sm:$0xf] }
0x395a   : > { %v6694_v42 = vpop.f32.mrf.mxu1  ;;  %9220 = vmatpush3.bf16.msra.mxu0 %v9456_v39  ;;  %v9459_v39 = vld [vmem:[%s11370_s4 + $0xf8] sm:$0xff]  }
0x395b   : > { %v6695_v45 = vadd.f32 %v8184_v40, %v6694_v42  ;;  %9231 = vmatprep.subr.bf16.mxu0 %v9691_v1  ;;  %v9460_v40 = vld [vmem:[%s11370_s4 + $0xf0] sm:$0xff]   ;;  %v6888_v42 = vsel %vm583_vm0, %v8199_v41, 0 }
0x395c   : > { %v9216_v14 = vpop.f32.mrf.mxu1 }
0x395d   : > { %v6765_v47 = vpack.c.bf16 %v6695_v45, %v6692_v43  ;;  %9222 = vmatmul.mubr.msk.bf16.vlgmr.msra.gmra.mxu0 %vm652_vm3, %v10944_v8 }
0x395e   : > { %9233 = vmatprep.mubr.msk.bf16.mxu0 %vm9692_vm1, %v9691_v1 }
0x395f   : > { %v6770_v49 = vsel %vm579_vm2, %v6765_v47, 0  ;;  %v9461_v47 = vld [vmem:[%s11369_s3 + $0xf8] sm:$0xff]  }
0x3960   : > { %9226 = vmatpush3.bf16.xpose.msra.mxu1 %v6770_v49 }
0x3961   : > { %9237 = vmatprep.subr.bf16.mxu1 %v9691_v1 }
0x3a0d   : > { %v11110_v50 = vpop.f32.mrf.mxu0 }
0x3a0f   : > { %v9193_v51 = vpop.f32.mrf.mxu0 }
0x3a11   : > { %v11112_v48 = vpop.f32.mrf.mxu0 }
0x3a13   : > { %v9194_v53 = vpop.f32.mrf.mxu0 }
0x3a15   : > { %v6625_v10 = vpop.f32.mrf.mxu0 }
0x3a16   : > { %v6626_v55 = vadd.f32 %v8175_v12, %v6625_v10  ;;  %v9462_v10 = vld [vmem:[%s11369_s3 + $0xf0] sm:$0xff]  }
0x3a17   : > { %v9207_v52 = vpop.f32.mrf.mxu0 }
0x3a19   : > { %v6628_v54 = vpop.f32.mrf.mxu0 }
0x3a1a   : > { %v6629_v56 = vadd.f32 %v8175_v12, %v6628_v54  ;;  %v8206_v12 = vld [vmem:[%s11371_s5 + $0xf] ss:$0 sm:$0xff] }
0x3a1b   : > { %v9208_v57 = vpop.f32.mrf.mxu0 }
0x3a1c   : > { %v6764_v58 = vpack.c.bf16 %v6629_v56, %v6626_v55 }
0x3a1d   : > { %v6757_v62 = vpop.f32.mrf.mxu0 }
0x3a1e   : > { %9228 = vmatmul.mubr.msk.bf16.vlgmr.msra.gmra.mxu1 %vm579_vm2, %v6764_v58  ;;  %v6758_v0 = vadd.f32 %v8193_v17, %v6757_v62 }
0x3a1f   : > { %v9223_v59 = vpop.f32.mrf.mxu0  ;;  %9239 = vmatprep.mubr.msk.bf16.mxu1 %vm9692_vm1, %v9691_v1  ;;  %9238 = vmatpush3.bf16.msra.mxu1 %v6888_v42 }
0x3a20   : > { %9251 = vmatprep.subr.bf16.mxu1 %v9691_v1 }
0x3a21   : > { %v6760_v60 = vpop.f32.mrf.mxu0 }
0x3a22   : > { %v6761_v21 = vadd.f32 %v8193_v17, %v6760_v60  ;;  %v8224_v17 = vld [vmem:[%s11373_s7 + $0xf] ss:$0 sm:$0xff] }
0x3a23   : > { %v9224_v16 = vpop.f32.mrf.mxu0 }
0x3a24   : > { %v6836_v32 = vpack.c.bf16 %v6761_v21, %v6758_v0 }
0x3a26   : > { %9232 = vmatpush3.bf16.msra.mxu0 %v6836_v32 }
0x3a27   : > { %9243 = vmatprep.subr.bf16.mxu0 %v9691_v1 }
0x3ade   : > { %v6806_v18 = vpop.f32.mrf.mxu1 }
0x3adf   : > { %v6813_v61 = vsel %vm874_vm4, %v6806_v18, -inf }
0x3ae0   : > { %6814 = vmax.xlane.f32.xlu0 %v6813_v61  ;;  %v9229_v19 = vpop.f32.mrf.mxu1 }
0x3ae2   : > { %v6809_v34 = vpop.f32.mrf.mxu1 }
0x3ae3   : > { %v6816_v63 = vsel %vm874_vm4, %v6809_v34, -inf }
0x3ae4   : > { %6817 = vmax.xlane.f32.xlu1 %v6816_v63  ;;  %v9230_v13 = vpop.f32.mrf.mxu1 }
0x3b69   : > { %v6815_v15 = vpop.xlane.xlu0 %6814 }
0x3b6a   : > { %v6819_v2 = vsub.f32 %v6806_v18, %v6815_v15 }
0x3b6c   : > { %v6821_v3 = vmul.f32 1.442695, %v6819_v2 }
0x3b6d   : > { %v6818_v4 = vpop.xlane.xlu1 %6817 }
0x3b6e   : > { %9601 = vpow2.f32 %v6821_v3  ;;  %v6820_v5 = vsub.f32 %v6809_v34, %v6818_v4  ;;  %v6563_v34 = vadd.f32 %v11086_v31, %v11112_v48  ;;  %v8215_v3 = vld [vmem:[%s11372_s6 + $0xf] ss:$0 sm:$0xff] }
0x3b70   : > { %v6823_v26 = vmul.f32 1.442695, %v6820_v5 }
0x3b72   : > { %9603 = vpow2.f32 %v6823_v26 }
0x3b7b   : > { %v9602_v29 = vpop.eup %9601 }
0x3b7c   : > { %v6825_v46 = vsel %vm874_vm4, %v9602_v29, 0.0 }
0x3b7d   : > { %6826 = vadd.xlane.f32.xlu0 %v6825_v46 }
0x3b7f   : > { %v9604_v11 = vpop.eup %9603 }
0x3b80   : > { %v6828_v20 = vsel %vm874_vm4, %v9604_v11, 0.0 }
0x3b81   : > { %6829 = vadd.xlane.f32.xlu1 %v6828_v20 }
0x3c06   : > { %v6827_v22 = vpop.xlane.xlu0 %6826 }
0x3c07   : > { %9605 = vrcp.f32 %v6827_v22 }
0x3c0a   : > { %v6830_v23 = vpop.xlane.xlu1 %6829 }
0x3c0b   : > { %9607 = vrcp.f32 %v6830_v23 }
0x3c14   : > { %v9606_v24 = vpop.eup %9605 }
0x3c15   : > { %v6833_v28 = vmul.f32 %v9606_v24, %v9602_v29 }
0x3c18   : > { %v9608_v25 = vpop.eup %9607 }
0x3c19   : > { %v6834_v30 = vmul.f32 %v9608_v25, %v9604_v11 }
0x3c1b   : > { %v6835_v37 = vpack.c.bf16 %v6834_v30, %v6833_v28 }
0x3c1d   : > { %9234 = vmatmul.mubr.msk.bf16.vlgmr.msra.gmra.mxu0 %vm874_vm4, %v6835_v37 }
0x3c1e   : > { %9244 = vmatpush3.bf16.msra.mxu0 %v9457_v36  ;;  %9247 = vmatprep.mubr.msk.bf16.mxu0 %vm9692_vm1, %v9691_v1 }
0x3c1f   : > { %9245 = vmatprep.subr.bf16.mxu0 %v9691_v1 }
0x3c22   : > { %9246 = vmatpush3.bf16.msra.mxu0 %v9458_v38 }
0x3c23   : > { %9259 = vmatprep.subr.bf16.mxu0 %v9691_v1 }
0x3c25   : > { %9248 = vmatmul.mubr.msk.bf16.vlgmr.msra.gmra.mxu0 %vm652_vm3, %v10944_v8 }
0x3c26   : > { %9260 = vmatpush3.bf16.msra.mxu0 %v9459_v39  ;;  %9263 = vmatprep.mubr.msk.bf16.mxu0 %vm9692_vm1, %v9691_v1 }
0x3c27   : > { %9261 = vmatprep.subr.bf16.mxu0 %v9691_v1 }
0x3c2a   : > { %9262 = vmatpush3.bf16.msra.mxu0 %v9460_v40 }
0x3c2b   : > { %9273 = vmatprep.subr.bf16.mxu0 %v9691_v1 }
0x3c2d   : > { %9264 = vmatmul.mubr.msk.bf16.vlgmr.msra.gmra.mxu0 %vm652_vm3, %v10944_v8 }
0x3c2e   : > { %9275 = vmatprep.mubr.msk.bf16.mxu0 %vm9692_vm1, %v9691_v1 }
0x3cdd   : > { %v6874_v43 = vpop.f32.mrf.mxu0 }
0x3cdf   : > { %v9235_v45 = vpop.f32.mrf.mxu0 }
0x3ce1   : > { %v6877_v14 = vpop.f32.mrf.mxu0 }
0x3ce2   : > { %v6881_v49 = vpack.c.bf16 %v6877_v14, %v6874_v43 }
0x3ce3   : > { %v9236_v51 = vpop.f32.mrf.mxu0 }
0x3ce4   : > { %9240 = vmatmul.mubr.msk.bf16.vlgmr.msra.gmra.mxu1 %vm579_vm2, %v6881_v49 }
0x3ce5   : > { %v6992_v53 = vpop.f32.mrf.mxu0  ;;  %9252 = vmatpush3.bf16.msra.mxu1 %v9461_v47  ;;  %9255 = vmatprep.mubr.msk.bf16.mxu1 %vm9692_vm1, %v9691_v1 }
0x3ce6   : > { %9253 = vmatprep.subr.bf16.mxu1 %v9691_v1  ;;  %v6993_v55 = vadd.f32 %v8206_v12, %v6992_v53  ;;  %v8230_v53 = vld [vmem:[%s11374_s8 + $0x3c] sm:$0xf] }
0x3ce7   : > { %v9249_v52 = vpop.f32.mrf.mxu0 }
0x3ce9   : > { %v6995_v54 = vpop.f32.mrf.mxu0  ;;  %9254 = vmatpush3.bf16.msra.mxu1 %v9462_v10  ;;  %v7255_v10 = vsel %vm583_vm0, %v8230_v53, 0 }
0x3cea   : > { %v6996_v56 = vadd.f32 %v8206_v12, %v6995_v54  ;;  %9267 = vmatprep.subr.bf16.mxu1 %v9691_v1 }
0x3ceb   : > { %v9250_v57 = vpop.f32.mrf.mxu0 }
0x3cec   : > { %v7131_v58 = vpack.c.bf16 %v6996_v56, %v6993_v55  ;;  %9256 = vmatmul.mubr.msk.bf16.vlgmr.msra.gmra.mxu1 %vm652_vm3, %v10944_v8  ;;  %v6560_v8 = vadd.f32 %v11078_v27, %v11110_v50 }
0x3ced   : > { %v7124_v62 = vpop.f32.mrf.mxu0  ;;  %9269 = vmatprep.mubr.msk.bf16.mxu1 %vm9692_vm1, %v9691_v1 }
0x3cee   : > { %v7125_v0 = vadd.f32 %v8224_v17, %v7124_v62 }
0x3cef   : > { %v9265_v59 = vpop.f32.mrf.mxu0 }
0x3cf1   : > { %v7127_v60 = vpop.f32.mrf.mxu0 }
0x3cf2   : > { %v7128_v21 = vadd.f32 %v8224_v17, %v7127_v60 }
0x3cf3   : > { %v9266_v16 = vpop.f32.mrf.mxu0 }
0x3cf4   : > { %v7203_v32 = vpack.c.bf16 %v7128_v21, %v7125_v0 }
0x3cf6   : > { %9274 = vmatpush3.bf16.msra.mxu0 %v7203_v32 }
0x3cf7   : > { %9285 = vmatprep.subr.bf16.mxu0 %v9691_v1 }
0x3da4   : > { %v6924_v18 = vpop.f32.mrf.mxu1 }
0x3da5   : > { %v11184_v61 = vadd.f32 %v6924_v18, %v6560_v8 }
0x3da6   : > { %v9241_v19 = vpop.f32.mrf.mxu1 }
0x3da8   : > { %v6927_v63 = vpop.f32.mrf.mxu1 }
0x3da9   : > { %v11188_v13 = vadd.f32 %v6927_v63, %v6563_v34 }
0x3daa   : > { %v9242_v15 = vpop.f32.mrf.mxu1 }
0x3dac   : > { %v7058_v2 = vpop.f32.mrf.mxu1 }
0x3dad   : > { %v7059_v26 = vadd.f32 %v8215_v3, %v7058_v2 }
0x3dae   : > { %v9257_v4 = vpop.f32.mrf.mxu1 }
0x3db0   : > { %v7061_v5 = vpop.f32.mrf.mxu1 }
0x3db1   : > { %v7062_v27 = vadd.f32 %v8215_v3, %v7061_v5 }
0x3db2   : > { %v9258_v50 = vpop.f32.mrf.mxu1 }
0x3db3   : > { %v7132_v29 = vpack.c.bf16 %v7062_v27, %v7059_v26 }
0x3db5   : > { %v7137_v46 = vsel %vm579_vm2, %v7132_v29, 0 }
0x3db6   : > { %9268 = vmatpush3.bf16.xpose.msra.mxu1 %v7137_v46 }
0x3db7   : > { %9279 = vmatprep.subr.bf16.mxu1 %v9691_v1 }
0x3dbd   : > { %9270 = vmatmul.mubr.msk.bf16.vlgmr.msra.gmra.mxu1 %vm579_vm2, %v7131_v58  ;;  %v8233_v58 = vld [vmem:[%s11375_s9 + $0x3] ss:$0 sm:$0xff] }
0x3dbe   : > { %9281 = vmatprep.mubr.msk.bf16.mxu1 %vm9692_vm1, %v9691_v1  ;;  %9280 = vmatpush3.bf16.msra.mxu1 %v7255_v10 }
0x3dbf   : > { %9293 = vmatprep.subr.bf16.mxu1 %v9691_v1 }
0x3e7d   : > { %v7173_v31 = vpop.f32.mrf.mxu1 }
0x3e7e   : > { %v7180_v48 = vsel %vm874_vm4, %v7173_v31, -inf }
0x3e7f   : > { %7181 = vmax.xlane.f32.xlu0 %v7180_v48  ;;  %v9271_v11 = vpop.f32.mrf.mxu1 }
0x3e81   : > { %v7176_v20 = vpop.f32.mrf.mxu1 }
0x3e82   : > { %v7183_v22 = vsel %vm874_vm4, %v7176_v20, -inf }
0x3e83   : > { %7184 = vmax.xlane.f32.xlu1 %v7183_v22  ;;  %v9272_v23 = vpop.f32.mrf.mxu1 }
0x3f08   : > { %v7182_v24 = vpop.xlane.xlu0 %7181 }
0x3f09   : > { %v7186_v25 = vsub.f32 %v7173_v31, %v7182_v24 }
0x3f0b   : > { %v7188_v28 = vmul.f32 1.442695, %v7186_v25 }
0x3f0c   : > { %v7185_v30 = vpop.xlane.xlu1 %7184 }
0x3f0d   : > { %9609 = vpow2.f32 %v7188_v28  ;;  %v7187_v36 = vsub.f32 %v7176_v20, %v7185_v30  ;;  %v8236_v28 = vld [vmem:[%s11376_s10 + $0x3] ss:$0 sm:$0xff] }
0x3f0f   : > { %v7190_v37 = vmul.f32 1.442695, %v7187_v36 }
0x3f11   : > { %9611 = vpow2.f32 %v7190_v37 }
0x3f1a   : > { %v9610_v38 = vpop.eup %9609 }
0x3f1b   : > { %v7192_v39 = vsel %vm874_vm4, %v9610_v38, 0.0 }
0x3f1c   : > { %7193 = vadd.xlane.f32.xlu0 %v7192_v39  ;;  %v8237_v39 = vld [vmem:[%s11377_s11 + $0x3] ss:$0 sm:$0xff] }
0x3f1e   : > { %v9612_v40 = vpop.eup %9611 }
0x3f1f   : > { %v7195_v41 = vsel %vm874_vm4, %v9612_v40, 0.0 }
0x3f20   : > { %7196 = vadd.xlane.f32.xlu1 %v7195_v41 }
0x3fa5   : > { %v7194_v42 = vpop.xlane.xlu0 %7193 }
0x3fa6   : > { %9613 = vrcp.f32 %v7194_v42 }
0x3fa9   : > { %v7197_v43 = vpop.xlane.xlu1 %7196 }
0x3faa   : > { %9615 = vrcp.f32 %v7197_v43 }
0x3fb3   : > { %v9614_v45 = vpop.eup %9613 }
0x3fb4   : > { %v7200_v47 = vmul.f32 %v9614_v45, %v9610_v38  ;;  %v9466_v45 = vld [vmem:[%s11380_s14 + $0x70] sm:$0xff]  }
0x3fb7   : > { %v9616_v14 = vpop.eup %9615 }
0x3fb8   : > { %v7201_v49 = vmul.f32 %v9616_v14, %v9612_v40  ;;  %v9467_v14 = vld [vmem:[%s11380_s14 + $0x68] sm:$0xff]  }
0x3fba   : > { %v7202_v51 = vpack.c.bf16 %v7201_v49, %v7200_v47  ;;  %v9468_v47 = vld [vmem:[%s11380_s14 + $0x60] sm:$0xff]  }
0x3fbb   : > { %v8243_v49 = vld [vmem:[%s11379_s13 + $0x3] ss:$0 sm:$0xff] }
0x3fbc   : > { %9276 = vmatmul.mubr.msk.bf16.vlgmr.msra.gmra.mxu0 %vm874_vm4, %v7202_v51 }
0x3fbd   : > { %9289 = vmatprep.mubr.msk.bf16.mxu0 %vm9692_vm1, %v9691_v1 }
0x407c   : > { %v7241_v12 = vpop.f32.mrf.mxu0 }
0x407e   : > { %v9277_v52 = vpop.f32.mrf.mxu0 }
0x4080   : > { %v7244_v54 = vpop.f32.mrf.mxu0 }
0x4081   : > { %v7248_v55 = vpack.c.bf16 %v7244_v54, %v7241_v12 }
0x4082   : > { %v9278_v56 = vpop.f32.mrf.mxu0 }
0x4083   : > { %9282 = vmatmul.mubr.msk.bf16.vlgmr.msra.gmra.mxu1 %vm579_vm2, %v7248_v55 }
0x4084   : > { %9301 = vmatprep.mubr.msk.bf16.mxu1 %vm9692_vm1, %v9691_v1 }
0x4143   : > { %v7291_v57 = vpop.f32.mrf.mxu1 }
0x4144   : > { %v7298_v62 = vadd.f32 %v7291_v57, %v11184_v61 }
0x4145   : > { %v9283_v17 = vpop.f32.mrf.mxu1 }
0x4146   : > { %v7308_v59 = vadd.f32 %v8233_v58, %v7298_v62  ;;  %v7940_v62 = vld [vmem:[%s11381_s15 + $0x1] ss:$0 sm:$0xff] }
0x4147   : > { %v7294_v60 = vpop.f32.mrf.mxu1 }
0x4148   : > { %v7310_v0 = vadd.f32 %v7308_v59, %v10935_v6  ;;  %v7299_v21 = vadd.f32 %v7294_v60, %v11188_v13  ;;  %v9463_v6 = vld [vmem:[%s11378_s12 + $0x38] sm:$0xff]  }
0x4149   : > { %v9284_v16 = vpop.f32.mrf.mxu1  ;;  %9286 = vmatpush3.bf16.msra.mxu0 %v9463_v6  ;;  %v9465_v13 = vld [vmem:[%s11380_s14 + $0x78] sm:$0xff]  }
0x414a   : > { %v7309_v32 = vadd.f32 %v8233_v58, %v7299_v21  ;;  %v7316_v8 = vsel %vm652_vm3, %v7310_v0, 0.0  ;;  %v7324_v18 = vmul.f32 %v7310_v0, %v7310_v0  ;;  %9287 = vmatprep.subr.bf16.mxu0 %v9691_v1  ;;  %9294 = vmatpush3.bf16.msra.mxu1 %v9465_v13 }
0x414b   : > { %7317 = vadd.xlane.f32.xlu0 %v7316_v8  ;;  %9295 = vmatprep.subr.bf16.mxu1 %v9691_v1 }
0x414c   : > { %v7311_v19 = vadd.f32 %v7309_v32, %v10937_v7  ;;  %v7326_v34 = vsel %vm652_vm3, %v7324_v18, 0.0  ;;  %v9464_v7 = vld [vmem:[%s11378_s12 + $0x30] sm:$0xff]  }
0x414d   : > { %9288 = vmatpush3.bf16.msra.mxu0 %v9464_v7 }
0x414e   : > { %v7319_v63 = vsel %vm652_vm3, %v7311_v19, 0.0  ;;  %v7325_v61 = vmul.f32 %v7311_v19, %v7311_v19  ;;  %9296 = vmatpush3.bf16.msra.mxu1 %v9466_v45 }
0x414f   : > { %7327 = vadd.xlane.f32.xlu0 %v7326_v34  ;;  %7320 = vadd.xlane.f32.xlu1 %v7319_v63  ;;  %v4041_v63 = vadd.f32 %v7940_v62, %v10639_v9 }
0x4150   : > { %v7329_v15 = vsel %vm652_vm3, %v7325_v61, 0.0  ;;  %9297 = vmatprep.subr.bf16.mxu1 %v9691_v1 }
0x4151   : > { %v11282_v6 = vadd.f32 %v4041_v63, %v10541_v35 }
0x4152   : > { %9298 = vmatpush3.bf16.msra.mxu1 %v9467_v14 }
0x4153   : > { %7330 = vadd.xlane.f32.xlu1 %v7329_v15  ;;  %9299 = vmatprep.subr.bf16.mxu1 %v9691_v1  ;;  %v8256_v1 = vld [vmem:[%s11381_s15 + $0x3] ss:$0 sm:$0xff] }
0x4156   : > { %9300 = vmatpush3.bf16.msra.mxu1 %v9468_v47 }
0x41d4   : > { %v7318_v2 = vpop.xlane.xlu0 %7317 }
0x41d5   : > { %v7322_v3 = vmul.f32 0.03125, %v7318_v2  ;;  %v4053_v2 = vsel %vm652_vm3, %v11282_v6, 0.0 }
0x41d7   : > { %v7334_v26 = vmul.f32 %v7322_v3, %v7322_v3  ;;  %v7338_v23 = vsub.f32 %v7310_v0, %v7322_v3  ;;  %v4038_v0 = vadd.f32 %v7940_v62, %v10637_v44  ;;  %v4059_v3 = vmul.f32 %v11282_v6, %v11282_v6 }
0x41d8   : > { %v7328_v4 = vpop.xlane.xlu0 %7327  ;;  %v7321_v5 = vpop.xlane.xlu1 %7320 }
0x41d9   : > { %v7332_v27 = vmul.f32 0.03125, %v7328_v4  ;;  %v7323_v50 = vmul.f32 0.03125, %v7321_v5  ;;  %v11273_v34 = vadd.f32 %v4038_v0, %v10539_v33  ;;  %v4063_v35 = vsel %vm652_vm3, %v4059_v3, 0.0  ;;  %v7949_v0 = vld [vmem:[%s11383_s17 + $0x1] ss:$0 sm:$0xff] }
0x41db   : > { %v7336_v29 = vsub.f32 %v7332_v27, %v7334_v26  ;;  %v7335_v48 = vmul.f32 %v7323_v50, %v7323_v50  ;;  %v7339_v30 = vsub.f32 %v7311_v19, %v7323_v50  ;;  %v4050_v7 = vsel %vm652_vm3, %v11273_v34, 0.0 }
0x41dc   : > { %v7331_v46 = vpop.xlane.xlu1 %7330  ;;  %v4058_v9 = vmul.f32 %v11273_v34, %v11273_v34 }
0x41dd   : > { %v7340_v31 = vadd.f32 1e-05, %v7336_v29  ;;  %v7333_v11 = vmul.f32 0.03125, %v7331_v46 }
0x41de   : > { %v4060_v13 = vsel %vm652_vm3, %v4058_v9, 0.0 }
0x41df   : > { %9617 = vrsqrt.f32 %v7340_v31  ;;  %v7337_v20 = vsub.f32 %v7333_v11, %v7335_v48 }
0x41e1   : > { %v7341_v22 = vadd.f32 1e-05, %v7337_v20 }
0x41e3   : > { %9619 = vrsqrt.f32 %v7341_v22 }
0x41ec   : > { %v9618_v24 = vpop.eup %9617 }
0x41ed   : > { %v7344_v25 = vmul.f32 %v9618_v24, %v7338_v23 }
0x41ef   : > { %v7352_v37 = vmul.f32 %v8236_v28, %v7344_v25 }
0x41f0   : > { %v9620_v36 = vpop.eup %9619 }
0x41f1   : > { %v7345_v38 = vmul.f32 %v9620_v36, %v7339_v30  ;;  %v7360_v41 = vadd.f32 %v8237_v39, %v7352_v37 }
0x41f3   : > { %v7353_v40 = vmul.f32 %v8236_v28, %v7345_v38 }
0x41f5   : > { %v7361_v42 = vadd.f32 %v8237_v39, %v7353_v40 }
0x41f7   : > { %v7362_v43 = vpack.c.bf16 %v7361_v42, %v7360_v41 }
0x41f9   : > { %9290 = vmatmul.mubr.msk.bf16.vlgmr.msra.gmra.mxu0 %vm652_vm3, %v7362_v43 }
0x42b9   : > { %v7425_v51 = vpop.f32.mrf.mxu0 }
0x42ba   : > { %v7426_v10 = vadd.f32 %v8243_v49, %v7425_v51 }
0x42bb   : > { %v9291_v53 = vpop.f32.mrf.mxu0 }
0x42bc   : > { %v7432_v55 = vmax.f32 %v7426_v10, 0.0  ;;  %v8264_v53 = vld [vmem:[%s11382_s16 + $0x3] ss:$0 sm:$0xff] }
0x42bd   : > { %v7428_v12 = vpop.f32.mrf.mxu0 }
0x42be   : > { %v7429_v52 = vadd.f32 %v8243_v49, %v7428_v12  ;;  %v8265_v12 = vld [vmem:[%s11383_s17 + $0x3] ss:$0 sm:$0xff] }
0x42bf   : > { %v9292_v54 = vpop.f32.mrf.mxu0 }
0x42c0   : > { %v7433_v56 = vmax.f32 %v7429_v52, 0.0 }
0x42c2   : > { %v7434_v57 = vpack.c.bf16 %v7433_v56, %v7432_v55 }
0x42c4   : > { %9302 = vmatmul.mubr.msk.bf16.vlgmr.msra.gmra.mxu1 %vm2261_vm5, %v7434_v57 }
0x4384   : > { %v7513_v58 = vpop.f32.mrf.mxu1 }
0x4385   : > { %v7514_v17 = vadd.f32 %v8256_v1, %v7513_v58 }
0x4386   : > { %v9303_v59 = vpop.f32.mrf.mxu1 }
0x4387   : > { %v11263_v60 = vadd.f32 %v7514_v17, %v7360_v41  ;;  %v7948_v17 = vld [vmem:[%s11382_s16 + $0x1] ss:$0 sm:$0xff] }
0x4388   : > { %v7516_v21 = vpop.f32.mrf.mxu1 }
0x4389   : > { %v7517_v16 = vadd.f32 %v8256_v1, %v7516_v21  ;;  %v7526_v32 = vsel %vm652_vm3, %v11263_v60, 0.0  ;;  %v7534_v8 = vmul.f32 %v11263_v60, %v11263_v60 }
0x438a   : > { %7527 = vadd.xlane.f32.xlu0 %v7526_v32  ;;  %v9304_v18 = vpop.f32.mrf.mxu1 }
0x438b   : > { %v11270_v19 = vadd.f32 %v7517_v16, %v7361_v42  ;;  %v7536_v61 = vsel %vm652_vm3, %v7534_v8, 0.0 }
0x438d   : > { %v7529_v44 = vsel %vm652_vm3, %v11270_v19, 0.0  ;;  %v7535_v15 = vmul.f32 %v11270_v19, %v11270_v19 }
0x438e   : > { %7537 = vadd.xlane.f32.xlu0 %v7536_v61  ;;  %7530 = vadd.xlane.f32.xlu1 %v7529_v44 }
0x438f   : > { %v7539_v33 = vsel %vm652_vm3, %v7535_v15, 0.0 }
0x4392   : > { %4051 = vadd.xlane.f32.xlu0 %v4050_v7  ;;  %7540 = vadd.xlane.f32.xlu1 %v7539_v33 }
0x4396   : > { %4061 = vadd.xlane.f32.xlu0 %v4060_v13  ;;  %4054 = vadd.xlane.f32.xlu1 %v4053_v2 }
0x439a   : > { %4064 = vadd.xlane.f32.xlu1 %v4063_v35 }
0x4413   : > { %v7528_v4 = vpop.xlane.xlu0 %7527 }
0x4414   : > { %v7532_v5 = vmul.f32 0.03125, %v7528_v4 }
0x4416   : > { %v7544_v50 = vmul.f32 %v7532_v5, %v7532_v5  ;;  %v7548_v49 = vsub.f32 %v11263_v60, %v7532_v5 }
0x4417   : > { %v7538_v26 = vpop.xlane.xlu0 %7537  ;;  %v7531_v27 = vpop.xlane.xlu1 %7530 }
0x4418   : > { %v7542_v29 = vmul.f32 0.03125, %v7538_v26  ;;  %v7533_v46 = vmul.f32 0.03125, %v7531_v27 }
0x441a   : > { %v7546_v31 = vsub.f32 %v7542_v29, %v7544_v50  ;;  %v7545_v22 = vmul.f32 %v7533_v46, %v7533_v46  ;;  %v7549_v52 = vsub.f32 %v11270_v19, %v7533_v46 }
0x441b   : > { %v4052_v48 = vpop.xlane.xlu0 %4051  ;;  %v7541_v11 = vpop.xlane.xlu1 %7540 }
0x441c   : > { %v7550_v20 = vadd.f32 1e-05, %v7546_v31  ;;  %v4056_v23 = vmul.f32 0.03125, %v4052_v48  ;;  %v7543_v24 = vmul.f32 0.03125, %v7541_v11 }
0x441e   : > { %9621 = vrsqrt.f32 %v7550_v20  ;;  %v7547_v25 = vsub.f32 %v7543_v24, %v7545_v22  ;;  %v4068_v36 = vmul.f32 %v4056_v23, %v4056_v23  ;;  %v4072_v1 = vsub.f32 %v11273_v34, %v4056_v23 }
0x441f   : > { %v4062_v28 = vpop.xlane.xlu0 %4061  ;;  %v4055_v30 = vpop.xlane.xlu1 %4054 }
0x4420   : > { %v7551_v37 = vadd.f32 1e-05, %v7547_v25  ;;  %v4066_v38 = vmul.f32 0.03125, %v4062_v28  ;;  %v4057_v39 = vmul.f32 0.03125, %v4055_v30 }
0x4422   : > { %9623 = vrsqrt.f32 %v7551_v37  ;;  %v4070_v40 = vsub.f32 %v4066_v38, %v4068_v36  ;;  %v4069_v43 = vmul.f32 %v4057_v39, %v4057_v39  ;;  %v4073_v21 = vsub.f32 %v11282_v6, %v4057_v39 }
0x4423   : > { %v4065_v41 = vpop.xlane.xlu1 %4064 }
0x4424   : > { %v4074_v42 = vadd.f32 1e-05, %v4070_v40  ;;  %v4067_v45 = vmul.f32 0.03125, %v4065_v41 }
0x4426   : > { %9625 = vrsqrt.f32 %v4074_v42  ;;  %v4071_v14 = vsub.f32 %v4067_v45, %v4069_v43 }
0x4428   : > { %v4075_v47 = vadd.f32 1e-05, %v4071_v14 }
0x442a   : > { %9627 = vrsqrt.f32 %v4075_v47 }
0x442b   : > { %v9622_v51 = vpop.eup %9621 }
0x442c   : > { %v7554_v10 = vmul.f32 %v9622_v51, %v7548_v49 }
0x442e   : > { %v7562_v54 = vmul.f32 %v8264_v53, %v7554_v10 }
0x442f   : > { %v9624_v55 = vpop.eup %9623 }
0x4430   : > { %v7570_v56 = vadd.f32 %v8265_v12, %v7562_v54  ;;  %v7555_v57 = vmul.f32 %v9624_v55, %v7549_v52 }
0x4432   : > { %7576 = vrot.lane.b32.xlu0 %v7570_v56, %s9693_s23  ;;  %v7563_v58 = vmul.f32 %v8264_v53, %v7555_v57 }
0x4433   : > { %v9626_v62 = vpop.eup %9625 }
0x4434   : > { %v7571_v59 = vadd.f32 %v8265_v12, %v7563_v58  ;;  %v4078_v60 = vmul.f32 %v9626_v62, %v4072_v1 }
0x4436   : > { %7578 = vrot.lane.b32.xlu1 %v7571_v59, %s9693_s23  ;;  %v4086_v16 = vmul.f32 %v7948_v17, %v4078_v60 }
0x4437   : > { %v9628_v32 = vpop.eup %9627 }
0x4438   : > { %v4094_v8 = vadd.f32 %v7949_v0, %v4086_v16  ;;  %v4079_v18 = vmul.f32 %v9628_v32, %v4073_v21 }
0x443a   : > { %7572 = vst.msk [vmem:[%s568_s24] sm:$0xff] %vm652_vm3, %v4094_v8  ;;  %v4087_v19 = vmul.f32 %v7948_v17, %v4079_v18 }
0x443c   : > { %v4095_v34 = vadd.f32 %v7949_v0, %v4087_v19 }
0x443e   : > { %7573 = vst.msk [vmem:[%s568_s24 + $0x8] sm:$0xff] %vm652_vm3, %v4095_v34 }
0x44a4   : > { %v7577_v63 = vpop.permute.xlu0 %7576 }
0x44a5   : > { %7583 = vst.msk [vmem:[%s568_s24] sm:$0xff] %vm7582_vm6, %v7577_v63 }
0x44a8   : > { %v7579_v61 = vpop.permute.xlu1 %7578 }
0x44a9   : > { %7584 = vst.msk [vmem:[%s568_s24 + $0x8] sm:$0xff] %vm7582_vm6, %v7579_v61 }
0x44aa   : > { %9642 = shalt.err (!%p9639_p3)
}
0x44ab   : > { %s9643_s22 = scalar_lea.hbm %s11320_s26, 256  ;;  %s9647_s23 = scalar_lea.hbm %s11384_s18, 1024 }
0x44ac   : > { %p9644_p4 = scmp.ne.s32.totalorder %s11320_s26, %s9643_s22  ;;  %p9648_p9 = scmp.lt.s32.totalorder %s11320_s26, %s11384_s18 }
0x44ad   : > { %p9649_p10 = scmp.lt.s32.totalorder %s9647_s23, %s9643_s22 }
0x44ae   : > { %p9645_p7 = pnand %p9644_p4, %p9830_p5 }
0x44af   : > { %p9650_p11 = por %p9649_p10, %p9648_p9 }
0x44b0   : > { %p9646_p8 = pneg %p9645_p7 }
0x44b2   : > { %p9651_p12 = pnand %p9650_p11, %p9646_p8 }
0x44b4   : > { %9654 = shalt.err (!%p9651_p12)
}
0x44b5   : > { %s9695_s20 = smov 128   ;;  %s9696_s21 = smov 8  }
0x44b6   : > { %9305 = dma.vmem_to_hbm [thread:$0]  (%p9830_p5), %s11322_s29, 256, %s11320_s26, %s11326_s19, %s9695_s20, %s9695_s20, %s9696_s21  }
0x44b7 PF: > { %s11405_s27 = sld [smem:[#allocation5_spill]]  ;;  %p9311_p13 = scmp.ge.s32.totalorder %s9689_s30, 2 }
0x44b9   : > { %p9308_p0 = pnand %p9311_p13, %p9834_p6 }
0x44bb   : > { %p9309_p1 = pneg %p9308_p0 }
0x44bd   : > { %s7614_s25 = sand.u32 1, %s11405_s27  }
0x44be   : > { %s7615_s1 = scalar_lea.sflag [#allocation3], %s7614_s25 }
0x44bf   : > { %9672 = dma.done.wait (%p9309_p1), %s7615_s1, 256  }
0x44c0   : > { %9674 = vsyncadd (%p9309_p1), %s7615_s1, 4294967040  ;;  %s11407_s30 = sld [smem:[#allocation7_spill]]  ;;  %s11410_s27 = smov %s9681_s28 }
0x44c1   : > { %s11408_s22 = sld [smem:[#allocation6_spill]] }
0x44c2   : > { %s11409_s29 = sld [smem:[#allocation8_spill]] }
0x44c6   : > { %p28_p2 = scmp.ge.s32.totalorder %s11407_s30, 6  }
0x44c7   : > { %s11411_s28 = smov %s11408_s22 }
0x44c8   :  { %30 = sbr.rel (!%p28_p2) target bundleno = 7 (0x7), region = 259 }
0x44cd   :  { %7620 = vsyncpa [#allocation3], 1 }
0x44ce   :  { %7622 = vsyncpa [#allocation3 + $0x1], 1 }

</bundles_post_ra>
